<compile_context>
chip_gen: v7x
topology: tpu7x:2x2x1
jax: 0.10.0
libtpu: 0.0.40
codegen_flags: <defaults>
</compile_context>

<pallas_src>
import functools
import math

import jax
import jax.numpy as jnp
from jax.experimental import pallas as pl
from jax.experimental.pallas import tpu as pltpu


_LANE = 128
_VMEM_LIMIT = 64 * 1024 * 1024   # above the 32 MiB scoped default, under v7x's 64 MiB


def _round_up(x, m):
    return (x + m - 1) // m * m


def _eup_dtype():
    """bf16 transcendentals on v6e/v7x (2x EUP throughput); f32 on v5e and older."""
    try:
        kind = jax.devices()[0].device_kind.lower()
    except Exception:
        return jnp.float32
    if ("v6" in kind) or ("v7" in kind):
        return jnp.bfloat16
    return jnp.float32


def _pick_nchunk(tc, e, npad, budget_bytes=512 * 1024):
    """Largest source-axis chunk (divisor of 128) keeping the f32 (tC, n, E)
    tanh intermediate under `budget_bytes` (bounds vreg/VMEM pressure)."""
    for nc in (128, 64, 32, 16, 8):
        if tc * nc * e * 4 <= budget_bytes:
            return min(nc, npad)
    return 8


# ----------------------------------------------------------------------------
# Kernel 1: fused  Conv2d(E,E,(1,10)) (as matmul)  +  bias  +  LayerNorm  + pos
# Grid: single flattened (B*C)/tR row axis.
# ----------------------------------------------------------------------------
def _conv_ln_pos_kernel(x_ref, w_ref, b_ref, g_ref, beta_ref, pos_ref, o_ref):
    # x: (tR, 10*E) bf16, w: (10*E, E) bf16 -> MXU with f32 accumulation.
    h = jnp.dot(x_ref[...], w_ref[...], preferred_element_type=jnp.float32)
    h = h + b_ref[...]                                             # (tR, E)
    # TODO(synk): custom `LayerNorm` class source not provided; standard
    # (x-mean)/sqrt(var+eps)*g+b with eps=1e-6 is used.
    mean = jnp.mean(h, axis=-1, keepdims=True)
    var = jnp.mean(jnp.square(h - mean), axis=-1, keepdims=True)
    y = (h - mean) * jax.lax.rsqrt(var + 1e-6)
    y = y * g_ref[...] + beta_ref[...]
    y = y + pos_ref[...]                                           # positional add
    o_ref[...] = y.astype(o_ref.dtype)


def conv_ln_pos(x2d, w, b, g, beta, pos2d, tr_pref=256):
    """(B*C, 10*E) -> (B*C, E): conv-as-matmul + bias + LayerNorm + pos (bf16)."""
    BC, WE = x2d.shape
    E = w.shape[1]
    tR = BC if BC <= tr_pref else tr_pref
    nR = pl.cdiv(BC, tR)
    return pl.pallas_call(
        _conv_ln_pos_kernel,
        out_shape=jax.ShapeDtypeStruct((BC, E), jnp.bfloat16),
        grid=(nR,),
        in_specs=[
            pl.BlockSpec((tR, WE), lambda r: (r, 0)),
            pl.BlockSpec((WE, E), lambda r: (0, 0)),
            pl.BlockSpec((1, E), lambda r: (0, 0)),
            pl.BlockSpec((1, E), lambda r: (0, 0)),
            pl.BlockSpec((1, E), lambda r: (0, 0)),
            pl.BlockSpec((tR, E), lambda r: (r, 0)),
        ],
        out_specs=pl.BlockSpec((tR, E), lambda r: (r, 0)),
        compiler_params=pltpu.CompilerParams(
            dimension_semantics=("parallel",),
            vmem_limit_bytes=_VMEM_LIMIT),
    )(x2d, w, b, g, beta, pos2d)


# ----------------------------------------------------------------------------
# Kernel 2: fused CopyNet + finalLinear/GELU/resLinear/softmax head.
# Output block is lane-padded: [ rule half (Rpad) | copy half (Npad) ], both
# written with aligned static-slice stores (no in-kernel concatenate).
# ----------------------------------------------------------------------------
def _copy_head_kernel(dec_ref, srclin_ref, mask_ref,
                      wt_ref, wres_ref, bres_ref, wp_ref, bp_ref,
                      wf_ref, bf_ref, wr_ref, br_ref, out_ref,
                      *, eup_dtype, nchunk):
    dec = dec_ref[0]                                  # (tC, E) bf16
    rpad = wr_ref.shape[1]
    npad = srclin_ref.shape[1]

    # --- CopyNet mixing prob: 2-way softmax == sigmoid of logit difference ---
    lp = jnp.dot(dec, wp_ref[...], preferred_element_type=jnp.float32) + bp_ref[...]
    p0 = jax.nn.sigmoid(lp[:, 0:1] - lp[:, 1:2])      # (tC, 1)
    p1 = 1.0 - p0

    # --- finalLinear -> GELU -> resLinear -> softmax over rule classes -------
    h = jnp.dot(dec, wf_ref[...], preferred_element_type=jnp.float32) + bf_ref[...]
    # TODO(synk): custom `GELU` class source not provided; BERT-style tanh approx.
    hb = h.astype(eup_dtype)                          # bf16 EUP on v6e/v7x
    gelu = 0.5 * hb * (1.0 + jnp.tanh(
        0.7978845608028654 * (hb + 0.044715 * hb * hb * hb)))
    lr = jnp.dot(gelu.astype(jnp.bfloat16), wr_ref[...],
                 preferred_element_type=jnp.float32) + br_ref[...]    # (tC, Rpad)
    lr = lr - jnp.max(lr, axis=-1, keepdims=True)
    er = jnp.exp(lr)
    res_soft = er / jnp.sum(er, axis=-1, keepdims=True)   # exact softmax (train path)
    # lane-dense, 128-aligned store of the (padded) rule half
    out_ref[0, :, 0:rpad] = (res_soft * p0).astype(out_ref.dtype)

    # --- CopyNet copy scores: source axis chunked to bound (tC, n, E) --------
    tgt_lin = jnp.dot(dec, wt_ref[...], preferred_element_type=jnp.float32)  # (tC, E)
    tgt_e = tgt_lin.astype(eup_dtype)
    wres = wres_ref[...]                               # (1, E) f32
    n_chunks = npad // nchunk
    for c in range(n_chunks):                          # static chunk loop
        c0 = c * nchunk
        src = srclin_ref[0, c0:c0 + nchunk, :].astype(eup_dtype)     # (nchunk, E)
        t = jnp.tanh(src[None, :, :] + tgt_e[:, None, :])            # (tC, nchunk, E)
        # LinearRes has a single output unit: VPU multiply + lane reduce (f32).
        gp = jnp.sum(t * wres[None, :, :], axis=-1) + bres_ref[...]  # (tC, nchunk)
        msk = mask_ref[0, :, c0:c0 + nchunk]                          # (1, nchunk)
        gp = jnp.where(msk > 0.0, gp, -1e9)            # masked_fill(copymask==0,-1e9)
        out_ref[0, :, rpad + c0:rpad + c0 + nchunk] = (gp * p1).astype(out_ref.dtype)


def copy_head(decode, src_lin, mask_f, p, tc_pref=256):
    B, C, E = decode.shape
    Npad = src_lin.shape[1]
    H = p["w_final"].shape[1]
    Rpad = p["w_res_linear"].shape[1]
    tC = C if C <= tc_pref else tc_pref
    nC = pl.cdiv(C, tC)
    nchunk = _pick_nchunk(tC, E, Npad)
    kernel = functools.partial(_copy_head_kernel,
                               eup_dtype=_eup_dtype(), nchunk=nchunk)

    def const(shape):
        r = len(shape)
        return pl.BlockSpec(shape, lambda bi, ci, _r=r: (0,) * _r)

    # TODO(synk): constant-index weight blocks are not re-DMA'd by the pipeline;
    # single-buffering them (pl.Buffered(1)) could shave VMEM further on v7x.
    return pl.pallas_call(
        kernel,
        out_shape=jax.ShapeDtypeStruct((B, C, Rpad + Npad), jnp.float32),
        grid=(B, nC),
        in_specs=[
            pl.BlockSpec((1, tC, E), lambda bi, ci: (bi, ci, 0)),
            pl.BlockSpec((1, Npad, E), lambda bi, ci: (bi, 0, 0)),
            pl.BlockSpec((1, 1, Npad), lambda bi, ci: (bi, 0, 0)),
            const((E, E)), const((1, E)), const((1, 1)),
            const((E, 2)), const((1, 2)),
            const((E, H)), const((1, H)),
            const((H, Rpad)), const((1, Rpad)),
        ],
        out_specs=pl.BlockSpec((1, tC, Rpad + Npad), lambda bi, ci: (bi, ci, 0)),
        compiler_params=pltpu.CompilerParams(
            dimension_semantics=("parallel", "parallel"),
            vmem_limit_bytes=_VMEM_LIMIT),
    )(decode, src_lin, mask_f,
      p["w_copy_tgt"], p["w_copy_res"], p["b_copy_res"],
      p["w_copy_prob"], p["b_copy_prob"],
      p["w_final"], p["b_final"],
      p["w_res_linear"], p["b_res_linear"])


# ----------------------------------------------------------------------------
# Host-side helpers
# ----------------------------------------------------------------------------
def sinusoidal_pos_emb(length, dim):
    pos = jnp.arange(length, dtype=jnp.float32)[:, None]
    i = jnp.arange(0, dim, 2, dtype=jnp.float32)
    div = jnp.exp(-math.log(10000.0) * i / dim)
    pe = jnp.zeros((length, dim), jnp.float32)
    pe = pe.at[:, 0::2].set(jnp.sin(pos * div))
    pe = pe.at[:, 1::2].set(jnp.cos(pos * div))
    return pe


def init_params(key, cfg):
    E, H = cfg["E"], 2048
    R = cfg["rulenum"] - cfg["NlLen"]
    Rpad = _round_up(R, _LANE)

    def mk(k, shape, dtype=jnp.float32, scale=0.05):
        return (scale * jax.random.normal(k, shape, jnp.float32)).astype(dtype)

    keys = jax.random.split(key, 16)
    p = {}
    # embedding tables + matmul weights in bf16 (MXU operands / halved DMA);
    # biases, LN params and the VPU-side LinearRes weight stay f32.
    p["nl_tok_emb"] = mk(keys[0], (cfg["Nl_Vocsize"], E), jnp.bfloat16)
    p["rule_tok_emb"] = mk(keys[1], (cfg["Code_Vocsize"], E), jnp.bfloat16)
    p["path_conv_w"] = mk(keys[2], (10 * E, E), jnp.bfloat16)
    p["path_conv_b"] = mk(keys[3], (1, E))
    p["ln_g"] = jnp.ones((1, E), jnp.float32)
    p["ln_b"] = jnp.zeros((1, E), jnp.float32)
    p["w_copy_src"] = mk(keys[4], (E, E), jnp.bfloat16)
    p["w_copy_tgt"] = mk(keys[5], (E, E), jnp.bfloat16)
    p["w_copy_res"] = mk(keys[6], (1, E))
    p["b_copy_res"] = mk(keys[7], (1, 1))
    p["w_copy_prob"] = mk(keys[8], (E, 2), jnp.bfloat16)
    p["b_copy_prob"] = mk(keys[9], (1, 2))
    p["w_final"] = mk(keys[10], (E, H), jnp.bfloat16)
    p["b_final"] = mk(keys[11], (1, H))
    # resLinear is lane-padded to a multiple of 128 output columns once at init:
    # zero weight columns + (-1e9) bias -> padded logits vanish under softmax,
    # so the first R probabilities are identical to the unpadded head, while
    # every store in the head kernel stays lane-dense and 128-aligned.
    wr = mk(keys[12], (H, R), jnp.bfloat16)
    br = mk(keys[13], (1, R))
    p["w_res_linear"] = jnp.pad(wr, ((0, 0), (0, Rpad - R)))
    p["b_res_linear"] = jnp.pad(br, ((0, 0), (0, Rpad - R)), constant_values=-1e9)
    return p


# ----------------------------------------------------------------------------
# Decoder forward
# ----------------------------------------------------------------------------
def decoder_forward(params, cfg, inputnl, inputnlchar, inputrule, inputruleparent,
                    inputrulechild, inputParent, inputParentPath, inputdepth,
                    tmpf, tmpc, tmpindex, rulead, antimask, inputRes=None,
                    mode="train"):
    E = cfg["E"]
    B, C = inputrule.shape
    N = inputnl.shape[1]
    R = cfg["rulenum"] - cfg["NlLen"]
    Rpad = params["w_res_linear"].shape[1]
    Npad = _round_up(N, _LANE)

    # ----- NlEncoder ---------------------------------------------------------
    # TODO(synk): TransformerBlock (x5) source not provided -> NL stack is
    # identity; the char-embedding conv branch only feeds that stack and is elided.
    nlmask = inputnl > 0
    nlencode = jnp.take(params["nl_tok_emb"], inputnl, axis=0)           # (B,N,E) bf16

    # TODO(synk): childEm / ruleEmCom / ruleselect of the reference are dead code
    # (never consumed) and are elided.  RightTransformerBlock (x9) and
    # DecodeTransformerBlock (x2) sources not provided -> identity; the ruleEm /
    # first ppathEm branch that only feeds them is elided.

    pos = sinusoidal_pos_emb(C, E)                                       # (C,E) f32

    # decode = dropout( LayerNorm(path_conv(rule_tok_emb[inputParentPath])) + pos )
    # TODO(synk): nn.Dropout(p=0.1) uses eval-mode (identity) semantics here.
    # TODO(synk): the embedding gather could be fused into the conv kernel via a
    # manual DMA gather (PrefetchScalarGridSpec + pl.ANY); kept in XLA for now.
    ppath = jnp.take(params["rule_tok_emb"], inputParentPath, axis=0)    # (B,C,10,E)
    x2d = ppath.reshape(B * C, 10 * E)
    pos2d = jnp.tile(pos, (B, 1))                                        # (B*C, E)
    decode = conv_ln_pos(x2d, params["path_conv_w"], params["path_conv_b"],
                         params["ln_g"], params["ln_b"], pos2d)
    decode = decode.reshape(B, C, E)                                     # bf16

    # ----- CopyNet source projection: invariant over code tiles -> hoisted ---
    src_lin = jnp.einsum("bne,ef->bnf", nlencode, params["w_copy_src"],
                         preferred_element_type=jnp.float32)             # (B,N,E) f32
    src_lin = jnp.pad(src_lin, ((0, 0), (0, Npad - N), (0, 0)))
    mask_f = jnp.pad(nlmask.astype(jnp.float32), ((0, 0), (0, Npad - N)))
    mask_f = mask_f.reshape(B, 1, Npad)

    # ----- fused CopyNet + output head (lane-dense padded output) ------------
    out_pad = copy_head(decode, src_lin, mask_f, params)                 # (B,C,Rpad+Npad)

    # un-pad back to the reference layout: [rule softmax (R) | copy scores (N)]
    resSoftmax = jnp.concatenate(
        [out_pad[..., :R], out_pad[..., Rpad:Rpad + N]], axis=-1)        # (B,C,R+N)

    if mode != "train":
        return resSoftmax

    resmask = inputRes > 0
    gathered = jnp.take_along_axis(resSoftmax, inputRes[..., None], axis=-1)[..., 0]
    loss = jnp.where(resmask, -jnp.log(gathered), 0.0)
    resTruelen = jnp.sum(resmask, axis=-1).astype(jnp.float32)
    totalloss = jnp.mean(loss, axis=-1) * float(cfg["CodeLen"]) / resTruelen
    return totalloss, resSoftmax


# ----------------------------------------------------------------------------
# Demo
# ----------------------------------------------------------------------------
if __name__ == "__main__":
    cfg = dict(E=64, NlLen=16, CodeLen=16, WoLen=8,
               Vocsize=50, Nl_Vocsize=60, Code_Vocsize=70, rulenum=48)
    B = 2
    R = cfg["rulenum"] - cfg["NlLen"]   # resLen = 32
    Lr = cfg["rulenum"]

    key = jax.random.PRNGKey(0)
    kp, *ki = jax.random.split(key, 14)
    params = init_params(kp, cfg)

    inputnl = jax.random.randint(ki[0], (B, cfg["NlLen"]), 1, cfg["Nl_Vocsize"],
                                 dtype=jnp.int32).at[:, -3:].set(0)
    inputnlchar = jax.random.randint(ki[1], (B, cfg["NlLen"], cfg["WoLen"]), 0,
                                     cfg["Vocsize"], dtype=jnp.int32)
    inputrule = jax.random.randint(ki[2], (B, cfg["CodeLen"]), 1, cfg["rulenum"],
                                   dtype=jnp.int32).at[:, -2:].set(0)
    inputruleparent = jax.random.randint(ki[3], (B, cfg["CodeLen"]), 0,
                                         cfg["rulenum"], dtype=jnp.int32)
    inputrulechild = jax.random.randint(ki[4], (B, cfg["CodeLen"], 10), 0,
                                        cfg["Code_Vocsize"], dtype=jnp.int32)
    inputParent = (jax.random.uniform(ki[5], (B, cfg["CodeLen"], cfg["CodeLen"]))
                   > 0.5).astype(jnp.float32)
    inputParentPath = jax.random.randint(ki[6], (B, cfg["CodeLen"], 10), 0,
                                         cfg["Code_Vocsize"], dtype=jnp.int32)
    inputdepth = jax.random.randint(ki[7], (B, cfg["CodeLen"]), 0, 40, dtype=jnp.int32)
    tmpf = jax.random.randint(ki[8], (B, Lr), 0, cfg["Code_Vocsize"], dtype=jnp.int32)
    tmpc = jax.random.randint(ki[9], (B, Lr, cfg["WoLen"]), 0, cfg["Code_Vocsize"],
                              dtype=jnp.int32)
    tmpindex = jnp.tile(jnp.arange(Lr, dtype=jnp.int32)[None], (B, 1))
    rulead = jnp.eye(Lr, dtype=jnp.float32)
    antimask = jnp.tril(jnp.ones((cfg["CodeLen"], cfg["CodeLen"]), jnp.float32))
    # targets index the softmaxed rule half (< R), matching finite-loss usage
    inputRes = jax.random.randint(ki[10], (B, cfg["CodeLen"]), 1, R,
                                  dtype=jnp.int32).at[:, -2:].set(0)

    fwd = jax.jit(lambda p, *args: decoder_forward(p, cfg, *args, mode="train"))

    totalloss, resSoftmax = fwd(params, inputnl, inputnlchar, inputrule,
                                inputruleparent, inputrulechild, inputParent,
                                inputParentPath, inputdepth, tmpf, tmpc,
                                tmpindex, rulead, antimask, inputRes)
    jax.block_until_ready((totalloss, resSoftmax))
    assert totalloss.shape == (B,)
    assert resSoftmax.shape == (B, cfg["CodeLen"], R + cfg["NlLen"])
    assert bool(jnp.all(jnp.isfinite(totalloss)))
    assert bool(jnp.all(jnp.isfinite(resSoftmax)))
    print("KERNEL_OK")
</pallas_src>

<mosaic_0001>
module attributes {stable_mosaic.version = 11 : i64} {
  func.func @_conv_ln_pos_kernel(%arg0: i32, %arg1: memref<32x640xbf16, #tpu.memory_space<vmem>>, %arg2: memref<640x64xbf16, #tpu.memory_space<vmem>>, %arg3: memref<1x64xf32, #tpu.memory_space<vmem>>, %arg4: memref<1x64xf32, #tpu.memory_space<vmem>>, %arg5: memref<1x64xf32, #tpu.memory_space<vmem>>, %arg6: memref<32x64xf32, #tpu.memory_space<vmem>>, %arg7: memref<32x64xbf16, #tpu.memory_space<vmem>>) attributes {dimension_semantics = [#tpu.dimension_semantics<parallel>], iteration_bounds = array<i64: 1>, scalar_prefetch = 0 : i64, scratch_operands = 0 : i64, tpu.core_type = #tpu.core_type<tc>, window_params = [{transform_indices = @transform_0, window_bounds = array<i64: 32, 640>}, {pipeline_mode = #tpu.pipeline_mode<synchronous>, transform_indices = @transform_1, window_bounds = array<i64: 640, 64>}, {pipeline_mode = #tpu.pipeline_mode<synchronous>, transform_indices = @transform_2, window_bounds = array<i64: 1, 64>}, {pipeline_mode = #tpu.pipeline_mode<synchronous>, transform_indices = @transform_3, window_bounds = array<i64: 1, 64>}, {pipeline_mode = #tpu.pipeline_mode<synchronous>, transform_indices = @transform_4, window_bounds = array<i64: 1, 64>}, {transform_indices = @transform_5, window_bounds = array<i64: 32, 64>}, {transform_indices = @transform_6, window_bounds = array<i64: 32, 64>}]} {
    %c0 = arith.constant 0 : index
    %c0_0 = arith.constant 0 : index
    %0 = vector.load %arg1[%c0, %c0_0] : memref<32x640xbf16, #tpu.memory_space<vmem>>, vector<32x640xbf16>
    %c0_1 = arith.constant 0 : index
    %c0_2 = arith.constant 0 : index
    %1 = vector.load %arg2[%c0_1, %c0_2] : memref<640x64xbf16, #tpu.memory_space<vmem>>, vector<640x64xbf16>
    %cst = arith.constant dense<0.000000e+00> : vector<32x64xf32>
    %2 = tpu.matmul %0, %1, %cst {dimension_numbers = #tpu.dot_dimension_numbers<[1], [0], [0], [1], [0, 0, 1, 1], [], []>} : vector<32x640xbf16>, vector<640x64xbf16>, vector<32x64xf32> -> vector<32x64xf32>
    %c0_3 = arith.constant 0 : index
    %c0_4 = arith.constant 0 : index
    %3 = vector.load %arg3[%c0_3, %c0_4] : memref<1x64xf32, #tpu.memory_space<vmem>>, vector<1x64xf32>
    %4 = vector.broadcast %3 : vector<1x64xf32> to vector<32x64xf32>
    %5 = arith.addf %2, %4 : vector<32x64xf32>
    %cst_5 = arith.constant dense<0.000000e+00> : vector<32xf32>
    %6 = vector.multi_reduction <add>, %5, %cst_5 [1] : vector<32x64xf32> to vector<32xf32>
    %7 = vector.shape_cast %6 : vector<32xf32> to vector<32x1xf32>
    %cst_6 = arith.constant 6.400000e+01 : f32
    %8 = vector.broadcast %cst_6 : f32 to vector<32x1xf32>
    %9 = arith.divf %7, %8 : vector<32x1xf32>
    %10 = vector.broadcast %9 : vector<32x1xf32> to vector<32x64xf32>
    %11 = arith.subf %5, %10 : vector<32x64xf32>
    %12 = arith.mulf %11, %11 : vector<32x64xf32>
    %cst_7 = arith.constant dense<0.000000e+00> : vector<32xf32>
    %13 = vector.multi_reduction <add>, %12, %cst_7 [1] : vector<32x64xf32> to vector<32xf32>
    %14 = vector.shape_cast %13 : vector<32xf32> to vector<32x1xf32>
    %cst_8 = arith.constant 6.400000e+01 : f32
    %15 = vector.broadcast %cst_8 : f32 to vector<32x1xf32>
    %16 = arith.divf %14, %15 : vector<32x1xf32>
    %17 = vector.broadcast %9 : vector<32x1xf32> to vector<32x64xf32>
    %18 = arith.subf %5, %17 : vector<32x64xf32>
    %cst_9 = arith.constant 9.99999997E-7 : f32
    %19 = vector.broadcast %cst_9 : f32 to vector<32x1xf32>
    %20 = arith.addf %16, %19 : vector<32x1xf32>
    %21 = math.rsqrt %20 : vector<32x1xf32>
    %22 = vector.broadcast %21 : vector<32x1xf32> to vector<32x64xf32>
    %23 = arith.mulf %18, %22 : vector<32x64xf32>
    %c0_10 = arith.constant 0 : index
    %c0_11 = arith.constant 0 : index
    %24 = vector.load %arg4[%c0_10, %c0_11] : memref<1x64xf32, #tpu.memory_space<vmem>>, vector<1x64xf32>
    %25 = vector.broadcast %24 : vector<1x64xf32> to vector<32x64xf32>
    %26 = arith.mulf %23, %25 : vector<32x64xf32>
    %c0_12 = arith.constant 0 : index
    %c0_13 = arith.constant 0 : index
    %27 = vector.load %arg5[%c0_12, %c0_13] : memref<1x64xf32, #tpu.memory_space<vmem>>, vector<1x64xf32>
    %28 = vector.broadcast %27 : vector<1x64xf32> to vector<32x64xf32>
    %29 = arith.addf %26, %28 : vector<32x64xf32>
    %c0_14 = arith.constant 0 : index
    %c0_15 = arith.constant 0 : index
    %30 = vector.load %arg6[%c0_14, %c0_15] : memref<32x64xf32, #tpu.memory_space<vmem>>, vector<32x64xf32>
    %31 = arith.addf %29, %30 : vector<32x64xf32>
    %32 = arith.truncf %31 : vector<32x64xf32> to vector<32x64xbf16>
    %c0_16 = arith.constant 0 : index
    %c0_17 = arith.constant 0 : index
    %33 = vector.load %arg7[%c0_16, %c0_17] : memref<32x64xbf16, #tpu.memory_space<vmem>>, vector<32x64xbf16>
    tpu.vector_store %arg7[%c0_16, %c0_17], %32 {strides = array<i32>} : memref<32x64xbf16, #tpu.memory_space<vmem>>, vector<32x64xbf16>,
    return
  }
  func.func @transform_0(%arg0: i32) -> (i32, i32) {
    %c0_i32 = arith.constant 0 : i32
    %c0_i32_0 = arith.constant 0 : i32
    return %arg0, %c0_i32 : i32, i32
  }
  func.func @transform_1(%arg0: i32) -> (i32, i32) {
    %c0_i32 = arith.constant 0 : i32
    %c0_i32_0 = arith.constant 0 : i32
    %c0_i32_1 = arith.constant 0 : i32
    return %c0_i32, %c0_i32_0 : i32, i32
  }
  func.func @transform_2(%arg0: i32) -> (i32, i32) {
    %c0_i32 = arith.constant 0 : i32
    %c0_i32_0 = arith.constant 0 : i32
    %c0_i32_1 = arith.constant 0 : i32
    return %c0_i32, %c0_i32_0 : i32, i32
  }
  func.func @transform_3(%arg0: i32) -> (i32, i32) {
    %c0_i32 = arith.constant 0 : i32
    %c0_i32_0 = arith.constant 0 : i32
    %c0_i32_1 = arith.constant 0 : i32
    return %c0_i32, %c0_i32_0 : i32, i32
  }
  func.func @transform_4(%arg0: i32) -> (i32, i32) {
    %c0_i32 = arith.constant 0 : i32
    %c0_i32_0 = arith.constant 0 : i32
    %c0_i32_1 = arith.constant 0 : i32
    return %c0_i32, %c0_i32_0 : i32, i32
  }
  func.func @transform_5(%arg0: i32) -> (i32, i32) {
    %c0_i32 = arith.constant 0 : i32
    %c0_i32_0 = arith.constant 0 : i32
    return %arg0, %c0_i32 : i32, i32
  }
  func.func @transform_6(%arg0: i32) -> (i32, i32) {
    %c0_i32 = arith.constant 0 : i32
    %c0_i32_0 = arith.constant 0 : i32
    return %arg0, %c0_i32 : i32, i32
  }
}

module attributes {stable_mosaic.version = 11 : i64} {
  func.func @_copy_head_kernel(%arg0: i32, %arg1: i32, %arg2: memref<1x16x64xbf16, #tpu.memory_space<vmem>>, %arg3: memref<1x128x64xf32, #tpu.memory_space<vmem>>, %arg4: memref<1x1x128xf32, #tpu.memory_space<vmem>>, %arg5: memref<64x64xbf16, #tpu.memory_space<vmem>>, %arg6: memref<1x64xf32, #tpu.memory_space<vmem>>, %arg7: memref<1x1xf32, #tpu.memory_space<vmem>>, %arg8: memref<64x2xbf16, #tpu.memory_space<vmem>>, %arg9: memref<1x2xf32, #tpu.memory_space<vmem>>, %arg10: memref<64x2048xbf16, #tpu.memory_space<vmem>>, %arg11: memref<1x2048xf32, #tpu.memory_space<vmem>>, %arg12: memref<2048x128xbf16, #tpu.memory_space<vmem>>, %arg13: memref<1x128xf32, #tpu.memory_space<vmem>>, %arg14: memref<1x16x256xf32, #tpu.memory_space<vmem>>) attributes {dimension_semantics = [#tpu.dimension_semantics<parallel>, #tpu.dimension_semantics<parallel>], iteration_bounds = array<i64: 2, 1>, scalar_prefetch = 0 : i64, scratch_operands = 0 : i64, tpu.core_type = #tpu.core_type<tc>, window_params = [{transform_indices = @transform_0, window_bounds = array<i64: 1, 16, 64>}, {transform_indices = @transform_1, window_bounds = array<i64: 1, 128, 64>}, {transform_indices = @transform_2, window_bounds = array<i64: 1, 1, 128>}, {pipeline_mode = #tpu.pipeline_mode<synchronous>, transform_indices = @transform_3, window_bounds = array<i64: 64, 64>}, {pipeline_mode = #tpu.pipeline_mode<synchronous>, transform_indices = @transform_4, window_bounds = array<i64: 1, 64>}, {pipeline_mode = #tpu.pipeline_mode<synchronous>, transform_indices = @transform_5, window_bounds = array<i64: 1, 1>}, {pipeline_mode = #tpu.pipeline_mode<synchronous>, transform_indices = @transform_6, window_bounds = array<i64: 64, 2>}, {pipeline_mode = #tpu.pipeline_mode<synchronous>, transform_indices = @transform_7, window_bounds = array<i64: 1, 2>}, {pipeline_mode = #tpu.pipeline_mode<synchronous>, transform_indices = @transform_8, window_bounds = array<i64: 64, 2048>}, {pipeline_mode = #tpu.pipeline_mode<synchronous>, transform_indices = @transform_9, window_bounds = array<i64: 1, 2048>}, {pipeline_mode = #tpu.pipeline_mode<synchronous>, transform_indices = @transform_10, window_bounds = array<i64: 2048, 128>}, {pipeline_mode = #tpu.pipeline_mode<synchronous>, transform_indices = @transform_11, window_bounds = array<i64: 1, 128>}, {transform_indices = @transform_12, window_bounds = array<i64: 1, 16, 256>}]} {
    %c0 = arith.constant 0 : index
    %c0_0 = arith.constant 0 : index
    %c0_1 = arith.constant 0 : index
    %0 = vector.load %arg2[%c0, %c0_0, %c0_1] : memref<1x16x64xbf16, #tpu.memory_space<vmem>>, vector<1x16x64xbf16>
    %1 = vector.shape_cast %0 : vector<1x16x64xbf16> to vector<16x64xbf16>
    %c0_2 = arith.constant 0 : index
    %c0_3 = arith.constant 0 : index
    %2 = vector.load %arg8[%c0_2, %c0_3] : memref<64x2xbf16, #tpu.memory_space<vmem>>, vector<64x2xbf16>
    %cst = arith.constant dense<0.000000e+00> : vector<16x2xf32>
    %3 = tpu.matmul %1, %2, %cst {dimension_numbers = #tpu.dot_dimension_numbers<[1], [0], [0], [1], [0, 0, 1, 1], [], []>} : vector<16x64xbf16>, vector<64x2xbf16>, vector<16x2xf32> -> vector<16x2xf32>
    %c0_4 = arith.constant 0 : index
    %c0_5 = arith.constant 0 : index
    %4 = vector.load %arg9[%c0_4, %c0_5] : memref<1x2xf32, #tpu.memory_space<vmem>>, vector<1x2xf32>
    %5 = vector.broadcast %4 : vector<1x2xf32> to vector<16x2xf32>
    %6 = arith.addf %3, %5 : vector<16x2xf32>
    %7 = vector.extract_strided_slice %6 {offsets = [0, 0], sizes = [16, 1], strides = [1, 1]} : vector<16x2xf32> to vector<16x1xf32>
    %8 = vector.extract_strided_slice %6 {offsets = [0, 1], sizes = [16, 1], strides = [1, 1]} : vector<16x2xf32> to vector<16x1xf32>
    %9 = arith.subf %7, %8 : vector<16x1xf32>
    %10 = arith.negf %9 : vector<16x1xf32>
    %11 = math.exp %10 : vector<16x1xf32>
    %cst_6 = arith.constant 1.000000e+00 : f32
    %12 = vector.broadcast %cst_6 : f32 to vector<16x1xf32>
    %13 = arith.addf %12, %11 : vector<16x1xf32>
    %14 = arith.divf %12, %13 : vector<16x1xf32>
    %cst_7 = arith.constant 1.000000e+00 : f32
    %15 = vector.broadcast %cst_7 : f32 to vector<16x1xf32>
    %16 = arith.subf %15, %14 : vector<16x1xf32>
    %c0_8 = arith.constant 0 : index
    %c0_9 = arith.constant 0 : index
    %17 = vector.load %arg10[%c0_8, %c0_9] : memref<64x2048xbf16, #tpu.memory_space<vmem>>, vector<64x2048xbf16>
    %cst_10 = arith.constant dense<0.000000e+00> : vector<16x2048xf32>
    %18 = tpu.matmul %1, %17, %cst_10 {dimension_numbers = #tpu.dot_dimension_numbers<[1], [0], [0], [1], [0, 0, 1, 1], [], []>} : vector<16x64xbf16>, vector<64x2048xbf16>, vector<16x2048xf32> -> vector<16x2048xf32>
    %c0_11 = arith.constant 0 : index
    %c0_12 = arith.constant 0 : index
    %19 = vector.load %arg11[%c0_11, %c0_12] : memref<1x2048xf32, #tpu.memory_space<vmem>>, vector<1x2048xf32>
    %20 = vector.broadcast %19 : vector<1x2048xf32> to vector<16x2048xf32>
    %21 = arith.addf %18, %20 : vector<16x2048xf32>
    %cst_13 = arith.constant 5.000000e-01 : f32
    %22 = vector.broadcast %cst_13 : f32 to vector<16x2048xf32>
    %23 = arith.mulf %22, %21 : vector<16x2048xf32>
    %cst_14 = arith.constant 4.471500e-02 : f32
    %24 = vector.broadcast %cst_14 : f32 to vector<16x2048xf32>
    %25 = arith.mulf %24, %21 : vector<16x2048xf32>
    %26 = arith.mulf %25, %21 : vector<16x2048xf32>
    %27 = arith.mulf %26, %21 : vector<16x2048xf32>
    %28 = arith.addf %21, %27 : vector<16x2048xf32>
    %cst_15 = arith.constant 0.797884583 : f32
    %29 = vector.broadcast %cst_15 : f32 to vector<16x2048xf32>
    %30 = arith.mulf %29, %28 : vector<16x2048xf32>
    %31 = math.tanh %30 : vector<16x2048xf32>
    %cst_16 = arith.constant 1.000000e+00 : f32
    %32 = vector.broadcast %cst_16 : f32 to vector<16x2048xf32>
    %33 = arith.addf %32, %31 : vector<16x2048xf32>
    %34 = arith.mulf %23, %33 : vector<16x2048xf32>
    %35 = arith.truncf %34 : vector<16x2048xf32> to vector<16x2048xbf16>
    %c0_17 = arith.constant 0 : index
    %c0_18 = arith.constant 0 : index
    %36 = vector.load %arg12[%c0_17, %c0_18] : memref<2048x128xbf16, #tpu.memory_space<vmem>>, vector<2048x128xbf16>
    %cst_19 = arith.constant dense<0.000000e+00> : vector<16x128xf32>
    %37 = tpu.matmul %35, %36, %cst_19 {dimension_numbers = #tpu.dot_dimension_numbers<[1], [0], [0], [1], [0, 0, 1, 1], [], []>} : vector<16x2048xbf16>, vector<2048x128xbf16>, vector<16x128xf32> -> vector<16x128xf32>
    %c0_20 = arith.constant 0 : index
    %c0_21 = arith.constant 0 : index
    %38 = vector.load %arg13[%c0_20, %c0_21] : memref<1x128xf32, #tpu.memory_space<vmem>>, vector<1x128xf32>
    %39 = vector.broadcast %38 : vector<1x128xf32> to vector<16x128xf32>
    %40 = arith.addf %37, %39 : vector<16x128xf32>
    %cst_22 = arith.constant dense<0xFF800000> : vector<16xf32>
    %41 = vector.multi_reduction <maximumf>, %40, %cst_22 [1] : vector<16x128xf32> to vector<16xf32>
    %42 = vector.shape_cast %41 : vector<16xf32> to vector<16x1xf32>
    %43 = vector.broadcast %42 : vector<16x1xf32> to vector<16x128xf32>
    %44 = arith.subf %40, %43 : vector<16x128xf32>
    %45 = math.exp %44 : vector<16x128xf32>
    %cst_23 = arith.constant dense<0.000000e+00> : vector<16xf32>
    %46 = vector.multi_reduction <add>, %45, %cst_23 [1] : vector<16x128xf32> to vector<16xf32>
    %47 = vector.shape_cast %46 : vector<16xf32> to vector<16x1xf32>
    %48 = vector.broadcast %47 : vector<16x1xf32> to vector<16x128xf32>
    %49 = arith.divf %45, %48 : vector<16x128xf32>
    %50 = vector.broadcast %14 : vector<16x1xf32> to vector<16x128xf32>
    %51 = arith.mulf %49, %50 : vector<16x128xf32>
    %c0_24 = arith.constant 0 : index
    %c0_25 = arith.constant 0 : index
    %c0_26 = arith.constant 0 : index
    %52 = vector.load %arg14[%c0_24, %c0_25, %c0_26] : memref<1x16x256xf32, #tpu.memory_space<vmem>>, vector<1x16x128xf32>
    %53 = vector.shape_cast %52 : vector<1x16x128xf32> to vector<16x128xf32>
    %54 = vector.shape_cast %51 : vector<16x128xf32> to vector<1x16x128xf32>
    tpu.vector_store %arg14[%c0_24, %c0_25, %c0_26], %54 {strides = array<i32>} : memref<1x16x256xf32, #tpu.memory_space<vmem>>, vector<1x16x128xf32>,
    %c0_27 = arith.constant 0 : index
    %c0_28 = arith.constant 0 : index
    %55 = vector.load %arg5[%c0_27, %c0_28] : memref<64x64xbf16, #tpu.memory_space<vmem>>, vector<64x64xbf16>
    %cst_29 = arith.constant dense<0.000000e+00> : vector<16x64xf32>
    %56 = tpu.matmul %1, %55, %cst_29 {dimension_numbers = #tpu.dot_dimension_numbers<[1], [0], [0], [1], [0, 0, 1, 1], [], []>} : vector<16x64xbf16>, vector<64x64xbf16>, vector<16x64xf32> -> vector<16x64xf32>
    %c0_30 = arith.constant 0 : index
    %c0_31 = arith.constant 0 : index
    %57 = vector.load %arg6[%c0_30, %c0_31] : memref<1x64xf32, #tpu.memory_space<vmem>>, vector<1x64xf32>
    %c0_32 = arith.constant 0 : index
    %c0_33 = arith.constant 0 : index
    %c0_34 = arith.constant 0 : index
    %58 = vector.load %arg3[%c0_32, %c0_33, %c0_34] : memref<1x128x64xf32, #tpu.memory_space<vmem>>, vector<1x128x64xf32>
    %59 = vector.shape_cast %58 : vector<1x128x64xf32> to vector<128x64xf32>
    %60 = vector.shape_cast %59 : vector<128x64xf32> to vector<1x128x64xf32>
    %61 = vector.shape_cast %56 : vector<16x64xf32> to vector<16x1x64xf32>
    %62 = vector.broadcast %60 : vector<1x128x64xf32> to vector<16x128x64xf32>
    %63 = vector.broadcast %61 : vector<16x1x64xf32> to vector<16x128x64xf32>
    %64 = arith.addf %62, %63 : vector<16x128x64xf32>
    %65 = math.tanh %64 : vector<16x128x64xf32>
    %66 = vector.shape_cast %57 : vector<1x64xf32> to vector<1x1x64xf32>
    %67 = vector.broadcast %66 : vector<1x1x64xf32> to vector<16x128x64xf32>
    %68 = arith.mulf %65, %67 : vector<16x128x64xf32>
    %cst_35 = arith.constant dense<0.000000e+00> : vector<16x128xf32>
    %69 = vector.multi_reduction <add>, %68, %cst_35 [2] : vector<16x128x64xf32> to vector<16x128xf32>
    %c0_36 = arith.constant 0 : index
    %c0_37 = arith.constant 0 : index
    %70 = vector.load %arg7[%c0_36, %c0_37] : memref<1x1xf32, #tpu.memory_space<vmem>>, vector<1x1xf32>
    %71 = vector.broadcast %70 : vector<1x1xf32> to vector<16x128xf32>
    %72 = arith.addf %69, %71 : vector<16x128xf32>
    %c0_38 = arith.constant 0 : index
    %c0_39 = arith.constant 0 : index
    %c0_40 = arith.constant 0 : index
    %73 = vector.load %arg4[%c0_38, %c0_39, %c0_40] : memref<1x1x128xf32, #tpu.memory_space<vmem>>, vector<1x1x128xf32>
    %74 = vector.shape_cast %73 : vector<1x1x128xf32> to vector<1x128xf32>
    %cst_41 = arith.constant 0.000000e+00 : f32
    %75 = vector.broadcast %cst_41 : f32 to vector<1x128xf32>
    %76 = arith.cmpf ogt, %74, %75 : vector<1x128xf32>
    %cst_42 = arith.constant -1.000000e+09 : f32
    %77 = vector.shape_cast %76 : vector<1x128xi1> to vector<1x128xi1>
    %78 = vector.broadcast %77 : vector<1x128xi1> to vector<16x128xi1>
    %79 = vector.broadcast %cst_42 : f32 to vector<16x128xf32>
    %80 = arith.select %78, %72, %79 : vector<16x128xi1>, vector<16x128xf32>
    %81 = vector.broadcast %16 : vector<16x1xf32> to vector<16x128xf32>
    %82 = arith.mulf %80, %81 : vector<16x128xf32>
    %c0_43 = arith.constant 0 : index
    %c0_44 = arith.constant 0 : index
    %c128 = arith.constant 128 : index
    %83 = vector.load %arg14[%c0_43, %c0_44, %c128] : memref<1x16x256xf32, #tpu.memory_space<vmem>>, vector<1x16x128xf32>
    %84 = vector.shape_cast %83 : vector<1x16x128xf32> to vector<16x128xf32>
    %85 = vector.shape_cast %82 : vector<16x128xf32> to vector<1x16x128xf32>
    tpu.vector_store %arg14[%c0_43, %c0_44, %c128], %85 {strides = array<i32>} : memref<1x16x256xf32, #tpu.memory_space<vmem>>, vector<1x16x128xf32>,
    return
  }
  func.func @transform_0(%arg0: i32, %arg1: i32) -> (i32, i32, i32) {
    %c0_i32 = arith.constant 0 : i32
    %c0_i32_0 = arith.constant 0 : i32
    return %arg0, %arg1, %c0_i32 : i32, i32, i32
  }
  func.func @transform_1(%arg0: i32, %arg1: i32) -> (i32, i32, i32) {
    %c0_i32 = arith.constant 0 : i32
    %c0_i32_0 = arith.constant 0 : i32
    %c0_i32_1 = arith.constant 0 : i32
    return %arg0, %c0_i32, %c0_i32_0 : i32, i32, i32
  }
  func.func @transform_2(%arg0: i32, %arg1: i32) -> (i32, i32, i32) {
    %c0_i32 = arith.constant 0 : i32
    %c0_i32_0 = arith.constant 0 : i32
    %c0_i32_1 = arith.constant 0 : i32
    return %arg0, %c0_i32, %c0_i32_0 : i32, i32, i32
  }
  func.func @transform_3(%arg0: i32, %arg1: i32) -> (i32, i32) {
    %c0_i32 = arith.constant 0 : i32
    %c0_i32_0 = arith.constant 0 : i32
    %c0_i32_1 = arith.constant 0 : i32
    return %c0_i32, %c0_i32_0 : i32, i32
  }
  func.func @transform_4(%arg0: i32, %arg1: i32) -> (i32, i32) {
    %c0_i32 = arith.constant 0 : i32
    %c0_i32_0 = arith.constant 0 : i32
    %c0_i32_1 = arith.constant 0 : i32
    return %c0_i32, %c0_i32_0 : i32, i32
  }
  func.func @transform_5(%arg0: i32, %arg1: i32) -> (i32, i32) {
    %c0_i32 = arith.constant 0 : i32
    %c0_i32_0 = arith.constant 0 : i32
    %c0_i32_1 = arith.constant 0 : i32
    return %c0_i32, %c0_i32_0 : i32, i32
  }
  func.func @transform_6(%arg0: i32, %arg1: i32) -> (i32, i32) {
    %c0_i32 = arith.constant 0 : i32
    %c0_i32_0 = arith.constant 0 : i32
    %c0_i32_1 = arith.constant 0 : i32
    return %c0_i32, %c0_i32_0 : i32, i32
  }
  func.func @transform_7(%arg0: i32, %arg1: i32) -> (i32, i32) {
    %c0_i32 = arith.constant 0 : i32
    %c0_i32_0 = arith.constant 0 : i32
    %c0_i32_1 = arith.constant 0 : i32
    return %c0_i32, %c0_i32_0 : i32, i32
  }
  func.func @transform_8(%arg0: i32, %arg1: i32) -> (i32, i32) {
    %c0_i32 = arith.constant 0 : i32
    %c0_i32_0 = arith.constant 0 : i32
    %c0_i32_1 = arith.constant 0 : i32
    return %c0_i32, %c0_i32_0 : i32, i32
  }
  func.func @transform_9(%arg0: i32, %arg1: i32) -> (i32, i32) {
    %c0_i32 = arith.constant 0 : i32
    %c0_i32_0 = arith.constant 0 : i32
    %c0_i32_1 = arith.constant 0 : i32
    return %c0_i32, %c0_i32_0 : i32, i32
  }
  func.func @transform_10(%arg0: i32, %arg1: i32) -> (i32, i32) {
    %c0_i32 = arith.constant 0 : i32
    %c0_i32_0 = arith.constant 0 : i32
    %c0_i32_1 = arith.constant 0 : i32
    return %c0_i32, %c0_i32_0 : i32, i32
  }
  func.func @transform_11(%arg0: i32, %arg1: i32) -> (i32, i32) {
    %c0_i32 = arith.constant 0 : i32
    %c0_i32_0 = arith.constant 0 : i32
    %c0_i32_1 = arith.constant 0 : i32
    return %c0_i32, %c0_i32_0 : i32, i32
  }
  func.func @transform_12(%arg0: i32, %arg1: i32) -> (i32, i32, i32) {
    %c0_i32 = arith.constant 0 : i32
    %c0_i32_0 = arith.constant 0 : i32
    return %arg0, %arg1, %c0_i32 : i32, i32, i32
  }
}

</mosaic_0001>

<bundles_post_ra>
// kernel: _lambda_.2
= control target key start
LH: loop header
LB: loop body
LE: loop exit
PB: predicated region body
PF: predicated region fallthrough
CT: control target
= control target key end

     0   :  { %11 = vsyncpa [#allocation3], 0  ;;  %s1300_s0 = inlined_call_operand.hbm [shape: bf16[32,640], index: 0, kind: input, shape index: {}]   ;;  %s1301_s1 = inlined_call_operand.hbm [shape: bf16[640,64], index: 1, kind: input, shape index: {}]   ;;  %s1302_s2 = inlined_call_operand.hbm [shape: f32[1,64], index: 2, kind: input, shape index: {}]   ;;  %s1303_s3 = inlined_call_operand.hbm [shape: f32[1,64], index: 3, kind: input, shape index: {}]   ;;  %s1304_s4 = inlined_call_operand.hbm [shape: f32[1,64], index: 4, kind: input, shape index: {}]   ;;  %s1305_s5 = inlined_call_operand.hbm [shape: f32[32,64], index: 5, kind: input, shape index: {}]   ;;  %s1306_s6 = inlined_call_operand.hbm [shape: bf16[32,64], index: 6, kind: output, shape index: {}]  }
   0x1   :  { %12 = vsyncpa [#allocation6], 0 }
   0x2   :  { %13 = vsyncpa [#allocation9], 0 }
   0x3   :  { %14 = vsyncpa [#allocation12], 0 }
   0x4   :  { %15 = vsyncpa [#allocation4], 0  ;;  %s1150_s21 = smov [#allocation5]   ;;  %s986_s25 = scalar_lea.hbm %s1301_s1, 5120 }
   0x5   :  { %s33_s22 = sshll.u32 %s1150_s21, 4  ;;  %p987_p0 = scmp.ne.s32.totalorder %s1301_s1, %s986_s25  ;;  %s34_s22 = int_to_ptr.vmem [resolvable:$true] %s33_s22 }
   0x6   :  { %p990_p1 = scmp.lt.u32.totalorder %s986_s25, %s1301_s1 }
   0x8   :  { %p992_p2 = pnand %p990_p1, %p987_p0 }
   0xa   :  { %995 = shalt.err (!%p992_p2)
}
   0xb   :  { %s996_s30 = scalar_lea.vmem %s34_s22, 5120  ;;  %p1001_p4 = scmp.lt.s32.totalorder %s34_s22, %s34_s22 }
   0xc   :  { %p997_p3 = scmp.ne.s32.totalorder %s34_s22, %s996_s30  ;;  %p1002_p5 = scmp.lt.s32.totalorder %s996_s30, %s996_s30 }
   0xe   :  { %p1003_p6 = por %p1002_p5, %p1001_p4 }
  0x10   :  { %p1004_p7 = pnand %p1003_p6, %p997_p3 }
  0x12   :  { %1007 = shalt.err (!%p1004_p7)
}
  0x13   :  { %s1151_s7 = smov 64   ;;  %s1152_s8 = smov 4  }
  0x14   :  { %39 = dma.hbm_to_vmem [thread:$0]  %s1301_s1, 5120, %s34_s22, [#allocation6], %s1151_s7, %s1151_s7, %s1152_s8  }
  0x15   :  { %s1153_s11 = smov [#allocation8]   ;;  %s1154_s13 = smov [#allocation2]  }
  0x16   :  { %s56_s12 = sshll.u32 %s1153_s11, 4  ;;  %s21_s14 = sshll.u32 %s1154_s13, 4  ;;  %s57_s12 = int_to_ptr.vmem [resolvable:$true] %s56_s12  ;;  %s22_s14 = int_to_ptr.vmem [resolvable:$true] %s21_s14 }
  0x17   :  { %s1008_s17 = scalar_lea.hbm %s1303_s3, 16 }
  0x18   :  { %p1009_p8 = scmp.ne.s32.totalorder %s1303_s3, %s1008_s17  ;;  %p1012_p9 = scmp.lt.u32.totalorder %s1008_s17, %s1303_s3 }
  0x1a   :  { %p1014_p10 = pnand %p1012_p9, %p1009_p8 }
  0x1c   :  { %1017 = shalt.err (!%p1014_p10)
}
  0x1d   :  { %s1018_s1 = scalar_lea.vmem %s57_s12, 16  ;;  %s1022_s22 = scalar_lea.vmem %s57_s12, 32 }
  0x1e   :  { %p1019_p11 = scmp.ne.s32.totalorder %s57_s12, %s1018_s1  ;;  %p1023_p12 = scmp.lt.s32.totalorder %s57_s12, %s57_s12 }
  0x1f   :  { %p1024_p13 = scmp.lt.s32.totalorder %s1022_s22, %s1018_s1 }
  0x21   :  { %p1025_p0 = por %p1024_p13, %p1023_p12 }
  0x23   :  { %p1026_p1 = pnand %p1025_p0, %p1019_p11 }
  0x25   :  { %1029 = shalt.err (!%p1026_p1)
}
  0x26   :  { %59 = dma.hbm_to_vmem [thread:$0]  %s1303_s3, 16, %s57_s12, [#allocation9]  }
  0x27   :  { %s1030_s27 = scalar_lea.hbm %s1300_s0, 1280 }
  0x28   :  { %p1031_p2 = scmp.ne.s32.totalorder %s1300_s0, %s1030_s27  ;;  %p1034_p3 = scmp.lt.u32.totalorder %s1030_s27, %s1300_s0 }
  0x2a   :  { %p1036_p4 = pnand %p1034_p3, %p1031_p2 }
  0x2c   :  { %1039 = shalt.err (!%p1036_p4)
}
  0x2d   :  { %s1040_s10 = scalar_lea.vmem %s22_s14, 1280  ;;  %p1045_p6 = scmp.lt.s32.totalorder %s22_s14, %s22_s14 }
  0x2e   :  { %p1041_p5 = scmp.ne.s32.totalorder %s22_s14, %s1040_s10  ;;  %p1046_p7 = scmp.lt.s32.totalorder %s1040_s10, %s1040_s10 }
  0x30   :  { %p1047_p8 = por %p1046_p7, %p1045_p6 }
  0x32   :  { %p1048_p9 = pnand %p1047_p8, %p1041_p5 }
  0x34   :  { %1051 = shalt.err (!%p1048_p9)
}
  0x35   :  { %s1155_s3 = smov 320   ;;  %s1156_s11 = smov 20  }
  0x36   :  { %27 = dma.hbm_to_vmem [thread:$0]  %s1300_s0, 1280, %s22_s14, [#allocation3], %s1155_s3, %s1155_s3, %s1156_s11  }
  0x37   :  { %s1157_s15 = smov [#allocation7]   ;;  %s1158_s17 = smov [#allocation10]  }
  0x38   :  { %s46_s16 = sshll.u32 %s1157_s15, 4  ;;  %s66_s18 = sshll.u32 %s1158_s17, 4  ;;  %s47_s16 = int_to_ptr.vmem [resolvable:$true] %s46_s16  ;;  %s67_s18 = int_to_ptr.vmem [resolvable:$true] %s66_s18 }
  0x39   :  { %s1052_s21 = scalar_lea.hbm %s1302_s2, 16 }
  0x3a   :  { %p1053_p10 = scmp.ne.s32.totalorder %s1302_s2, %s1052_s21  ;;  %p1056_p11 = scmp.lt.u32.totalorder %s1052_s21, %s1302_s2 }
  0x3c   :  { %p1058_p12 = pnand %p1056_p11, %p1053_p10 }
  0x3e   :  { %1061 = shalt.err (!%p1058_p12)
}
  0x3f   :  { %s1062_s0 = scalar_lea.vmem %s47_s16, 16  ;;  %s1066_s14 = scalar_lea.vmem %s47_s16, 32 }
  0x40   :  { %p1063_p13 = scmp.ne.s32.totalorder %s47_s16, %s1062_s0  ;;  %p1067_p0 = scmp.lt.s32.totalorder %s47_s16, %s47_s16 }
  0x41   :  { %p1068_p1 = scmp.lt.s32.totalorder %s1066_s14, %s1062_s0 }
  0x43   :  { %p1069_p2 = por %p1068_p1, %p1067_p0 }
  0x45   :  { %p1070_p3 = pnand %p1069_p2, %p1063_p13 }
  0x47   :  { %1073 = shalt.err (!%p1070_p3)
}
  0x48   :  { %49 = dma.hbm_to_vmem [thread:$0]  %s1302_s2, 16, %s47_s16, [#allocation6]  }
  0x49   :  { %s1074_s29 = scalar_lea.hbm %s1304_s4, 16 }
  0x4a   :  { %p1075_p4 = scmp.ne.s32.totalorder %s1304_s4, %s1074_s29  ;;  %p1078_p5 = scmp.lt.u32.totalorder %s1074_s29, %s1304_s4 }
  0x4c   :  { %p1080_p6 = pnand %p1078_p5, %p1075_p4 }
  0x4e   :  { %1083 = shalt.err (!%p1080_p6)
}
  0x4f   :  { %s1084_s11 = scalar_lea.vmem %s67_s18, 16  ;;  %s1088_s12 = scalar_lea.vmem %s67_s18, 32 }
  0x50   :  { %p1085_p7 = scmp.ne.s32.totalorder %s67_s18, %s1084_s11  ;;  %p1089_p8 = scmp.lt.s32.totalorder %s67_s18, %s67_s18 }
  0x51   :  { %p1090_p9 = scmp.lt.s32.totalorder %s1088_s12, %s1084_s11 }
  0x53   :  { %p1091_p10 = por %p1090_p9, %p1089_p8 }
  0x55   :  { %p1092_p11 = pnand %p1091_p10, %p1085_p7 }
  0x57   :  { %1095 = shalt.err (!%p1092_p11)
}
  0x58   :  { %69 = dma.hbm_to_vmem [thread:$0]  %s1304_s4, 16, %s67_s18, [#allocation9]  }
  0x59   :  { %s1159_s15 = smov [#allocation11]   ;;  %s1096_s20 = scalar_lea.hbm %s1305_s5, 512 }
  0x5a   :  { %s75_s16 = sshll.u32 %s1159_s15, 4  ;;  %p1097_p12 = scmp.ne.s32.totalorder %s1305_s5, %s1096_s20  ;;  %s76_s16 = int_to_ptr.vmem [resolvable:$true] %s75_s16 }
  0x5b   :  { %p1100_p13 = scmp.lt.u32.totalorder %s1096_s20, %s1305_s5 }
  0x5d   :  { %p1102_p0 = pnand %p1100_p13, %p1097_p12 }
  0x5f   :  { %1105 = shalt.err (!%p1102_p0)
}
  0x60   :  { %s1106_s24 = scalar_lea.vmem %s76_s16, 512  ;;  %p1111_p2 = scmp.lt.s32.totalorder %s76_s16, %s76_s16 }
  0x61   :  { %p1107_p1 = scmp.ne.s32.totalorder %s76_s16, %s1106_s24  ;;  %p1112_p3 = scmp.lt.s32.totalorder %s1106_s24, %s1106_s24 }
  0x63   :  { %p1113_p4 = por %p1112_p3, %p1111_p2 }
  0x65   :  { %p1114_p5 = pnand %p1113_p4, %p1107_p1 }
  0x67   :  { %1117 = shalt.err (!%p1114_p5)
}
  0x68   :  { %s1160_s4 = smov 128   ;;  %s1161_s18 = smov 8  }
  0x69   :  { %81 = dma.hbm_to_vmem [thread:$0]  %s1305_s5, 512, %s76_s16, [#allocation12], %s1160_s4, %s1160_s4, %s1161_s18  }
  0x6a   :  { %1140 = dma.done.wait [#allocation3], 1280  }
  0x6b   :  { %1141 = vsyncadd [#allocation3], 4294966016 }
  0x6c   :  { %1142 = dma.done.wait [#allocation6], 5136  }
  0x6d   :  { %1143 = vsyncadd [#allocation6], 4294962160 }
  0x6e   :  { %1144 = dma.done.wait [#allocation9], 32  }
  0x6f   :  { %1145 = vsyncadd [#allocation9], 4294967264 }
  0x70   :  { %1146 = dma.done.wait [#allocation12], 512  }
  0x71   :  { %1147 = vsyncadd [#allocation12], 4294966784  ;;  %v924_v0 = vld [vmem:[#allocation5 + $0x40] sm:$0xff]   ;;  %v928_v4 = vld [vmem:[#allocation5 + $0x48] sm:$0xff]   ;;  %vm639_vm0 = vcmask 523264   ;;  %vm739_vm1 = vcmask 519168  }
  0x72   :  { %v925_v1 = vld [vmem:[#allocation5] sm:$0xff]   ;;  %825 = vmatprep.subr.bf16.mxu0 %v924_v0  ;;  %v929_v5 = vld [vmem:[#allocation5 + $0x8] sm:$0xff]   ;;  %v932_v8 = vld [vmem:[#allocation5 + $0x50] sm:$0xff]   ;;  %s1162_s5 = smov [#allocation13]  }
  0x73   :  { %v926_v2 = vld [vmem:[#allocation5 + $0xc0] sm:$0xff]   ;;  %826 = vmatpush3.bf16.msra.mxu0 %v925_v1  ;;  %v930_v6 = vld [vmem:[#allocation5 + $0xc8] sm:$0xff]   ;;  %v933_v9 = vld [vmem:[#allocation5 + $0x10] sm:$0xff]   ;;  %s749_s25 = sshll.u32 %s1162_s5, 4  ;;  %s750_s25 = int_to_ptr.vmem [resolvable:$true] %s749_s25 }
  0x74   :  { %v927_v3 = vld [vmem:[#allocation5 + $0x80] sm:$0xff]   ;;  %853 = vmatprep.subr.bf16.mxu1 %v926_v2  ;;  %827 = vmatprep.subr.bf16.mxu0 %v928_v4  ;;  %v931_v7 = vld [vmem:[#allocation5 + $0x88] sm:$0xff]   ;;  %v934_v10 = vld [vmem:[#allocation5 + $0xd0] sm:$0xff]   ;;  %s1118_s26 = scalar_lea.vmem %s750_s25, 256  ;;  %p1123_p7 = scmp.lt.s32.totalorder %s750_s25, %s750_s25 }
  0x75   :  { %854 = vmatpush3.bf16.msra.mxu1 %v927_v3  ;;  %v935_v11 = vld [vmem:[#allocation5 + $0x90] sm:$0xff]   ;;  %v936_v12 = vld [vmem:[#allocation5 + $0x58] sm:$0xff]   ;;  %v940_v16 = vld [vmem:[#allocation5 + $0x60] sm:$0xff]   ;;  %p1119_p6 = scmp.ne.s32.totalorder %s750_s25, %s1118_s26  ;;  %p1124_p8 = scmp.lt.s32.totalorder %s1118_s26, %s1118_s26 }
  0x76   :  { %855 = vmatprep.subr.bf16.mxu1 %v930_v6  ;;  %v937_v13 = vld [vmem:[#allocation5 + $0x18] sm:$0xff]   ;;  %v941_v17 = vld [vmem:[#allocation5 + $0x20] sm:$0xff]   ;;  %v944_v20 = vld [vmem:[#allocation5 + $0x68] sm:$0xff]  }
  0x77   :  { %828 = vmatpush3.bf16.msra.mxu0 %v929_v5  ;;  %v938_v14 = vld [vmem:[#allocation5 + $0xd8] sm:$0xff]   ;;  %v942_v18 = vld [vmem:[#allocation5 + $0xe0] sm:$0xff]   ;;  %v945_v21 = vld [vmem:[#allocation5 + $0x28] sm:$0xff]   ;;  %p1125_p9 = por %p1124_p8, %p1123_p7 }
  0x78   :  { %829 = vmatprep.subr.bf16.mxu0 %v932_v8  ;;  %v939_v15 = vld [vmem:[#allocation5 + $0x98] sm:$0xff]   ;;  %v943_v19 = vld [vmem:[#allocation5 + $0xa0] sm:$0xff]   ;;  %v946_v22 = vld [vmem:[#allocation5 + $0xe8] sm:$0xff]  }
  0x79   :  { %856 = vmatpush3.bf16.msra.mxu1 %v931_v7  ;;  %v947_v23 = vld [vmem:[#allocation5 + $0xa8] sm:$0xff]   ;;  %v948_v24 = vld [vmem:[#allocation5 + $0x70] sm:$0xff]   ;;  %v952_v28 = vld [vmem:[#allocation5 + $0x78] sm:$0xff]   ;;  %p1126_p10 = pnand %p1125_p9, %p1119_p6 }
  0x7a   :  { %857 = vmatprep.subr.bf16.mxu1 %v934_v10  ;;  %v949_v25 = vld [vmem:[#allocation5 + $0x30] sm:$0xff]   ;;  %v953_v29 = vld [vmem:[#allocation5 + $0x38] sm:$0xff]   ;;  %v959_v34 = vld [vmem:[#allocation5 + $0x100] sm:$0xff]  }
  0x7b   :  { %830 = vmatpush3.bf16.msra.mxu0 %v933_v9  ;;  %v950_v26 = vld [vmem:[#allocation5 + $0xf0] sm:$0xff]   ;;  %v954_v30 = vld [vmem:[#allocation5 + $0xf8] sm:$0xff]   ;;  %v963_v37 = vld [vmem:[#allocation5 + $0x108] sm:$0xff]  }
  0x7c   :  { %831 = vmatprep.subr.bf16.mxu0 %v936_v12  ;;  %v951_v27 = vld [vmem:[#allocation5 + $0xb0] sm:$0xff]   ;;  %v958_v33 = vld [vmem:[#allocation5 + $0xb8] sm:$0xff]   ;;  %v966_v44 = vld [vmem:[#allocation5 + $0x120] sm:$0xff]  }
  0x7d   :  { %858 = vmatpush3.bf16.msra.mxu1 %v935_v11  ;;  %v955_v31 = vld [vmem:[#allocation2] ss:$20 sps:$4 sm:$0xff]   ;;  %v957_v32 = vld [vmem:[#allocation2 + $0x4] ss:$20 sps:$4 sm:$0xff]   ;;  %v960_v35 = vld [vmem:[#allocation2 + $0x8] ss:$20 sps:$4 sm:$0xff]  }
  0x7e   :  { %859 = vmatprep.subr.bf16.mxu1 %v938_v14  ;;  %524 = vmatprep.mubr.bf16.mxu0 %v957_v32  ;;  %v962_v36 = vld [vmem:[#allocation2 + $0xc] ss:$20 sps:$4 sm:$0xff]   ;;  %v970_v41 = vld [vmem:[#allocation2 + $0x28] ss:$20 sps:$4 sm:$0xff]   ;;  %v973_v43 = vld [vmem:[#allocation2 + $0x30] ss:$20 sps:$4 sm:$0xff]  }
  0x7f   :  { %832 = vmatpush3.bf16.msra.mxu0 %v937_v13  ;;  %573 = vmatprep.mubr.bf16.mxu1 %v962_v36  ;;  %v964_v38 = vld [vmem:[#allocation5 + $0x110] sm:$0xff]   ;;  %v965_v40 = vld [vmem:[#allocation5 + $0x118] sm:$0xff]   ;;  %v969_v46 = vld [vmem:[#allocation5 + $0x128] sm:$0xff]  }
  0x80   :  { %833 = vmatprep.subr.bf16.mxu0 %v940_v16  ;;  %v967_v39 = vld [vmem:[#allocation2 + $0x2c] ss:$20 sps:$4 sm:$0xff]   ;;  %v971_v42 = vld [vmem:[#allocation2 + $0x34] ss:$20 sps:$4 sm:$0xff]   ;;  %v976_v45 = vld [vmem:[#allocation2 + $0x10] ss:$20 sps:$4 sm:$0xff]  }
  0x81   :  { %860 = vmatpush3.bf16.msra.mxu1 %v939_v15  ;;  %v974_v47 = vld [vmem:[#allocation5 + $0x130] sm:$0xff]   ;;  %v975_v48 = vld [vmem:[#allocation5 + $0x138] sm:$0xff]   ;;  %v764_v51 = vld [vmem:[#allocation7] ss:$0 sm:$0xff] }
  0x82   :  { %861 = vmatprep.subr.bf16.mxu1 %v942_v18  ;;  %v977_v49 = vld [vmem:[#allocation2 + $0x38] ss:$20 sps:$4 sm:$0xff]  }
  0x83   :  { %834 = vmatpush3.bf16.msra.mxu0 %v941_v17 }
  0x84   :  { %835 = vmatprep.subr.bf16.mxu0 %v944_v20 }
  0x85   :  { %862 = vmatpush3.bf16.msra.mxu1 %v943_v19 }
  0x86   :  { %863 = vmatprep.subr.bf16.mxu1 %v946_v22 }
  0x87   :  { %836 = vmatpush3.bf16.msra.mxu0 %v945_v21 }
  0x88   :  { %837 = vmatprep.subr.bf16.mxu0 %v948_v24 }
  0x89   :  { %864 = vmatpush3.bf16.msra.mxu1 %v947_v23 }
  0x8a   :  { %865 = vmatprep.subr.bf16.mxu1 %v950_v26 }
  0x8b   :  { %838 = vmatpush3.bf16.msra.mxu0 %v949_v25 }
  0x8c   :  { %839 = vmatprep.subr.bf16.mxu0 %v952_v28 }
  0x8d   :  { %866 = vmatpush3.bf16.msra.mxu1 %v951_v27 }
  0x8e   :  { %867 = vmatprep.subr.bf16.mxu1 %v954_v30 }
  0x8f   :  { %840 = vmatpush3.bf16.msra.mxu0 %v953_v29 }
  0x90   :  { %891 = vmatprep.subr.bf16.mxu0 %v959_v34 }
  0x91   :  { %868 = vmatpush3.bf16.msra.mxu1 %v958_v33 }
  0x92   :  { %525 = vmatmul.mubr.bf16.vlgmr.msra.gmra.mrb[0].mxu0 %v955_v31 }
  0x93   :  { %892 = vmatpush3.bf16.msra.mxu0 %v959_v34  ;;  %532 = vmatprep.mubr.bf16.mxu0 %v967_v39 }
  0x94   :  { %574 = vmatmul.mubr.bf16.vlgmr.msra.gmra.mrb[0].mxu1 %v960_v35  ;;  %893 = vmatprep.subr.bf16.mxu0 %v963_v37 }
  0x95   :  { %581 = vmatprep.mubr.bf16.mxu1 %v971_v42 }
  0x97   :  { %894 = vmatpush3.bf16.msra.mxu0 %v963_v37 }
  0x98   :  { %895 = vmatprep.subr.bf16.mxu0 %v964_v38 }
  0x9a   :  { %533 = vmatmul.mubr.bf16.gmra.mrb[4].mxu0 %v970_v41 }
  0x9b   :  { %896 = vmatpush3.bf16.msra.mxu0 %v964_v38  ;;  %907 = vmatprep.mubr.bf16.mxu0 %v976_v45 }
  0x9c   :  { %897 = vmatprep.subr.bf16.mxu0 %v965_v40  ;;  %582 = vmatmul.mubr.bf16.gmra.mrb[4].mxu1 %v973_v43 }
  0x9f   :  { %898 = vmatpush3.bf16.msra.mxu0 %v965_v40 }
  0xa0   :  { %899 = vmatprep.subr.bf16.mxu0 %v966_v44 }
  0xa3   :  { %900 = vmatpush3.bf16.msra.mxu0 %v966_v44 }
  0xa4   :  { %901 = vmatprep.subr.bf16.mxu0 %v969_v46 }
  0xa7   :  { %902 = vmatpush3.bf16.msra.mxu0 %v969_v46 }
  0xa8   :  { %903 = vmatprep.subr.bf16.mxu0 %v974_v47 }
  0xab   :  { %904 = vmatpush3.bf16.msra.mxu0 %v974_v47 }
  0xac   :  { %905 = vmatprep.subr.bf16.mxu0 %v975_v48 }
  0xaf   :  { %906 = vmatpush3.bf16.msra.mxu0 %v975_v48 }
  0xb2   :  { %908 = vmatmul.mubr.bf16.vlgmr.msra.gmra.mrb[8].mxu0 %v977_v49 }
 0x165   :  { %v841_v50 = vpop.f32.mrb[0].mxu0 }
 0x166   :  { %v842_v52 = vpop.f32.mrb[1].mxu0 }
 0x167   :  { %v843_v53 = vadd.f32 %v842_v52, %v841_v50  ;;  %v844_v54 = vpop.f32.mrb[2].mxu0  ;;  %v869_v55 = vpop.f32.mrb[0].mxu1 }
 0x168   :  { %v845_v56 = vpop.f32.mrb[3].mxu0  ;;  %v870_v59 = vpop.f32.mrb[1].mxu1 }
 0x169   :  { %v527_v57 = vadd.f32 %v843_v53, %v764_v51  ;;  %v846_v58 = vadd.f32 %v845_v56, %v844_v54  ;;  %v871_v60 = vadd.f32 %v870_v59, %v869_v55  ;;  %v872_v61 = vpop.f32.mrb[2].mxu1 }
 0x16a   :  { %v873_v63 = vpop.f32.mrb[3].mxu1 }
 0x16b   :  { %v530_v62 = vadd.f32 %v846_v58, %v764_v51  ;;  %v874_v0 = vadd.f32 %v873_v63, %v872_v61  ;;  %v576_v1 = vadd.f32 %v871_v60, %v527_v57 }
 0x16d   :  { %v847_v2 = vpop.f32.mrb[4].mxu0  ;;  %v579_v4 = vadd.f32 %v874_v0, %v530_v62  ;;  %v815_v0 = vld [vmem:[#allocation8] ss:$0 sm:$0xff] }
 0x16e   :  { %v848_v3 = vpop.f32.mrb[5].mxu0 }
 0x16f   :  { %v849_v5 = vadd.f32 %v848_v3, %v847_v2  ;;  %v850_v6 = vpop.f32.mrb[6].mxu0  ;;  %v875_v7 = vpop.f32.mrb[4].mxu1  ;;  %v816_v2 = vld [vmem:[#allocation10] ss:$0 sm:$0xff] }
 0x170   :  { %v851_v8 = vpop.f32.mrb[7].mxu0  ;;  %v876_v11 = vpop.f32.mrb[5].mxu1 }
 0x171   :  { %v535_v9 = vadd.f32 %v849_v5, %v764_v51  ;;  %v852_v10 = vadd.f32 %v851_v8, %v850_v6  ;;  %v877_v12 = vadd.f32 %v876_v11, %v875_v7  ;;  %v878_v13 = vpop.f32.mrb[6].mxu1  ;;  %v715_v5 = vld [vmem:[#allocation11] sm:$0xff] }
 0x172   :  { %v879_v15 = vpop.f32.mrb[7].mxu1 }
 0x173   :  { %v538_v14 = vadd.f32 %v852_v10, %v764_v51  ;;  %v880_v16 = vadd.f32 %v879_v15, %v878_v13  ;;  %v584_v17 = vadd.f32 %v877_v12, %v535_v9 }
 0x175   :  { %v587_v18 = vadd.f32 %v880_v16, %v538_v14  ;;  %v716_v14 = vld [vmem:[#allocation11 + $0x8] sm:$0xff] }
 0x185   :  { %v909_v19 = vpop.f32.mrb[8].mxu0 }
 0x186   :  { %v633_v20 = vadd.f32 %v909_v19, %v584_v17  ;;  %v624_v21 = vpop.f32.mrb[9].mxu0  ;;  %v717_v17 = vld [vmem:[#allocation11 + $0x10] sm:$0xff] }
 0x187   :  { %v625_v22 = vadd.f32 %v624_v21, %v576_v1  ;;  %v910_v23 = vpop.f32.mrb[10].mxu0 }
 0x188   :  { %v636_v24 = vadd.f32 %v910_v23, %v587_v18  ;;  %v627_v25 = vpop.f32.mrb[11].mxu0  ;;  %v646_v26 = vsel %vm639_vm0, %v633_v20, 0.0 }
 0x189   :  { %v628_v27 = vadd.f32 %v627_v25, %v579_v4  ;;  %647 = vadd.xlane.f32.xlu1 %v646_v26  ;;  %v640_v28 = vsel %vm639_vm0, %v625_v22, 0.0 }
 0x18a   :  { %641 = vadd.xlane.f32.xlu0 %v640_v28  ;;  %v649_v29 = vsel %vm639_vm0, %v636_v24, 0.0 }
 0x18b   :  { %v643_v30 = vsel %vm639_vm0, %v628_v27, 0.0 }
 0x18d   :  { %650 = vadd.xlane.f32.xlu1 %v649_v29 }
 0x18e   :  { %644 = vadd.xlane.f32.xlu0 %v643_v30 }
 0x216   :  { %v648_v31 = vpop.xlane.xlu1 %647 }
 0x217   :  { %v655_v32 = vmul.f32 0.015625, %v648_v31  ;;  %v642_v33 = vpop.xlane.xlu0 %641 }
 0x218   :  { %v653_v34 = vmul.f32 0.015625, %v642_v33 }
 0x219   :  { %v659_v35 = vsub.f32 %v633_v20, %v655_v32 }
 0x21a   :  { %v657_v36 = vsub.f32 %v625_v22, %v653_v34  ;;  %v651_v37 = vpop.xlane.xlu1 %650  ;;  %v718_v22 = vld [vmem:[#allocation11 + $0x18] sm:$0xff] }
 0x21b   :  { %v656_v38 = vmul.f32 0.015625, %v651_v37  ;;  %v645_v39 = vpop.xlane.xlu0 %644  ;;  %v663_v45 = vmul.f32 %v659_v35, %v659_v35 }
 0x21c   :  { %v654_v40 = vmul.f32 0.015625, %v645_v39  ;;  %v661_v41 = vmul.f32 %v657_v36, %v657_v36 }
 0x21d   :  { %v660_v42 = vsub.f32 %v636_v24, %v656_v38  ;;  %v671_v47 = vsel %vm639_vm0, %v663_v45, 0.0 }
 0x21e   :  { %v658_v43 = vsub.f32 %v628_v27, %v654_v40  ;;  %v665_v44 = vsel %vm639_vm0, %v661_v41, 0.0 }
 0x21f   :  { %666 = vadd.xlane.f32.xlu0 %v665_v44  ;;  %v664_v49 = vmul.f32 %v660_v42, %v660_v42 }
 0x220   :  { %v662_v46 = vmul.f32 %v658_v43, %v658_v43 }
 0x221   :  { %v674_v50 = vsel %vm639_vm0, %v664_v49, 0.0 }
 0x222   :  { %v668_v48 = vsel %vm639_vm0, %v662_v46, 0.0 }
 0x223   :  { %672 = vadd.xlane.f32.xlu0 %v671_v47  ;;  %669 = vadd.xlane.f32.xlu1 %v668_v48 }
 0x227   :  { %675 = vadd.xlane.f32.xlu1 %v674_v50 }
 0x2ac   :  { %v667_v51 = vpop.xlane.xlu0 %666 }
 0x2ad   :  { %v677_v52 = vmul.f32 0.015625, %v667_v51 }
 0x2af   :  { %v681_v53 = vadd.f32 1e-06, %v677_v52 }
 0x2b0   :  { %v670_v54 = vpop.xlane.xlu1 %669  ;;  %v673_v55 = vpop.xlane.xlu0 %672 }
 0x2b1   :  { %978 = vrsqrt.f32 %v681_v53  ;;  %v678_v56 = vmul.f32 0.015625, %v670_v54  ;;  %v679_v57 = vmul.f32 0.015625, %v673_v55 }
 0x2b3   :  { %v682_v58 = vadd.f32 1e-06, %v678_v56  ;;  %v683_v59 = vadd.f32 1e-06, %v679_v57 }
 0x2b4   :  { %v676_v60 = vpop.xlane.xlu1 %675 }
 0x2b5   :  { %980 = vrsqrt.f32 %v682_v58  ;;  %v680_v61 = vmul.f32 0.015625, %v676_v60 }
 0x2b6   :  { %982 = vrsqrt.f32 %v683_v59 }
 0x2b7   :  { %v684_v62 = vadd.f32 1e-06, %v680_v61 }
 0x2b9   :  { %984 = vrsqrt.f32 %v684_v62 }
 0x2bb   :  { %v979_v63 = vpop.eup %978 }
 0x2bc   :  { %v689_v1 = vmul.f32 %v979_v63, %v657_v36 }
 0x2be   :  { %v700_v3 = vmul.f32 %v815_v0, %v689_v1 }
 0x2bf   :  { %v981_v4 = vpop.eup %980 }
 0x2c0   :  { %v983_v6 = vpop.eup %982  ;;  %v690_v7 = vmul.f32 %v981_v4, %v658_v43  ;;  %v711_v8 = vadd.f32 %v816_v2, %v700_v3 }
 0x2c1   :  { %v691_v9 = vmul.f32 %v983_v6, %v659_v35 }
 0x2c2   :  { %v701_v10 = vmul.f32 %v815_v0, %v690_v7  ;;  %v719_v11 = vadd.f32 %v715_v5, %v711_v8 }
 0x2c3   :  { %v985_v12 = vpop.eup %984  ;;  %v702_v13 = vmul.f32 %v815_v0, %v691_v9 }
 0x2c4   :  { %v692_v15 = vmul.f32 %v985_v12, %v660_v42  ;;  %v712_v16 = vadd.f32 %v816_v2, %v701_v10  ;;  %v821_v18 = vpack.c.bf16 %v719_v11, %v719_v11 }
 0x2c5   :  { %v713_v19 = vadd.f32 %v816_v2, %v702_v13 }
 0x2c6   :  { %v703_v20 = vmul.f32 %v815_v0, %v692_v15  ;;  %v720_v21 = vadd.f32 %v716_v14, %v712_v16  ;;  %740 = vst.msk [vmem:[#allocation13] sm:$0xf] %vm739_vm1, %v821_v18 }
 0x2c7   :  { %v721_v23 = vadd.f32 %v717_v17, %v713_v19 }
 0x2c8   :  { %v714_v24 = vadd.f32 %v816_v2, %v703_v20  ;;  %v822_v25 = vpack.c.bf16 %v720_v21, %v720_v21 }
 0x2c9   :  { %v823_v26 = vpack.c.bf16 %v721_v23, %v721_v23 }
 0x2ca   :  { %v722_v27 = vadd.f32 %v718_v22, %v714_v24  ;;  %741 = vst.msk [vmem:[#allocation13 + $0x4] sm:$0xf] %vm739_vm1, %v822_v25 }
 0x2cb   :  { %742 = vst.msk [vmem:[#allocation13 + $0x8] sm:$0xf] %vm739_vm1, %v823_v26 }
 0x2cc   :  { %v824_v28 = vpack.c.bf16 %v722_v27, %v722_v27 }
 0x2ce   :  { %743 = vst.msk [vmem:[#allocation13 + $0xc] sm:$0xf] %vm739_vm1, %v824_v28 }
 0x2cf   :  { %1129 = shalt.err (!%p1126_p10)
}
 0x2d0   :  { %s1130_s29 = scalar_lea.hbm %s1306_s6, 256 }
 0x2d1   :  { %p1131_p11 = scmp.ne.s32.totalorder %s1306_s6, %s1130_s29  ;;  %p1134_p12 = scmp.lt.u32.totalorder %s1130_s29, %s1306_s6 }
 0x2d3   :  { %p1136_p13 = pnand %p1134_p12, %p1131_p11 }
 0x2d5   :  { %1139 = shalt.err (!%p1136_p13)
}
 0x2d6   :  { %755 = dma.vmem_to_hbm [thread:$0]  %s750_s25, 256, %s1306_s6, [#allocation4], %s1151_s7, %s1151_s7, %s1152_s8  }
 0x2d7   :  { %1148 = dma.done.wait [#allocation4], 256  }
 0x2d8   :  { %1149 = vsyncadd [#allocation4], 4294967040 }
 0x2d9   :  { %759 = vsyncpa [#allocation3], 1 }
 0x2da   :  { %760 = vsyncpa [#allocation6], 1 }
 0x2db   :  { %761 = vsyncpa [#allocation9], 1 }
 0x2dc   :  { %762 = vsyncpa [#allocation12], 1 }
 0x2dd   :  { %763 = vsyncpa [#allocation4], 1 }

// kernel: _lambda_.3
= control target key start
LH: loop header
LB: loop body
LE: loop exit
PB: predicated region body
PF: predicated region fallthrough
CT: control target
= control target key end

     0   :  { %s12506_s0 = inlined_call_operand.hbm [shape: bf16[2,16,64], index: 0, kind: input, shape index: {}]   ;;  %s12507_s1 = inlined_call_operand.hbm [shape: f32[2,128,64], index: 1, kind: input, shape index: {}]   ;;  %s12508_s2 = inlined_call_operand.hbm [shape: f32[2,1,128], index: 2, kind: input, shape index: {}]   ;;  %s12509_s3 = inlined_call_operand.hbm [shape: bf16[64,64], index: 3, kind: input, shape index: {}]   ;;  %s12510_s4 = inlined_call_operand.hbm [shape: f32[1,64], index: 4, kind: input, shape index: {}]   ;;  %s12511_s5 = inlined_call_operand.<no memory space> [shape: f32[1,1], index: 5, kind: input, shape index: {}]   ;;  %s12512_s6 = inlined_call_operand.hbm [shape: bf16[64,2], index: 6, kind: input, shape index: {}]   ;;  %s12513_s7 = inlined_call_operand.hbm [shape: f32[1,2], index: 7, kind: input, shape index: {}]   ;;  %s12514_s8 = inlined_call_operand.hbm [shape: bf16[64,2048], index: 8, kind: input, shape index: {}]   ;;  %s12515_s9 = inlined_call_operand.hbm [shape: f32[1,2048], index: 9, kind: input, shape index: {}]   ;;  %s12516_s10 = inlined_call_operand.hbm [shape: bf16[2048,128], index: 10, kind: input, shape index: {}]   ;;  %s12517_s11 = inlined_call_operand.hbm [shape: f32[1,128], index: 11, kind: input, shape index: {}]   ;;  %s12518_s12 = inlined_call_operand.hbm [shape: f32[2,16,256], index: 12, kind: output, shape index: {}]  }
   0x1   :  { %12565 = sst [smem:[#allocation52_spill]] %s12506_s0  ;;  %v17_v0 = vstv %s12511_s5 }
   0x2   :  { %12566 = sst [smem:[#allocation53_spill]] %s12507_s1  ;;  %18 = vst [vmem:[#allocation2] sm:$0x1] %v17_v0 }
   0x3   :  { %12567 = sst [smem:[#allocation54_spill]] %s12508_s2 }
   0x4   :  { %12568 = sst [smem:[#allocation55_spill]] %s12509_s3 }
   0x5   :  { %12569 = sst [smem:[#allocation56_spill]] %s12510_s4 }
   0x6   :  { %12570 = sst [smem:[#allocation57_spill]] %s12512_s6 }
   0x7   :  { %12571 = sst [smem:[#allocation58_spill]] %s12513_s7 }
   0x8   :  { %12572 = sst [smem:[#allocation59_spill]] %s12514_s8 }
   0x9   :  { %12573 = sst [smem:[#allocation60_spill]] %s12516_s10 }
   0xa   :  { %12574 = sst [smem:[#allocation61_spill]] %s12518_s12 }
   0xb   :  { %19 = vsyncpa [#allocation4], 0 }
   0xc   :  { %21 = vsyncpa [#allocation4 + $0x1], 0 }
   0xd   :  { %22 = vsyncpa [#allocation7], 0 }
   0xe   :  { %24 = vsyncpa [#allocation7 + $0x1], 0 }
   0xf   :  { %25 = vsyncpa [#allocation10], 0 }
  0x10   :  { %26 = vsyncpa [#allocation13], 0 }
  0x11   :  { %27 = vsyncpa [#allocation16], 0 }
  0x12   :  { %28 = vsyncpa [#allocation19], 0 }
  0x13   :  { %29 = vsyncpa [#allocation5], 0 }
  0x14   :  { %31 = vsyncpa [#allocation5 + $0x1], 0  ;;  %s9078_s23 = smov 0   ;;  %s9080_s24 = smov 0  }
  0x15   :  { %s9082_s25 = smov 0   ;;  %s9084_s26 = smov 0  }
  0x16   :  { %s9086_s5 = smov 0   ;;  %s9088_s27 = smov 0  }
  0x17 LB: > { %12575 = sst [smem:[#allocation29_spill]] %s8972_s25  ;;  %s9109_s28 = sadd.s32 4294967295, %s8984_s27   ;;  %s8984_s27 = sphi %s9088_s27, %s37_s27   ;;  %s8980_s5 = sphi %s9086_s5, %s12708_s5   ;;  %s8976_s26 = sphi %s9084_s26, %s12707_s26   ;;  %s8972_s25 = sphi %s9082_s25, %s12703_s25   ;;  %s8968_s24 = sphi %s9080_s24, %s12706_s24   ;;  %s8964_s23 = sphi %s9078_s23, %s12705_s23  }
  0x18   : > { %12576 = sst [smem:[#allocation30_spill]] %s8976_s26  ;;  %p7155_p0 = scmp.ge.s32.totalorder %s8984_s27, 1 }
  0x19   : > { %12577 = sst [smem:[#allocation31_spill]] %s8984_s27  ;;  %p12523_p1 = scmp.eq.s32.totalorder %s9109_s28, 0 }
  0x1a   : > { %p351_p2 = scmp.lt.s32.totalorder %s8984_s27, 3  ;;  %s8986_s30 = smov [#allocation9]  }
  0x1b   : > { %s363_s13 = sshll.u32 %s8986_s30, 4  ;;  %s8987_s15 = smov [#allocation12]   ;;  %s9118_s13 = int_to_ptr.vmem [resolvable:$true] %s363_s13 }
  0x1c   : > { %p9114_p3 = pnand %p7155_p0, %p351_p2  ;;  %s390_s16 = sshll.u32 %s8987_s15, 4  ;;  %s9129_s16 = int_to_ptr.vmem [resolvable:$true] %s390_s16 }
  0x1d   : > { %s8988_s17 = smov [#allocation15]   ;;  %s12581_s3 = sld [smem:[#allocation55_spill]] }
  0x1e   : > { %s12578_s29 = scalar_select %p9114_p3, 1, 0 }
  0x1f   : > { %p7659_p4 = pneg %p9114_p3  ;;  %s9131_s18 = sshll.u32 %s8988_s17, 4  ;;  %s415_s18 = int_to_ptr.vmem [resolvable:$true] %s9131_s18 }
  0x20   : > { %12579 = sst [smem:[#allocation32_spill]] %s12578_s29 }
  0x21   : > { %p9125_p6 = pnand %p7659_p4, %p12523_p1 }
  0x23   : > { %s12580_s14 = scalar_select %p9125_p6, 1, 0 }
  0x24   : > { %s8568_s21 = scalar_lea.hbm %s12581_s3, 512  ;;  %p9141_p8 = pneg %p9125_p6 }
  0x25   : > { %p8569_p7 = scmp.ne.s32.totalorder %s12581_s3, %s8568_s21  ;;  %p8575_p11 = scmp.lt.u32.totalorder %s8568_s21, %s12581_s3 }
  0x26   : > { %s12582_s12 = scalar_select %p9141_p8, 1, 0 }
  0x27   : > { %p8571_p9 = pnand %p9141_p8, %p8569_p7 }
  0x29   : > { %p8572_p10 = pneg %p8571_p9 }
  0x2b   : > { %p8577_p12 = pnand %p8575_p11, %p8572_p10 }
  0x2d   : > { %8580 = shalt.err (!%p8577_p12)
}
  0x2e   : > { %s8581_s19 = scalar_lea.vmem %s9118_s13, 512  ;;  %p8589_p4 = scmp.lt.s32.totalorder %s9118_s13, %s9118_s13 }
  0x2f   : > { %p8582_p13 = scmp.ne.s32.totalorder %s9118_s13, %s8581_s19  ;;  %p8590_p5 = scmp.lt.s32.totalorder %s8581_s19, %s8581_s19 }
  0x31   : > { %p8584_p0 = pnand %p8582_p13, %p9141_p8  ;;  %p8591_p7 = por %p8590_p5, %p8589_p4 }
  0x33   : > { %p8585_p2 = pneg %p8584_p0 }
  0x35   : > { %p8592_p9 = pnand %p8591_p7, %p8585_p2 }
  0x37   : > { %8595 = shalt.err (!%p8592_p9)
}
  0x38   : > { %s12527_s20 = smov 64   ;;  %s12525_s21 = smov 4  }
  0x39   : > { %7662 = dma.hbm_to_vmem [thread:$0]  (!%p9125_p6), %s12581_s3, 512, %s9118_s13, [#allocation10], %s12527_s20, %s12527_s20, %s12525_s21  }
  0x3a   : > { %s12583_s6 = sld [smem:[#allocation57_spill]] }
  0x40   : > { %s8596_s19 = scalar_lea.hbm %s12583_s6, 512 }
  0x41   : > { %p8597_p5 = scmp.ne.s32.totalorder %s12583_s6, %s8596_s19  ;;  %p8603_p12 = scmp.lt.u32.totalorder %s8596_s19, %s12583_s6 }
  0x43   : > { %p8599_p10 = pnand %p8597_p5, %p9141_p8 }
  0x45   : > { %p8600_p11 = pneg %p8599_p10 }
  0x47   : > { %p8605_p13 = pnand %p8603_p12, %p8600_p11 }
  0x49   : > { %8608 = shalt.err (!%p8605_p13)
}
  0x4a   : > { %s8609_s13 = scalar_lea.vmem %s9129_s16, 512  ;;  %p8617_p7 = scmp.lt.s32.totalorder %s9129_s16, %s9129_s16 }
  0x4b   : > { %p8610_p0 = scmp.ne.s32.totalorder %s9129_s16, %s8609_s13  ;;  %p8618_p9 = scmp.lt.s32.totalorder %s8609_s13, %s8609_s13 }
  0x4d   : > { %p8612_p2 = pnand %p8610_p0, %p9141_p8  ;;  %p8619_p5 = por %p8618_p9, %p8617_p7 }
  0x4f   : > { %p8613_p4 = pneg %p8612_p2 }
  0x51   : > { %p8620_p10 = pnand %p8619_p5, %p8613_p4 }
  0x53   : > { %8623 = shalt.err (!%p8620_p10)
}
  0x54   : > { %7668 = dma.hbm_to_vmem [thread:$0]  (!%p9125_p6), %s12583_s6, 512, %s9129_s16, [#allocation13], %s12527_s20, %s12527_s20, %s12525_s21  }
  0x55   : > { %s12584_s8 = sld [smem:[#allocation59_spill]] }
  0x5b   : > { %s8624_s22 = scalar_lea.hbm %s12584_s8, 8192 }
  0x5c   : > { %p8625_p11 = scmp.ne.s32.totalorder %s12584_s8, %s8624_s22  ;;  %p8631_p0 = scmp.lt.u32.totalorder %s8624_s22, %s12584_s8 }
  0x5e   : > { %p8627_p12 = pnand %p8625_p11, %p9141_p8 }
  0x60   : > { %p8628_p13 = pneg %p8627_p12 }
  0x62   : > { %p8633_p2 = pnand %p8631_p0, %p8628_p13 }
  0x64   : > { %8636 = shalt.err (!%p8633_p2)
}
  0x65   : > { %s8637_s13 = scalar_lea.vmem %s415_s18, 8192  ;;  %p8645_p5 = scmp.lt.s32.totalorder %s415_s18, %s415_s18 }
  0x66   : > { %p8638_p4 = scmp.ne.s32.totalorder %s415_s18, %s8637_s13  ;;  %p8646_p10 = scmp.lt.s32.totalorder %s8637_s13, %s8637_s13 }
  0x68   : > { %p8640_p7 = pnand %p8638_p4, %p9141_p8  ;;  %p8647_p1 = por %p8646_p10, %p8645_p5 }
  0x6a   : > { %p8641_p9 = pneg %p8640_p7 }
  0x6c   : > { %p8648_p3 = pnand %p8647_p1, %p8641_p9 }
  0x6e   : > { %8651 = shalt.err (!%p8648_p3)
}
  0x6f   : > { %s8991_s16 = smov 1024   ;;  %s8992_s26 = smov [#allocation18]  }
  0x70   : > { %7674 = dma.hbm_to_vmem [thread:$0]  (!%p9125_p6), %s12584_s8, 8192, %s415_s18, [#allocation16], %s8991_s16, %s8991_s16, %s12527_s20  }
  0x71   : > { %s438_s29 = sshll.u32 %s8992_s26, 4  ;;  %s12585_s10 = sld [smem:[#allocation60_spill]]  ;;  %s439_s29 = int_to_ptr.vmem [resolvable:$true] %s438_s29 }
  0x77   : > { %s8652_s15 = scalar_lea.hbm %s12585_s10, 16384 }
  0x78   : > { %p8653_p1 = scmp.ne.s32.totalorder %s12585_s10, %s8652_s15  ;;  %p8659_p12 = scmp.lt.u32.totalorder %s8652_s15, %s12585_s10 }
  0x7a   : > { %p8655_p3 = pnand %p8653_p1, %p9141_p8 }
  0x7c   : > { %p8656_p11 = pneg %p8655_p3 }
  0x7e   : > { %p8661_p13 = pnand %p8659_p12, %p8656_p11 }
  0x80   : > { %8664 = shalt.err (!%p8661_p13)
}
  0x81   : > { %s8665_s18 = scalar_lea.vmem %s439_s29, 16384  ;;  %p8673_p7 = scmp.lt.s32.totalorder %s439_s29, %s439_s29 }
  0x82   : > { %p8666_p0 = scmp.ne.s32.totalorder %s439_s29, %s8665_s18  ;;  %p8674_p9 = scmp.lt.s32.totalorder %s8665_s18, %s8665_s18 }
  0x84   : > { %p8668_p2 = pnand %p8666_p0, %p9141_p8  ;;  %p8675_p5 = por %p8674_p9, %p8673_p7 }
  0x86   : > { %p8669_p4 = pneg %p8668_p2 }
  0x88   : > { %p8676_p10 = pnand %p8675_p5, %p8669_p4 }
  0x8a   : > { %8679 = shalt.err (!%p8676_p10)
}
  0x8b   : > { %s12586_s16 = smov 4   ;;  %s7154_s2 = sadd.s32 4294967294, %s8984_s27  }
  0x8c   : > { %7680 = dma.hbm_to_vmem [thread:$0]  (!%p9125_p6), %s12585_s10, 16384, %s439_s29, [#allocation19], %s12527_s20, %s12527_s20, %s12586_s16  }
  0x8d   : > { %s49_s26 = sadd.s32 1, %s8980_s5  ;;  %s58_s22 = sadd.s32 1, %s8972_s25 }
  0x8e   : > { %p51_p1 = scmp.ge.s32.totalorder %s49_s26, 2  ;;  %p65_p3 = scmp.ne.s32.totalorder %s8972_s25, %s8968_s24 }
  0x8f   : > { %p66_p11 = scmp.eq.s32.totalorder %s8984_s27, 0  ;;  %p71_p12 = scmp.ne.s32.totalorder %s8968_s24, %s8964_s23 }
  0x90   : > { %s12710_s26 = smov (%p51_p1, %s49_s26), 0  ;;  %p12588_p0 = scmp.eq.s32.totalorder %s9109_s28, 0 }
  0x91   : > { %12587 = sst [smem:[#allocation33_spill]] %s12710_s26  ;;  %p67_p13 = por %p66_p11, %p65_p3 }
  0x92   : > { %p9244_p2 = por %p12588_p0, %p71_p12  ;;  %s53_s29 = ssub.s32 %s8980_s5, %s12710_s26 }
  0x93   : > { %p338_p4 = scmp.eq.s32.totalorder %s9109_s28, 1  ;;  %p56_p7 = scmp.eq.s32.totalorder %s53_s29, 0 }
  0x94   : > { %s12589_s30 = scalar_select %p9244_p2, 1, 0 }
  0x95   : > { %p344_p9 = scmp.eq.s32.totalorder %s7154_s2, 1  ;;  %p9251_p5 = por %p338_p4, %p65_p3 }
  0x96   : > { %p7706_p10 = scmp.lt.s32.totalorder %s8984_s27, 2  ;;  %s9264_s13 = sand.u32 1, %s8972_s25  }
  0x97   : > { %s12590_s15 = scalar_select %p9251_p5, 1, 0 }
  0x98   : > { %s9257_s17 = scalar_select %p56_p7, %s8972_s25, %s58_s22  }
  0x99   : > { %p9259_p1 = por %p344_p9, %p71_p12  ;;  %p9266_p11 = pnand %p7706_p10, %p67_p13 }
  0x9a   : > { %12591 = sst [smem:[#allocation34_spill]] %s9257_s17  ;;  %s486_s21 = sand.u32 1, %s8984_s27  }
  0x9b   : > { %s12592_s19 = scalar_select %p9259_p1, 1, 0 }
  0x9c   : > { %s12594_s18 = scalar_select %p9266_p11, 1, 0 }
  0x9d   : > { %12593 = sst [smem:[#allocation35_spill]] %s12592_s19  ;;  %s7168_s0 = sshll.u32 %s9264_s13, 7 }
  0x9e   : > { %s7407_s2 = sshll.u32 %s8980_s5, 11  ;;  %s490_s29 = scalar_lea.vmem [#allocation6], %s7168_s0 }
  0x9f   : > { %s497_s20 = sshll.u32 %s490_s29, 4  ;;  %s12595_s1 = sld [smem:[#allocation53_spill]]  ;;  %s9278_s20 = int_to_ptr.vmem [resolvable:$true] %s497_s20 }
  0xa0   : > { %s9280_s8 = scalar_lea.sflag [#allocation7], %s486_s21  ;;  %p9286_p12 = pneg %p9266_p11 }
  0xa2   : > { %s12596_s26 = scalar_select %p9286_p12, 1, 0 }
  0xa5   : > { %s9276_s6 = scalar_lea.hbm %s12595_s1, %s7407_s2  ;;  %s8685_s2 = scalar_lea.hbm %s12595_s1, 4096 }
  0xa6   : > { %s8680_s10 = scalar_lea.hbm %s9276_s6, 2048  ;;  %p8686_p4 = scmp.lt.u32.totalorder %s9276_s6, %s12595_s1 }
  0xa7   : > { %p8681_p3 = scmp.ne.s32.totalorder %s9276_s6, %s8680_s10  ;;  %p8687_p7 = scmp.lt.u32.totalorder %s8685_s2, %s8680_s10 }
  0xa8   : > { %p8689_p10 = scmp.lt.u32.totalorder %s8680_s10, %s9276_s6 }
  0xa9   : > { %p8683_p13 = pnand %p9286_p12, %p8681_p3  ;;  %p8688_p9 = por %p8687_p7, %p8686_p4 }
  0xab   : > { %p8684_p0 = pneg %p8683_p13  ;;  %p8690_p1 = por %p8689_p10, %p8688_p9 }
  0xad   : > { %p8691_p5 = pnand %p8690_p1, %p8684_p0 }
  0xaf   : > { %8694 = shalt.err (!%p8691_p5)
}
  0xb0   : > { %s8695_s21 = scalar_lea.vmem %s9278_s20, 2048  ;;  %s8993_s3 = smov [#allocation6]  }
  0xb1   : > { %p8696_p3 = scmp.ne.s32.totalorder %s9278_s20, %s8695_s21  ;;  %s8700_s0 = sshll.u32 %s8993_s3, 4  ;;  %s8701_s0 = int_to_ptr.vmem [resolvable:$false] %s8700_s0 }
  0xb2   : > { %s8702_s29 = scalar_lea.vmem %s8701_s0, 4096  ;;  %p8703_p6 = scmp.lt.s32.totalorder %s9278_s20, %s8701_s0 }
  0xb3   : > { %p8698_p13 = pnand %p8696_p3, %p9286_p12  ;;  %p8704_p8 = scmp.lt.s32.totalorder %s8702_s29, %s8695_s21 }
  0xb5   : > { %p8699_p2 = pneg %p8698_p13  ;;  %p8705_p4 = por %p8704_p8, %p8703_p6 }
  0xb7   : > { %p8706_p7 = pnand %p8705_p4, %p8699_p2 }
  0xb9   : > { %8709 = shalt.err (!%p8706_p7)
}
  0xba   : > { %s8994_s10 = smov 128   ;;  %s8995_s2 = smov 8  }
  0xbb   : > { %7690 = dma.hbm_to_vmem [thread:$0]  (!%p9266_p11), %s9276_s6, 2048, %s9278_s20, %s9280_s8, %s8994_s10, %s8994_s10, %s8995_s2  }
  0xbc   : > { %s8996_s22 = smov [#allocation11]   ;;  %s8997_s17 = smov [#allocation14]  }
  0xbd   : > { %s377_s1 = sshll.u32 %s8996_s22, 4  ;;  %s404_s3 = sshll.u32 %s8997_s17, 4  ;;  %s378_s1 = int_to_ptr.vmem [resolvable:$true] %s377_s1  ;;  %s9310_s3 = int_to_ptr.vmem [resolvable:$true] %s404_s3 }
  0xbe   : > { %s12597_s4 = sld [smem:[#allocation56_spill]]  ;;  %p12598_p8 = scmp.ne.s32.totalorder %s12582_s12, 0 }
  0xc4   : > { %s8710_s29 = scalar_lea.hbm %s12597_s4, 16 }
  0xc5   : > { %p8711_p6 = scmp.ne.s32.totalorder %s12597_s4, %s8710_s29  ;;  %p8717_p1 = scmp.lt.u32.totalorder %s8710_s29, %s12597_s4 }
  0xc7   : > { %p8713_p2 = pnand %p8711_p6, %p12598_p8 }
  0xc9   : > { %p8714_p5 = pneg %p8713_p2 }
  0xcb   : > { %p8719_p0 = pnand %p8717_p1, %p8714_p5 }
  0xcd   : > { %8722 = shalt.err (!%p8719_p0)
}
  0xce   : > { %s8723_s20 = scalar_lea.vmem %s378_s1, 16  ;;  %s8730_s17 = scalar_lea.vmem %s378_s1, 32 }
  0xcf   : > { %p8724_p9 = scmp.ne.s32.totalorder %s378_s1, %s8723_s20  ;;  %p8731_p13 = scmp.lt.s32.totalorder %s378_s1, %s378_s1 }
  0xd0   : > { %p8732_p4 = scmp.lt.s32.totalorder %s8730_s17, %s8723_s20 }
  0xd1   : > { %p8726_p10 = pnand %p8724_p9, %p12598_p8 }
  0xd2   : > { %p8733_p7 = por %p8732_p4, %p8731_p13 }
  0xd3   : > { %p8727_p3 = pneg %p8726_p10 }
  0xd5   : > { %p8734_p11 = pnand %p8733_p7, %p8727_p3 }
  0xd7   : > { %8737 = shalt.err (!%p8734_p11)
}
  0xd8   : > { %p12599_p6 = scmp.ne.s32.totalorder %s12580_s14, 0  ;;  %s12600_s7 = sld [smem:[#allocation58_spill]] }
  0xda   : > { %7665 = dma.hbm_to_vmem [thread:$0]  (!%p12599_p6), %s12597_s4, 16, %s378_s1, [#allocation10]  }
  0xde   : > { %s8738_s2 = scalar_lea.hbm %s12600_s7, 16 }
  0xdf   : > { %p8739_p2 = scmp.ne.s32.totalorder %s12600_s7, %s8738_s2  ;;  %p8745_p11 = scmp.lt.u32.totalorder %s8738_s2, %s12600_s7 }
  0xe1   : > { %p8741_p5 = pnand %p8739_p2, %p12598_p8 }
  0xe3   : > { %p8742_p1 = pneg %p8741_p5 }
  0xe5   : > { %p8747_p0 = pnand %p8745_p11, %p8742_p1 }
  0xe7   : > { %8750 = shalt.err (!%p8747_p0)
}
  0xe8   : > { %s8751_s1 = scalar_lea.vmem %s9310_s3, 16  ;;  %s8758_s6 = scalar_lea.vmem %s9310_s3, 32 }
  0xe9   : > { %p8752_p9 = scmp.ne.s32.totalorder %s9310_s3, %s8751_s1  ;;  %p8759_p13 = scmp.lt.s32.totalorder %s9310_s3, %s9310_s3 }
  0xea   : > { %p8760_p4 = scmp.lt.s32.totalorder %s8758_s6, %s8751_s1 }
  0xeb   : > { %p8754_p10 = pnand %p8752_p9, %p12598_p8 }
  0xec   : > { %p8761_p7 = por %p8760_p4, %p8759_p13 }
  0xed   : > { %p8755_p3 = pneg %p8754_p10 }
  0xef   : > { %p8762_p2 = pnand %p8761_p7, %p8755_p3 }
  0xf1   : > { %8765 = shalt.err (!%p8762_p2)
}
  0xf2   : > { %7671 = dma.hbm_to_vmem [thread:$0]  (!%p12599_p6), %s12600_s7, 16, %s9310_s3, [#allocation13]  }
  0xf3   : > { %s8998_s25 = smov [#allocation17]   ;;  %s8999_s19 = smov [#allocation20]  }
  0xf4   : > { %s428_s27 = sshll.u32 %s8998_s25, 4  ;;  %s452_s10 = sshll.u32 %s8999_s19, 4  ;;  %s429_s27 = int_to_ptr.vmem [resolvable:$true] %s428_s27  ;;  %s9354_s10 = int_to_ptr.vmem [resolvable:$true] %s452_s10 }
  0xf5   : > { %s8766_s21 = scalar_lea.hbm %s12515_s9, 256 }
  0xf6   : > { %p8767_p5 = scmp.ne.s32.totalorder %s12515_s9, %s8766_s21  ;;  %p8773_p0 = scmp.lt.u32.totalorder %s8766_s21, %s12515_s9 }
  0xf8   : > { %p8769_p1 = pnand %p8767_p5, %p12598_p8 }
  0xfa   : > { %p8770_p11 = pneg %p8769_p1 }
  0xfc   : > { %p8775_p9 = pnand %p8773_p0, %p8770_p11 }
  0xfe   : > { %8778 = shalt.err (!%p8775_p9)
}
  0xff   : > { %s8779_s6 = scalar_lea.vmem %s429_s27, 256  ;;  %p8787_p4 = scmp.lt.s32.totalorder %s429_s27, %s429_s27 }
 0x100   : > { %p8780_p10 = scmp.ne.s32.totalorder %s429_s27, %s8779_s6  ;;  %p8788_p7 = scmp.lt.s32.totalorder %s8779_s6, %s8779_s6 }
 0x102   : > { %p8782_p3 = pnand %p8780_p10, %p12598_p8  ;;  %p8789_p2 = por %p8788_p7, %p8787_p4 }
 0x104   : > { %p8783_p13 = pneg %p8782_p3 }
 0x106   : > { %p8790_p12 = pnand %p8789_p2, %p8783_p13 }
 0x108   : > { %8793 = shalt.err (!%p8790_p12)
}
 0x109   : > { %7677 = dma.hbm_to_vmem [thread:$0]  (!%p12599_p6), %s12515_s9, 256, %s429_s27, [#allocation16]  }
 0x10a   : > { %s8794_s2 = scalar_lea.hbm %s12517_s11, 16 }
 0x10b   : > { %p8795_p5 = scmp.ne.s32.totalorder %s12517_s11, %s8794_s2  ;;  %p8801_p12 = scmp.lt.u32.totalorder %s8794_s2, %s12517_s11 }
 0x10d   : > { %p8797_p1 = pnand %p8795_p5, %p12598_p8 }
 0x10f   : > { %p8798_p11 = pneg %p8797_p1 }
 0x111   : > { %p8803_p0 = pnand %p8801_p12, %p8798_p11 }
 0x113   : > { %8806 = shalt.err (!%p8803_p0)
}
 0x114   : > { %s8807_s27 = scalar_lea.vmem %s9354_s10, 16  ;;  %s8814_s1 = scalar_lea.vmem %s9354_s10, 32 }
 0x115   : > { %p8808_p9 = scmp.ne.s32.totalorder %s9354_s10, %s8807_s27  ;;  %p8815_p13 = scmp.lt.s32.totalorder %s9354_s10, %s9354_s10 }
 0x116   : > { %p8816_p4 = scmp.lt.s32.totalorder %s8814_s1, %s8807_s27 }
 0x117   : > { %p8810_p10 = pnand %p8808_p9, %p12598_p8 }
 0x118   : > { %p8817_p7 = por %p8816_p4, %p8815_p13 }
 0x119   : > { %p8811_p3 = pneg %p8810_p10 }
 0x11b   : > { %p8818_p2 = pnand %p8817_p7, %p8811_p3 }
 0x11d   : > { %8821 = shalt.err (!%p8818_p2)
}
 0x11e   : > { %7683 = dma.hbm_to_vmem [thread:$0]  (!%p12599_p6), %s12517_s11, 16, %s9354_s10, [#allocation19]  }
 0x11f   : > { %s7165_s12 = sshll.u32 %s9264_s13, 3  ;;  %s7406_s20 = sshll.u32 %s8980_s5, 7 }
 0x120   : > { %s12601_s19 = sld [smem:[#allocation52_spill]]  ;;  %s467_s14 = scalar_lea.vmem [#allocation3], %s7165_s12 }
 0x121   : > { %s476_s22 = sshll.u32 %s467_s14, 4  ;;  %s464_s21 = scalar_lea.sflag [#allocation4], %s9264_s13  ;;  %s9405_s22 = int_to_ptr.vmem [resolvable:$true] %s476_s22 }
 0x122   : > { %p12602_p5 = scmp.ne.s32.totalorder %s12596_s26, 0 }
 0x126   : > { %s9403_s2 = scalar_lea.hbm %s12601_s19, %s7406_s20  ;;  %s8827_s27 = scalar_lea.hbm %s12601_s19, 256 }
 0x127   : > { %s8822_s0 = scalar_lea.hbm %s9403_s2, 128  ;;  %p8828_p11 = scmp.lt.u32.totalorder %s9403_s2, %s12601_s19 }
 0x128   : > { %p8823_p8 = scmp.ne.s32.totalorder %s9403_s2, %s8822_s0  ;;  %p8829_p12 = scmp.lt.u32.totalorder %s8827_s27, %s8822_s0 }
 0x129   : > { %p8831_p9 = scmp.lt.u32.totalorder %s8822_s0, %s9403_s2 }
 0x12a   : > { %p8825_p6 = pnand %p8823_p8, %p12602_p5  ;;  %p8830_p0 = por %p8829_p12, %p8828_p11 }
 0x12c   : > { %p8826_p1 = pneg %p8825_p6  ;;  %p8832_p10 = por %p8831_p9, %p8830_p0 }
 0x12e   : > { %p8833_p3 = pnand %p8832_p10, %p8826_p1 }
 0x130   : > { %8836 = shalt.err (!%p8833_p3)
}
 0x131   : > { %s8837_s6 = scalar_lea.vmem %s9405_s22, 128  ;;  %s9000_s12 = smov [#allocation3]  }
 0x132   : > { %p8838_p13 = scmp.ne.s32.totalorder %s9405_s22, %s8837_s6  ;;  %s8842_s20 = sshll.u32 %s9000_s12, 4  ;;  %s8843_s20 = int_to_ptr.vmem [resolvable:$false] %s8842_s20 }
 0x133   : > { %s8844_s17 = scalar_lea.vmem %s8843_s20, 256  ;;  %p8845_p2 = scmp.lt.s32.totalorder %s9405_s22, %s8843_s20 }
 0x134   : > { %p8840_p4 = pnand %p8838_p13, %p12602_p5  ;;  %p8846_p8 = scmp.lt.s32.totalorder %s8844_s17, %s8837_s6 }
 0x136   : > { %p8841_p7 = pneg %p8840_p4  ;;  %p8847_p6 = por %p8846_p8, %p8845_p2 }
 0x138   : > { %p8848_p11 = pnand %p8847_p6, %p8841_p7 }
 0x13a   : > { %8851 = shalt.err (!%p8848_p11)
}
 0x13b   : > { %p12603_p1 = scmp.ne.s32.totalorder %s12594_s18, 0  ;;  %s12604_s25 = smov 64  }
 0x13c   : > { %s7171_s14 = sshll.u32 %s8980_s5, 4  ;;  %s510_s0 = scalar_lea.vmem [#allocation8], %s9264_s13 }
 0x13d   : > { %7687 = dma.hbm_to_vmem [thread:$0]  (!%p12603_p1), %s9403_s2, 128, %s9405_s22, %s464_s21, %s12604_s25, %s12604_s25, %s12586_s16  }
 0x13e   : > { %s517_s10 = sshll.u32 %s510_s0, 4  ;;  %s12605_s1 = sld [smem:[#allocation54_spill]]  ;;  %s518_s10 = int_to_ptr.vmem [resolvable:$true] %s517_s10 }
 0x144   : > { %s515_s3 = scalar_lea.hbm %s12605_s1, %s7171_s14  ;;  %s8857_s17 = scalar_lea.hbm %s12605_s1, 32 }
 0x145   : > { %s8852_s6 = scalar_lea.hbm %s515_s3, 16  ;;  %p8858_p10 = scmp.lt.u32.totalorder %s515_s3, %s12605_s1 }
 0x146   : > { %p8853_p12 = scmp.ne.s32.totalorder %s515_s3, %s8852_s6  ;;  %p8859_p3 = scmp.lt.u32.totalorder %s8857_s17, %s8852_s6 }
 0x147   : > { %p8861_p4 = scmp.lt.u32.totalorder %s8852_s6, %s515_s3 }
 0x148   : > { %p8855_p0 = pnand %p8853_p12, %p12602_p5  ;;  %p8860_p13 = por %p8859_p3, %p8858_p10 }
 0x14a   : > { %p8856_p9 = pneg %p8855_p0  ;;  %p8862_p7 = por %p8861_p4, %p8860_p13 }
 0x14c   : > { %p8863_p2 = pnand %p8862_p7, %p8856_p9 }
 0x14e   : > { %8866 = shalt.err (!%p8863_p2)
}
 0x14f   : > { %s8867_s16 = scalar_lea.vmem %s518_s10, 16  ;;  %s9001_s13 = smov [#allocation8]  }
 0x150   : > { %p8868_p8 = scmp.ne.s32.totalorder %s518_s10, %s8867_s16  ;;  %s8872_s2 = sshll.u32 %s9001_s13, 4  ;;  %s8873_s2 = int_to_ptr.vmem [resolvable:$false] %s8872_s2 }
 0x151   : > { %s8874_s22 = scalar_lea.vmem %s8873_s2, 32  ;;  %p8875_p12 = scmp.lt.s32.totalorder %s518_s10, %s8873_s2 }
 0x152   : > { %p8870_p6 = pnand %p8868_p8, %p12602_p5  ;;  %p8876_p0 = scmp.lt.s32.totalorder %s8874_s22, %s8867_s16 }
 0x154   : > { %p8871_p11 = pneg %p8870_p6  ;;  %p8877_p1 = por %p8876_p0, %p8875_p12 }
 0x156   : > { %p8878_p3 = pnand %p8877_p1, %p8871_p11 }
 0x158   : > { %8881 = shalt.err (!%p8878_p3)
}
 0x159   : > { %p12606_p10 = scmp.ne.s32.totalorder %s12594_s18, 0  ;;  %s12607_s4 = sld [smem:[#allocation32_spill]] }
 0x15b   : > { %7693 = dma.hbm_to_vmem [thread:$0]  (!%p12606_p10), %s515_s3, 16, %s518_s10, %s9280_s8  }
 0x15f   : > { %p12608_p9 = scmp.ne.s32.totalorder %s12607_s4, 0 }
 0x161   : > { %526 = sbr.rel (%p12608_p9) target bundleno = 1701 (0x6a5), region = 68 }
 0x168   : > { %s9455_s7 = sand.u32 1, %s8968_s24   ;;  %p12609_p5 = scmp.ne.s32.totalorder %s12589_s30, 0 }
 0x169   : > { %s7173_s26 = sshll.u32 %s9455_s7, 3  ;;  %s529_s21 = scalar_lea.sflag [#allocation4], %s9455_s7 }
 0x16a   : > { %s9459_s25 = scalar_lea.vmem [#allocation3], %s7173_s26 }
 0x16b   : > { %8935 = dma.done.wait (%p12609_p5), %s529_s21, 128  }
 0x16c   : > { %8937 = vsyncadd (%p12609_p5), %s529_s21, 4294967168  ;;  %s537_s8 = sand.u32 1, %s9109_s28   ;;  %s7174_s18 = sshll.u32 %s9455_s7, 7 }
 0x16d   : > { %s538_s14 = scalar_lea.sflag [#allocation7], %s537_s8  ;;  %s9467_s0 = scalar_lea.vmem [#allocation6], %s7174_s18 }
 0x16e   : > { %8939 = dma.done.wait (%p12609_p5), %s538_s14, 2064  }
 0x16f   : > { %8941 = vsyncadd (%p12609_p5), %s538_s14, 4294965232  ;;  %s549_s10 = scalar_lea.vmem [#allocation8], %s9455_s7  ;;  %p12610_p1 = scmp.eq.s32.totalorder %s9109_s28, 0 }
 0x171   : > { %8943 = dma.done.wait (%p12610_p1), [#allocation10], 528   ;;  %p12611_p13 = pmov %p12610_p1 }
 0x172   : > { %p12612_p4 = pmov %p12610_p1 }
 0x173   : > { %8945 = vsyncadd (%p12611_p13), [#allocation10], 4294966768 }
 0x174   : > { %8947 = dma.done.wait (%p12612_p4), [#allocation13], 528   ;;  %p12613_p7 = pmov %p12610_p1 }
 0x175   : > { %p12614_p2 = pmov %p12610_p1 }
 0x176   : > { %8949 = vsyncadd (%p12613_p7), [#allocation13], 4294966768 }
 0x177   : > { %8951 = dma.done.wait (%p12614_p2), [#allocation16], 8448   ;;  %p12615_p8 = pmov %p12610_p1 }
 0x178   : > { %p12616_p6 = pmov %p12610_p1 }
 0x179   : > { %8953 = vsyncadd (%p12615_p8), [#allocation16], 4294958848 }
 0x17a   : > { %8955 = dma.done.wait (%p12616_p6), [#allocation19], 16400   ;;  %p12617_p11 = pmov %p12610_p1 }
 0x17b   : > { %v9002_v1 = vmov 0.0   ;;  %vm9003_vm0 = vmmov 0   ;;  %v12543_v2 = vmov 0   ;;  %v7786_v3 = vld [vmem:[#allocation12] sm:$0xff]   ;;  %v7787_v8 = vld [vmem:[#allocation12 + $0x8] sm:$0xff]   ;;  %v7788_v15 = vld [vmem:[#allocation12 + $0x10] sm:$0xff]  }
 0x17c   : > { %8957 = vsyncadd (%p12617_p11), [#allocation19], 4294950896  ;;  %7595 = vmatprep.subr.bf16.mxu0 %v9002_v1  ;;  %7603 = vmatprep.mubr.msk.bf16.mxu0 %vm9003_vm0, %v9002_v1  ;;  %v749_v4 = vld [vmem:[#allocation15] sm:$0xff]  ;;  %v750_v19 = vld [vmem:[#allocation15 + $0x8] sm:$0xff]  ;;  %vm680_vm1 = vcmask 523264   ;;  %s9005_s28 = smov 127  }
 0x17d   : > { %1249 = vmatprep.mubr.bf16.mxu1 %v12543_v2  ;;  %7784 = vset.pattern.permute.xlu0 %v12543_v2  ;;  %v757_v5 = vld [vmem:[#allocation15 + $0x40] sm:$0xff]  ;;  %v758_v20 = vld [vmem:[#allocation15 + $0x48] sm:$0xff]  ;;  %v7789_v22 = vld [vmem:[#allocation12 + $0x18] sm:$0xff]   ;;  %vm5609_vm2 = vcmask 130112   ;;  %vm12559_vm3 = vcmask 195712   ;;  %vm12560_vm4 = vcmask 261312  }
 0x17e   : > { %7785 = vset.pattern.permute.xlu1 %v12543_v2  ;;  %7596 = vmatpush3.bf16.msra.mxu0 %v7786_v3  ;;  %v7194_v6 = vcombine.high %v749_v4, %v757_v5  ;;  %v7193_v7 = vcombine.low %v749_v4, %v757_v5  ;;  %v765_v9 = vld [vmem:[#allocation15 + $0x80] sm:$0xff]  ;;  %v7196_v24 = vcombine.high %v750_v19, %v758_v20  ;;  %v751_v25 = vld [vmem:[#allocation15 + $0x10] sm:$0xff]  ;;  %v766_v27 = vld [vmem:[#allocation15 + $0x88] sm:$0xff]  ;;  %vm5630_vm5 = vcmask 326912   ;;  %s7183_s30 = sshll.u32 %s9455_s7, 5  ;;  %s12692_s27 = sld [smem:[#allocation30_spill]] }
 0x17f   : > { %7597 = vmatprep.subr.bf16.mxu0 %v9002_v1  ;;  %v773_v10 = vld [vmem:[#allocation15 + $0xc0] sm:$0xff]  ;;  %v759_v26 = vld [vmem:[#allocation15 + $0x50] sm:$0xff]  ;;  %v774_v28 = vld [vmem:[#allocation15 + $0xc8] sm:$0xff]  ;;  %v7195_v31 = vcombine.low %v750_v19, %v758_v20  ;;  %vm12561_vm6 = vcmask 392512   ;;  %vm5644_vm7 = vcmask 458112   ;;  %vm5651_vm8 = vcmask 523712  }
 0x180   : > { %1217 = vmatprep.subr.bf16.mxu1 %v7194_v6  ;;  %v7210_v11 = vcombine.high %v765_v9, %v773_v10  ;;  %v781_v12 = vld [vmem:[#allocation15 + $0x100] sm:$0xff]  ;;  %v7209_v14 = vcombine.low %v765_v9, %v773_v10  ;;  %v9500_v30 = vld [vmem:[%s9459_s25] sm:$0xff]   ;;  %v7198_v32 = vcombine.high %v751_v25, %v759_v26  ;;  %v7212_v33 = vcombine.high %v766_v27, %v774_v28  ;;  %v7400_v61 = vld [vmem:[#allocation2] ss:$0 sm:$0xff]  ;;  %s12386_s29 = scalar_lea.vmem [#allocation21], %s7183_s30  ;;  %s12695_s17 = sld [smem:[#allocation61_spill]] }
 0x181   : > { %v789_v13 = vld [vmem:[#allocation15 + $0x140] sm:$0xff]  ;;  %1218 = vmatpush1.bf16.msra.mxu1 %v7193_v7  ;;  %v767_v34 = vld [vmem:[#allocation15 + $0x90] sm:$0xff]  ;;  %v782_v36 = vld [vmem:[#allocation15 + $0x108] sm:$0xff]  ;;  %v7197_v38 = vcombine.low %v751_v25, %v759_v26  ;;  %v7211_v39 = vcombine.low %v766_v27, %v774_v28  ;;  %5075 = vperm.xlu0 %7784, %v7400_v61   ;;  %vm5658_vm9 = vcmask 589312   ;;  %vm5665_vm10 = vcmask 654912   ;;  %s6950_s3 = sshll.u32 %s12386_s29, 4  ;;  %s12449_s3 = int_to_ptr.vmem [resolvable:$true] %s6950_s3 }
 0x182   : > { %7598 = vmatpush3.bf16.msra.mxu0 %v7787_v8  ;;  %1219 = vmatprep.subr.bf16.mxu1 %v7210_v11  ;;  %v7226_v16 = vcombine.high %v781_v12, %v789_v13  ;;  %v797_v17 = vld [vmem:[#allocation15 + $0x180] sm:$0xff]  ;;  %v7225_v21 = vcombine.low %v781_v12, %v789_v13  ;;  %v775_v35 = vld [vmem:[#allocation15 + $0xd0] sm:$0xff]  ;;  %v790_v37 = vld [vmem:[#allocation15 + $0x148] sm:$0xff]  ;;  %vm5672_vm11 = vcmask 720512   ;;  %vm5679_vm12 = vcmask 786112   ;;  %s6934_s13 = scalar_lea.sflag [#allocation5], %s9455_s7 }
 0x183   : > { %7599 = vmatprep.subr.bf16.mxu0 %v9002_v1  ;;  %v805_v18 = vld [vmem:[#allocation15 + $0x1c0] sm:$0xff]  ;;  %v7214_v40 = vcombine.high %v767_v34, %v775_v35  ;;  %v7228_v41 = vcombine.high %v782_v36, %v790_v37  ;;  %v783_v42 = vld [vmem:[#allocation15 + $0x110] sm:$0xff]  ;;  %v798_v44 = vld [vmem:[#allocation15 + $0x188] sm:$0xff]  ;;  %v7213_v46 = vcombine.low %v767_v34, %v775_v35  ;;  %v7227_v47 = vcombine.low %v782_v36, %v790_v37  ;;  %s8882_s2 = scalar_lea.vmem %s12449_s3, 512  ;;  %p12697_p0 = scmp.ne.s32.totalorder %s12590_s15, 0 }
 0x184   : > { %v7242_v23 = vcombine.high %v797_v17, %v805_v18  ;;  %v7241_v29 = vcombine.low %v797_v17, %v805_v18  ;;  %v791_v43 = vld [vmem:[#allocation15 + $0x150] sm:$0xff]  ;;  %v806_v45 = vld [vmem:[#allocation15 + $0x1c8] sm:$0xff]  ;;  %v752_v52 = vld [vmem:[#allocation15 + $0x18] sm:$0xff]  ;;  %vm5686_vm13 = vcmask 851712   ;;  %vm12555_vm14 = vcmask 917312   ;;  %s7408_s6 = sshll.u32 %s12692_s27, 9  ;;  %p8883_p12 = scmp.ne.s32.totalorder %s12449_s3, %s8882_s2 }
 0x185   : > { %1220 = vmatpush1.bf16.msra.mxu1 %v7209_v14  ;;  %v7230_v48 = vcombine.high %v783_v42, %v791_v43  ;;  %v7244_v49 = vcombine.high %v798_v44, %v806_v45  ;;  %v799_v50 = vld [vmem:[#allocation15 + $0x190] sm:$0xff]  ;;  %v760_v53 = vld [vmem:[#allocation15 + $0x58] sm:$0xff]  ;;  %v7229_v54 = vcombine.low %v783_v42, %v791_v43  ;;  %v7243_v55 = vcombine.low %v798_v44, %v806_v45  ;;  %v753_v59 = vld [vmem:[#allocation15 + $0x20] sm:$0xff]  ;;  %s9007_s22 = smov [#allocation21]  }
 0x186   : > { %7600 = vmatpush3.bf16.msra.mxu0 %v7788_v15  ;;  %1221 = vmatprep.subr.bf16.mxu1 %v7226_v16  ;;  %v807_v51 = vld [vmem:[#allocation15 + $0x1d0] sm:$0xff]  ;;  %v768_v57 = vld [vmem:[#allocation15 + $0x98] sm:$0xff]  ;;  %v761_v60 = vld [vmem:[#allocation15 + $0x60] sm:$0xff]  ;;  %v7200_v62 = vcombine.high %v752_v52, %v760_v53  ;;  %v7199_v4 = vcombine.low %v752_v52, %v760_v53  ;;  %vm5700_vm15 = vcmask 982912   ;;  %s12455_s16 = scalar_lea.hbm %s12695_s17, %s7408_s6  ;;  %p8884_p3 = pnand %p8883_p12, %p12697_p0 }
 0x187   : > { %7601 = vmatprep.subr.bf16.mxu0 %v9002_v1  ;;  %v7246_v56 = vcombine.high %v799_v50, %v807_v51  ;;  %v776_v58 = vld [vmem:[#allocation15 + $0xd8] sm:$0xff]  ;;  %v7245_v63 = vcombine.low %v799_v50, %v807_v51  ;;  %v769_v0 = vld [vmem:[#allocation15 + $0xa0] sm:$0xff]  ;;  %v7202_v5 = vcombine.high %v753_v59, %v761_v60  ;;  %v7201_v9 = vcombine.low %v753_v59, %v761_v60  ;;  %v755_v26 = vld [vmem:[#allocation15 + $0x30] sm:$0xff]  ;;  %s8886_s4 = sshll.u32 %s9007_s22, 4  ;;  %s8887_s4 = int_to_ptr.vmem [resolvable:$false] %s8886_s4 }
 0x188   : > { %v777_v3 = vld [vmem:[#allocation15 + $0xe0] sm:$0xff]  ;;  %v784_v6 = vld [vmem:[#allocation15 + $0x118] sm:$0xff]  ;;  %v7216_v8 = vcombine.high %v768_v57, %v776_v58  ;;  %v7215_v12 = vcombine.low %v768_v57, %v776_v58  ;;  %v763_v27 = vld [vmem:[#allocation15 + $0x70] sm:$0xff]  ;;  %p8885_p10 = pneg %p8884_p3  ;;  %s8888_s26 = scalar_lea.vmem %s8887_s4, 1024 }
 0x189   : > { %1222 = vmatpush1.bf16.msra.mxu1 %v7225_v21  ;;  %v792_v7 = vld [vmem:[#allocation15 + $0x158] sm:$0xff]  ;;  %v785_v10 = vld [vmem:[#allocation15 + $0x120] sm:$0xff]  ;;  %v7218_v13 = vcombine.high %v769_v0, %v777_v3  ;;  %v7217_v17 = vcombine.low %v769_v0, %v777_v3  ;;  %v771_v35 = vld [vmem:[#allocation15 + $0xb0] sm:$0xff]  ;;  %v7205_v42 = vcombine.low %v755_v26, %v763_v27  ;;  %p8889_p9 = scmp.lt.s32.totalorder %s12449_s3, %s8887_s4  ;;  %p8890_p5 = scmp.lt.s32.totalorder %s8888_s26, %s8882_s2 }
 0x18a   : > { %7602 = vmatpush3.bf16.msra.mxu0 %v7789_v22  ;;  %1223 = vmatprep.subr.bf16.mxu1 %v7242_v23  ;;  %v793_v11 = vld [vmem:[#allocation15 + $0x160] sm:$0xff]  ;;  %v800_v14 = vld [vmem:[#allocation15 + $0x198] sm:$0xff]  ;;  %v7232_v16 = vcombine.high %v784_v6, %v792_v7  ;;  %v7231_v20 = vcombine.low %v784_v6, %v792_v7  ;;  %v754_v22 = vld [vmem:[#allocation15 + $0x28] sm:$0xff] }
 0x18b   : > { %1260 = vmatprep.subr.bf16.mxu0 %v7196_v24  ;;  %v808_v15 = vld [vmem:[#allocation15 + $0x1d8] sm:$0xff]  ;;  %v801_v18 = vld [vmem:[#allocation15 + $0x1a0] sm:$0xff]  ;;  %v7234_v21 = vcombine.high %v785_v10, %v793_v11  ;;  %v762_v23 = vld [vmem:[#allocation15 + $0x68] sm:$0xff]  ;;  %v7233_v25 = vcombine.low %v785_v10, %v793_v11  ;;  %p8891_p1 = por %p8890_p5, %p8889_p9 }
 0x18c   : > { %v809_v19 = vld [vmem:[#allocation15 + $0x1e0] sm:$0xff]  ;;  %v7248_v24 = vcombine.high %v800_v14, %v808_v15  ;;  %v7247_v28 = vcombine.low %v800_v14, %v808_v15  ;;  %v779_v36 = vld [vmem:[#allocation15 + $0xf0] sm:$0xff]  ;;  %v7203_v37 = vcombine.low %v754_v22, %v762_v23  ;;  %v772_v61 = vld [vmem:[#allocation15 + $0xb8] sm:$0xff] }
 0x18d   : > { %1224 = vmatpush1.bf16.msra.mxu1 %v7241_v29  ;;  %7604 = vmatmul.mubr.msk.bf16.vlgmr.msra.gmra.mrb[0].mxu0 %vm680_vm1, %v9500_v30  ;;  %v7250_v29 = vcombine.high %v801_v18, %v809_v19  ;;  %v7249_v34 = vcombine.low %v801_v18, %v809_v19  ;;  %v787_v43 = vld [vmem:[#allocation15 + $0x130] sm:$0xff]  ;;  %v7221_v50 = vcombine.low %v771_v35, %v779_v36  ;;  %v7795_v18 = vld [vmem:[#allocation18 + $0x50] sm:$0xff]   ;;  %p8892_p13 = pnand %p8891_p1, %p8885_p10 }
 0x18e   : > { %1261 = vmatpush1.bf16.msra.mxu0 %v7195_v31  ;;  %1303 = vmatprep.subr.bf16.mxu1 %v7198_v32  ;;  %v770_v31 = vld [vmem:[#allocation15 + $0xa8] sm:$0xff]  ;;  %v795_v44 = vld [vmem:[#allocation15 + $0x170] sm:$0xff]  ;;  %v7796_v19 = vld [vmem:[#allocation18 + $0x10] sm:$0xff]  }
 0x18f   : > { %1262 = vmatprep.subr.bf16.mxu0 %v7212_v33  ;;  %1292 = vmatprep.mubr.bf16.mxu0 %v12543_v2  ;;  %v778_v32 = vld [vmem:[#allocation15 + $0xe8] sm:$0xff]  ;;  %v7204_v33 = vcombine.high %v754_v22, %v762_v23  ;;  %v803_v51 = vld [vmem:[#allocation15 + $0x1b0] sm:$0xff]  ;;  %v7237_v58 = vcombine.low %v787_v43, %v795_v44 }
 0x190   : > { %7257 = vmatmul.mubr.msk.bf16.vlgmr.msra.gmra.mrb[0].mxu1 %vm680_vm1, %v9500_v30  ;;  %v7219_v45 = vcombine.low %v770_v31, %v778_v32  ;;  %v811_v52 = vld [vmem:[#allocation15 + $0x1f0] sm:$0xff] }
 0x191   : > { %1304 = vmatpush1.bf16.msra.mxu1 %v7197_v38  ;;  %1335 = vmatprep.mubr.bf16.mxu1 %v12543_v2  ;;  %v7206_v38 = vcombine.high %v755_v26, %v763_v27  ;;  %v7254_v60 = vcombine.high %v803_v51, %v811_v52  ;;  %v7253_v0 = vcombine.low %v803_v51, %v811_v52  ;;  %v7791_v14 = vld [vmem:[#allocation18 + $0x40] sm:$0xff]   ;;  %v7805_v26 = vld [vmem:[#allocation18 + $0x88] sm:$0xff]   ;;  %v9531_v51 = vld [vmem:[#allocation17 + $0x8] sm:$0xff] }
 0x192   : > { %1263 = vmatpush1.bf16.msra.mxu0 %v7211_v39  ;;  %1305 = vmatprep.subr.bf16.mxu1 %v7214_v40  ;;  %v786_v39 = vld [vmem:[#allocation15 + $0x128] sm:$0xff]  ;;  %v7792_v15 = vld [vmem:[#allocation18] sm:$0xff]   ;;  %v7804_v27 = vld [vmem:[#allocation18 + $0x68] sm:$0xff]  }
 0x193   : > { %1264 = vmatprep.subr.bf16.mxu0 %v7228_v41  ;;  %v794_v40 = vld [vmem:[#allocation15 + $0x168] sm:$0xff]  ;;  %v7220_v41 = vcombine.high %v770_v31, %v778_v32  ;;  %v7799_v22 = vld [vmem:[#allocation18 + $0xc0] sm:$0xff]   ;;  %v7809_v31 = vld [vmem:[#allocation18 + $0x90] sm:$0xff]  }
 0x194   : > { %v7235_v53 = vcombine.low %v786_v39, %v794_v40  ;;  %v7801_v23 = vld [vmem:[#allocation18 + $0x80] sm:$0xff]   ;;  %v7808_v32 = vld [vmem:[#allocation18 + $0x70] sm:$0xff]  }
 0x195   : > { %1306 = vmatpush1.bf16.msra.mxu1 %v7213_v46  ;;  %v7222_v46 = vcombine.high %v771_v35, %v779_v36  ;;  %v7813_v35 = vld [vmem:[#allocation18 + $0x98] sm:$0xff]  }
 0x196   : > { %1265 = vmatpush1.bf16.msra.mxu0 %v7227_v47  ;;  %1307 = vmatprep.subr.bf16.mxu1 %v7230_v48  ;;  %v802_v47 = vld [vmem:[#allocation15 + $0x1a8] sm:$0xff] }
 0x197   : > { %1266 = vmatprep.subr.bf16.mxu0 %v7244_v49  ;;  %v810_v48 = vld [vmem:[#allocation15 + $0x1e8] sm:$0xff]  ;;  %v7236_v49 = vcombine.high %v786_v39, %v794_v40  ;;  %v7816_v39 = vld [vmem:[#allocation18 + $0xa0] sm:$0xff]  }
 0x198   : > { %v7252_v57 = vcombine.high %v802_v47, %v810_v48  ;;  %v7251_v59 = vcombine.low %v802_v47, %v810_v48  ;;  %v7812_v36 = vld [vmem:[#allocation18 + $0x78] sm:$0xff]   ;;  %v7817_v40 = vld [vmem:[#allocation18 + $0x140] sm:$0xff]   ;;  %v817_v48 = vlaneseq }
 0x199   : > { %1308 = vmatpush1.bf16.msra.mxu1 %v7229_v54  ;;  %v7238_v54 = vcombine.high %v787_v43, %v795_v44  ;;  %v7823_v43 = vld [vmem:[#allocation18 + $0xf0] sm:$0xff]   ;;  %v7831_v47 = vld [vmem:[#allocation18 + $0x1c0] sm:$0xff]  }
 0x19a   : > { %1267 = vmatpush1.bf16.msra.mxu0 %v7243_v55  ;;  %1309 = vmatprep.subr.bf16.mxu1 %v7246_v56  ;;  %v756_v55 = vld [vmem:[#allocation15 + $0x38] sm:$0xff]  ;;  %v7824_v44 = vld [vmem:[#allocation18 + $0xb0] sm:$0xff]  }
 0x19b   : > { %1346 = vmatprep.subr.bf16.mxu0 %v7200_v62  ;;  %v764_v56 = vld [vmem:[#allocation15 + $0x78] sm:$0xff] }
 0x19c   : > { %v780_v62 = vld [vmem:[#allocation15 + $0xf8] sm:$0xff]  ;;  %v7207_v3 = vcombine.low %v756_v55, %v764_v56 }
 0x19d   : > { %1310 = vmatpush1.bf16.msra.mxu1 %v7245_v63  ;;  %7258 = vmatmul.mubr.msk.bf16.vlgmr.msra.gmra.mrb[4].mxu0 %vm680_vm1, %v9500_v30  ;;  %v7208_v63 = vcombine.high %v756_v55, %v764_v56  ;;  %v7224_v6 = vcombine.high %v772_v61, %v780_v62  ;;  %v7223_v7 = vcombine.low %v772_v61, %v780_v62  ;;  %v7184_v56 = vld [vmem:[#allocation14] ss:$0 sm:$0xff] }
 0x19e   : > { %1347 = vmatpush1.bf16.msra.mxu0 %v7199_v4  ;;  %1389 = vmatprep.subr.bf16.mxu1 %v7202_v5  ;;  %v788_v4 = vld [vmem:[#allocation15 + $0x138] sm:$0xff] }
 0x19f   : > { %1348 = vmatprep.subr.bf16.mxu0 %v7216_v8  ;;  %1378 = vmatprep.mubr.bf16.mxu0 %v12543_v2  ;;  %v796_v5 = vld [vmem:[#allocation15 + $0x178] sm:$0xff] }
 0x1a0   : > { %7259 = vmatmul.mubr.msk.bf16.vlgmr.msra.gmra.mrb[4].mxu1 %vm680_vm1, %v9500_v30  ;;  %v804_v8 = vld [vmem:[#allocation15 + $0x1b8] sm:$0xff]  ;;  %v7240_v10 = vcombine.high %v788_v4, %v796_v5  ;;  %v7239_v11 = vcombine.low %v788_v4, %v796_v5 }
 0x1a1   : > { %1390 = vmatpush1.bf16.msra.mxu1 %v7201_v9  ;;  %1421 = vmatprep.mubr.bf16.mxu1 %v12543_v2  ;;  %v812_v9 = vld [vmem:[#allocation15 + $0x1f8] sm:$0xff] }
 0x1a2   : > { %1349 = vmatpush1.bf16.msra.mxu0 %v7215_v12  ;;  %1391 = vmatprep.subr.bf16.mxu1 %v7218_v13  ;;  %v7256_v12 = vcombine.high %v804_v8, %v812_v9  ;;  %v7255_v13 = vcombine.low %v804_v8, %v812_v9 }
 0x1a3   : > { %1350 = vmatprep.subr.bf16.mxu0 %v7232_v16  ;;  %v7793_v16 = vld [vmem:[#allocation18 + $0x48] sm:$0xff]  }
 0x1a5   : > { %1392 = vmatpush1.bf16.msra.mxu1 %v7217_v17  ;;  %v7794_v17 = vld [vmem:[#allocation18 + $0x8] sm:$0xff]  }
 0x1a6   : > { %1351 = vmatpush1.bf16.msra.mxu0 %v7231_v20  ;;  %1393 = vmatprep.subr.bf16.mxu1 %v7234_v21  ;;  %v7797_v20 = vld [vmem:[#allocation18 + $0x58] sm:$0xff]  }
 0x1a7   : > { %1352 = vmatprep.subr.bf16.mxu0 %v7248_v24  ;;  %v7798_v21 = vld [vmem:[#allocation18 + $0x18] sm:$0xff]   ;;  %v7802_v24 = vld [vmem:[#allocation18 + $0x20] sm:$0xff]  }
 0x1a9   : > { %1394 = vmatpush1.bf16.msra.mxu1 %v7233_v25  ;;  %v7803_v25 = vld [vmem:[#allocation18 + $0xc8] sm:$0xff]  }
 0x1aa   : > { %1353 = vmatpush1.bf16.msra.mxu0 %v7247_v28  ;;  %1395 = vmatprep.subr.bf16.mxu1 %v7250_v29  ;;  %v7806_v28 = vld [vmem:[#allocation18 + $0x28] sm:$0xff]   ;;  %v7807_v29 = vld [vmem:[#allocation18 + $0xd0] sm:$0xff]  }
 0x1ab   : > { %1432 = vmatprep.subr.bf16.mxu0 %v7204_v33  ;;  %v7810_v33 = vld [vmem:[#allocation18 + $0x30] sm:$0xff]  }
 0x1ad   : > { %7260 = vmatmul.mubr.msk.bf16.vlgmr.msra.gmra.mrb[8].mxu0 %vm680_vm1, %v9500_v30  ;;  %1396 = vmatpush1.bf16.msra.mxu1 %v7249_v34  ;;  %v7811_v34 = vld [vmem:[#allocation18 + $0xd8] sm:$0xff]  }
 0x1ae   : > { %1433 = vmatpush1.bf16.msra.mxu0 %v7203_v37  ;;  %1475 = vmatprep.subr.bf16.mxu1 %v7206_v38  ;;  %v7814_v37 = vld [vmem:[#allocation18 + $0x38] sm:$0xff]   ;;  %v7815_v38 = vld [vmem:[#allocation18 + $0xe0] sm:$0xff]  }
 0x1af   : > { %1434 = vmatprep.subr.bf16.mxu0 %v7220_v41  ;;  %1464 = vmatprep.mubr.bf16.mxu0 %v12543_v2  ;;  %v7819_v41 = vld [vmem:[#allocation18 + $0xe8] sm:$0xff]  }
 0x1b0   : > { %7261 = vmatmul.mubr.msk.bf16.vlgmr.msra.gmra.mrb[8].mxu1 %vm680_vm1, %v9500_v30 }
 0x1b1   : > { %1476 = vmatpush1.bf16.msra.mxu1 %v7205_v42  ;;  %1507 = vmatprep.mubr.bf16.mxu1 %v12543_v2  ;;  %v7820_v42 = vld [vmem:[#allocation18 + $0xa8] sm:$0xff]  }
 0x1b2   : > { %1435 = vmatpush1.bf16.msra.mxu0 %v7219_v45  ;;  %1477 = vmatprep.subr.bf16.mxu1 %v7222_v46  ;;  %v7827_v45 = vld [vmem:[#allocation18 + $0xf8] sm:$0xff]  }
 0x1b3   : > { %1436 = vmatprep.subr.bf16.mxu0 %v7236_v49  ;;  %v7828_v46 = vld [vmem:[#allocation18 + $0xb8] sm:$0xff]   ;;  %v9528_v49 = vshrl.u32 %v817_v48, 7 }
 0x1b5   : > { %1478 = vmatpush1.bf16.msra.mxu1 %v7221_v50  ;;  %v843_v50 = vsub.s32 6, %v9528_v49  ;;  %v823_v55 = vsub.s32 1, %v9528_v49 }
 0x1b6   : > { %1437 = vmatpush1.bf16.msra.mxu0 %v7235_v53  ;;  %1479 = vmatprep.subr.bf16.mxu1 %v7238_v54  ;;  %v9537_v53 = vsub.s32 0, %v9528_v49  ;;  %v813_v54 = vld [vmem:[#allocation17] sm:$0xff] }
 0x1b7   : > { %1438 = vmatprep.subr.bf16.mxu0 %v7252_v57  ;;  %v9534_v52 = vrot.slane %v9531_v51, %v843_v50 }
 0x1b8   : > { %12618 = vst [vmem:[#allocation36_spill] sm:$0xff] %v9537_v53 }
 0x1b9   : > { %1480 = vmatpush1.bf16.msra.mxu1 %v7237_v58  ;;  %v820_v58 = vrot.slane %v813_v54, %v9537_v53 }
 0x1ba   : > { %1439 = vmatpush1.bf16.msra.mxu0 %v7251_v59  ;;  %1481 = vmatprep.subr.bf16.mxu1 %v7254_v60  ;;  %v824_v60 = vrot.slane %v813_v54, %v823_v55 }
 0x1bb   : > { %1518 = vmatprep.subr.bf16.mxu0 %v7208_v63 }
 0x1bd   : > { %7262 = vmatmul.mubr.msk.bf16.vlgmr.msra.gmra.mrb[12].mxu0 %vm680_vm1, %v9500_v30  ;;  %1482 = vmatpush1.bf16.msra.mxu1 %v7253_v0 }
 0x1be   : > { %1519 = vmatpush1.bf16.msra.mxu0 %v7207_v3  ;;  %1550 = vmatprep.mubr.bf16.mxu0 %v12543_v2 }
 0x1bf   : > { %1520 = vmatprep.subr.bf16.mxu0 %v7224_v6  ;;  %7414 = vmatprep.subr.bf16.mxu1 %v7791_v14  ;;  %v831_v14 = vsub.s32 3, %v9528_v49 }
 0x1c0   : > { %7263 = vmatmul.mubr.msk.bf16.vlgmr.msra.gmra.mrb[12].mxu1 %vm680_vm1, %v9500_v30 }
 0x1c1   : > { %7415 = vmatpush3.bf16.msra.mxu1 %v7792_v15 }
 0x1c2   : > { %1521 = vmatpush1.bf16.msra.mxu0 %v7223_v7  ;;  %7416 = vmatprep.subr.bf16.mxu1 %v7793_v16 }
 0x1c3   : > { %1522 = vmatprep.subr.bf16.mxu0 %v7240_v10 }
 0x1c5   : > { %7417 = vmatpush3.bf16.msra.mxu1 %v7794_v17  ;;  %v835_v17 = vsub.s32 4, %v9528_v49 }
 0x1c6   : > { %1523 = vmatpush1.bf16.msra.mxu0 %v7239_v11  ;;  %7418 = vmatprep.subr.bf16.mxu1 %v7795_v18  ;;  %v839_v18 = vsub.s32 5, %v9528_v49 }
 0x1c7   : > { %1524 = vmatprep.subr.bf16.mxu0 %v7256_v12 }
 0x1c9   : > { %7419 = vmatpush3.bf16.msra.mxu1 %v7796_v19 }
 0x1ca   : > { %1525 = vmatpush1.bf16.msra.mxu0 %v7255_v13  ;;  %7420 = vmatprep.subr.bf16.mxu1 %v7797_v20  ;;  %v827_v13 = vsub.s32 2, %v9528_v49 }
 0x1cb   : > { %7436 = vmatprep.subr.bf16.mxu0 %v7799_v22 }
 0x1cd   : > { %7264 = vmatmul.mubr.msk.bf16.vlgmr.msra.gmra.mrb[16].mxu0 %vm680_vm1, %v9500_v30  ;;  %7421 = vmatpush3.bf16.msra.mxu1 %v7798_v21  ;;  %v7800_v30 = vld [vmem:[#allocation18 + $0x60] sm:$0xff]   ;;  %v847_v21 = vsub.s32 7, %v9528_v49 }
 0x1ce   : > { %7437 = vmatpush3.bf16.msra.mxu0 %v7801_v23  ;;  %7422 = vmatprep.subr.bf16.mxu1 %v7800_v30 }
 0x1cf   : > { %7438 = vmatprep.subr.bf16.mxu0 %v7803_v25  ;;  %v828_v25 = vrot.slane %v813_v54, %v827_v13 }
 0x1d1   : > { %7423 = vmatpush3.bf16.msra.mxu1 %v7802_v24 }
 0x1d2   : > { %7439 = vmatpush3.bf16.msra.mxu0 %v7805_v26  ;;  %7424 = vmatprep.subr.bf16.mxu1 %v7804_v27  ;;  %v832_v26 = vrot.slane %v813_v54, %v831_v14 }
 0x1d3   : > { %7440 = vmatprep.subr.bf16.mxu0 %v7807_v29  ;;  %v836_v29 = vrot.slane %v813_v54, %v835_v17 }
 0x1d5   : > { %7425 = vmatpush3.bf16.msra.mxu1 %v7806_v28 }
 0x1d6   : > { %7441 = vmatpush3.bf16.msra.mxu0 %v7809_v31  ;;  %7426 = vmatprep.subr.bf16.mxu1 %v7808_v32  ;;  %v840_v31 = vrot.slane %v813_v54, %v839_v18 }
 0x1d7   : > { %7442 = vmatprep.subr.bf16.mxu0 %v7811_v34 }
 0x1d9   : > { %7427 = vmatpush3.bf16.msra.mxu1 %v7810_v33  ;;  %v9552_v33 = vrot.slane %v813_v54, %v843_v50 }
 0x1da   : > { %7443 = vmatpush3.bf16.msra.mxu0 %v7813_v35  ;;  %7428 = vmatprep.subr.bf16.mxu1 %v7812_v36  ;;  %v9554_v35 = vrot.slane %v813_v54, %v847_v21 }
 0x1db   : > { %7444 = vmatprep.subr.bf16.mxu0 %v7815_v38  ;;  %v9558_v38 = vrot.slane %v9531_v51, %v9537_v53 }
 0x1dd   : > { %7429 = vmatpush3.bf16.msra.mxu1 %v7814_v37 }
 0x1de   : > { %7445 = vmatpush3.bf16.msra.mxu0 %v7816_v39  ;;  %7458 = vmatprep.subr.bf16.mxu1 %v7817_v40  ;;  %v9561_v39 = vrot.slane %v9531_v51, %v823_v55 }
 0x1df   : > { %7446 = vmatprep.subr.bf16.mxu0 %v7819_v41 }
 0x1e2   : > { %7447 = vmatpush3.bf16.msra.mxu0 %v7820_v42  ;;  %v9564_v42 = vrot.slane %v9531_v51, %v827_v13 }
 0x1e3   : > { %7448 = vmatprep.subr.bf16.mxu0 %v7823_v43  ;;  %v9567_v43 = vrot.slane %v9531_v51, %v831_v14 }
 0x1e6   : > { %7449 = vmatpush3.bf16.msra.mxu0 %v7824_v44 }
 0x1e7   : > { %7450 = vmatprep.subr.bf16.mxu0 %v7827_v45 }
 0x1ea   : > { %7451 = vmatpush3.bf16.msra.mxu0 %v7828_v46  ;;  %v9570_v46 = vrot.slane %v9531_v51, %v835_v17 }
 0x1eb   : > { %7480 = vmatprep.subr.bf16.mxu0 %v7831_v47  ;;  %v9573_v47 = vrot.slane %v9531_v51, %v839_v18 }
 0x260   : > { %v718_v57 = vpop.f32.mrb[0].mxu0 }
 0x261   : > { %v9541_v59 = vadd.f32 %v7184_v56, %v718_v57  ;;  %v7605_v61 = vpop.f32.mrb[1].mxu0 }
 0x262   : > { %v721_v62 = vpop.f32.mrb[2].mxu0 }
 0x263   : > { %v1251_v63 = vpop.f32.mrb[0].mxu1  ;;  %727 = vrot.lane.b32.xlu0 %v9541_v59, %s9005_s28  ;;  %v9544_v0 = vadd.f32 %v7184_v56, %v721_v62  ;;  %v7606_v3 = vpop.f32.mrb[3].mxu0  ;;  %v9576_v56 = vrot.slane %v9531_v51, %v847_v21 }
 0x264   : > { %v1252_v4 = vadd.f32 %v1251_v63, %v820_v58  ;;  %v1253_v5 = vpop.f32.mrb[1].mxu1 }
 0x265   : > { %v1254_v6 = vadd.f32 %v1253_v5, %v824_v60  ;;  %v1255_v7 = vpop.f32.mrb[2].mxu1 }
 0x266   : > { %v1593_v8 = vmul.f32 0.044715, %v1252_v4  ;;  %v1256_v9 = vadd.f32 %v1255_v7, %v820_v58  ;;  %v1257_v10 = vpop.f32.mrb[3].mxu1  ;;  %v1561_v61 = vmul.f32 0.5, %v1252_v4 }
 0x267   : > { %v1594_v11 = vmul.f32 0.044715, %v1254_v6  ;;  %v1258_v12 = vadd.f32 %v1257_v10, %v824_v60  ;;  %729 = vrot.lane.b32.xlu0 %v9544_v0, %s9005_s28  ;;  %v9580_v60 = vmul.f32 0.5, %v1254_v6 }
 0x268   : > { %v1625_v15 = vmul.f32 %v1593_v8, %v1252_v4  ;;  %v1609_v16 = vmul.f32 0.044715, %v1256_v9  ;;  %v1577_v7 = vmul.f32 0.5, %v1256_v9 }
 0x269   : > { %v1626_v19 = vmul.f32 %v1594_v11, %v1254_v6  ;;  %v1610_v20 = vmul.f32 0.044715, %v1258_v12  ;;  %v1578_v13 = vmul.f32 0.5, %v1258_v12 }
 0x26a   : > { %v1657_v22 = vmul.f32 %v1625_v15, %v1252_v4  ;;  %v1641_v23 = vmul.f32 %v1609_v16, %v1256_v9 }
 0x26b   : > { %v1658_v30 = vmul.f32 %v1626_v19, %v1254_v6  ;;  %v1642_v24 = vmul.f32 %v1610_v20, %v1258_v12 }
 0x26c   : > { %v1689_v27 = vadd.f32 %v1657_v22, %v1252_v4  ;;  %v1673_v28 = vmul.f32 %v1641_v23, %v1256_v9 }
 0x26d   : > { %v1674_v32 = vmul.f32 %v1642_v24, %v1258_v12  ;;  %v1690_v34 = vadd.f32 %v1658_v30, %v1254_v6 }
 0x26e   : > { %v1721_v36 = vmul.f32 0.7978846, %v1689_v27  ;;  %v1705_v37 = vadd.f32 %v1673_v28, %v1256_v9 }
 0x26f   : > { %v1706_v40 = vadd.f32 %v1674_v32, %v1258_v12  ;;  %v1722_v41 = vmul.f32 0.7978846, %v1690_v34 }
 0x270   : > { %7923 = vtanh.f32 %v1721_v36  ;;  %v1737_v44 = vmul.f32 0.7978846, %v1705_v37  ;;  %v1294_v45 = vpop.f32.mrb[4].mxu0 }
 0x271   : > { %v1295_v50 = vadd.f32 %v1294_v45, %v828_v25  ;;  %v1296_v54 = vpop.f32.mrb[5].mxu0  ;;  %v1738_v55 = vmul.f32 0.7978846, %v1706_v40  ;;  %7925 = vtanh.f32 %v1722_v41 }
 0x272   : > { %7927 = vtanh.f32 %v1737_v44  ;;  %v9578_v57 = vadd.f32 %v1296_v54, %v832_v26  ;;  %v1298_v58 = vpop.f32.mrb[6].mxu0 }
 0x273   : > { %v1595_v62 = vmul.f32 0.044715, %v1295_v50  ;;  %v1337_v63 = vpop.f32.mrb[4].mxu1  ;;  %v1299_v3 = vadd.f32 %v1298_v58, %v828_v25  ;;  %v1300_v5 = vpop.f32.mrb[7].mxu0  ;;  %7929 = vtanh.f32 %v1738_v55  ;;  %v9587_v17 = vmul.f32 0.5, %v1295_v50 }
 0x274   : > { %v1596_v8 = vmul.f32 0.044715, %v9578_v57  ;;  %v9583_v10 = vadd.f32 %v1337_v63, %v836_v29  ;;  %v1339_v11 = vpop.f32.mrb[5].mxu1  ;;  %v1301_v51 = vadd.f32 %v1300_v5, %v832_v26  ;;  %v9599_v26 = vmul.f32 0.5, %v9578_v57 }
 0x275   : > { %v1627_v14 = vmul.f32 %v1595_v62, %v1295_v50  ;;  %v1611_v15 = vmul.f32 0.044715, %v1299_v3  ;;  %v9585_v16 = vadd.f32 %v1339_v11, %v840_v31  ;;  %v1341_v6 = vpop.f32.mrb[6].mxu1  ;;  %v9602_v32 = vmul.f32 0.5, %v1299_v3 }
 0x276   : > { %v1628_v4 = vmul.f32 %v1596_v8, %v9578_v57  ;;  %v1597_v18 = vmul.f32 0.044715, %v9583_v10  ;;  %v1612_v19 = vmul.f32 0.044715, %v1301_v51  ;;  %v9591_v9 = vadd.f32 %v1341_v6, %v836_v29  ;;  %v1343_v20 = vpop.f32.mrb[7].mxu1 }
 0x277   : > { %v1659_v21 = vmul.f32 %v1627_v14, %v1295_v50  ;;  %v1643_v22 = vmul.f32 %v1611_v15, %v1299_v3  ;;  %v1598_v23 = vmul.f32 0.044715, %v9585_v16  ;;  %v9594_v12 = vadd.f32 %v1343_v20, %v840_v31 }
 0x278   : > { %v1629_v30 = vmul.f32 %v1597_v18, %v9583_v10  ;;  %v1644_v24 = vmul.f32 %v1612_v19, %v1301_v51  ;;  %v1613_v25 = vmul.f32 0.044715, %v9591_v9  ;;  %v1660_v36 = vmul.f32 %v1628_v4, %v9578_v57 }
 0x279   : > { %v1691_v27 = vadd.f32 %v1659_v21, %v1295_v50  ;;  %v1675_v28 = vmul.f32 %v1643_v22, %v1299_v3  ;;  %v1614_v29 = vmul.f32 0.044715, %v9594_v12  ;;  %v1630_v37 = vmul.f32 %v1598_v23, %v9585_v16 }
 0x27a   : > { %v7924_v34 = vpop.eup %7923  ;;  %v1661_v31 = vmul.f32 %v1629_v30, %v9583_v10  ;;  %v1645_v40 = vmul.f32 %v1613_v25, %v9591_v9  ;;  %v1676_v54 = vmul.f32 %v1644_v24, %v1301_v51  ;;  %v9611_v15 = vmul.f32 0.5, %v1301_v51 }
 0x27b   : > { %v7926_v41 = vpop.eup %7925  ;;  %v1723_v44 = vmul.f32 0.7978846, %v1691_v27  ;;  %v1707_v45 = vadd.f32 %v1675_v28, %v1299_v3  ;;  %v1646_v50 = vmul.f32 %v1614_v29, %v9594_v12  ;;  %v1785_v5 = vadd.f32 1.0, %v7924_v34 }
 0x27c   : > { %v7928_v55 = vpop.eup %7927  ;;  %v1693_v58 = vadd.f32 %v1661_v31, %v9583_v10  ;;  %v1677_v62 = vmul.f32 %v1645_v40, %v9591_v9  ;;  %v1786_v63 = vadd.f32 1.0, %v7926_v41  ;;  %v9614_v4 = vmul.f32 %v1630_v37, %v9585_v16 }
 0x27d   : > { %v7930_v8 = vpop.eup %7929  ;;  %7931 = vtanh.f32 %v1723_v44  ;;  %v1739_v11 = vmul.f32 0.7978846, %v1707_v45  ;;  %v1801_v14 = vadd.f32 1.0, %v7928_v55  ;;  %v1817_v19 = vmul.f32 %v1785_v5, %v1561_v61 }
 0x27e   : > { %v1725_v6 = vmul.f32 0.7978846, %v1693_v58  ;;  %v1709_v3 = vadd.f32 %v1677_v62, %v9591_v9  ;;  %v1802_v18 = vadd.f32 1.0, %v7930_v8  ;;  %v1692_v21 = vadd.f32 %v1660_v36, %v9578_v57  ;;  %v7818_v57 = vld [vmem:[#allocation18 + $0x100] sm:$0xff]   ;;  %v7822_v8 = vld [vmem:[#allocation18 + $0x108] sm:$0xff]  }
 0x27f   : > { %7933 = vtanh.f32 %v1739_v11  ;;  %v1833_v20 = vmul.f32 %v1801_v14, %v1577_v7  ;;  %v9619_v22 = vmul.f32 %v1646_v50, %v9594_v12  ;;  %v1818_v30 = vmul.f32 %v1786_v63, %v9580_v60 }
 0x280   : > { %v1380_v23 = vpop.f32.mrb[8].mxu0  ;;  %v1834_v24 = vmul.f32 %v1802_v18, %v1578_v13  ;;  %v1708_v25 = vadd.f32 %v1676_v54, %v1301_v51  ;;  %v1741_v27 = vmul.f32 0.7978846, %v1709_v3  ;;  %v1724_v31 = vmul.f32 0.7978846, %v1692_v21  ;;  %v7821_v13 = vld [vmem:[#allocation18 + $0x148] sm:$0xff]  }
 0x281   : > { %v9623_v28 = vadd.f32 %v1380_v23, %v9552_v33  ;;  %v1382_v29 = vpop.f32.mrb[9].mxu0  ;;  %v1849_v34 = vpack.c.bf16 %v1833_v20, %v1817_v19  ;;  %7935 = vtanh.f32 %v1725_v6  ;;  %v9633_v44 = vmul.f32 0.5, %v9585_v16  ;;  %v7825_v21 = vld [vmem:[#allocation18 + $0x150] sm:$0xff]  }
 0x282   : > { %v1850_v61 = vpack.c.bf16 %v1834_v24, %v1818_v30  ;;  %v9626_v7 = vadd.f32 %v1382_v29, %v9554_v35  ;;  %v1384_v36 = vpop.f32.mrb[10].mxu0  ;;  %v1740_v37 = vmul.f32 0.7978846, %v1708_v25  ;;  %7937 = vtanh.f32 %v1724_v31 }
 0x283   : > { %v1599_v40 = vmul.f32 0.044715, %v9623_v28  ;;  %v9630_v60 = vadd.f32 %v1384_v36, %v9552_v33  ;;  %v1386_v51 = vpop.f32.mrb[11].mxu0  ;;  %v1423_v41 = vpop.f32.mrb[8].mxu1  ;;  %v9663_v25 = vmul.f32 0.5, %v9594_v12 }
 0x284   : > { %2928 = vmatprep.mubr.bf16.mxu1 %v1850_v61  ;;  %v1600_v45 = vmul.f32 0.044715, %v9626_v7  ;;  %v9637_v54 = vadd.f32 %v1386_v51, %v9554_v35  ;;  %v9640_v50 = vadd.f32 %v1423_v41, %v9558_v38  ;;  %v1425_v55 = vpop.f32.mrb[9].mxu1  ;;  %7939 = vtanh.f32 %v1740_v37  ;;  %v7826_v37 = vld [vmem:[#allocation18 + $0x110] sm:$0xff]  }
 0x285   : > { %7941 = vtanh.f32 %v1741_v27  ;;  %v1631_v33 = vmul.f32 %v1599_v40, %v9623_v28  ;;  %2929 = vmatmul.mubr.bf16.vlgmr.msra.gmra.mrb[16].mxu1 %v1849_v34  ;;  %v1615_v58 = vmul.f32 0.044715, %v9630_v60  ;;  %v9645_v62 = vadd.f32 %v1425_v55, %v9561_v39  ;;  %v1427_v63 = vpop.f32.mrb[10].mxu1 }
 0x286   : > { %v1632_v5 = vmul.f32 %v1600_v45, %v9626_v7  ;;  %7459 = vmatpush3.bf16.msra.mxu1 %v7818_v57  ;;  %v1616_v35 = vmul.f32 0.044715, %v9637_v54  ;;  %v1601_v11 = vmul.f32 0.044715, %v9640_v50  ;;  %v9651_v14 = vadd.f32 %v1427_v63, %v9558_v38  ;;  %v1429_v6 = vpop.f32.mrb[11].mxu1 }
 0x287   : > { %v7932_v3 = vpop.eup %7931  ;;  %v1663_v18 = vmul.f32 %v1631_v33, %v9623_v28  ;;  %v1647_v19 = vmul.f32 %v1615_v58, %v9630_v60  ;;  %7460 = vmatprep.subr.bf16.mxu1 %v7821_v13  ;;  %v1602_v20 = vmul.f32 0.044715, %v9645_v62  ;;  %v9657_v23 = vadd.f32 %v1429_v6, %v9561_v39 }
 0x288   : > { %v1648_v30 = vmul.f32 %v1616_v35, %v9637_v54  ;;  %v1633_v24 = vmul.f32 %v1601_v11, %v9640_v50  ;;  %v1617_v38 = vmul.f32 0.044715, %v9651_v14  ;;  %v1694_v39 = vadd.f32 %v9614_v4, %v9585_v16  ;;  %v7829_v16 = vld [vmem:[#allocation18 + $0x158] sm:$0xff]  }
 0x289   : > { %v7934_v27 = vpop.eup %7933  ;;  %v1695_v29 = vadd.f32 %v1663_v18, %v9623_v28  ;;  %v1679_v34 = vmul.f32 %v1647_v19, %v9630_v60  ;;  %v1634_v31 = vmul.f32 %v1602_v20, %v9645_v62  ;;  %v9671_v61 = vmul.f32 %v1632_v5, %v9626_v7  ;;  %v7830_v19 = vld [vmem:[#allocation18 + $0x118] sm:$0xff]  }
 0x28a   : > { %7461 = vmatpush3.bf16.msra.mxu1 %v7822_v8  ;;  %v1665_v57 = vmul.f32 %v1633_v24, %v9640_v50  ;;  %v1649_v36 = vmul.f32 %v1617_v38, %v9651_v14  ;;  %v1787_v40 = vadd.f32 1.0, %v7932_v3  ;;  %v9677_v41 = vmul.f32 %v1648_v30, %v9637_v54  ;;  %v7832_v38 = vld [vmem:[#allocation18 + $0x160] sm:$0xff]  }
 0x28b   : > { %v1727_v51 = vmul.f32 0.7978846, %v1695_v29  ;;  %v1711_v13 = vadd.f32 %v1679_v34, %v9630_v60  ;;  %7462 = vmatprep.subr.bf16.mxu1 %v7825_v21  ;;  %v1618_v45 = vmul.f32 0.044715, %v9657_v23  ;;  %v7936_v4 = vpop.eup %7935  ;;  %v9682_v33 = vmul.f32 %v1634_v31, %v9645_v62 }
 0x28c   : > { %v1697_v55 = vadd.f32 %v1665_v57, %v9640_v50  ;;  %v1681_v58 = vmul.f32 %v1649_v36, %v9651_v14  ;;  %v1803_v63 = vadd.f32 1.0, %v7934_v27  ;;  %v7938_v5 = vpop.eup %7937  ;;  %v1819_v8 = vmul.f32 %v1787_v40, %v9587_v17 }
 0x28d   : > { %7943 = vtanh.f32 %v1727_v51  ;;  %v1743_v35 = vmul.f32 0.7978846, %v1711_v13  ;;  %v1710_v11 = vadd.f32 %v9619_v22, %v9594_v12  ;;  %v1788_v20 = vadd.f32 1.0, %v7938_v5 }
 0x28e   : > { %v7940_v6 = vpop.eup %7939  ;;  %v1729_v3 = vmul.f32 0.7978846, %v1697_v55  ;;  %v1713_v18 = vadd.f32 %v1681_v58, %v9651_v14  ;;  %7463 = vmatpush3.bf16.msra.mxu1 %v7826_v37  ;;  %v1835_v21 = vmul.f32 %v1803_v63, %v9602_v32  ;;  %v1726_v27 = vmul.f32 0.7978846, %v1694_v39  ;;  %v7834_v37 = vld [vmem:[#allocation18 + $0x120] sm:$0xff]   ;;  %v7836_v55 = vld [vmem:[#allocation18 + $0x168] sm:$0xff]  }
 0x28f   : > { %v7942_v30 = vpop.eup %7941  ;;  %7945 = vtanh.f32 %v1743_v35  ;;  %7464 = vmatprep.subr.bf16.mxu1 %v7829_v16  ;;  %v1804_v24 = vadd.f32 1.0, %v7940_v6  ;;  %v1742_v29 = vmul.f32 0.7978846, %v1710_v11  ;;  %v1650_v12 = vmul.f32 %v1618_v45, %v9657_v23  ;;  %v7835_v35 = vld [vmem:[#allocation18 + $0x1c8] sm:$0xff]  }
 0x290   : > { %7947 = vtanh.f32 %v1729_v3  ;;  %v1745_v17 = vmul.f32 0.7978846, %v1713_v18  ;;  %v1851_v22 = vpack.c.bf16 %v1835_v21, %v1819_v8  ;;  %v1466_v34 = vpop.f32.mrb[12].mxu0  ;;  %v1820_v31 = vmul.f32 %v1788_v20, %v9599_v26  ;;  %v7833_v26 = vld [vmem:[#allocation18 + $0x180] sm:$0xff]   ;;  %v7838_v20 = vld [vmem:[#allocation18 + $0x128] sm:$0xff]  }
 0x291   : > { %v1836_v57 = vmul.f32 %v1804_v24, %v9611_v15  ;;  %7949 = vtanh.f32 %v1726_v27  ;;  %v9694_v32 = vadd.f32 %v1466_v34, %v9564_v42  ;;  %v1468_v36 = vpop.f32.mrb[13].mxu0  ;;  %v1565_v39 = vmul.f32 0.5, %v9583_v10  ;;  %v7839_v34 = vld [vmem:[#allocation18 + $0x1d0] sm:$0xff]  }
 0x292   : > { %7465 = vmatpush3.bf16.msra.mxu1 %v7830_v19  ;;  %v1581_v40 = vmul.f32 0.5, %v9591_v9  ;;  %v1789_v51 = vadd.f32 1.0, %v7936_v4  ;;  %v1805_v13 = vadd.f32 1.0, %v7942_v30  ;;  %v1470_v45 = vpop.f32.mrb[14].mxu0  ;;  %7951 = vtanh.f32 %v1742_v29  ;;  %v7840_v29 = vld [vmem:[#allocation18 + $0x170] sm:$0xff]  }
 0x293   : > { %v1852_v16 = vpack.c.bf16 %v1836_v57, %v1820_v31  ;;  %7466 = vmatprep.subr.bf16.mxu1 %v7832_v38  ;;  %v1603_v15 = vmul.f32 0.044715, %v9694_v32  ;;  %v9700_v58 = vadd.f32 %v1468_v36, %v9567_v43  ;;  %v1472_v63 = vpop.f32.mrb[15].mxu0  ;;  %v1509_v5 = vpop.f32.mrb[12].mxu1  ;;  %7953 = vtanh.f32 %v1745_v17 }
 0x294   : > { %v1682_v10 = vmul.f32 %v1650_v12, %v9657_v23  ;;  %v9703_v9 = vmul.f32 %v1789_v51, %v1565_v39  ;;  %v9705_v4 = vmul.f32 %v1805_v13, %v1581_v40  ;;  %v1511_v8 = vpop.f32.mrb[13].mxu1  ;;  %v1696_v3 = vadd.f32 %v9671_v61, %v9626_v7  ;;  %v7842_v51 = vld [vmem:[#allocation18 + $0x130] sm:$0xff]  }
 0x295   : > { %2969 = vmatprep.mubr.bf16.mxu0 %v1852_v16  ;;  %v1635_v11 = vmul.f32 %v1603_v15, %v9694_v32  ;;  %v1604_v6 = vmul.f32 0.044715, %v9700_v58  ;;  %v1712_v18 = vadd.f32 %v9677_v41, %v9637_v54  ;;  %v9713_v19 = vpop.f32.mrb[14].mxu1  ;;  %v9718_v30 = vmul.f32 0.5, %v9626_v7  ;;  %v7837_v41 = vld [vmem:[#allocation18 + $0x188] sm:$0xff]   ;;  %v7844_v15 = vld [vmem:[#allocation18 + $0x178] sm:$0xff]  }
 0x296   : > { %2970 = vmatmul.mubr.bf16.vlgmr.msra.gmra.mrb[20].mxu0 %v1851_v22  ;;  %7467 = vmatpush3.bf16.msra.mxu1 %v7834_v37  ;;  %v1853_v21 = vpack.c.bf16 %v9705_v4, %v9703_v9  ;;  %v9721_v24 = vadd.f32 %v1470_v45, %v9564_v42  ;;  %v9724_v38 = vadd.f32 %v1472_v63, %v9567_v43  ;;  %v1515_v61 = vpop.f32.mrb[15].mxu1  ;;  %v1728_v22 = vmul.f32 0.7978846, %v1696_v3  ;;  %v7852_v4 = vld [vmem:[#allocation18 + $0x1a8] sm:$0xff]  }
 0x297   : > { %v9726_v27 = vpop.eup %7943  ;;  %7481 = vmatpush3.bf16.msra.mxu0 %v7833_v26  ;;  %7468 = vmatprep.subr.bf16.mxu1 %v7836_v55  ;;  %v1667_v17 = vmul.f32 %v1635_v11, %v9694_v32  ;;  %v1636_v12 = vmul.f32 %v1604_v6, %v9700_v58  ;;  %v1744_v7 = vmul.f32 0.7978846, %v1712_v18  ;;  %v9731_v42 = vmul.f32 0.5, %v9637_v54  ;;  %v7841_v55 = vld [vmem:[#allocation18 + $0x190] sm:$0xff]   ;;  %v7843_v6 = vld [vmem:[#allocation18 + $0x1d8] sm:$0xff]  }
 0x298   : > { %7482 = vmatprep.subr.bf16.mxu0 %v7835_v35  ;;  %v1619_v43 = vmul.f32 0.044715, %v9721_v24  ;;  %v1620_v31 = vmul.f32 0.044715, %v9724_v38  ;;  %v9736_v57 = vadd.f32 %v1509_v5, %v9570_v46  ;;  %7955 = vtanh.f32 %v1728_v22  ;;  %v7846_v22 = vld [vmem:[#allocation18 + $0x138] sm:$0xff]  }
 0x299   : > { %v9738_v36 = vpop.eup %7945  ;;  %v1699_v37 = vadd.f32 %v1667_v17, %v9694_v32  ;;  %v9742_v39 = vadd.f32 %v1511_v8, %v9573_v47  ;;  %v9745_v40 = vmul.f32 0.5, %v9645_v62  ;;  %7957 = vtanh.f32 %v1744_v7 }
 0x29a   : > { %v9747_v54 = vpop.eup %7947  ;;  %7469 = vmatpush3.bf16.msra.mxu1 %v7838_v20  ;;  %v1651_v13 = vmul.f32 %v1619_v43, %v9721_v24  ;;  %v1652_v45 = vmul.f32 %v1620_v31, %v9724_v38  ;;  %v1605_v16 = vmul.f32 0.044715, %v9736_v57  ;;  %v9753_v5 = vmul.f32 %v1636_v12, %v9700_v58  ;;  %v7845_v43 = vld [vmem:[#allocation18 + $0x198] sm:$0xff]   ;;  %v7849_v31 = vld [vmem:[#allocation18 + $0x240] sm:$0xff]  }
 0x29b   : > { %v7950_v26 = vpop.eup %7949  ;;  %7483 = vmatpush3.bf16.msra.mxu0 %v7837_v41  ;;  %7470 = vmatprep.subr.bf16.mxu1 %v7840_v29  ;;  %v1731_v63 = vmul.f32 0.7978846, %v1699_v37  ;;  %v1698_v35 = vadd.f32 %v9682_v33, %v9645_v62  ;;  %v1714_v8 = vadd.f32 %v1682_v10, %v9657_v23  ;;  %v9761_v20 = vmul.f32 0.5, %v9657_v23 }
 0x29c   : > { %v1790_v11 = vadd.f32 1.0, %v7950_v26  ;;  %7484 = vmatprep.subr.bf16.mxu0 %v7839_v34  ;;  %v1683_v3 = vmul.f32 %v1651_v13, %v9721_v24  ;;  %v1637_v18 = vmul.f32 %v1605_v16, %v9736_v57  ;;  %v7952_v41 = vpop.eup %7951  ;;  %v9764_v29 = vmul.f32 %v1652_v45, %v9724_v38  ;;  %v7847_v45 = vld [vmem:[#allocation18 + $0x1e0] sm:$0xff]  }
 0x29d   : > { %v1606_v17 = vmul.f32 0.044715, %v9742_v39  ;;  %v1730_v12 = vmul.f32 0.7978846, %v1698_v35  ;;  %v1746_v62 = vmul.f32 0.7978846, %v1714_v8  ;;  %v9767_v33 = vpop.eup %7953  ;;  %7959 = vtanh.f32 %v1731_v63 }
 0x29e   : > { %v1806_v10 = vadd.f32 1.0, %v7952_v41  ;;  %7471 = vmatpush3.bf16.msra.mxu1 %v7842_v51  ;;  %v1715_v7 = vadd.f32 %v1683_v3, %v9721_v24  ;;  %v1669_v34 = vmul.f32 %v1637_v18, %v9736_v57  ;;  %v1822_v23 = vmul.f32 %v1790_v11, %v9633_v44  ;;  %v7853_v3 = vld [vmem:[#allocation18 + $0x248] sm:$0xff]  }
 0x29f   : > { %7485 = vmatpush3.bf16.msra.mxu0 %v7841_v55  ;;  %7472 = vmatprep.subr.bf16.mxu1 %v7844_v15  ;;  %7961 = vtanh.f32 %v1730_v12  ;;  %v9774_v37 = vadd.f32 %v9713_v19, %v9570_v46  ;;  %v9777_v13 = vadd.f32 %v1515_v61, %v9573_v47  ;;  %v1567_v63 = vmul.f32 0.5, %v9623_v28  ;;  %v7850_v47 = vld [vmem:[#allocation18 + $0x200] sm:$0xff]  }
 0x2a0   : > { %v1838_v51 = vmul.f32 %v1806_v10, %v9663_v25  ;;  %7486 = vmatprep.subr.bf16.mxu0 %v7843_v6  ;;  %v1747_v16 = vmul.f32 0.7978846, %v1715_v7  ;;  %v1701_v26 = vadd.f32 %v1669_v34, %v9736_v57  ;;  %7963 = vtanh.f32 %v1746_v62  ;;  %v1552_v44 = vpop.f32.mrb[16].mxu0  ;;  %v7848_v6 = vld [vmem:[#allocation18 + $0x1a0] sm:$0xff]  }
 0x2a1   : > { %v1621_v55 = vmul.f32 0.044715, %v9774_v37  ;;  %v1622_v15 = vmul.f32 0.044715, %v9777_v13  ;;  %v1583_v46 = vmul.f32 0.5, %v9630_v60  ;;  %v1638_v25 = vmul.f32 %v1606_v17, %v9742_v39  ;;  %v1554_v8 = vpop.f32.mrb[17].mxu0 }
 0x2a2   : > { %v1854_v19 = vpack.c.bf16 %v1838_v51, %v1822_v23  ;;  %7473 = vmatpush3.bf16.msra.mxu1 %v7846_v22  ;;  %v1733_v61 = vmul.f32 0.7978846, %v1701_v26  ;;  %v1791_v35 = vadd.f32 1.0, %v9726_v27  ;;  %v7956_v11 = vpop.eup %7955  ;;  %7965 = vtanh.f32 %v1747_v16  ;;  %v1556_v41 = vpop.f32.mrb[18].mxu0  ;;  %v7851_v27 = vld [vmem:[#allocation18 + $0x1e8] sm:$0xff]  }
 0x2a3   : > { %7487 = vmatpush3.bf16.msra.mxu0 %v7845_v43  ;;  %7502 = vmatprep.subr.bf16.mxu1 %v7849_v31  ;;  %v1653_v18 = vmul.f32 %v1621_v55, %v9774_v37  ;;  %v1807_v28 = vadd.f32 1.0, %v9738_v36  ;;  %v9790_v60 = vadd.f32 %v1552_v44, %v9534_v52  ;;  %v7958_v12 = vpop.eup %7957  ;;  %v1792_v17 = vadd.f32 1.0, %v7956_v11  ;;  %v1558_v7 = vpop.f32.mrb[19].mxu0  ;;  %v7854_v31 = vld [vmem:[#allocation18 + $0x208] sm:$0xff]   ;;  %v7855_v55 = vld [vmem:[#allocation18 + $0x1f0] sm:$0xff]  }
 0x2a4   : > { %3010 = vmatprep.mubr.bf16.mxu1 %v1854_v19  ;;  %7488 = vmatprep.subr.bf16.mxu0 %v7847_v45  ;;  %v1654_v62 = vmul.f32 %v1622_v15, %v9777_v13  ;;  %v9793_v10 = vmul.f32 %v1791_v35, %v1567_v63  ;;  %v9796_v22 = vadd.f32 %v1554_v8, %v9576_v56  ;;  %v1808_v36 = vadd.f32 1.0, %v7958_v12  ;;  %v7857_v63 = vld [vmem:[#allocation18 + $0x250] sm:$0xff]  }
 0x2a5   : > { %3011 = vmatmul.mubr.bf16.vlgmr.msra.gmra.mrb[20].mxu1 %v1853_v21  ;;  %7967 = vtanh.f32 %v1733_v61  ;;  %v1685_v34 = vmul.f32 %v1653_v18, %v9774_v37  ;;  %v9802_v23 = vmul.f32 %v1807_v28, %v1583_v46  ;;  %v1824_v43 = vmul.f32 %v1792_v17, %v9718_v30  ;;  %v7861_v28 = vld [vmem:[#allocation18 + $0x258] sm:$0xff]  }
 0x2a6   : > { %7503 = vmatpush3.bf16.msra.mxu1 %v7850_v47  ;;  %v1607_v51 = vmul.f32 0.044715, %v9790_v60  ;;  %v1608_v45 = vmul.f32 0.044715, %v9796_v22  ;;  %v1569_v16 = vmul.f32 0.5, %v9640_v50  ;;  %v1840_v9 = vmul.f32 %v1808_v36, %v9731_v42  ;;  %v7859_v17 = vld [vmem:[#allocation18 + $0x1f8] sm:$0xff]  }
 0x2a7   : > { %7489 = vmatpush3.bf16.msra.mxu0 %v7848_v6  ;;  %7504 = vmatprep.subr.bf16.mxu1 %v7853_v3  ;;  %v1717_v21 = vadd.f32 %v1685_v34, %v9774_v37  ;;  %v1855_v26 = vpack.c.bf16 %v9802_v23, %v9793_v10  ;;  %v1585_v30 = vmul.f32 0.5, %v9651_v14  ;;  %v9813_v44 = vpop.eup %7959  ;;  %v1670_v15 = vmul.f32 %v1638_v25, %v9742_v39  ;;  %v7858_v6 = vld [vmem:[#allocation18 + $0x210] sm:$0xff]  }
 0x2a8   : > { %7490 = vmatprep.subr.bf16.mxu0 %v7851_v27  ;;  %v1639_v50 = vmul.f32 %v1607_v51, %v9790_v60  ;;  %v1793_v42 = vadd.f32 1.0, %v9747_v54  ;;  %v1809_v46 = vadd.f32 1.0, %v9767_v33  ;;  %v1856_v47 = vpack.c.bf16 %v1840_v9, %v1824_v43  ;;  %v7856_v54 = vld [vmem:[#allocation18 + $0x1b0] sm:$0xff]  }
 0x2a9   : > { %v7962_v19 = vpop.eup %7961  ;;  %v1749_v61 = vmul.f32 0.7978846, %v1717_v21  ;;  %v1686_v35 = vmul.f32 %v1654_v62, %v9777_v13  ;;  %v9821_v14 = vadd.f32 %v1556_v41, %v9534_v52  ;;  %v1640_v3 = vmul.f32 %v1608_v45, %v9796_v22  ;;  %v7862_v45 = vld [vmem:[#allocation18 + $0x218] sm:$0xff]   ;;  %v7871_v10 = vld [vmem:[#allocation18 + $0x2d0] sm:$0xff]  }
 0x2aa   : > { %v7964_v8 = vpop.eup %7963  ;;  %7505 = vmatpush3.bf16.msra.mxu1 %v7854_v31  ;;  %v1794_v11 = vadd.f32 1.0, %v7962_v19  ;;  %v1671_v25 = vmul.f32 %v1639_v50, %v9790_v60  ;;  %v9825_v18 = vmul.f32 %v1793_v42, %v1569_v16  ;;  %3051 = vmatprep.mubr.bf16.mxu0 %v1856_v47  ;;  %v9827_v12 = vmul.f32 %v1809_v46, %v1585_v30  ;;  %v7860_v21 = vld [vmem:[#allocation18 + $0x1b8] sm:$0xff]   ;;  %v7865_v47 = vld [vmem:[#allocation18 + $0x280] sm:$0xff]  }
 0x2ab   : > { %7491 = vmatpush3.bf16.msra.mxu0 %v7852_v4  ;;  %v1810_v33 = vadd.f32 1.0, %v7964_v8  ;;  %7969 = vtanh.f32 %v1749_v61  ;;  %v1623_v52 = vmul.f32 0.044715, %v9821_v14  ;;  %7506 = vmatprep.subr.bf16.mxu1 %v7857_v63  ;;  %v1700_v62 = vadd.f32 %v9753_v5, %v9700_v58  ;;  %v7866_v61 = vld [vmem:[#allocation18 + $0x220] sm:$0xff]  }
 0x2ac   : > { %7492 = vmatprep.subr.bf16.mxu0 %v7855_v55  ;;  %v1826_v41 = vmul.f32 %v1794_v11, %v9745_v40  ;;  %v1703_v27 = vadd.f32 %v1671_v25, %v9790_v60  ;;  %v7966_v36 = vpop.eup %7965  ;;  %v1857_v43 = vpack.c.bf16 %v9827_v12, %v9825_v18  ;;  %v1716_v51 = vadd.f32 %v9764_v29, %v9724_v38  ;;  %v7863_v29 = vld [vmem:[#allocation18 + $0x2c0] sm:$0xff]   ;;  %v7890_v18 = vld [vmem:[#allocation18 + $0x310] sm:$0xff]  }
 0x2ad   : > { %v1842_v34 = vmul.f32 %v1810_v33, %v9761_v20  ;;  %v1655_v31 = vmul.f32 %v1623_v52, %v9821_v14  ;;  %v1732_v16 = vmul.f32 0.7978846, %v1700_v62  ;;  %v9841_v9 = vadd.f32 %v1558_v7, %v9576_v56  ;;  %v7864_v20 = vld [vmem:[#allocation18 + $0x260] sm:$0xff]   ;;  %v7872_v62 = vld [vmem:[#allocation18 + $0x270] sm:$0xff]  }
 0x2ae   : > { %7507 = vmatpush3.bf16.msra.mxu1 %v7858_v6  ;;  %v1735_v40 = vmul.f32 0.7978846, %v1703_v27  ;;  %v1672_v30 = vmul.f32 %v1640_v3, %v9796_v22  ;;  %v1748_v63 = vmul.f32 0.7978846, %v1716_v51  ;;  %v1702_v42 = vadd.f32 %v1670_v15, %v9742_v39  ;;  %v7868_v15 = vld [vmem:[#allocation18 + $0x268] sm:$0xff]   ;;  %v7888_v12 = vld [vmem:[#allocation18 + $0x2b0] sm:$0xff]  }
 0x2af   : > { %v7968_v4 = vpop.eup %7967  ;;  %7493 = vmatpush3.bf16.msra.mxu0 %v7856_v54  ;;  %v1858_v5 = vpack.c.bf16 %v1842_v34, %v1826_v41  ;;  %7508 = vmatprep.subr.bf16.mxu1 %v7861_v28  ;;  %v1687_v55 = vmul.f32 %v1655_v31, %v9821_v14  ;;  %v1624_v50 = vmul.f32 0.044715, %v9841_v9  ;;  %v1718_v56 = vadd.f32 %v1686_v35, %v9777_v13 }
 0x2b0   : > { %7494 = vmatprep.subr.bf16.mxu0 %v7859_v17  ;;  %7971 = vtanh.f32 %v1735_v40  ;;  %v1571_v46 = vmul.f32 0.5, %v9694_v32  ;;  %v1587_v19 = vmul.f32 0.5, %v9721_v24  ;;  %v1734_v11 = vmul.f32 0.7978846, %v1702_v42  ;;  %v7867_v32 = vld [vmem:[#allocation18 + $0x2c8] sm:$0xff]   ;;  %v7874_v40 = vld [vmem:[#allocation18 + $0x230] sm:$0xff]  }
 0x2b1   : > { %3092 = vmatprep.mubr.bf16.mxu1 %v1858_v5  ;;  %v1719_v7 = vadd.f32 %v1687_v55, %v9821_v14  ;;  %7973 = vtanh.f32 %v1732_v16  ;;  %v1656_v8 = vmul.f32 %v1624_v50, %v9841_v9  ;;  %v1750_v6 = vmul.f32 0.7978846, %v1718_v56 }
 0x2b2   : > { %7509 = vmatpush3.bf16.msra.mxu1 %v7862_v45  ;;  %7975 = vtanh.f32 %v1748_v63  ;;  %v1795_v25 = vadd.f32 1.0, %v9813_v44  ;;  %v1811_v3 = vadd.f32 1.0, %v7966_v36  ;;  %v1573_v54 = vmul.f32 0.5, %v9736_v57  ;;  %v7870_v57 = vld [vmem:[#allocation18 + $0x228] sm:$0xff]   ;;  %v7875_v63 = vld [vmem:[#allocation18 + $0x2d8] sm:$0xff]  }
 0x2b3   : > { %7495 = vmatpush3.bf16.msra.mxu0 %v7860_v21  ;;  %7510 = vmatprep.subr.bf16.mxu1 %v7864_v20  ;;  %v1751_v35 = vmul.f32 0.7978846, %v1719_v7  ;;  %v1688_v24 = vmul.f32 %v1656_v8, %v9841_v9  ;;  %7977 = vtanh.f32 %v1734_v11  ;;  %v1589_v33 = vmul.f32 0.5, %v9774_v37  ;;  %v7869_v37 = vld [vmem:[#allocation18 + $0x288] sm:$0xff]   ;;  %v7873_v21 = vld [vmem:[#allocation18 + $0x290] sm:$0xff]   ;;  %v7876_v20 = vld [vmem:[#allocation18 + $0x278] sm:$0xff]  }
 0x2b4   : > { %7524 = vmatprep.subr.bf16.mxu0 %v7863_v29  ;;  %v1797_v28 = vadd.f32 1.0, %v7968_v4  ;;  %v9856_v41 = vmul.f32 %v1795_v25, %v1571_v46  ;;  %v9858_v17 = vmul.f32 %v1811_v3, %v1587_v19  ;;  %v1704_v34 = vadd.f32 %v1672_v30, %v9796_v22  ;;  %v7878_v46 = vld [vmem:[#allocation18 + $0x238] sm:$0xff]   ;;  %v7881_v8 = vld [vmem:[#allocation18 + $0x340] sm:$0xff]  }
 0x2b5   : > { %v7970_v52 = vpop.eup %7969  ;;  %7979 = vtanh.f32 %v1751_v35  ;;  %v1720_v31 = vadd.f32 %v1688_v24, %v9841_v9  ;;  %v1572_v16 = vmul.f32 0.5, %v9700_v58  ;;  %v1588_v30 = vmul.f32 0.5, %v9724_v38  ;;  %v7877_v38 = vld [vmem:[#allocation18 + $0x298] sm:$0xff]   ;;  %v7879_v35 = vld [vmem:[#allocation18 + $0x2e0] sm:$0xff]  }
 0x2b6   : > { %3052 = vmatmul.mubr.bf16.vlgmr.msra.gmra.mrb[24].mxu0 %v1855_v26  ;;  %7511 = vmatpush3.bf16.msra.mxu1 %v7866_v61  ;;  %7981 = vtanh.f32 %v1750_v6  ;;  %v1813_v44 = vadd.f32 1.0, %v7970_v52  ;;  %v9863_v27 = vmul.f32 %v1797_v28, %v1573_v54  ;;  %v1859_v36 = vpack.c.bf16 %v9858_v17, %v9856_v41  ;;  %v7885_v28 = vld [vmem:[#allocation18 + $0x348] sm:$0xff]   ;;  %v7905_v41 = vld [vmem:[#allocation18 + $0x390] sm:$0xff]   ;;  %v7908_v17 = vld [vmem:[#allocation18 + $0x378] sm:$0xff]  }
 0x2b7   : > { %7525 = vmatpush3.bf16.msra.mxu0 %v7865_v47  ;;  %7512 = vmatprep.subr.bf16.mxu1 %v7868_v15  ;;  %v1736_v26 = vmul.f32 0.7978846, %v1704_v34  ;;  %v1752_v51 = vmul.f32 0.7978846, %v1720_v31  ;;  %v1575_v50 = vmul.f32 0.5, %v9790_v60  ;;  %v1574_v56 = vmul.f32 0.5, %v9742_v39 }
 0x2b8   : > { %7526 = vmatprep.subr.bf16.mxu0 %v7867_v32  ;;  %v9869_v23 = vmul.f32 %v1813_v44, %v1589_v33  ;;  %v1591_v47 = vmul.f32 0.5, %v9821_v14  ;;  %v1590_v6 = vmul.f32 0.5, %v9777_v13  ;;  %v7882_v14 = vld [vmem:[#allocation18 + $0x300] sm:$0xff]   ;;  %v7883_v13 = vld [vmem:[#allocation18 + $0x2e8] sm:$0xff]   ;;  %v1592_v34 = vmul.f32 0.5, %v9841_v9 }
 0x2b9   : > { %7983 = vtanh.f32 %v1736_v26  ;;  %v7880_v33 = vld [vmem:[#allocation18 + $0x2a0] sm:$0xff]  }
 0x2ba   : > { %v7972_v45 = vpop.eup %7971  ;;  %7513 = vmatpush3.bf16.msra.mxu1 %v7870_v57  ;;  %v1861_v4 = vpack.c.bf16 %v9869_v23, %v9863_v27  ;;  %7985 = vtanh.f32 %v1752_v51  ;;  %v1576_v57 = vmul.f32 0.5, %v9796_v22  ;;  %v7884_v51 = vld [vmem:[#allocation18 + $0x2a8] sm:$0xff]   ;;  %v7918_v27 = vld [vmem:[#allocation18 + $0x3b0] sm:$0xff]   ;;  %v7920_v23 = vld [vmem:[#allocation18 + $0x3f8] sm:$0xff]  }
 0x2bb   : > { %v7974_v5 = vpop.eup %7973  ;;  %7527 = vmatpush3.bf16.msra.mxu0 %v7869_v37  ;;  %7514 = vmatprep.subr.bf16.mxu1 %v7872_v62  ;;  %v1799_v42 = vadd.f32 1.0, %v7972_v45  ;;  %v7889_v45 = vld [vmem:[#allocation18 + $0x350] sm:$0xff]  }
 0x2bc   : > { %v7976_v55 = vpop.eup %7975  ;;  %7528 = vmatprep.subr.bf16.mxu0 %v7871_v10  ;;  %v1796_v29 = vadd.f32 1.0, %v7974_v5  ;;  %v7886_v10 = vld [vmem:[#allocation18 + $0x308] sm:$0xff]  }
 0x2bd   : > { %v1812_v58 = vadd.f32 1.0, %v7976_v55  ;;  %v7978_v7 = vpop.eup %7977  ;;  %v9879_v39 = vmul.f32 %v1799_v42, %v1575_v50  ;;  %v9890_v55 = vpop.permute.xlu0 %5075  ;;  %v7898_v50 = vld [vmem:[#allocation18 + $0x320] sm:$0xff]  }
 0x2be   : > { %7515 = vmatpush3.bf16.msra.mxu1 %v7874_v40  ;;  %v1828_v19 = vmul.f32 %v1796_v29, %v1572_v16  ;;  %v1798_v15 = vadd.f32 1.0, %v7978_v7  ;;  %v7887_v40 = vld [vmem:[#allocation18 + $0x2f0] sm:$0xff]   ;;  %v7895_v29 = vld [vmem:[#allocation18 + $0x3c0] sm:$0xff]  }
 0x2bf   : > { %v7980_v61 = vpop.eup %7979  ;;  %7529 = vmatpush3.bf16.msra.mxu0 %v7873_v21  ;;  %7516 = vmatprep.subr.bf16.mxu1 %v7876_v20  ;;  %v1844_v11 = vmul.f32 %v1812_v58, %v1588_v30  ;;  %v7891_v21 = vld [vmem:[#allocation18 + $0x2f8] sm:$0xff]   ;;  %v7897_v42 = vld [vmem:[#allocation18 + $0x380] sm:$0xff]   ;;  %v7900_v58 = vld [vmem:[#allocation18 + $0x368] sm:$0xff]  }
 0x2c0   : > { %v7982_v60 = vpop.eup %7981  ;;  %7530 = vmatprep.subr.bf16.mxu0 %v7875_v63  ;;  %v1815_v25 = vadd.f32 1.0, %v7980_v61  ;;  %v1830_v32 = vmul.f32 %v1798_v15, %v1574_v56  ;;  %v7894_v20 = vld [vmem:[#allocation18 + $0x318] sm:$0xff]   ;;  %v7896_v63 = vld [vmem:[#allocation18 + $0x360] sm:$0xff]   ;;  %v7899_v56 = vld [vmem:[#allocation18 + $0x3c8] sm:$0xff]  }
 0x2c1   : > { %v1860_v3 = vpack.c.bf16 %v1844_v11, %v1828_v19  ;;  %v1814_v54 = vadd.f32 1.0, %v7982_v60  ;;  %v7892_v30 = vld [vmem:[#allocation18 + $0x2b8] sm:$0xff]   ;;  %v7902_v19 = vld [vmem:[#allocation18 + $0x328] sm:$0xff]   ;;  %v7904_v61 = vld [vmem:[#allocation18 + $0x370] sm:$0xff]  }
 0x2c2   : > { %7517 = vmatpush3.bf16.msra.mxu1 %v7878_v46  ;;  %v9881_v24 = vmul.f32 %v1815_v25, %v1591_v47  ;;  %v7901_v47 = vld [vmem:[#allocation18 + $0x388] sm:$0xff]   ;;  %v7906_v15 = vld [vmem:[#allocation18 + $0x330] sm:$0xff]   ;;  %v7910_v60 = vld [vmem:[#allocation18 + $0x338] sm:$0xff]  }
 0x2c3   : > { %7531 = vmatpush3.bf16.msra.mxu0 %v7877_v38  ;;  %7546 = vmatprep.subr.bf16.mxu1 %v7881_v8  ;;  %v1846_v52 = vmul.f32 %v1814_v54, %v1590_v6  ;;  %v7984_v37 = vpop.eup %7983  ;;  %v7903_v8 = vld [vmem:[#allocation18 + $0x3d0] sm:$0xff]   ;;  %v7911_v25 = vld [vmem:[#allocation18 + $0x3e0] sm:$0xff]  }
 0x2c4   : > { %7532 = vmatprep.subr.bf16.mxu0 %v7879_v35  ;;  %3133 = vmatprep.mubr.bf16.mxu0 %v1860_v3  ;;  %v1863_v44 = vpack.c.bf16 %v9881_v24, %v9879_v39  ;;  %v7986_v31 = vpop.eup %7985  ;;  %v1800_v26 = vadd.f32 1.0, %v7984_v37  ;;  %v7909_v35 = vld [vmem:[#allocation18 + $0x398] sm:$0xff]   ;;  %v7913_v3 = vld [vmem:[#allocation9] sm:$0xff]  }
 0x2c5   : > { %3093 = vmatmul.mubr.bf16.vlgmr.msra.gmra.mrb[24].mxu1 %v1857_v43  ;;  %v1862_v62 = vpack.c.bf16 %v1846_v52, %v1830_v32  ;;  %v1816_v22 = vadd.f32 1.0, %v7986_v31  ;;  %v7893_v43 = vld [vmem:[#allocation18 + $0x358] sm:$0xff]   ;;  %v7914_v32 = vld [vmem:[#allocation18 + $0x3e8] sm:$0xff]  }
 0x2c6   : > { %7547 = vmatpush3.bf16.msra.mxu1 %v7882_v14  ;;  %v1832_v16 = vmul.f32 %v1800_v26, %v1576_v57  ;;  %v7919_v37 = vld [vmem:[#allocation9 + $0x10] sm:$0xff]  }
 0x2c7   : > { %7533 = vmatpush3.bf16.msra.mxu0 %v7880_v33  ;;  %7548 = vmatprep.subr.bf16.mxu1 %v7885_v28  ;;  %v1848_v5 = vmul.f32 %v1816_v22, %v1592_v34  ;;  %v7916_v33 = vld [vmem:[#allocation9 + $0x8] sm:$0xff]   ;;  %v7915_v28 = vld [vmem:[#allocation18 + $0x3a8] sm:$0xff]  }
 0x2c8   : > { %7534 = vmatprep.subr.bf16.mxu0 %v7883_v13  ;;  %3174 = vmatprep.mubr.bf16.mxu1 %v1862_v62  ;;  %v7917_v13 = vld [vmem:[#allocation18 + $0x3f0] sm:$0xff]   ;;  %v7921_v62 = vld [vmem:[#allocation18 + $0x3b8] sm:$0xff]  }
 0x2c9   : > { %v1864_v9 = vpack.c.bf16 %v1848_v5, %v1832_v16  ;;  %v7265_v16 = vld [vmem:[#allocation20] ss:$0 sm:$0xff] }
 0x2ca   : > { %7549 = vmatpush3.bf16.msra.mxu1 %v7886_v10  ;;  %v8515_v10 = vld [vmem:[%s9459_s25] sm:$0xff]  }
 0x2cb   : > { %7535 = vmatpush3.bf16.msra.mxu0 %v7884_v51  ;;  %7550 = vmatprep.subr.bf16.mxu1 %v7889_v45 }
 0x2cc   : > { %7536 = vmatprep.subr.bf16.mxu0 %v7887_v40 }
 0x2ce   : > { %7551 = vmatpush3.bf16.msra.mxu1 %v7890_v18 }
 0x2cf   : > { %7537 = vmatpush3.bf16.msra.mxu0 %v7888_v12  ;;  %7552 = vmatprep.subr.bf16.mxu1 %v7893_v43 }
 0x2d0   : > { %7538 = vmatprep.subr.bf16.mxu0 %v7891_v21 }
 0x2d2   : > { %7553 = vmatpush3.bf16.msra.mxu1 %v7894_v20 }
 0x2d3   : > { %7539 = vmatpush3.bf16.msra.mxu0 %v7892_v30  ;;  %7554 = vmatprep.subr.bf16.mxu1 %v7896_v63 }
 0x2d4   : > { %7568 = vmatprep.subr.bf16.mxu0 %v7895_v29 }
 0x2d5   : > { %v728_v7 = vpop.permute.xlu0 %727 }
 0x2d6   : > { %3134 = vmatmul.mubr.bf16.vlgmr.msra.gmra.mrb[28].mxu0 %v1859_v36  ;;  %7555 = vmatpush3.bf16.msra.mxu1 %v7898_v50  ;;  %v733_v46 = vsub.f32 %v9541_v59, %v728_v7  ;;  %v7907_v36 = vld [vmem:[#allocation18 + $0x3d8] sm:$0xff]  }
 0x2d7   : > { %7569 = vmatpush3.bf16.msra.mxu0 %v7897_v42  ;;  %7556 = vmatprep.subr.bf16.mxu1 %v7900_v58 }
 0x2d8   : > { %v7191_v38 = vmul.f32 -1.442695, %v733_v46  ;;  %7570 = vmatprep.subr.bf16.mxu0 %v7899_v56  ;;  %3215 = vmatprep.mubr.bf16.mxu0 %v1864_v9 }
 0x2d9   : > { %v730_v11 = vpop.permute.xlu0 %729 }
 0x2da   : > { %7987 = vpow2.f32 %v7191_v38  ;;  %7557 = vmatpush3.bf16.msra.mxu1 %v7902_v19  ;;  %v734_v6 = vsub.f32 %v9544_v0, %v730_v11  ;;  %v7912_v0 = vld [vmem:[#allocation18 + $0x3a0] sm:$0xff]  }
 0x2db   : > { %7571 = vmatpush3.bf16.msra.mxu0 %v7901_v47  ;;  %7558 = vmatprep.subr.bf16.mxu1 %v7904_v61 }
 0x2dc   : > { %v7192_v59 = vmul.f32 -1.442695, %v734_v6  ;;  %7572 = vmatprep.subr.bf16.mxu0 %v7903_v8 }
 0x2de   : > { %7989 = vpow2.f32 %v7192_v59  ;;  %7559 = vmatpush3.bf16.msra.mxu1 %v7906_v15 }
 0x2df   : > { %7573 = vmatpush3.bf16.msra.mxu0 %v7905_v41  ;;  %7560 = vmatprep.subr.bf16.mxu1 %v7908_v17 }
 0x2e0   : > { %7574 = vmatprep.subr.bf16.mxu0 %v7907_v36 }
 0x2e2   : > { %7561 = vmatpush3.bf16.msra.mxu1 %v7910_v60 }
 0x2e3   : > { %7575 = vmatpush3.bf16.msra.mxu0 %v7909_v35  ;;  %7607 = vmatprep.subr.bf16.mxu1 %v9002_v1 }
 0x2e4   : > { %v7988_v54 = vpop.eup %7987  ;;  %7576 = vmatprep.subr.bf16.mxu0 %v7911_v25 }
 0x2e5   : > { %v741_v14 = vadd.f32 1.0, %v7988_v54  ;;  %3175 = vmatmul.mubr.bf16.vlgmr.msra.gmra.mrb[28].mxu1 %v1861_v4  ;;  %v7922_v4 = vld [vmem:[#allocation9 + $0x18] sm:$0xff]  }
 0x2e6   : > { %7608 = vmatpush3.bf16.msra.mxu1 %v7913_v3  ;;  %7615 = vmatprep.mubr.msk.bf16.mxu1 %vm9003_vm0, %v9002_v1  ;;  %vm5707_vm0 = vcmask 1048512  }
 0x2e7   : > { %7991 = vrcp.f32 %v741_v14  ;;  %7577 = vmatpush3.bf16.msra.mxu0 %v7912_v0  ;;  %7609 = vmatprep.subr.bf16.mxu1 %v9002_v1 }
 0x2e8   : > { %v7990_v52 = vpop.eup %7989  ;;  %7578 = vmatprep.subr.bf16.mxu0 %v7914_v32 }
 0x2e9   : > { %v742_v57 = vadd.f32 1.0, %v7990_v52 }
 0x2ea   : > { %7610 = vmatpush3.bf16.msra.mxu1 %v7916_v33 }
 0x2eb   : > { %7993 = vrcp.f32 %v742_v57  ;;  %7579 = vmatpush3.bf16.msra.mxu0 %v7915_v28  ;;  %7611 = vmatprep.subr.bf16.mxu1 %v9002_v1 }
 0x2ec   : > { %7580 = vmatprep.subr.bf16.mxu0 %v7917_v13 }
 0x2ee   : > { %7612 = vmatpush3.bf16.msra.mxu1 %v7919_v37 }
 0x2ef   : > { %7581 = vmatpush3.bf16.msra.mxu0 %v7918_v27  ;;  %7613 = vmatprep.subr.bf16.mxu1 %v9002_v1 }
 0x2f0   : > { %7582 = vmatprep.subr.bf16.mxu0 %v7920_v23 }
 0x2f1   : > { %v9906_v34 = vpop.eup %7991 }
 0x2f2   : > { %12619 = vst [vmem:[#allocation37_spill] sm:$0xff] %v9906_v34  ;;  %7614 = vmatpush3.bf16.msra.mxu1 %v7922_v4  ;;  %3244 = vperm.xlu1 %7785, %v9906_v34  }
 0x2f3   : > { %7583 = vmatpush3.bf16.msra.mxu0 %v7921_v62 }
 0x2f5   : > { %v9909_v31 = vpop.eup %7993  ;;  %7616 = vmatmul.mubr.msk.bf16.vlgmr.msra.gmra.mrb[32].mxu1 %vm680_vm1, %v8515_v10  ;;  %v9006_v10 = vmov 1966171168  }
 0x2f6   : > { %12620 = vst [vmem:[#allocation38_spill] sm:$0xff] %v9909_v31  ;;  %3216 = vmatmul.mubr.bf16.vlgmr.msra.gmra.mrb[32].mxu0 %v1863_v44  ;;  %3249 = vperm.xlu1 %7785, %v9909_v31  }
 0x358   : > { %v7430_v26 = vpop.f32.mrb[16].mxu1 }
 0x359   : > { %v7431_v1 = vpop.f32.mrb[17].mxu1 }
 0x35a   : > { %v7432_v51 = vadd.f32 %v7431_v1, %v7430_v26  ;;  %v7433_v45 = vpop.f32.mrb[18].mxu1  ;;  %v3350_v26 = vunpack.c.l.s4 %v9006_v10 }
 0x35b   : > { %v7434_v22 = vpop.f32.mrb[19].mxu1 }
 0x35c   : > { %v7435_v40 = vadd.f32 %v7434_v22, %v7433_v45  ;;  %v2931_v12 = vadd.f32 %v7432_v51, %v7265_v16  ;;  %v3351_v51 = vunpack.c.0.s8 %v3350_v26  ;;  %v10001_v26 = vld [vmem:[%s9467_s0 + $0x30] sm:$0xff] }
 0x35e   : > { %v2934_v20 = vadd.f32 %v7435_v40, %v7265_v16  ;;  %v3354_v45 = vsub.s32 %v3351_v51, %v9528_v49 }
 0x369   : > { %v7452_v5 = vpop.f32.mrb[20].mxu0 }
 0x36a   : > { %v7453_v18 = vpop.f32.mrb[21].mxu0 }
 0x36b   : > { %v7454_v43 = vadd.f32 %v7453_v18, %v7452_v5  ;;  %v7455_v9 = vpop.f32.mrb[22].mxu0 }
 0x36c   : > { %v7456_v21 = vpop.f32.mrb[23].mxu0 }
 0x36d   : > { %v2972_v30 = vadd.f32 %v7454_v43, %v2931_v12  ;;  %v7457_v63 = vadd.f32 %v7456_v21, %v7455_v9 }
 0x36f   : > { %v2975_v39 = vadd.f32 %v7457_v63, %v2934_v20 }
 0x378   : > { %v7474_v24 = vpop.f32.mrb[20].mxu1 }
 0x379   : > { %v7475_v44 = vpop.f32.mrb[21].mxu1 }
 0x37a   : > { %v7476_v29 = vadd.f32 %v7475_v44, %v7474_v24  ;;  %v7477_v50 = vpop.f32.mrb[22].mxu1 }
 0x37b   : > { %v7478_v42 = vpop.f32.mrb[23].mxu1 }
 0x37c   : > { %v3013_v58 = vadd.f32 %v7476_v29, %v2972_v30  ;;  %v7479_v56 = vadd.f32 %v7478_v42, %v7477_v50 }
 0x37e   : > { %v3016_v7 = vadd.f32 %v7479_v56, %v2975_v39 }
 0x389   : > { %v7496_v46 = vpop.f32.mrb[24].mxu0 }
 0x38a   : > { %v7497_v19 = vpop.f32.mrb[25].mxu0 }
 0x38b   : > { %v7498_v47 = vadd.f32 %v7497_v19, %v7496_v46  ;;  %v7499_v61 = vpop.f32.mrb[26].mxu0 }
 0x38c   : > { %v7500_v38 = vpop.f32.mrb[27].mxu0 }
 0x38d   : > { %v3054_v8 = vadd.f32 %v7498_v47, %v3013_v58  ;;  %v7501_v11 = vadd.f32 %v7500_v38, %v7499_v61 }
 0x38f   : > { %v3057_v6 = vadd.f32 %v7501_v11, %v3016_v7  ;;  %v9937_v11 = vld [vmem:[%s9467_s0 + $0x8] sm:$0xff] }
 0x398   : > { %v7518_v15 = vpop.f32.mrb[24].mxu1 }
 0x399   : > { %v7519_v41 = vpop.f32.mrb[25].mxu1 }
 0x39a   : > { %v7520_v17 = vadd.f32 %v7519_v41, %v7518_v15  ;;  %v7521_v59 = vpop.f32.mrb[26].mxu1  ;;  %v9944_v41 = vld [vmem:[%s9467_s0] sm:$0xff] }
 0x39b   : > { %v7522_v36 = vpop.f32.mrb[27].mxu1 }
 0x39c   : > { %v3095_v60 = vadd.f32 %v7520_v17, %v3054_v8  ;;  %v7523_v35 = vadd.f32 %v7522_v36, %v7521_v59  ;;  %v9947_v17 = vld [vmem:[%s9467_s0 + $0x10] sm:$0xff]  ;;  %v9950_v59 = vld [vmem:[%s9467_s0 + $0x48] sm:$0xff]  ;;  %v9953_v36 = vld [vmem:[%s9467_s0 + $0x18] sm:$0xff] }
 0x39e   : > { %v3098_v25 = vadd.f32 %v7523_v35, %v3057_v6  ;;  %v9959_v35 = vld [vmem:[%s9467_s0 + $0x58] sm:$0xff] }
 0x3a9   : > { %v7540_v3 = vpop.f32.mrb[28].mxu0 }
 0x3aa   : > { %v7541_v0 = vpop.f32.mrb[29].mxu0 }
 0x3ab   : > { %v7542_v54 = vadd.f32 %v7541_v0, %v7540_v3  ;;  %v7543_v32 = vpop.f32.mrb[30].mxu0 }
 0x3ac   : > { %v7544_v14 = vpop.f32.mrb[31].mxu0 }
 0x3ad   : > { %v3136_v33 = vadd.f32 %v7542_v54, %v3095_v60  ;;  %v7545_v28 = vadd.f32 %v7544_v14, %v7543_v32 }
 0x3af   : > { %v3139_v52 = vadd.f32 %v7545_v28, %v3098_v25  ;;  %v9976_v28 = vld [vmem:[%s9467_s0 + $0x68] sm:$0xff] }
 0x3b8   : > { %v7562_v13 = vpop.f32.mrb[28].mxu1 }
 0x3b9   : > { %v7563_v57 = vpop.f32.mrb[29].mxu1 }
 0x3ba   : > { %v7564_v37 = vadd.f32 %v7563_v57, %v7562_v13  ;;  %v7565_v27 = vpop.f32.mrb[30].mxu1 }
 0x3bb   : > { %v7566_v23 = vpop.f32.mrb[31].mxu1 }
 0x3bc   : > { %v3177_v4 = vadd.f32 %v7564_v37, %v3136_v33  ;;  %v7567_v62 = vadd.f32 %v7566_v23, %v7565_v27  ;;  %v9972_v33 = vld [vmem:[%s9467_s0 + $0x20] sm:$0xff]  ;;  %v9985_v37 = vld [vmem:[%s9467_s0 + $0x28] sm:$0xff]  ;;  %v9988_v27 = vld [vmem:[%s9467_s0 + $0x78] sm:$0xff] }
 0x3bd   : > { %v9990_v23 = vld [vmem:[#allocation11] ss:$0 sm:$0xff] }
 0x3be   : > { %v3180_v1 = vadd.f32 %v7567_v62, %v3139_v52 }
 0x3c8   : > { %v3322_v22 = vpop.f32.mrb[32].mxu1 }
 0x3c9   : > { %v7584_v40 = vpop.f32.mrb[32].mxu0  ;;  %v3348_v16 = vcombine.high %v3322_v22, %v3322_v22  ;;  %v3355_v5 = vrot.slane %v3322_v22, %v3354_v45  ;;  %v7617_v18 = vpop.f32.mrb[33].mxu1 }
 0x3ca   : > { %v7585_v12 = vpop.f32.mrb[33].mxu0  ;;  %v3325_v43 = vpop.f32.mrb[34].mxu1 }
 0x3cb   : > { %v7586_v9 = vadd.f32 %v7585_v12, %v7584_v40  ;;  %v3362_v21 = vrot.slane %v3348_v16, %v3354_v45  ;;  %v7587_v20 = vpop.f32.mrb[34].mxu0  ;;  %v7618_v30 = vpop.f32.mrb[35].mxu1  ;;  %v3397_v39 = vcombine.high %v3325_v43, %v3325_v43  ;;  %v3404_v24 = vrot.slane %v3325_v43, %v3354_v45 }
 0x3cc   : > { %v7588_v63 = vpop.f32.mrb[35].mxu0  ;;  %v9918_v29 = vrot.slane %v3355_v5, %v3354_v45  ;;  %v3363_v32 = vcombine.high %v3355_v5, %v3355_v5 }
 0x3cd   : > { %v3364_v44 = vcombine.high %v3362_v21, %v3362_v21  ;;  %v9920_v50 = vrot.slane %v3362_v21, %v3354_v45  ;;  %v7589_v42 = vadd.f32 %v7588_v63, %v7587_v20  ;;  %v3411_v58 = vrot.slane %v3397_v39, %v3354_v45 }
 0x3ce   : > { %v3412_v56 = vcombine.high %v3404_v24, %v3404_v24  ;;  %v9924_v19 = vrot.slane %v3404_v24, %v3354_v45  ;;  %v9928_v47 = vrot.slane %v9918_v29, %v9537_v53  ;;  %v9939_v6 = vadd.f32 %v7586_v9, %v3177_v4  ;;  %v10012_v9 = vld [vmem:[%s9467_s0 + $0x38] sm:$0xff] }
 0x3cf   : > { %v9922_v7 = vrot.slane %v3364_v44, %v3354_v45  ;;  %v3413_v46 = vcombine.high %v3411_v58, %v3411_v58  ;;  %v9930_v61 = vrot.slane %v3411_v58, %v3354_v45  ;;  %v9941_v15 = vadd.f32 %v7589_v42, %v3180_v1  ;;  %v10023_v58 = vld [vmem:[%s9467_s0 + $0x40] sm:$0xff] }
 0x3d0   : > { %12622 = vst [vmem:[#allocation40_spill] sm:$0xff] %v9924_v19  ;;  %v9932_v38 = vrot.slane %v3412_v56, %v3354_v45  ;;  %12626 = vst [vmem:[#allocation44_spill] sm:$0xff] %v9939_v6  ;;  %3224 = vmax.xlane.f32.xlu1 %v9939_v6  ;;  %v3527_v60 = vadd.f32 %v9928_v47, %v9937_v11  ;;  %v3526_v25 = vadd.f32 %v9928_v47, %v9944_v41 }
 0x3d1   : > { %12621 = vst [vmem:[#allocation39_spill] sm:$0xff] %v9922_v7  ;;  %12623 = vst [vmem:[#allocation41_spill] sm:$0xff] %v9930_v61  ;;  %v9934_v8 = vrot.slane %v3413_v46, %v3354_v45  ;;  %v3528_v3 = vadd.f32 %v9928_v47, %v9947_v17  ;;  %v3535_v0 = vadd.f32 %v9928_v47, %v9950_v59 }
 0x3d2   : > { %12624 = vst [vmem:[#allocation42_spill] sm:$0xff] %v9932_v38  ;;  %12627 = vst [vmem:[#allocation45_spill] sm:$0xff] %v9941_v15  ;;  %7995 = vtanh.f32 %v3527_v60  ;;  %v3529_v54 = vadd.f32 %v9928_v47, %v9953_v36  ;;  %v3537_v14 = vadd.f32 %v9928_v47, %v9959_v35  ;;  %v3530_v52 = vadd.f32 %v9928_v47, %v9972_v33 }
 0x3d3   : > { %12625 = vst [vmem:[#allocation43_spill] sm:$0xff] %v9934_v8  ;;  %7997 = vtanh.f32 %v3526_v25  ;;  %v9980_v13 = vrot.slane %v3363_v32, %v3354_v45  ;;  %v3539_v57 = vadd.f32 %v9928_v47, %v9976_v28  ;;  %v3531_v4 = vadd.f32 %v9928_v47, %v9985_v37 }
 0x3d4   : > { %3226 = vmax.xlane.f32.xlu1 %v9941_v15  ;;  %7999 = vtanh.f32 %v3528_v3  ;;  %v3541_v10 = vadd.f32 %v9928_v47, %v9988_v27  ;;  %v3532_v16 = vadd.f32 %v9928_v47, %v10001_v26  ;;  %v3533_v39 = vadd.f32 %v9928_v47, %v10012_v9 }
 0x3d5   : > { %8001 = vtanh.f32 %v3535_v0  ;;  %v9996_v62 = vrot.slane %v9980_v13, %v9537_v53  ;;  %v3534_v3 = vadd.f32 %v9928_v47, %v10023_v58 }
 0x3d6   : > { %8003 = vtanh.f32 %v3529_v54 }
 0x3d7   : > { %8005 = vtanh.f32 %v3537_v14  ;;  %v3543_v43 = vadd.f32 %v9996_v62, %v9937_v11  ;;  %v3545_v42 = vadd.f32 %v9996_v62, %v9953_v36  ;;  %v3547_v32 = vadd.f32 %v9996_v62, %v9985_v37  ;;  %v10034_v14 = vld [vmem:[%s9467_s0 + $0x50] sm:$0xff] }
 0x3d8   : > { %8007 = vtanh.f32 %v3530_v52 }
 0x3d9   : > { %8009 = vtanh.f32 %v3539_v57 }
 0x3da   : > { %8011 = vtanh.f32 %v3531_v4 }
 0x3db   : > { %8013 = vtanh.f32 %v3541_v10 }
 0x3dc   : > { %v7996_v1 = vpop.eup %7995  ;;  %8015 = vtanh.f32 %v3532_v16 }
 0x3dd   : > { %v7998_v51 = vpop.eup %7997  ;;  %v4045_v45 = vmul.f32 %v7996_v1, %v9990_v23  ;;  %8017 = vtanh.f32 %v3543_v43  ;;  %v3536_v1 = vadd.f32 %v9928_v47, %v10034_v14 }
 0x3de   : > { %v8000_v22 = vpop.eup %7999  ;;  %v4044_v40 = vmul.f32 %v7998_v51, %v9990_v23  ;;  %8019 = vtanh.f32 %v3533_v39 }
 0x3df   : > { %v8002_v5 = vpop.eup %8001  ;;  %v4303_v18 = vsel %vm680_vm1, %v4045_v45, 0.0  ;;  %v4046_v12 = vmul.f32 %v8000_v22, %v9990_v23  ;;  %8021 = vtanh.f32 %v3545_v42  ;;  %v3549_v22 = vadd.f32 %v9996_v62, %v10012_v9 }
 0x3e0   : > { %v8004_v21 = vpop.eup %8003  ;;  %4304 = vadd.xlane.f32.xlu0 %v4303_v18  ;;  %v4300_v20 = vsel %vm680_vm1, %v4044_v40, 0.0  ;;  %v4053_v30 = vmul.f32 %v8002_v5, %v9990_v23  ;;  %8023 = vtanh.f32 %v3534_v3  ;;  %v10045_v40 = vld [vmem:[%s9467_s0 + $0x60] sm:$0xff] }
 0x3e1   : > { %v8006_v63 = vpop.eup %8005  ;;  %4301 = vadd.xlane.f32.xlu1 %v4300_v20  ;;  %v4306_v24 = vsel %vm680_vm1, %v4046_v12, 0.0  ;;  %v4047_v44 = vmul.f32 %v8004_v21, %v9990_v23  ;;  %8025 = vtanh.f32 %v3547_v32  ;;  %v3538_v43 = vadd.f32 %v9928_v47, %v10045_v40 }
 0x3e2   : > { %v8008_v56 = vpop.eup %8007  ;;  %v4327_v46 = vsel %vm680_vm1, %v4053_v30, 0.0  ;;  %v4055_v60 = vmul.f32 %v8006_v63, %v9990_v23  ;;  %8027 = vtanh.f32 %v3536_v1  ;;  %v3551_v30 = vadd.f32 %v9996_v62, %v9950_v59  ;;  %v10056_v63 = vld [vmem:[%s9467_s0 + $0x70] sm:$0xff] }
 0x3e3   : > { %v8010_v25 = vpop.eup %8009  ;;  %v4309_v0 = vsel %vm680_vm1, %v4047_v44, 0.0  ;;  %v4048_v54 = vmul.f32 %v8008_v56, %v9990_v23  ;;  %8029 = vtanh.f32 %v3549_v22  ;;  %v3540_v56 = vadd.f32 %v9928_v47, %v10056_v63 }
 0x3e4   : > { %4307 = vadd.xlane.f32.xlu0 %v4306_v24  ;;  %v8012_v52 = vpop.eup %8011  ;;  %v4333_v57 = vsel %vm680_vm1, %v4055_v60, 0.0  ;;  %v4057_v4 = vmul.f32 %v8010_v25, %v9990_v23  ;;  %8031 = vtanh.f32 %v3538_v43  ;;  %v3553_v25 = vadd.f32 %v9996_v62, %v9959_v35 }
 0x3e5   : > { %4328 = vadd.xlane.f32.xlu1 %v4327_v46  ;;  %v8014_v10 = vpop.eup %8013  ;;  %v4312_v51 = vsel %vm680_vm1, %v4048_v54, 0.0  ;;  %v4049_v45 = vmul.f32 %v8012_v52, %v9990_v23  ;;  %8033 = vtanh.f32 %v3551_v30  ;;  %v3393_v52 = vcombine.high %v9918_v29, %v9918_v29 }
 0x3e6   : > { %v8016_v16 = vpop.eup %8015  ;;  %v4339_v5 = vsel %vm680_vm1, %v4057_v4, 0.0  ;;  %v4059_v18 = vmul.f32 %v8014_v10, %v9990_v23  ;;  %8035 = vtanh.f32 %v3540_v56  ;;  %v3542_v47 = vadd.f32 %v9996_v62, %v9944_v41 }
 0x3e7   : > { %v8018_v12 = vpop.eup %8017  ;;  %v4315_v21 = vsel %vm680_vm1, %v4049_v45, 0.0  ;;  %v4050_v20 = vmul.f32 %v8016_v16, %v9990_v23  ;;  %8037 = vtanh.f32 %v3553_v25  ;;  %v3555_v10 = vadd.f32 %v9996_v62, %v9976_v28 }
 0x3e8   : > { %4310 = vadd.xlane.f32.xlu0 %v4309_v0  ;;  %v8020_v39 = vpop.eup %8019  ;;  %v4345_v24 = vsel %vm680_vm1, %v4059_v18, 0.0  ;;  %v4061_v44 = vmul.f32 %v8018_v12, %v9990_v23  ;;  %v10079_v29 = vrot.slane %v3393_v52, %v9537_v53  ;;  %8039 = vtanh.f32 %v3542_v47 }
 0x3e9   : > { %4334 = vadd.xlane.f32.xlu1 %v4333_v57  ;;  %v8022_v42 = vpop.eup %8021  ;;  %v4318_v46 = vsel %vm680_vm1, %v4050_v20, 0.0  ;;  %v4051_v60 = vmul.f32 %v8020_v39, %v9990_v23  ;;  %v3544_v16 = vadd.f32 %v9996_v62, %v9947_v17  ;;  %8041 = vtanh.f32 %v3555_v10 }
 0x3ea   : > { %v8024_v3 = vpop.eup %8023  ;;  %v4351_v0 = vsel %vm680_vm1, %v4061_v44, 0.0  ;;  %v4063_v54 = vmul.f32 %v8022_v42, %v9990_v23  ;;  %v3557_v12 = vadd.f32 %v9996_v62, %v9988_v27  ;;  %v3546_v39 = vadd.f32 %v9996_v62, %v9972_v33 }
 0x3eb   : > { %v8026_v32 = vpop.eup %8025  ;;  %v4321_v57 = vsel %vm680_vm1, %v4051_v60, 0.0  ;;  %v4052_v4 = vmul.f32 %v8024_v3, %v9990_v23  ;;  %8043 = vtanh.f32 %v3544_v16  ;;  %v3559_v42 = vadd.f32 %v10079_v29, %v9937_v11 }
 0x3ec   : > { %4313 = vadd.xlane.f32.xlu0 %v4312_v51  ;;  %v8028_v1 = vpop.eup %8027  ;;  %v4357_v51 = vsel %vm680_vm1, %v4063_v54, 0.0  ;;  %v4065_v45 = vmul.f32 %v8026_v32, %v9990_v23  ;;  %8045 = vtanh.f32 %v3557_v12  ;;  %v3548_v3 = vadd.f32 %v9996_v62, %v10001_v26 }
 0x3ed   : > { %4340 = vadd.xlane.f32.xlu1 %v4339_v5  ;;  %v8030_v22 = vpop.eup %8029  ;;  %v4324_v5 = vsel %vm680_vm1, %v4052_v4, 0.0  ;;  %v4054_v18 = vmul.f32 %v8028_v1, %v9990_v23  ;;  %8047 = vtanh.f32 %v3546_v39  ;;  %v3561_v32 = vadd.f32 %v10079_v29, %v9953_v36 }
 0x3ee   : > { %v8032_v43 = vpop.eup %8031  ;;  %v4067_v20 = vmul.f32 %v8030_v22, %v9990_v23  ;;  %8049 = vtanh.f32 %v3559_v42  ;;  %v3550_v10 = vadd.f32 %v9996_v62, %v10023_v58  ;;  %v3552_v12 = vadd.f32 %v9996_v62, %v10034_v14 }
 0x3ef   : > { %v8034_v30 = vpop.eup %8033  ;;  %v4056_v44 = vmul.f32 %v8032_v43, %v9990_v23  ;;  %8051 = vtanh.f32 %v3548_v3  ;;  %v3554_v42 = vadd.f32 %v9996_v62, %v10045_v40 }
 0x3f0   : > { %4316 = vadd.xlane.f32.xlu0 %v4315_v21  ;;  %v4363_v21 = vsel %vm680_vm1, %v4065_v45, 0.0  ;;  %v8036_v56 = vpop.eup %8035  ;;  %v4069_v60 = vmul.f32 %v8034_v30, %v9990_v23  ;;  %8053 = vtanh.f32 %v3561_v32  ;;  %v3563_v45 = vadd.f32 %v10079_v29, %v9985_v37 }
 0x3f1   : > { %4346 = vadd.xlane.f32.xlu1 %v4345_v24  ;;  %v4330_v24 = vsel %vm680_vm1, %v4054_v18, 0.0  ;;  %v8038_v25 = vpop.eup %8037  ;;  %v4058_v54 = vmul.f32 %v8036_v56, %v9990_v23  ;;  %8055 = vtanh.f32 %v3550_v10  ;;  %v3556_v32 = vadd.f32 %v9996_v62, %v10056_v63 }
 0x3f2   : > { %v8040_v52 = vpop.eup %8039  ;;  %v4375_v47 = vsel %vm680_vm1, %v4069_v60, 0.0  ;;  %8057 = vtanh.f32 %v3563_v45  ;;  %v3567_v60 = vadd.f32 %v10079_v29, %v9950_v59  ;;  %v3558_v62 = vadd.f32 %v10079_v29, %v9944_v41 }
 0x3f3   : > { %v8042_v4 = vpop.eup %8041  ;;  %v4342_v1 = vsel %vm680_vm1, %v4058_v54, 0.0  ;;  %8059 = vtanh.f32 %v3552_v12 }
 0x3f4   : > { %4319 = vadd.xlane.f32.xlu0 %v4318_v46  ;;  %v4369_v46 = vsel %vm680_vm1, %v4067_v20, 0.0  ;;  %v3565_v20 = vadd.f32 %v10079_v29, %v10012_v9 }
 0x3f5   : > { %4352 = vadd.xlane.f32.xlu1 %v4351_v0  ;;  %v4336_v0 = vsel %vm680_vm1, %v4056_v44, 0.0  ;;  %v8044_v22 = vpop.eup %8043 }
 0x3f6   : > { %v8046_v18 = vpop.eup %8045  ;;  %8061 = vtanh.f32 %v3565_v20  ;;  %v3560_v20 = vadd.f32 %v10079_v29, %v9947_v17 }
 0x3f7   : > { %v8048_v30 = vpop.eup %8047  ;;  %8063 = vtanh.f32 %v3554_v42 }
 0x3f8   : > { %4322 = vadd.xlane.f32.xlu0 %v4321_v57  ;;  %v4071_v57 = vmul.f32 %v8038_v25, %v9990_v23  ;;  %v8050_v44 = vpop.eup %8049  ;;  %8065 = vtanh.f32 %v3567_v60  ;;  %v3562_v60 = vadd.f32 %v10079_v29, %v9972_v33 }
 0x3f9   : > { %4358 = vadd.xlane.f32.xlu1 %v4357_v51  ;;  %v4060_v51 = vmul.f32 %v8040_v52, %v9990_v23  ;;  %v8052_v25 = vpop.eup %8051  ;;  %8067 = vtanh.f32 %v3556_v32 }
 0x3fa   : > { %v4381_v16 = vsel %vm680_vm1, %v4071_v57, 0.0  ;;  %v8054_v54 = vpop.eup %8053  ;;  %v3569_v57 = vadd.f32 %v10079_v29, %v9959_v35 }
 0x3fb   : > { %v4348_v43 = vsel %vm680_vm1, %v4060_v51, 0.0 }
 0x3fc   : > { %4325 = vadd.xlane.f32.xlu0 %v4324_v5  ;;  %v4073_v5 = vmul.f32 %v8042_v4, %v9990_v23  ;;  %v8056_v4 = vpop.eup %8055  ;;  %8069 = vtanh.f32 %v3569_v57  ;;  %v3564_v57 = vadd.f32 %v10079_v29, %v10001_v26 }
 0x3fd   : > { %4364 = vadd.xlane.f32.xlu1 %v4363_v21  ;;  %v4062_v21 = vmul.f32 %v8044_v22, %v9990_v23  ;;  %v8058_v51 = vpop.eup %8057  ;;  %v4068_v22 = vmul.f32 %v8056_v4, %v9990_v23  ;;  %8071 = vtanh.f32 %v3558_v62 }
 0x3fe   : > { %v4387_v39 = vsel %vm680_vm1, %v4073_v5, 0.0  ;;  %v8060_v5 = vpop.eup %8059  ;;  %v4081_v12 = vmul.f32 %v8058_v51, %v9990_v23 }
 0x3ff   : > { %v4354_v56 = vsel %vm680_vm1, %v4062_v21, 0.0  ;;  %v10147_v21 = vrot.slane %v9920_v50, %v9537_v53 }
 0x400   : > { %4331 = vadd.xlane.f32.xlu0 %v4330_v24  ;;  %v4075_v24 = vmul.f32 %v8046_v18, %v9990_v23  ;;  %v4411_v42 = vsel %vm680_vm1, %v4081_v12, 0.0 }
 0x401   : > { %4370 = vadd.xlane.f32.xlu1 %v4369_v46  ;;  %v4064_v46 = vmul.f32 %v8048_v30, %v9990_v23  ;;  %v4372_v30 = vsel %vm680_vm1, %v4068_v22, 0.0  ;;  %v3595_v12 = vadd.f32 %v10147_v21, %v9985_v37 }
 0x402   : > { %v4393_v3 = vsel %vm680_vm1, %v4075_v24, 0.0  ;;  %v3573_v24 = vadd.f32 %v10079_v29, %v9988_v27 }
 0x403   : > { %v4360_v52 = vsel %vm680_vm1, %v4064_v46, 0.0 }
 0x404   : > { %4337 = vadd.xlane.f32.xlu0 %v4336_v0  ;;  %v4077_v0 = vmul.f32 %v8050_v44, %v9990_v23 }
 0x405   : > { %4376 = vadd.xlane.f32.xlu1 %v4375_v47  ;;  %v4066_v47 = vmul.f32 %v8052_v25, %v9990_v23 }
 0x406   : > { %v4399_v10 = vsel %vm680_vm1, %v4077_v0, 0.0  ;;  %v3591_v0 = vadd.f32 %v10147_v21, %v9937_v11 }
 0x407   : > { %v4366_v45 = vsel %vm680_vm1, %v4066_v47, 0.0 }
 0x408   : > { %4343 = vadd.xlane.f32.xlu0 %v4342_v1  ;;  %v4079_v1 = vmul.f32 %v8054_v54, %v9990_v23 }
 0x409   : > { %4382 = vadd.xlane.f32.xlu1 %v4381_v16  ;;  %v3571_v16 = vadd.f32 %v10079_v29, %v9976_v28 }
 0x40a   : > { %v4405_v18 = vsel %vm680_vm1, %v4079_v1, 0.0  ;;  %v3593_v1 = vadd.f32 %v10147_v21, %v9953_v36 }
 0x40b   : > { %8073 = vtanh.f32 %v3571_v16  ;;  %v3566_v16 = vadd.f32 %v10079_v29, %v10023_v58 }
 0x40c   : > { %4349 = vadd.xlane.f32.xlu0 %v4348_v43  ;;  %v8062_v43 = vpop.eup %8061  ;;  %8075 = vtanh.f32 %v3560_v20 }
 0x40d   : > { %4388 = vadd.xlane.f32.xlu1 %v4387_v39  ;;  %v4070_v39 = vmul.f32 %v8060_v5, %v9990_v23  ;;  %v8064_v44 = vpop.eup %8063  ;;  %8077 = vtanh.f32 %v3573_v24  ;;  %v3568_v24 = vadd.f32 %v10079_v29, %v10034_v14 }
 0x40e   : > { %v8066_v46 = vpop.eup %8065  ;;  %8079 = vtanh.f32 %v3562_v60 }
 0x40f   : > { %v4378_v25 = vsel %vm680_vm1, %v4070_v39, 0.0  ;;  %v8068_v54 = vpop.eup %8067  ;;  %8081 = vtanh.f32 %v3591_v0  ;;  %v3570_v0 = vadd.f32 %v10079_v29, %v10045_v40 }
 0x410   : > { %4355 = vadd.xlane.f32.xlu0 %v4354_v56  ;;  %v4083_v56 = vmul.f32 %v8062_v43, %v9990_v23  ;;  %v8070_v47 = vpop.eup %8069  ;;  %8083 = vtanh.f32 %v3564_v57 }
 0x411   : > { %4394 = vadd.xlane.f32.xlu1 %v4393_v3  ;;  %v4072_v3 = vmul.f32 %v8064_v44, %v9990_v23  ;;  %v8072_v51 = vpop.eup %8071  ;;  %8085 = vtanh.f32 %v3593_v1  ;;  %v3572_v1 = vadd.f32 %v10079_v29, %v10056_v63  ;;  %v3590_v29 = vadd.f32 %v10147_v21, %v9944_v41 }
 0x412   : > { %v4417_v32 = vsel %vm680_vm1, %v4083_v56, 0.0  ;;  %8087 = vtanh.f32 %v3566_v16  ;;  %v3597_v56 = vadd.f32 %v10147_v21, %v10012_v9 }
 0x413   : > { %v4384_v4 = vsel %vm680_vm1, %v4072_v3, 0.0  ;;  %8089 = vtanh.f32 %v3595_v12 }
 0x414   : > { %4361 = vadd.xlane.f32.xlu0 %v4360_v52  ;;  %v4085_v52 = vmul.f32 %v8066_v46, %v9990_v23  ;;  %8091 = vtanh.f32 %v3568_v24 }
 0x415   : > { %4400 = vadd.xlane.f32.xlu1 %v4399_v10  ;;  %v4074_v10 = vmul.f32 %v8068_v54, %v9990_v23  ;;  %v8074_v22 = vpop.eup %8073  ;;  %8093 = vtanh.f32 %v3597_v56  ;;  %v3592_v56 = vadd.f32 %v10147_v21, %v9947_v17 }
 0x416   : > { %v4423_v62 = vsel %vm680_vm1, %v4085_v52, 0.0  ;;  %v8076_v43 = vpop.eup %8075  ;;  %v3599_v52 = vadd.f32 %v10147_v21, %v9950_v59  ;;  %8095 = vtanh.f32 %v3570_v0 }
 0x417   : > { %v4390_v5 = vsel %vm680_vm1, %v4074_v10, 0.0  ;;  %v8078_v39 = vpop.eup %8077 }
 0x418   : > { %4367 = vadd.xlane.f32.xlu0 %v4366_v45  ;;  %v4087_v45 = vmul.f32 %v8070_v47, %v9990_v23  ;;  %v8080_v46 = vpop.eup %8079  ;;  %8097 = vtanh.f32 %v3599_v52  ;;  %v3594_v52 = vadd.f32 %v10147_v21, %v9972_v33 }
 0x419   : > { %4406 = vadd.xlane.f32.xlu1 %v4405_v18  ;;  %v4076_v18 = vmul.f32 %v8072_v51, %v9990_v23  ;;  %v8082_v3 = vpop.eup %8081  ;;  %8099 = vtanh.f32 %v3572_v1 }
 0x41a   : > { %v4429_v20 = vsel %vm680_vm1, %v4087_v45, 0.0  ;;  %v8084_v47 = vpop.eup %8083  ;;  %v3601_v45 = vadd.f32 %v10147_v21, %v9959_v35 }
 0x41b   : > { %v4396_v44 = vsel %vm680_vm1, %v4076_v18, 0.0  ;;  %v8086_v10 = vpop.eup %8085 }
 0x41c   : > { %4373 = vadd.xlane.f32.xlu0 %v4372_v30  ;;  %v4089_v30 = vmul.f32 %v8074_v22, %v9990_v23  ;;  %v8088_v22 = vpop.eup %8087  ;;  %8101 = vtanh.f32 %v3601_v45  ;;  %v3596_v45 = vadd.f32 %v10147_v21, %v10001_v26 }
 0x41d   : > { %4412 = vadd.xlane.f32.xlu1 %v4411_v42  ;;  %v4078_v42 = vmul.f32 %v8076_v43, %v9990_v23  ;;  %v8090_v18 = vpop.eup %8089  ;;  %v4084_v43 = vmul.f32 %v8088_v22, %v9990_v23  ;;  %8103 = vtanh.f32 %v3590_v29 }
 0x41e   : > { %v4435_v60 = vsel %vm680_vm1, %v4089_v30, 0.0  ;;  %v8092_v30 = vpop.eup %8091  ;;  %v4113_v24 = vmul.f32 %v8090_v18, %v9990_v23 }
 0x41f   : > { %v4402_v54 = vsel %vm680_vm1, %v4078_v42, 0.0  ;;  %v10215_v42 = vrot.slane %v9924_v19, %v9537_v53 }
 0x420   : > { %4379 = vadd.xlane.f32.xlu0 %v4378_v25  ;;  %v4091_v25 = vmul.f32 %v8078_v39, %v9990_v23  ;;  %v4507_v0 = vsel %vm680_vm1, %v4113_v24, 0.0 }
 0x421   : > { %4418 = vadd.xlane.f32.xlu1 %v4417_v32  ;;  %v4080_v32 = vmul.f32 %v8080_v46, %v9990_v23  ;;  %v4420_v46 = vsel %vm680_vm1, %v4084_v43, 0.0  ;;  %v3659_v24 = vadd.f32 %v10215_v42, %v9985_v37 }
 0x422   : > { %v4441_v57 = vsel %vm680_vm1, %v4091_v25, 0.0  ;;  %v3605_v25 = vadd.f32 %v10147_v21, %v9988_v27 }
 0x423   : > { %v4408_v51 = vsel %vm680_vm1, %v4080_v32, 0.0 }
 0x424   : > { %4385 = vadd.xlane.f32.xlu0 %v4384_v4  ;;  %v4109_v4 = vmul.f32 %v8082_v3, %v9990_v23 }
 0x425   : > { %4424 = vadd.xlane.f32.xlu1 %v4423_v62  ;;  %v4082_v62 = vmul.f32 %v8084_v47, %v9990_v23 }
 0x426   : > { %v4495_v16 = vsel %vm680_vm1, %v4109_v4, 0.0  ;;  %v3655_v4 = vadd.f32 %v10215_v42, %v9937_v11 }
 0x427   : > { %v4414_v12 = vsel %vm680_vm1, %v4082_v62, 0.0 }
 0x428   : > { %4391 = vadd.xlane.f32.xlu0 %v4390_v5  ;;  %v4111_v5 = vmul.f32 %v8086_v10, %v9990_v23 }
 0x429   : > { %4430 = vadd.xlane.f32.xlu1 %v4429_v20  ;;  %v3603_v20 = vadd.f32 %v10147_v21, %v9976_v28 }
 0x42a   : > { %v4501_v39 = vsel %vm680_vm1, %v4111_v5, 0.0  ;;  %v3657_v5 = vadd.f32 %v10215_v42, %v9953_v36 }
 0x42b   : > { %8105 = vtanh.f32 %v3603_v20  ;;  %v3598_v20 = vadd.f32 %v10147_v21, %v10023_v58 }
 0x42c   : > { %4397 = vadd.xlane.f32.xlu0 %v4396_v44  ;;  %v8094_v44 = vpop.eup %8093  ;;  %8107 = vtanh.f32 %v3592_v56 }
 0x42d   : > { %4436 = vadd.xlane.f32.xlu1 %v4435_v60  ;;  %v4086_v60 = vmul.f32 %v8092_v30, %v9990_v23  ;;  %v8096_v3 = vpop.eup %8095  ;;  %8109 = vtanh.f32 %v3605_v25  ;;  %v3600_v25 = vadd.f32 %v10147_v21, %v10034_v14 }
 0x42e   : > { %v8098_v32 = vpop.eup %8097  ;;  %8111 = vtanh.f32 %v3594_v52 }
 0x42f   : > { %v4426_v47 = vsel %vm680_vm1, %v4086_v60, 0.0  ;;  %v8100_v10 = vpop.eup %8099  ;;  %8113 = vtanh.f32 %v3655_v4  ;;  %v3602_v4 = vadd.f32 %v10147_v21, %v10045_v40 }
 0x430   : > { %4403 = vadd.xlane.f32.xlu0 %v4402_v54  ;;  %v4115_v54 = vmul.f32 %v8094_v44, %v9990_v23  ;;  %v8102_v62 = vpop.eup %8101  ;;  %8115 = vtanh.f32 %v3596_v45 }
 0x431   : > { %4442 = vadd.xlane.f32.xlu1 %v4441_v57  ;;  %v4088_v57 = vmul.f32 %v8096_v3, %v9990_v23  ;;  %v8104_v18 = vpop.eup %8103  ;;  %8117 = vtanh.f32 %v3657_v5  ;;  %v3604_v5 = vadd.f32 %v10147_v21, %v10056_v63  ;;  %v3654_v21 = vadd.f32 %v10215_v42, %v9944_v41 }
 0x432   : > { %v4513_v1 = vsel %vm680_vm1, %v4115_v54, 0.0  ;;  %8119 = vtanh.f32 %v3598_v20  ;;  %v3661_v54 = vadd.f32 %v10215_v42, %v10012_v9 }
 0x433   : > { %v4432_v22 = vsel %vm680_vm1, %v4088_v57, 0.0  ;;  %8121 = vtanh.f32 %v3659_v24  ;;  %v3395_v24 = vcombine.high %v9980_v13, %v9980_v13  ;;  %v10283_v13 = vpop.permute.xlu1 %3244 }
 0x434   : > { %4409 = vadd.xlane.f32.xlu0 %v4408_v51  ;;  %v4117_v51 = vmul.f32 %v8098_v32, %v9990_v23  ;;  %8123 = vtanh.f32 %v3600_v25  ;;  %12628 = vst [vmem:[#allocation46_spill] sm:$0xff] %v10283_v13  ;;  %v10514_v13 = vld [vmem:[%s9467_s0 + $0x28] sm:$0xff] }
 0x435   : > { %4496 = vadd.xlane.f32.xlu1 %v4495_v16  ;;  %v4090_v16 = vmul.f32 %v8100_v10, %v9990_v23  ;;  %v8106_v43 = vpop.eup %8105  ;;  %8125 = vtanh.f32 %v3661_v54  ;;  %v10286_v41 = vrot.slane %v3395_v24, %v9537_v53 }
 0x436   : > { %v4519_v29 = vsel %vm680_vm1, %v4117_v51, 0.0  ;;  %v8108_v44 = vpop.eup %8107  ;;  %v3663_v51 = vadd.f32 %v10215_v42, %v9950_v59  ;;  %8127 = vtanh.f32 %v3602_v4 }
 0x437   : > { %v4438_v30 = vsel %vm680_vm1, %v4090_v16, 0.0  ;;  %v8110_v60 = vpop.eup %8109 }
 0x438   : > { %4415 = vadd.xlane.f32.xlu0 %v4414_v12  ;;  %v4119_v12 = vmul.f32 %v8102_v62, %v9990_v23  ;;  %v8112_v32 = vpop.eup %8111  ;;  %8129 = vtanh.f32 %v3663_v51 }
 0x439   : > { %4502 = vadd.xlane.f32.xlu1 %v4501_v39  ;;  %v4108_v39 = vmul.f32 %v8104_v18, %v9990_v23  ;;  %v8114_v57 = vpop.eup %8113  ;;  %8131 = vtanh.f32 %v3604_v5 }
 0x43a   : > { %v4525_v56 = vsel %vm680_vm1, %v4119_v12, 0.0  ;;  %v8116_v62 = vpop.eup %8115  ;;  %v3665_v12 = vadd.f32 %v10215_v42, %v9959_v35  ;;  %v3667_v35 = vadd.f32 %v10215_v42, %v9976_v28 }
 0x43b   : > { %v4492_v3 = vsel %vm680_vm1, %v4108_v39, 0.0  ;;  %v8118_v16 = vpop.eup %8117 }
 0x43c   : > { %4421 = vadd.xlane.f32.xlu0 %v4420_v46  ;;  %v4121_v46 = vmul.f32 %v8106_v43, %v9990_v23  ;;  %v8120_v43 = vpop.eup %8119  ;;  %8133 = vtanh.f32 %v3665_v12 }
 0x43d   : > { %4508 = vadd.xlane.f32.xlu1 %v4507_v0  ;;  %v4110_v0 = vmul.f32 %v8108_v44, %v9990_v23  ;;  %v8122_v39 = vpop.eup %8121  ;;  %8135 = vtanh.f32 %v3654_v21  ;;  %v3579_v21 = vadd.f32 %v10286_v41, %v9985_v37 }
 0x43e   : > { %v4531_v52 = vsel %vm680_vm1, %v4121_v46, 0.0  ;;  %v8124_v46 = vpop.eup %8123  ;;  %v4177_v25 = vmul.f32 %v8122_v39, %v9990_v23  ;;  %8137 = vtanh.f32 %v3667_v35  ;;  %v3662_v39 = vadd.f32 %v10215_v42, %v10023_v58 }
 0x43f   : > { %v4498_v10 = vsel %vm680_vm1, %v4110_v0, 0.0  ;;  %v3656_v0 = vadd.f32 %v10215_v42, %v9947_v17  ;;  %v4118_v28 = vmul.f32 %v8124_v46, %v9990_v23  ;;  %v3658_v17 = vadd.f32 %v10215_v42, %v9972_v33 }
 0x440   : > { %4427 = vadd.xlane.f32.xlu0 %v4426_v47  ;;  %v4123_v47 = vmul.f32 %v8110_v60, %v9990_v23  ;;  %v3660_v33 = vadd.f32 %v10215_v42, %v10001_v26 }
 0x441   : > { %4514 = vadd.xlane.f32.xlu1 %v4513_v1  ;;  %v4112_v1 = vmul.f32 %v8112_v32, %v9990_v23  ;;  %v3669_v32 = vadd.f32 %v10215_v42, %v9988_v27  ;;  %8139 = vtanh.f32 %v3656_v0  ;;  %v3575_v27 = vadd.f32 %v10286_v41, %v9937_v11 }
 0x442   : > { %v4537_v45 = vsel %vm680_vm1, %v4123_v47, 0.0  ;;  %v4699_v47 = vsel %vm680_vm1, %v4177_v25, 0.0  ;;  %v3577_v11 = vadd.f32 %v10286_v41, %v9953_v36  ;;  %v3664_v25 = vadd.f32 %v10215_v42, %v10034_v14 }
 0x443   : > { %v4504_v18 = vsel %vm680_vm1, %v4112_v1, 0.0  ;;  %8141 = vtanh.f32 %v3669_v32  ;;  %v3581_v0 = vadd.f32 %v10286_v41, %v10012_v9 }
 0x444   : > { %4433 = vadd.xlane.f32.xlu0 %v4432_v22  ;;  %v4173_v22 = vmul.f32 %v8114_v57, %v9990_v23  ;;  %8143 = vtanh.f32 %v3658_v17  ;;  %v3666_v17 = vadd.f32 %v10215_v42, %v10045_v40 }
 0x445   : > { %4520 = vadd.xlane.f32.xlu1 %v4519_v29  ;;  %v4114_v29 = vmul.f32 %v8116_v62, %v9990_v23  ;;  %v10302_v62 = vpop.permute.xlu1 %3249  ;;  %8145 = vtanh.f32 %v3575_v27 }
 0x446   : > { %v4687_v20 = vsel %vm680_vm1, %v4173_v22, 0.0  ;;  %12629 = vst [vmem:[#allocation47_spill] sm:$0xff] %v10302_v62  ;;  %8147 = vtanh.f32 %v3660_v33 }
 0x447   : > { %v4510_v44 = vsel %vm680_vm1, %v4114_v29, 0.0  ;;  %8149 = vtanh.f32 %v3577_v11 }
 0x448   : > { %4439 = vadd.xlane.f32.xlu0 %v4438_v30  ;;  %v4175_v30 = vmul.f32 %v8118_v16, %v9990_v23  ;;  %8151 = vtanh.f32 %v3662_v39 }
 0x449   : > { %4526 = vadd.xlane.f32.xlu1 %v4525_v56  ;;  %v4116_v56 = vmul.f32 %v8120_v43, %v9990_v23  ;;  %8153 = vtanh.f32 %v3579_v21 }
 0x44a   : > { %v4693_v60 = vsel %vm680_vm1, %v4175_v30, 0.0  ;;  %v10317_v30 = vand.u32 127, %v817_v48  ;;  %8155 = vtanh.f32 %v3664_v25 }
 0x44b   : > { %v4516_v54 = vsel %vm680_vm1, %v4116_v56, 0.0 }
 0x44c   : > { %4493 = vadd.xlane.f32.xlu0 %v4492_v3  ;;  %v8126_v3 = vpop.eup %8125  ;;  %v5604_v35 = vadd.s32 4294967288, %v10317_v30  ;;  %v5611_v58 = vadd.s32 4294967280, %v10317_v30  ;;  %v10350_v9 = vsub.s32 %v10317_v30, %v9528_v49  ;;  %8157 = vtanh.f32 %v3581_v0 }
 0x44d   : > { %4532 = vadd.xlane.f32.xlu1 %v4531_v52  ;;  %v8128_v52 = vpop.eup %8127  ;;  %v4179_v57 = vmul.f32 %v8126_v3, %v9990_v23  ;;  %v5618_v11 = vadd.s32 4294967272, %v10317_v30  ;;  %8159 = vtanh.f32 %v3666_v17  ;;  %v5681_v15 = vadd.s32 4294967200, %v10317_v30 }
 0x44e   : > { %v8130_v4 = vpop.eup %8129  ;;  %v4120_v1 = vmul.f32 %v8128_v52, %v9990_v23  ;;  %v10341_v52 = vsub.s32 %v5604_v35, %v9528_v49  ;;  %v10356_v27 = vsub.s32 %v5611_v58, %v9528_v49 }
 0x44f   : > { %v8132_v51 = vpop.eup %8131  ;;  %v4181_v22 = vmul.f32 %v8130_v4, %v9990_v23 }
 0x450   : > { %4499 = vadd.xlane.f32.xlu0 %v4498_v10  ;;  %v4522_v10 = vsel %vm680_vm1, %v4118_v28, 0.0  ;;  %v8134_v16 = vpop.eup %8133  ;;  %v4528_v5 = vsel %vm680_vm1, %v4120_v1, 0.0 }
 0x451   : > { %4538 = vadd.xlane.f32.xlu1 %v4537_v45  ;;  %v4705_v45 = vsel %vm680_vm1, %v4179_v57, 0.0  ;;  %v8136_v29 = vpop.eup %8135  ;;  %v4711_v43 = vsel %vm680_vm1, %v4181_v22, 0.0  ;;  %v10346_v57 = vrot.slane %v9922_v7, %v9537_v53  ;;  %v10553_v7 = vld [vmem:[%s9467_s0 + $0x60] sm:$0xff] }
 0x452   : > { %v8138_v26 = vpop.eup %8137  ;;  %v4172_v36 = vmul.f32 %v8136_v29, %v9990_v23 }
 0x453   : > { %v4185_v48 = vmul.f32 %v8138_v26, %v9990_v23  ;;  %v5625_v26 = vadd.s32 4294967264, %v10317_v30 }
 0x454   : > { %4505 = vadd.xlane.f32.xlu0 %v4504_v18  ;;  %v4122_v18 = vmul.f32 %v8132_v51, %v9990_v23  ;;  %v4684_v37 = vsel %vm680_vm1, %v4172_v36, 0.0  ;;  %v3583_v51 = vadd.f32 %v10286_v41, %v9950_v59  ;;  %v3668_v36 = vadd.f32 %v10215_v42, %v10056_v63 }
 0x455   : > { %4688 = vadd.xlane.f32.xlu1 %v4687_v20  ;;  %v4183_v20 = vmul.f32 %v8134_v16, %v9990_v23  ;;  %v4723_v32 = vsel %vm680_vm1, %v4185_v48, 0.0  ;;  %v10379_v48 = vld [vmem:[%s9467_s0 + $0x58] sm:$0xff]  ;;  %v10386_v63 = vsub.s32 %v5618_v11, %v9528_v49 }
 0x456   : > { %v4534_v24 = vsel %vm680_vm1, %v4122_v18, 0.0  ;;  %8161 = vtanh.f32 %v3583_v51  ;;  %v3585_v35 = vadd.f32 %v10379_v48, %v10286_v41 }
 0x457   : > { %v4717_v56 = vsel %vm680_vm1, %v4183_v20, 0.0  ;;  %v5660_v20 = vadd.s32 4294967224, %v10317_v30  ;;  %8163 = vtanh.f32 %v3668_v36 }
 0x458   : > { %4511 = vadd.xlane.f32.xlu0 %v4510_v44  ;;  %v8140_v44 = vpop.eup %8139  ;;  %8165 = vtanh.f32 %v3585_v35 }
 0x459   : > { %4694 = vadd.xlane.f32.xlu1 %v4693_v60  ;;  %v8142_v46 = vpop.eup %8141  ;;  %v4174_v3 = vmul.f32 %v8140_v44, %v9990_v23 }
 0x45a   : > { %v4187_v14 = vmul.f32 %v8142_v46, %v9990_v23 }
 0x45b   : > { %v4690_v22 = vsel %vm680_vm1, %v4174_v3, 0.0  ;;  %v10390_v3 = vsub.s32 %v5660_v20, %v9528_v49  ;;  %v5639_v20 = vadd.s32 4294967248, %v10317_v30 }
 0x45c   : > { %4517 = vadd.xlane.f32.xlu0 %v4516_v54  ;;  %v8144_v54 = vpop.eup %8143 }
 0x45d   : > { %4700 = vadd.xlane.f32.xlu1 %v4699_v47  ;;  %v10312_v12 = vpop.xlane.xlu1 %3224  ;;  %v8146_v47 = vpop.eup %8145  ;;  %v4176_v16 = vmul.f32 %v8144_v54, %v9990_v23  ;;  %v5674_v54 = vadd.s32 4294967208, %v10317_v30 }
 0x45e   : > { %12630 = vst [vmem:[#allocation48_spill] sm:$0xff] %v10312_v12  ;;  %v8148_v33 = vpop.eup %8147  ;;  %v4093_v18 = vmul.f32 %v8146_v47, %v9990_v23 }
 0x45f   : > { %v8150_v29 = vpop.eup %8149  ;;  %v4696_v44 = vsel %vm680_vm1, %v4176_v16, 0.0 }
 0x460   : > { %4523 = vadd.xlane.f32.xlu0 %v4522_v10  ;;  %v8152_v46 = vpop.eup %8151  ;;  %v4447_v25 = vsel %vm680_vm1, %v4093_v18, 0.0  ;;  %v4095_v42 = vmul.f32 %v8150_v29, %v9990_v23  ;;  %v5632_v18 = vadd.s32 4294967256, %v10317_v30  ;;  %v10419_v29 = vsub.s32 %v5674_v54, %v9528_v49 }
 0x461   : > { %4706 = vadd.xlane.f32.xlu1 %v4705_v45  ;;  %v10328_v60 = vpop.xlane.xlu1 %3226 }
 0x462   : > { %12631 = vst [vmem:[#allocation49_spill] sm:$0xff] %v10328_v60  ;;  %v10442_v54 = vsub.s32 %v5632_v18, %v9528_v49 }
 0x464   : > { %4529 = vadd.xlane.f32.xlu0 %v4528_v5  ;;  %v4729_v5 = vsel %vm680_vm1, %v4187_v14, 0.0 }
 0x465   : > { %4712 = vadd.xlane.f32.xlu1 %v4711_v43 }
 0x468   : > { %4535 = vadd.xlane.f32.xlu0 %v4534_v24 }
 0x469   : > { %4718 = vadd.xlane.f32.xlu1 %v4717_v56  ;;  %v4178_v56 = vmul.f32 %v8148_v33, %v9990_v23  ;;  %v10401_v23 = vld [vmem:[%s9467_s0] sm:$0xff] }
 0x46a   : > { %v3574_v17 = vadd.f32 %v10401_v23, %v10286_v41 }
 0x46c   : > { %4685 = vadd.xlane.f32.xlu0 %v4684_v37  ;;  %v8154_v37 = vpop.eup %8153  ;;  %8167 = vtanh.f32 %v3574_v17 }
 0x46d   : > { %4724 = vadd.xlane.f32.xlu1 %v4723_v32  ;;  %v4305_v4 = vpop.xlane.xlu0 %4304  ;;  %v10394_v32 = vsub.s32 %v5625_v26, %v9528_v49  ;;  %v8156_v16 = vpop.eup %8155 }
 0x46e   : > { %v5079_v10 = vadd.f32 %v9890_v55, %v4305_v4  ;;  %v4302_v1 = vpop.xlane.xlu1 %4301  ;;  %v8158_v11 = vpop.eup %8157 }
 0x46f   : > { %v5078_v45 = vadd.f32 %v9890_v55, %v4302_v1  ;;  %v10406_v1 = vld [vmem:[#allocation11] ss:$0 sm:$0xff] }
 0x470   : > { %v5608_v40 = vrot.slane %v5079_v10, %v10341_v52  ;;  %4691 = vadd.xlane.f32.xlu0 %v4690_v22  ;;  %v4702_v10 = vsel %vm680_vm1, %v4178_v56, 0.0  ;;  %v4180_v51 = vmul.f32 %v10406_v1, %v8152_v46  ;;  %v8160_v56 = vpop.eup %8159  ;;  %v4182_v46 = vmul.f32 %v10406_v1, %v8156_v16 }
 0x471   : > { %v5603_v59 = vrot.slane %v5078_v45, %v10350_v9  ;;  %4730 = vadd.xlane.f32.xlu1 %v4729_v5  ;;  %v4308_v43 = vpop.xlane.xlu0 %4307  ;;  %v10410_v45 = vld [vmem:[%s9467_s0 + $0x68] sm:$0xff]  ;;  %v4097_v5 = vmul.f32 %v10406_v1, %v8154_v37 }
 0x472   : > { %v5080_v39 = vadd.f32 %v9890_v55, %v4308_v43  ;;  %v10371_v24 = vpop.xlane.xlu1 %4328  ;;  %v3587_v22 = vadd.f32 %v10410_v45, %v10286_v41  ;;  %v5688_v43 = vadd.s32 4294967192, %v10317_v30  ;;  %v4708_v35 = vsel %vm680_vm1, %v4180_v51, 0.0 }
 0x473   : > { %v5610_v21 = vsel %vm5609_vm2, %v5608_v40, %v5603_v59  ;;  %v4453_v40 = vsel %vm680_vm1, %v4095_v42, 0.0  ;;  %v8162_v42 = vpop.eup %8161  ;;  %v10450_v51 = vsub.s32 %v5639_v20, %v9528_v49  ;;  %v4714_v18 = vsel %vm680_vm1, %v4182_v46, 0.0 }
 0x474   : > { %v5615_v58 = vrot.slane %v5080_v39, %v10356_v27  ;;  %4697 = vadd.xlane.f32.xlu0 %v4696_v44  ;;  %8169 = vtanh.f32 %v3587_v22  ;;  %v8164_v20 = vpop.eup %8163 }
 0x475   : > { %4448 = vadd.xlane.f32.xlu1 %v4447_v25  ;;  %v4311_v0 = vpop.xlane.xlu0 %4310  ;;  %v8166_v46 = vpop.eup %8165 }
 0x476   : > { %v5617_v14 = vsel %vm12559_vm3, %v5615_v58, %v5610_v21  ;;  %v5081_v47 = vadd.f32 %v9890_v55, %v4311_v0  ;;  %v10398_v4 = vpop.xlane.xlu1 %4334  ;;  %v10428_v21 = vld [vmem:[%s9467_s0 + $0x10] sm:$0xff]  ;;  %v10435_v58 = vld [vmem:[%s9467_s0 + $0x78] sm:$0xff]  ;;  %v4459_v0 = vsel %vm680_vm1, %v4097_v5, 0.0 }
 0x477   : > { %v3576_v44 = vadd.f32 %v10428_v21, %v10286_v41  ;;  %v3589_v25 = vadd.f32 %v10435_v58, %v10286_v41  ;;  %v5089_v12 = vadd.f32 %v9890_v55, %v10398_v4 }
 0x478   : > { %v5622_v33 = vrot.slane %v5081_v47, %v10386_v63  ;;  %4703 = vadd.xlane.f32.xlu0 %v4702_v10  ;;  %v10446_v47 = vsub.s32 %v5688_v43, %v9528_v49  ;;  %v5702_v10 = vadd.s32 4294967176, %v10317_v30 }
 0x479   : > { %4454 = vadd.xlane.f32.xlu1 %v4453_v40  ;;  %v4314_v59 = vpop.xlane.xlu0 %4313  ;;  %8171 = vtanh.f32 %v3576_v44  ;;  %v10457_v40 = vld [vmem:[%s9467_s0 + $0x20] sm:$0xff]  ;;  %v4101_v44 = vmul.f32 %v10406_v1, %v8162_v42  ;;  %v10481_v42 = vld [vmem:[%s9467_s0 + $0x30] sm:$0xff] }
 0x47a   : > { %v5624_v26 = vsel %vm12560_vm4, %v5622_v33, %v5617_v14  ;;  %v5082_v39 = vadd.f32 %v9890_v55, %v4314_v59  ;;  %v10425_v36 = vpop.xlane.xlu1 %4340  ;;  %v4099_v14 = vmul.f32 %v10406_v1, %v8158_v11  ;;  %v3578_v5 = vadd.f32 %v10457_v40, %v10286_v41  ;;  %v10464_v59 = vld [vmem:[%s9467_s0 + $0x8] sm:$0xff] }
 0x47b   : > { %v4184_v11 = vmul.f32 %v10406_v1, %v8160_v56  ;;  %8173 = vtanh.f32 %v3589_v25  ;;  %v3607_v43 = vadd.f32 %v10464_v59, %v10346_v57  ;;  %v10473_v56 = vsub.s32 %v5702_v10, %v9528_v49 }
 0x47c   : > { %v5629_v37 = vrot.slane %v5082_v39, %v10394_v32  ;;  %4709 = vadd.xlane.f32.xlu0 %v4708_v35  ;;  %v4465_v39 = vsel %vm680_vm1, %v4099_v14, 0.0  ;;  %v5646_v35 = vadd.s32 4294967240, %v10317_v30  ;;  %8175 = vtanh.f32 %v3578_v5 }
 0x47d   : > { %4460 = vadd.xlane.f32.xlu1 %v4459_v0  ;;  %v4317_v17 = vpop.xlane.xlu0 %4316  ;;  %v4720_v10 = vsel %vm680_vm1, %v4184_v11, 0.0  ;;  %8177 = vtanh.f32 %v3607_v43  ;;  %v4471_v5 = vsel %vm680_vm1, %v4101_v44, 0.0  ;;  %v4103_v11 = vmul.f32 %v10406_v1, %v8166_v46 }
 0x47e   : > { %v5631_v22 = vsel %vm5630_vm5, %v5629_v37, %v5624_v26  ;;  %v5083_v16 = vadd.f32 %v9890_v55, %v4317_v17  ;;  %v10454_v33 = vpop.xlane.xlu1 %4346  ;;  %v5653_v37 = vadd.s32 4294967232, %v10317_v30  ;;  %v10495_v2 = vsub.s32 %v5646_v35, %v9528_v49  ;;  %v10507_v35 = vld [vmem:[%s9467_s0 + $0x40] sm:$0xff] }
 0x47f   : > { %v3582_v46 = vadd.f32 %v10507_v35, %v10286_v41 }
 0x480   : > { %v5636_v26 = vrot.slane %v5083_v16, %v10442_v54  ;;  %4715 = vadd.xlane.f32.xlu0 %v4714_v18  ;;  %v3580_v16 = vadd.f32 %v10481_v42, %v10286_v41  ;;  %v4186_v18 = vmul.f32 %v10406_v1, %v8164_v20  ;;  %v10499_v20 = vsub.s32 %v5653_v37, %v9528_v49 }
 0x481   : > { %4466 = vadd.xlane.f32.xlu1 %v4465_v39  ;;  %v4320_v25 = vpop.xlane.xlu0 %4319  ;;  %v10488_v39 = vld [vmem:[%s9467_s0 + $0x18] sm:$0xff] }
 0x482   : > { %v5638_v0 = vsel %vm12561_vm6, %v5636_v26, %v5631_v22  ;;  %v5084_v17 = vadd.f32 %v9890_v55, %v4320_v25  ;;  %v10478_v14 = vpop.xlane.xlu1 %4352  ;;  %v3609_v22 = vadd.f32 %v10488_v39, %v10346_v57  ;;  %v8168_v26 = vpop.eup %8167  ;;  %8179 = vtanh.f32 %v3580_v16 }
 0x483   : > { %v8170_v28 = vpop.eup %8169  ;;  %v4092_v37 = vmul.f32 %v10406_v1, %v8168_v26  ;;  %v4477_v16 = vsel %vm680_vm1, %v4103_v11, 0.0 }
 0x484   : > { %v5643_v25 = vrot.slane %v5084_v17, %v10450_v51  ;;  %4721 = vadd.xlane.f32.xlu0 %v4720_v10  ;;  %v5667_v17 = vadd.s32 4294967216, %v10317_v30  ;;  %8181 = vtanh.f32 %v3609_v22  ;;  %v4105_v31 = vmul.f32 %v10406_v1, %v8170_v28  ;;  %v10532_v28 = vld [vmem:[%s9467_s0 + $0x50] sm:$0xff] }
 0x485   : > { %4472 = vadd.xlane.f32.xlu1 %v4471_v5  ;;  %v4323_v43 = vpop.xlane.xlu0 %4322  ;;  %v4726_v5 = vsel %vm680_vm1, %v4186_v18, 0.0  ;;  %v5087_v22 = vadd.f32 %v9890_v55, %v10371_v24  ;;  %8183 = vtanh.f32 %v3582_v46  ;;  %v3584_v24 = vadd.f32 %v10532_v28, %v10286_v41 }
 0x486   : > { %v5645_v10 = vsel %vm5644_vm7, %v5643_v25, %v5638_v0  ;;  %v5085_v44 = vadd.f32 %v9890_v55, %v4323_v43  ;;  %v10504_v62 = vpop.xlane.xlu1 %4358  ;;  %v3611_v0 = vadd.f32 %v10514_v13, %v10346_v57  ;;  %v8172_v25 = vpop.eup %8171  ;;  %v10525_v60 = vsub.s32 %v5667_v17, %v9528_v49  ;;  %v10539_v17 = vld [vmem:[%s9467_s0 + $0x38] sm:$0xff] }
 0x487   : > { %v8174_v18 = vpop.eup %8173  ;;  %v4094_v34 = vmul.f32 %v10406_v1, %v8172_v25 }
 0x488   : > { %v5650_v43 = vrot.slane %v5085_v44, %v10495_v2  ;;  %4727 = vadd.xlane.f32.xlu0 %v4726_v5  ;;  %8185 = vtanh.f32 %v3611_v0  ;;  %v4107_v6 = vmul.f32 %v10406_v1, %v8174_v18  ;;  %v5664_v0 = vrot.slane %v5087_v22, %v10390_v3 }
 0x489   : > { %4478 = vadd.xlane.f32.xlu1 %v4477_v16  ;;  %v4326_v26 = vpop.xlane.xlu0 %4325  ;;  %v4444_v16 = vsel %vm680_vm1, %v4092_v37, 0.0  ;;  %v10547_v37 = vsub.s32 %v5681_v15, %v9528_v49  ;;  %8187 = vtanh.f32 %v3584_v24 }
 0x48a   : > { %v5652_v44 = vsel %vm5651_vm8, %v5650_v43, %v5645_v10  ;;  %v5086_v11 = vadd.f32 %v9890_v55, %v4326_v26  ;;  %v10529_v5 = vpop.xlane.xlu1 %4364  ;;  %v3613_v10 = vadd.f32 %v10539_v17, %v10346_v57  ;;  %v8176_v43 = vpop.eup %8175  ;;  %v4483_v26 = vsel %vm680_vm1, %v4105_v31, 0.0 }
 0x48b   : > { %v8178_v25 = vpop.eup %8177  ;;  %v4096_v61 = vmul.f32 %v10406_v1, %v8176_v43 }
 0x48c   : > { %v5657_v46 = vrot.slane %v5086_v11, %v10499_v20  ;;  %4445 = vadd.xlane.f32.xlu0 %v4444_v16  ;;  %v3586_v11 = vadd.f32 %v10553_v7, %v10286_v41  ;;  %v10562_v16 = vld [vmem:[%s9467_s0 + $0x48] sm:$0xff]  ;;  %8189 = vtanh.f32 %v3613_v10  ;;  %v8180_v19 = vpop.eup %8179  ;;  %v4125_v24 = vmul.f32 %v10406_v1, %v8178_v25  ;;  %v10577_v10 = vld [vmem:[%s9467_s0 + $0x70] sm:$0xff] }
 0x48d   : > { %4484 = vadd.xlane.f32.xlu1 %v4483_v26  ;;  %v4332_v8 = vpop.xlane.xlu0 %4331  ;;  %12632 = vst [vmem:[#allocation50_spill] sm:$0xff] %v10562_v16  ;;  %v3615_v4 = vadd.f32 %v10562_v16, %v10346_v57  ;;  %v4450_v26 = vsel %vm680_vm1, %v4094_v34, 0.0  ;;  %v5678_v16 = vrot.slane %v5089_v12, %v10419_v29  ;;  %v3588_v43 = vadd.f32 %v10577_v10, %v10286_v41 }
 0x48e   : > { %v5659_v31 = vsel %vm5658_vm9, %v5657_v46, %v5652_v44  ;;  %v5088_v18 = vadd.f32 %v9890_v55, %v4332_v8  ;;  %v10559_v15 = vpop.xlane.xlu1 %4370  ;;  %v4489_v8 = vsel %vm680_vm1, %v4107_v6, 0.0  ;;  %v5695_v46 = vadd.s32 4294967184, %v10317_v30  ;;  %v8182_v38 = vpop.eup %8181 }
 0x48f   : > { %v5666_v22 = vsel %vm5665_vm10, %v5664_v0, %v5659_v31  ;;  %v5091_v0 = vadd.f32 %v9890_v55, %v10425_v36  ;;  %8191 = vtanh.f32 %v3586_v11  ;;  %v3617_v12 = vadd.f32 %v10379_v48, %v10346_v57 }
 0x490   : > { %v5671_v44 = vrot.slane %v5088_v18, %v10525_v60  ;;  %4451 = vadd.xlane.f32.xlu0 %v4450_v26  ;;  %v4456_v36 = vsel %vm680_vm1, %v4096_v61, 0.0  ;;  %v4098_v18 = vmul.f32 %v10406_v1, %v8180_v19  ;;  %8193 = vtanh.f32 %v3615_v4  ;;  %v8184_v26 = vpop.eup %8183 }
 0x491   : > { %4490 = vadd.xlane.f32.xlu1 %v4489_v8  ;;  %v4338_v34 = vpop.xlane.xlu0 %4337  ;;  %v4127_v11 = vmul.f32 %v10406_v1, %v8182_v38  ;;  %v5093_v61 = vadd.f32 %v9890_v55, %v10454_v33  ;;  %8195 = vtanh.f32 %v3588_v43  ;;  %v3619_v38 = vadd.f32 %v10410_v45, %v10346_v57 }
 0x492   : > { %v5673_v6 = vsel %vm5672_vm11, %v5671_v44, %v5666_v22  ;;  %v5090_v25 = vadd.f32 %v9890_v55, %v4338_v34  ;;  %v10583_v31 = vpop.xlane.xlu1 %4376  ;;  %v4543_v22 = vsel %vm680_vm1, %v4125_v24, 0.0  ;;  %v10593_v44 = vsub.s32 %v5695_v46, %v9528_v49  ;;  %v8186_v8 = vpop.eup %8185 }
 0x493   : > { %v5680_v30 = vsel %vm5679_vm12, %v5678_v16, %v5673_v6  ;;  %v5692_v34 = vrot.slane %v5091_v0, %v10446_v47  ;;  %v3606_v16 = vadd.f32 %v10401_v23, %v10346_v57  ;;  %v4462_v33 = vsel %vm680_vm1, %v4098_v18, 0.0  ;;  %v8188_v6 = vpop.eup %8187 }
 0x494   : > { %v5685_v41 = vrot.slane %v5090_v25, %v10547_v37  ;;  %4457 = vadd.xlane.f32.xlu0 %v4456_v36  ;;  %v4100_v0 = vmul.f32 %v10406_v1, %v8184_v26  ;;  %8197 = vtanh.f32 %v3617_v12  ;;  %v5095_v25 = vadd.f32 %v9890_v55, %v10478_v14 }
 0x495   : > { %4544 = vadd.xlane.f32.xlu1 %v4543_v22  ;;  %v4344_v19 = vpop.xlane.xlu0 %4343  ;;  %v4549_v36 = vsel %vm680_vm1, %v4127_v11, 0.0  ;;  %v4129_v43 = vmul.f32 %v10406_v1, %v8186_v8  ;;  %v12633_v22 = vcombine.high %v9920_v50, %v9920_v50  ;;  %v5706_v12 = vrot.slane %v5093_v61, %v10473_v56 }
 0x496   : > { %v5687_v4 = vsel %vm5686_vm13, %v5685_v41, %v5680_v30  ;;  %v5092_v24 = vadd.f32 %v9890_v55, %v4344_v19  ;;  %v10603_v49 = vpop.xlane.xlu1 %4382  ;;  %v8190_v41 = vpop.eup %8189  ;;  %v3608_v14 = vadd.f32 %v10428_v21, %v10346_v57  ;;  %8199 = vtanh.f32 %v3606_v16 }
 0x497   : > { %v5694_v46 = vsel %vm12555_vm14, %v5692_v34, %v5687_v4  ;;  %v10619_v18 = vrot.slane %v12633_v22, %v9537_v53  ;;  %v3621_v8 = vadd.f32 %v10435_v58, %v10346_v57  ;;  %v4468_v61 = vsel %vm680_vm1, %v4100_v0, 0.0 }
 0x498   : > { %v5699_v30 = vrot.slane %v5092_v24, %v10593_v44  ;;  %4463 = vadd.xlane.f32.xlu0 %v4462_v33  ;;  %v4102_v4 = vmul.f32 %v10406_v1, %v8188_v6  ;;  %8201 = vtanh.f32 %v3619_v38  ;;  %v5716_v33 = vrot.slane %v5095_v25, %v10341_v52 }
 0x499   : > { %4550 = vadd.xlane.f32.xlu1 %v4549_v36  ;;  %v4350_v26 = vpop.xlane.xlu0 %4349  ;;  %v8192_v24 = vpop.eup %8191  ;;  %v4131_v16 = vmul.f32 %v10406_v1, %v8190_v41  ;;  %v5097_v22 = vadd.f32 %v9890_v55, %v10504_v62  ;;  %8203 = vtanh.f32 %v3608_v14  ;;  %v3610_v25 = vadd.f32 %v10457_v40, %v10346_v57 }
 0x49a   : > { %v5701_v34 = vsel %vm5700_vm15, %v5699_v30, %v5694_v46  ;;  %v5094_v11 = vadd.f32 %v9890_v55, %v4350_v26  ;;  %v10626_v19 = vpop.xlane.xlu1 %4388  ;;  %v4555_v30 = vsel %vm680_vm1, %v4129_v43, 0.0  ;;  %v8194_v36 = vpop.eup %8193  ;;  %v4474_v43 = vsel %vm680_vm1, %v4102_v4, 0.0 }
 0x49b   : > { %v10631_v50 = vsel %vm5707_vm0, %v5706_v12, %v5701_v34  ;;  %v4104_v41 = vmul.f32 %v10406_v1, %v8192_v24  ;;  %8205 = vtanh.f32 %v3621_v8  ;;  %v3623_v62 = vadd.f32 %v10464_v59, %v10619_v18  ;;  %v8196_v26 = vpop.eup %8195 }
 0x49c   : > { %v5712_v46 = vrot.slane %v5094_v11, %v10350_v9  ;;  %4469 = vadd.xlane.f32.xlu0 %v4468_v61  ;;  %v4561_v11 = vsel %vm680_vm1, %v4131_v16, 0.0  ;;  %v4133_v61 = vmul.f32 %v10406_v1, %v8194_v36  ;;  %v5099_v4 = vadd.f32 %v9890_v55, %v10529_v5 }
 0x49d   : > { %4556 = vadd.xlane.f32.xlu1 %v4555_v30  ;;  %v4356_v12 = vpop.xlane.xlu0 %4355  ;;  %v3612_v8 = vadd.f32 %v10481_v42, %v10346_v57  ;;  %8207 = vtanh.f32 %v3610_v25  ;;  %v3625_v16 = vadd.f32 %v10488_v39, %v10619_v18  ;;  %v4106_v5 = vmul.f32 %v10406_v1, %v8196_v26 }
 0x49e   : > { %v5717_v0 = vsel %vm5609_vm2, %v5716_v33, %v5712_v46  ;;  %v5096_v38 = vadd.f32 %v9890_v55, %v4356_v12  ;;  %v10643_v6 = vpop.xlane.xlu1 %4394  ;;  %v8198_v14 = vpop.eup %8197  ;;  %v5726_v33 = vrot.slane %v5097_v22, %v10386_v63  ;;  %v4480_v22 = vsel %vm680_vm1, %v4104_v41, 0.0 }
 0x49f   : > { %8209 = vtanh.f32 %v3623_v62  ;;  %v5736_v25 = vrot.slane %v5099_v4, %v10442_v54  ;;  %v3614_v41 = vadd.f32 %v10507_v35, %v10346_v57  ;;  %v4486_v4 = vsel %vm680_vm1, %v4106_v5, 0.0 }
 0x4a0   : > { %v5721_v34 = vrot.slane %v5096_v38, %v10356_v27  ;;  %4475 = vadd.xlane.f32.xlu0 %v4474_v43  ;;  %v8200_v38 = vpop.eup %8199  ;;  %8211 = vtanh.f32 %v3612_v8 }
 0x4a1   : > { %4562 = vadd.xlane.f32.xlu1 %v4561_v11  ;;  %v4362_v24 = vpop.xlane.xlu0 %4361  ;;  %8213 = vtanh.f32 %v3625_v16 }
 0x4a2   : > { %v5722_v46 = vsel %vm12559_vm3, %v5721_v34, %v5717_v0  ;;  %v5098_v30 = vadd.f32 %v9890_v55, %v4362_v24  ;;  %v10661_v12 = vpop.xlane.xlu1 %4400  ;;  %v4567_v0 = vsel %vm680_vm1, %v4133_v61, 0.0  ;;  %v4135_v34 = vmul.f32 %v10406_v1, %v8198_v14  ;;  %v8202_v11 = vpop.eup %8201 }
 0x4a3   : > { %v5727_v36 = vsel %vm12560_vm4, %v5726_v33, %v5722_v46  ;;  %v5101_v24 = vadd.f32 %v9890_v55, %v10559_v15  ;;  %v3627_v61 = vadd.f32 %v10514_v13, %v10619_v18  ;;  %v4124_v15 = vmul.f32 %v10406_v1, %v8200_v38 }
 0x4a4   : > { %v5731_v43 = vrot.slane %v5098_v30, %v10394_v32  ;;  %4481 = vadd.xlane.f32.xlu0 %v4480_v22  ;;  %v8204_v30 = vpop.eup %8203  ;;  %8215 = vtanh.f32 %v3614_v41 }
 0x4a5   : > { %4568 = vadd.xlane.f32.xlu1 %v4567_v0  ;;  %v4368_v33 = vpop.xlane.xlu0 %4367  ;;  %v8206_v0 = vpop.eup %8205  ;;  %v5746_v8 = vrot.slane %v5101_v24, %v10495_v2  ;;  %8217 = vtanh.f32 %v3627_v61  ;;  %v4540_v24 = vsel %vm680_vm1, %v4124_v15, 0.0 }
 0x4a6   : > { %v5732_v62 = vsel %vm5630_vm5, %v5731_v43, %v5727_v36  ;;  %v5100_v26 = vadd.f32 %v9890_v55, %v4368_v33  ;;  %v10678_v46 = vpop.xlane.xlu1 %4406  ;;  %v4573_v36 = vsel %vm680_vm1, %v4135_v34, 0.0  ;;  %v4137_v43 = vmul.f32 %v10406_v1, %v8202_v11 }
 0x4a7   : > { %v5737_v14 = vsel %vm12561_vm6, %v5736_v25, %v5732_v62  ;;  %v5103_v33 = vadd.f32 %v9890_v55, %v10583_v31  ;;  %v3616_v34 = vadd.f32 %v10532_v28, %v10346_v57  ;;  %v4126_v62 = vmul.f32 %v10406_v1, %v8204_v30  ;;  %v8208_v41 = vpop.eup %8207 }
 0x4a8   : > { %v5741_v22 = vrot.slane %v5100_v26, %v10450_v51  ;;  %4487 = vadd.xlane.f32.xlu0 %v4486_v4  ;;  %v3629_v31 = vadd.f32 %v10539_v17, %v10619_v18  ;;  %v4139_v61 = vmul.f32 %v10406_v1, %v8206_v0  ;;  %v3618_v30 = vadd.f32 %v10553_v7, %v10346_v57 }
 0x4a9   : > { %4574 = vadd.xlane.f32.xlu1 %v4573_v36  ;;  %v4374_v25 = vpop.xlane.xlu0 %4373  ;;  %v8210_v4 = vpop.eup %8209  ;;  %v5105_v36 = vadd.f32 %v9890_v55, %v10603_v49  ;;  %8219 = vtanh.f32 %v3616_v34  ;;  %v4128_v49 = vmul.f32 %v10406_v1, %v8208_v41 }
 0x4aa   : > { %v5742_v5 = vsel %vm5644_vm7, %v5741_v22, %v5737_v14  ;;  %v5102_v16 = vadd.f32 %v9890_v55, %v4374_v25  ;;  %v10693_v38 = vpop.xlane.xlu1 %4412  ;;  %v4579_v14 = vsel %vm680_vm1, %v4137_v43, 0.0  ;;  %v5756_v22 = vrot.slane %v5103_v33, %v10390_v3  ;;  %v12634_v43 = vld [vmem:[#allocation50_spill] sm:$0xff] }
 0x4ab   : > { %v5747_v11 = vsel %vm5651_vm8, %v5746_v8, %v5742_v5  ;;  %v3631_v0 = vadd.f32 %v12634_v43, %v10619_v18  ;;  %8221 = vtanh.f32 %v3629_v31  ;;  %v5766_v34 = vrot.slane %v5105_v36, %v10419_v29 }
 0x4ac   : > { %v5751_v26 = vrot.slane %v5102_v16, %v10499_v20  ;;  %4541 = vadd.xlane.f32.xlu0 %v4540_v24  ;;  %v4546_v16 = vsel %vm680_vm1, %v4126_v62, 0.0  ;;  %v8212_v24 = vpop.eup %8211  ;;  %v5107_v43 = vadd.f32 %v9890_v55, %v10626_v19  ;;  %v3620_v62 = vadd.f32 %v10577_v10, %v10346_v57 }
 0x4ad   : > { %4580 = vadd.xlane.f32.xlu1 %v4579_v14  ;;  %v4380_v15 = vpop.xlane.xlu0 %4379  ;;  %8223 = vtanh.f32 %v3618_v30  ;;  %v4552_v19 = vsel %vm680_vm1, %v4128_v49, 0.0  ;;  %v3622_v49 = vadd.f32 %v10401_v23, %v10619_v18 }
 0x4ae   : > { %v5752_v8 = vsel %vm5658_vm9, %v5751_v26, %v5747_v11  ;;  %v5104_v25 = vadd.f32 %v9890_v55, %v4380_v15  ;;  %v10712_v5 = vpop.xlane.xlu1 %4418  ;;  %v4585_v11 = vsel %vm680_vm1, %v4139_v61, 0.0  ;;  %v4141_v26 = vmul.f32 %v10406_v1, %v8210_v4  ;;  %v8214_v15 = vpop.eup %8213 }
 0x4af   : > { %v5757_v33 = vsel %vm5665_vm10, %v5756_v22, %v5752_v8  ;;  %v3633_v61 = vadd.f32 %v10379_v48, %v10619_v18  ;;  %v8216_v4 = vpop.eup %8215  ;;  %8225 = vtanh.f32 %v3631_v0  ;;  %v5776_v30 = vrot.slane %v5107_v43, %v10446_v47 }
 0x4b0   : > { %v5761_v14 = vrot.slane %v5104_v25, %v10525_v60  ;;  %4547 = vadd.xlane.f32.xlu0 %v4546_v16  ;;  %v4130_v25 = vmul.f32 %v10406_v1, %v8212_v24  ;;  %v8218_v16 = vpop.eup %8217  ;;  %8227 = vtanh.f32 %v3620_v62 }
 0x4b1   : > { %4586 = vadd.xlane.f32.xlu1 %v4585_v11  ;;  %v4386_v22 = vpop.xlane.xlu0 %4385  ;;  %v5109_v11 = vadd.f32 %v9890_v55, %v10643_v6  ;;  %8229 = vtanh.f32 %v3633_v61  ;;  %v4145_v62 = vmul.f32 %v10406_v1, %v8218_v16  ;;  %v3624_v16 = vadd.f32 %v10428_v21, %v10619_v18 }
 0x4b2   : > { %v5762_v31 = vsel %vm5672_vm11, %v5761_v14, %v5757_v33  ;;  %v5106_v41 = vadd.f32 %v9890_v55, %v4386_v22  ;;  %v10729_v8 = vpop.xlane.xlu1 %4424  ;;  %v4591_v33 = vsel %vm680_vm1, %v4141_v26, 0.0  ;;  %v4143_v14 = vmul.f32 %v10406_v1, %v8214_v15 }
 0x4b3   : > { %v5767_v36 = vsel %vm5679_vm12, %v5766_v34, %v5762_v31  ;;  %v3635_v26 = vadd.f32 %v10410_v45, %v10619_v18  ;;  %v4558_v6 = vsel %vm680_vm1, %v4130_v25, 0.0  ;;  %v4132_v15 = vmul.f32 %v10406_v1, %v8216_v4  ;;  %v8220_v31 = vpop.eup %8219 }
 0x4b4   : > { %v5771_v57 = vrot.slane %v5106_v41, %v10547_v37  ;;  %4553 = vadd.xlane.f32.xlu0 %v4552_v19  ;;  %v12635_v41 = vld [vmem:[#allocation42_spill] sm:$0xff]  ;;  %v5111_v19 = vadd.f32 %v9890_v55, %v10661_v12  ;;  %v5786_v25 = vrot.slane %v5109_v11, %v10473_v56  ;;  %8231 = vtanh.f32 %v3622_v49 }
 0x4b5   : > { %4592 = vadd.xlane.f32.xlu1 %v4591_v33  ;;  %v4392_v34 = vpop.xlane.xlu0 %4391  ;;  %v8222_v33 = vpop.eup %8221  ;;  %8233 = vtanh.f32 %v3635_v26  ;;  %v4564_v11 = vsel %vm680_vm1, %v4132_v15, 0.0  ;;  %v4134_v49 = vmul.f32 %v10406_v1, %v8220_v31  ;;  %v5113_v15 = vadd.f32 %v9890_v55, %v10678_v46 }
 0x4b6   : > { %v5772_v0 = vsel %vm5686_vm13, %v5771_v57, %v5767_v36  ;;  %v5108_v24 = vadd.f32 %v9890_v55, %v4392_v34  ;;  %v10746_v22 = vpop.xlane.xlu1 %4430  ;;  %v10756_v36 = vrot.slane %v12635_v41, %v9537_v53  ;;  %v4597_v57 = vsel %vm680_vm1, %v4143_v14, 0.0 }
 0x4b7   : > { %v5777_v43 = vsel %vm12555_vm14, %v5776_v30, %v5772_v0  ;;  %vm12556_vm14 = vcmask 1041409   ;;  %v3637_v14 = vadd.f32 %v10435_v58, %v10619_v18  ;;  %8235 = vtanh.f32 %v3624_v16 }
 0x4b8   : > { %v5781_v61 = vrot.slane %v5108_v24, %v10593_v44  ;;  %4559 = vadd.xlane.f32.xlu0 %v4558_v6  ;;  %v4603_v24 = vsel %vm680_vm1, %v4145_v62, 0.0  ;;  %v8224_v6 = vpop.eup %8223  ;;  %v3671_v46 = vadd.f32 %v10464_v59, %v10756_v36 }
 0x4b9   : > { %4598 = vadd.xlane.f32.xlu1 %v4597_v57  ;;  %v4398_v4 = vpop.xlane.xlu0 %4397  ;;  %v5795_v57 = vrot.slane %v5111_v19, %v10341_v52  ;;  %8237 = vtanh.f32 %v3637_v14  ;;  %v3628_v14 = vadd.f32 %v10481_v42, %v10619_v18 }
 0x4ba   : > { %v5782_v30 = vsel %vm5700_vm15, %v5781_v61, %v5777_v43  ;;  %v5110_v34 = vadd.f32 %v9890_v55, %v4398_v4  ;;  %v10767_v12 = vpop.xlane.xlu1 %4436  ;;  %v4147_v61 = vmul.f32 %v10406_v1, %v8222_v33  ;;  %v8226_v4 = vpop.eup %8225  ;;  %v4136_v33 = vmul.f32 %v10406_v1, %v8224_v6 }
 0x4bb   : > { %v5787_v0 = vsel %vm5707_vm0, %v5786_v25, %v5782_v30  ;;  %v8228_v30 = vpop.eup %8227  ;;  %v4149_v16 = vmul.f32 %v10406_v1, %v8226_v4 }
 0x4bc   : > { %v10778_v43 = vsel %vm12556_vm14, %v5787_v0, %v10631_v50  ;;  %v5791_v26 = vrot.slane %v5110_v34, %v10350_v9  ;;  %4565 = vadd.xlane.f32.xlu0 %v4564_v11  ;;  %v3626_v50 = vadd.f32 %v10457_v40, %v10619_v18  ;;  %v4570_v34 = vsel %vm680_vm1, %v4134_v49, 0.0  ;;  %v8230_v0 = vpop.eup %8229 }
 0x4bd   : > { %4604 = vadd.xlane.f32.xlu1 %v4603_v24  ;;  %v4404_v62 = vpop.xlane.xlu0 %4403  ;;  %v4609_v24 = vsel %vm680_vm1, %v4147_v61, 0.0  ;;  %v3673_v61 = vadd.f32 %v10488_v39, %v10756_v36  ;;  %vm12638_vm14 = vcmask 917312  }
 0x4be   : > { %v5796_v31 = vsel %vm5609_vm2, %v5795_v57, %v5791_v26  ;;  %v5112_v25 = vadd.f32 %v9890_v55, %v4404_v62  ;;  %v10786_v19 = vpop.xlane.xlu1 %4442  ;;  %v5805_v57 = vrot.slane %v5113_v15, %v10386_v63  ;;  %v5115_v26 = vadd.f32 %v9890_v55, %v10693_v38  ;;  %v8232_v4 = vpop.eup %8231 }
 0x4bf   : > { %8239 = vtanh.f32 %v3626_v50  ;;  %v4576_v38 = vsel %vm680_vm1, %v4136_v33, 0.0  ;;  %v3630_v33 = vadd.f32 %v10507_v35, %v10619_v18 }
 0x4c0   : > { %v5800_v11 = vrot.slane %v5112_v25, %v10356_v27  ;;  %4571 = vadd.xlane.f32.xlu0 %v4570_v34  ;;  %v4138_v34 = vmul.f32 %v10406_v1, %v8228_v30  ;;  %8241 = vtanh.f32 %v3671_v46  ;;  %v5815_v50 = vrot.slane %v5115_v26, %v10442_v54 }
 0x4c1   : > { %4610 = vadd.xlane.f32.xlu1 %v4609_v24  ;;  %v4410_v49 = vpop.xlane.xlu0 %4409  ;;  %v8234_v24 = vpop.eup %8233  ;;  %8243 = vtanh.f32 %v3628_v14 }
 0x4c2   : > { %v5801_v6 = vsel %vm12559_vm3, %v5800_v11, %v5796_v31  ;;  %v5114_v62 = vadd.f32 %v9890_v55, %v4410_v49  ;;  %v10804_v25 = vpop.xlane.xlu1 %4496  ;;  %v4615_v31 = vsel %vm680_vm1, %v4149_v16, 0.0  ;;  %v4151_v11 = vmul.f32 %v10406_v1, %v8230_v0 }
 0x4c3   : > { %v5806_v15 = vsel %vm12560_vm4, %v5805_v57, %v5801_v6  ;;  %v5117_v49 = vadd.f32 %v9890_v55, %v10712_v5  ;;  %v3675_v0 = vadd.f32 %v10514_v13, %v10756_v36  ;;  %v4582_v26 = vsel %vm680_vm1, %v4138_v34, 0.0 }
 0x4c4   : > { %v5810_v41 = vrot.slane %v5114_v62, %v10394_v32  ;;  %4577 = vadd.xlane.f32.xlu0 %v4576_v38  ;;  %v4140_v5 = vmul.f32 %v10406_v1, %v8232_v4  ;;  %8245 = vtanh.f32 %v3673_v61  ;;  %v8236_v62 = vpop.eup %8235 }
 0x4c5   : > { %4616 = vadd.xlane.f32.xlu1 %v4615_v31  ;;  %v4416_v57 = vpop.xlane.xlu0 %4415  ;;  %v8238_v31 = vpop.eup %8237  ;;  %v5825_v14 = vrot.slane %v5117_v49, %v10495_v2  ;;  %8247 = vtanh.f32 %v3630_v33 }
 0x4c6   : > { %v5811_v30 = vsel %vm5630_vm5, %v5810_v41, %v5806_v15  ;;  %v5116_v46 = vadd.f32 %v9890_v55, %v4416_v57  ;;  %v10821_v6 = vpop.xlane.xlu1 %4502  ;;  %v4621_v41 = vsel %vm680_vm1, %v4151_v11, 0.0  ;;  %v4153_v15 = vmul.f32 %v10406_v1, %v8234_v24 }
 0x4c7   : > { %v5816_v16 = vsel %vm12561_vm6, %v5815_v50, %v5811_v30  ;;  %v5119_v57 = vadd.f32 %v9890_v55, %v10729_v8  ;;  %8249 = vtanh.f32 %v3675_v0  ;;  %v3632_v11 = vadd.f32 %v10532_v28, %v10619_v18 }
 0x4c8   : > { %v5820_v38 = vrot.slane %v5116_v46, %v10450_v51  ;;  %4583 = vadd.xlane.f32.xlu0 %v4582_v26  ;;  %v4588_v49 = vsel %vm680_vm1, %v4140_v5, 0.0  ;;  %v4142_v30 = vmul.f32 %v10406_v1, %v8236_v62  ;;  %v3677_v8 = vadd.f32 %v10539_v17, %v10756_v36 }
 0x4c9   : > { %4622 = vadd.xlane.f32.xlu1 %v4621_v41  ;;  %v4422_v50 = vpop.xlane.xlu0 %4421  ;;  %v8240_v33 = vpop.eup %8239  ;;  %v4155_v0 = vmul.f32 %v10406_v1, %v8238_v31  ;;  %v5121_v41 = vadd.f32 %v9890_v55, %v10746_v22  ;;  %v3634_v62 = vadd.f32 %v10553_v7, %v10619_v18  ;;  %8251 = vtanh.f32 %v3632_v11 }
 0x4ca   : > { %v5821_v4 = vsel %vm5644_vm7, %v5820_v38, %v5816_v16  ;;  %v5118_v61 = vadd.f32 %v9890_v55, %v4422_v50  ;;  %v10836_v34 = vpop.xlane.xlu1 %4508  ;;  %v4627_v16 = vsel %vm680_vm1, %v4153_v15, 0.0  ;;  %v8242_v26 = vpop.eup %8241  ;;  %v5835_v38 = vrot.slane %v5119_v57, %v10390_v3  ;;  %v12636_v15 = vld [vmem:[#allocation50_spill] sm:$0xff] }
 0x4cb   : > { %v5826_v24 = vsel %vm5651_vm8, %v5825_v14, %v5821_v4  ;;  %v3679_v31 = vadd.f32 %v12636_v15, %v10756_v36  ;;  %v4144_v22 = vmul.f32 %v10406_v1, %v8240_v33  ;;  %8253 = vtanh.f32 %v3677_v8 }
 0x4cc   : > { %v5830_v46 = vrot.slane %v5118_v61, %v10499_v20  ;;  %4589 = vadd.xlane.f32.xlu0 %v4588_v49  ;;  %v4594_v61 = vsel %vm680_vm1, %v4142_v30, 0.0  ;;  %v8244_v49 = vpop.eup %8243  ;;  %v5845_v11 = vrot.slane %v5121_v41, %v10419_v29  ;;  %v5123_v15 = vadd.f32 %v9890_v55, %v10767_v12 }
 0x4cd   : > { %4628 = vadd.xlane.f32.xlu1 %v4627_v16  ;;  %v4428_v5 = vpop.xlane.xlu0 %4427  ;;  %v3636_v30 = vadd.f32 %v10577_v10, %v10619_v18  ;;  %8255 = vtanh.f32 %v3634_v62  ;;  %v4600_v12 = vsel %vm680_vm1, %v4144_v22, 0.0  ;;  %v12637_v18 = vld [vmem:[#allocation40_spill] sm:$0xff] }
 0x4ce   : > { %v5831_v14 = vsel %vm5658_vm9, %v5830_v46, %v5826_v24  ;;  %v5120_v50 = vadd.f32 %v9890_v55, %v4428_v5  ;;  %v10855_v4 = vpop.xlane.xlu1 %4514  ;;  %v4633_v24 = vsel %vm680_vm1, %v4155_v0, 0.0  ;;  %v4189_v46 = vmul.f32 %v10406_v1, %v8242_v26  ;;  %v8246_v5 = vpop.eup %8245 }
 0x4cf   : > { %v5836_v57 = vsel %vm5665_vm10, %v5835_v38, %v5831_v14  ;;  %v3681_v0 = vadd.f32 %v10379_v48, %v10756_v36  ;;  %v8248_v26 = vpop.eup %8247  ;;  %8257 = vtanh.f32 %v3679_v31  ;;  %v5855_v48 = vrot.slane %v5123_v15, %v10446_v47 }
 0x4d0   : > { %v5840_v16 = vrot.slane %v5120_v50, %v10525_v60  ;;  %4595 = vadd.xlane.f32.xlu0 %v4594_v61  ;;  %v4146_v50 = vmul.f32 %v10406_v1, %v8244_v49  ;;  %v4735_v62 = vsel %vm680_vm1, %v4189_v46, 0.0  ;;  %8259 = vtanh.f32 %v3636_v30 }
 0x4d1   : > { %4634 = vadd.xlane.f32.xlu1 %v4633_v24  ;;  %v4434_v38 = vpop.xlane.xlu0 %4433  ;;  %v8250_v61 = vpop.eup %8249  ;;  %v4191_v24 = vmul.f32 %v10406_v1, %v8246_v5  ;;  %v3670_v31 = vadd.f32 %v10401_v23, %v10756_v36  ;;  %8261 = vtanh.f32 %v3681_v0  ;;  %v3683_v46 = vadd.f32 %v10410_v45, %v10756_v36 }
 0x4d2   : > { %v5841_v8 = vsel %vm5672_vm11, %v5840_v16, %v5836_v57  ;;  %v5122_v33 = vadd.f32 %v9890_v55, %v4434_v38  ;;  %v10872_v14 = vpop.xlane.xlu1 %4520  ;;  %v3442_v57 = vcombine.high %v12637_v18, %v12637_v18  ;;  %v4148_v5 = vmul.f32 %v10406_v1, %v8248_v26 }
 0x4d3   : > { %v5846_v41 = vsel %vm5679_vm12, %v5845_v11, %v5841_v8  ;;  %v5125_v11 = vadd.f32 %v9890_v55, %v10786_v19  ;;  %v4606_v19 = vsel %vm680_vm1, %v4146_v50, 0.0  ;;  %v4193_v30 = vmul.f32 %v10406_v1, %v8250_v61 }
 0x4d4   : > { %v5850_v16 = vrot.slane %v5122_v33, %v10547_v37  ;;  %4601 = vadd.xlane.f32.xlu0 %v4600_v12  ;;  %v8252_v33 = vpop.eup %8251  ;;  %v10900_v23 = vrot.slane %v3442_v57, %v9537_v53  ;;  %v4741_v45 = vsel %vm680_vm1, %v4191_v24, 0.0  ;;  %8263 = vtanh.f32 %v3670_v31 }
 0x4d5   : > { %4736 = vadd.xlane.f32.xlu1 %v4735_v62  ;;  %v4440_v22 = vpop.xlane.xlu0 %4439  ;;  %v8254_v12 = vpop.eup %8253  ;;  %v5865_v18 = vrot.slane %v5125_v11, %v10473_v56  ;;  %v3672_v1 = vadd.f32 %v10428_v21, %v10756_v36  ;;  %8265 = vtanh.f32 %v3683_v46  ;;  %v3685_v57 = vadd.f32 %v10435_v58, %v10756_v36 }
 0x4d6   : > { %v5851_v49 = vsel %vm5686_vm13, %v5850_v16, %v5846_v41  ;;  %v5124_v38 = vadd.f32 %v9890_v55, %v4440_v22  ;;  %v10891_v8 = vpop.xlane.xlu1 %4526  ;;  %v5143_v41 = vadd.f32 %v9890_v55, %v10804_v25  ;;  %v4612_v62 = vsel %vm680_vm1, %v4148_v5, 0.0 }
 0x4d7   : > { %v5856_v15 = vsel %vm12638_vm14, %v5855_v48, %v5851_v49  ;;  %vm12557_vm14 = vcmask 1042434   ;;  %v4747_v24 = vsel %vm680_vm1, %v4193_v30, 0.0  ;;  %v10918_v48 = vld [vmem:[#allocation11] ss:$0 sm:$0xff]  ;;  %v8256_v11 = vpop.eup %8255  ;;  %v5145_v46 = vadd.f32 %v9890_v55, %v10821_v6 }
 0x4d8   : > { %v5860_v0 = vrot.slane %v5124_v38, %v10593_v44  ;;  %4607 = vadd.xlane.f32.xlu0 %v4606_v19  ;;  %v4150_v21 = vmul.f32 %v10918_v48, %v8252_v33  ;;  %v5953_v22 = vrot.slane %v5143_v41, %v10341_v52  ;;  %v4195_v58 = vmul.f32 %v10918_v48, %v8254_v12 }
 0x4d9   : > { %4742 = vadd.xlane.f32.xlu1 %v4741_v45  ;;  %v4494_v26 = vpop.xlane.xlu0 %4493  ;;  %v8258_v38 = vpop.eup %8257  ;;  %8267 = vtanh.f32 %v3672_v1  ;;  %v3687_v6 = vadd.f32 %v10464_v59, %v10900_v23  ;;  %v5963_v1 = vrot.slane %v5145_v46, %v10386_v63 }
 0x4da   : > { %v5861_v50 = vsel %vm5700_vm15, %v5860_v0, %v5856_v15  ;;  %v5142_v61 = vadd.f32 %v9890_v55, %v4494_v26  ;;  %v10911_v25 = vpop.xlane.xlu1 %4532  ;;  %v8260_v33 = vpop.eup %8259  ;;  %v4618_v41 = vsel %vm680_vm1, %v4150_v21, 0.0  ;;  %v4152_v0 = vmul.f32 %v10918_v48, %v8256_v11 }
 0x4db   : > { %v5866_v16 = vsel %vm5707_vm0, %v5865_v18, %v5861_v50  ;;  %8269 = vtanh.f32 %v3685_v57  ;;  %v8262_v45 = vpop.eup %8261  ;;  %v4753_v18 = vsel %vm680_vm1, %v4195_v58, 0.0  ;;  %v4197_v26 = vmul.f32 %v10918_v48, %v8258_v38 }
 0x4dc   : > { %v10924_v31 = vsel %vm12557_vm14, %v5866_v16, %v10778_v43  ;;  %v5949_v49 = vrot.slane %v5142_v61, %v10350_v9  ;;  %4613 = vadd.xlane.f32.xlu0 %v4612_v62  ;;  %v3674_v43 = vadd.f32 %v10457_v40, %v10756_v36  ;;  %v5147_v40 = vadd.f32 %v9890_v55, %v10836_v34 }
 0x4dd   : > { %12639 = vst [vmem:[#allocation40_spill] sm:$0xff] %v10924_v31  ;;  %4748 = vadd.xlane.f32.xlu1 %v4747_v24  ;;  %v4500_v15 = vpop.xlane.xlu0 %4499  ;;  %v3676_v61 = vadd.f32 %v10481_v42, %v10756_v36  ;;  %v3689_v62 = vadd.f32 %v10488_v39, %v10900_v23  ;;  %v4624_v34 = vsel %vm680_vm1, %v4152_v0, 0.0  ;;  %v4154_v11 = vmul.f32 %v10918_v48, %v8260_v33 }
 0x4de   : > { %v5954_v19 = vsel %vm5609_vm2, %v5953_v22, %v5949_v49  ;;  %v5144_v5 = vadd.f32 %v9890_v55, %v4500_v15  ;;  %v10932_v30 = vpop.xlane.xlu1 %4538  ;;  %8271 = vtanh.f32 %v3674_v43  ;;  %v8264_v24 = vpop.eup %8263  ;;  %v4759_v49 = vsel %vm680_vm1, %v4197_v26, 0.0 }
 0x4df   : > { %8273 = vtanh.f32 %v3687_v6  ;;  %v8266_v22 = vpop.eup %8265  ;;  %v4199_v58 = vmul.f32 %v10918_v48, %v8262_v45  ;;  %v5973_v38 = vrot.slane %v5147_v40, %v10442_v54  ;;  %v5149_v39 = vadd.f32 %v9890_v55, %v10855_v4 }
 0x4e0   : > { %v5958_v12 = vrot.slane %v5144_v5, %v10356_v27  ;;  %4619 = vadd.xlane.f32.xlu0 %v4618_v41  ;;  %v3678_v15 = vadd.f32 %v10507_v35, %v10756_v36  ;;  %8275 = vtanh.f32 %v3676_v61  ;;  %v3691_v33 = vadd.f32 %v10514_v13, %v10900_v23 }
 0x4e1   : > { %4754 = vadd.xlane.f32.xlu1 %v4753_v18  ;;  %v4506_v50 = vpop.xlane.xlu0 %4505  ;;  %v4630_v0 = vsel %vm680_vm1, %v4154_v11, 0.0  ;;  %v4188_v4 = vmul.f32 %v10918_v48, %v8264_v24  ;;  %8277 = vtanh.f32 %v3689_v62  ;;  %v4765_v45 = vsel %vm680_vm1, %v4199_v58, 0.0 }
 0x4e2   : > { %v5959_v59 = vsel %vm12559_vm3, %v5958_v12, %v5954_v19  ;;  %v5146_v57 = vadd.f32 %v9890_v55, %v4506_v50  ;;  %v10950_v16 = vpop.xlane.xlu1 %4688  ;;  %v4201_v12 = vmul.f32 %v10918_v48, %v8266_v22  ;;  %v5983_v26 = vrot.slane %v5149_v39, %v10495_v2 }
 0x4e3   : > { %v5964_v21 = vsel %vm12560_vm4, %v5963_v1, %v5959_v59  ;;  %v8268_v6 = vpop.eup %8267  ;;  %v5151_v13 = vadd.f32 %v9890_v55, %v10872_v14  ;;  %v3680_v40 = vadd.f32 %v10532_v28, %v10756_v36  ;;  %8279 = vtanh.f32 %v3678_v15  ;;  %v12640_v15 = vld [vmem:[#allocation50_spill] sm:$0xff] }
 0x4e4   : > { %v5968_v42 = vrot.slane %v5146_v57, %v10394_v32  ;;  %4625 = vadd.xlane.f32.xlu0 %v4624_v34  ;;  %v3693_v57 = vadd.f32 %v10539_v17, %v10900_v23  ;;  %v4732_v24 = vsel %vm680_vm1, %v4188_v4, 0.0  ;;  %v4190_v14 = vmul.f32 %v10918_v48, %v8268_v6 }
 0x4e5   : > { %4760 = vadd.xlane.f32.xlu1 %v4759_v49  ;;  %v4512_v46 = vpop.xlane.xlu0 %4511  ;;  %v8270_v18 = vpop.eup %8269  ;;  %8281 = vtanh.f32 %v3691_v33  ;;  %v4771_v34 = vsel %vm680_vm1, %v4201_v12, 0.0  ;;  %v5153_v17 = vadd.f32 %v9890_v55, %v10891_v8  ;;  %v3682_v58 = vadd.f32 %v10553_v7, %v10756_v36 }
 0x4e6   : > { %v5969_v19 = vsel %vm5630_vm5, %v5968_v42, %v5964_v21  ;;  %v5148_v5 = vadd.f32 %v9890_v55, %v4512_v46  ;;  %v10967_v43 = vpop.xlane.xlu1 %4694  ;;  %v4203_v11 = vmul.f32 %v10918_v48, %v8270_v18  ;;  %v5993_v42 = vrot.slane %v5151_v13, %v10390_v3 }
 0x4e7   : > { %v5974_v41 = vsel %vm12561_vm6, %v5973_v38, %v5969_v19  ;;  %8283 = vtanh.f32 %v3680_v40  ;;  %v3695_v19 = vadd.f32 %v12640_v15, %v10900_v23  ;;  %v4738_v33 = vsel %vm680_vm1, %v4190_v14, 0.0  ;;  %v11021_v40 = vld [vmem:[%s9467_s0 + $0x58] sm:$0xff] }
 0x4e8   : > { %v5978_v35 = vrot.slane %v5148_v5, %v10450_v51  ;;  %4631 = vadd.xlane.f32.xlu0 %v4630_v0  ;;  %v8272_v21 = vpop.eup %8271  ;;  %8285 = vtanh.f32 %v3693_v57  ;;  %v4777_v0 = vsel %vm680_vm1, %v4203_v11, 0.0  ;;  %v3684_v18 = vadd.f32 %v10577_v10, %v10756_v36  ;;  %v11035_v11 = vld [vmem:[%s9467_s0] sm:$0xff] }
 0x4e9   : > { %4766 = vadd.xlane.f32.xlu1 %v4765_v45  ;;  %v4518_v1 = vpop.xlane.xlu0 %4517  ;;  %v8274_v22 = vpop.eup %8273  ;;  %v4192_v8 = vmul.f32 %v10918_v48, %v8272_v21  ;;  %v5155_v45 = vadd.f32 %v9890_v55, %v10911_v25  ;;  %8287 = vtanh.f32 %v3682_v58  ;;  %v11044_v58 = vld [vmem:[%s9467_s0 + $0x68] sm:$0xff]  ;;  %vm12641_vm14 = vcmask 917312  }
 0x4ea   : > { %v5979_v50 = vsel %vm5644_vm7, %v5978_v35, %v5974_v41  ;;  %v5150_v61 = vadd.f32 %v9890_v55, %v4518_v1  ;;  %v10984_v59 = vpop.xlane.xlu1 %4700  ;;  %v8276_v41 = vpop.eup %8275  ;;  %v4205_v4 = vmul.f32 %v10918_v48, %v8274_v22  ;;  %v6003_v35 = vrot.slane %v5153_v17, %v10419_v29 }
 0x4eb   : > { %v5984_v62 = vsel %vm5651_vm8, %v5983_v26, %v5979_v50  ;;  %v8278_v6 = vpop.eup %8277  ;;  %v3697_v50 = vadd.f32 %v11021_v40, %v10900_v23  ;;  %v4194_v57 = vmul.f32 %v10918_v48, %v8276_v41  ;;  %8289 = vtanh.f32 %v3695_v19 }
 0x4ec   : > { %v5988_v28 = vrot.slane %v5150_v61, %v10499_v20  ;;  %4733 = vadd.xlane.f32.xlu0 %v4732_v24  ;;  %v4744_v61 = vsel %vm680_vm1, %v4192_v8, 0.0  ;;  %v4207_v24 = vmul.f32 %v10918_v48, %v8278_v6  ;;  %v6013_v21 = vrot.slane %v5155_v45, %v10446_v47 }
 0x4ed   : > { %4772 = vadd.xlane.f32.xlu1 %v4771_v34  ;;  %v4524_v49 = vpop.xlane.xlu0 %4523  ;;  %v8280_v10 = vpop.eup %8279  ;;  %v3686_v22 = vadd.f32 %v11035_v11, %v10900_v23  ;;  %8291 = vtanh.f32 %v3684_v18 }
 0x4ee   : > { %v5989_v38 = vsel %vm5658_vm9, %v5988_v28, %v5984_v62  ;;  %v5152_v39 = vadd.f32 %v9890_v55, %v4524_v49  ;;  %v11001_v46 = vpop.xlane.xlu1 %4706  ;;  %v4783_v62 = vsel %vm680_vm1, %v4205_v4, 0.0  ;;  %v5157_v28 = vadd.f32 %v9890_v55, %v10932_v30 }
 0x4ef   : > { %v5994_v5 = vsel %vm5665_vm10, %v5993_v42, %v5989_v38  ;;  %v8282_v14 = vpop.eup %8281  ;;  %v3699_v38 = vadd.f32 %v11044_v58, %v10900_v23  ;;  %v4196_v15 = vmul.f32 %v10918_v48, %v8280_v10  ;;  %8293 = vtanh.f32 %v3697_v50 }
 0x4f0   : > { %v5998_v7 = vrot.slane %v5152_v39, %v10525_v60  ;;  %4739 = vadd.xlane.f32.xlu0 %v4738_v33  ;;  %v4750_v39 = vsel %vm680_vm1, %v4194_v57, 0.0  ;;  %v4789_v8 = vsel %vm680_vm1, %v4207_v24, 0.0  ;;  %v4209_v41 = vmul.f32 %v10918_v48, %v8282_v14 }
 0x4f1   : > { %4778 = vadd.xlane.f32.xlu1 %v4777_v0  ;;  %v4530_v12 = vpop.xlane.xlu0 %4529  ;;  %v8284_v19 = vpop.eup %8283  ;;  %v12642_v0 = vld [vmem:[#allocation41_spill] sm:$0xff]  ;;  %v6023_v6 = vrot.slane %v5157_v28, %v10473_v56  ;;  %8295 = vtanh.f32 %v3686_v22  ;;  %v4756_v10 = vsel %vm680_vm1, %v4196_v15, 0.0  ;;  %v5209_v22 = vadd.f32 %v9890_v55, %v10967_v43 }
 0x4f2   : > { %v5999_v26 = vsel %vm5672_vm11, %v5998_v7, %v5994_v5  ;;  %v5154_v13 = vadd.f32 %v9890_v55, %v4530_v12  ;;  %v11018_v1 = vpop.xlane.xlu1 %4712  ;;  %v5207_v5 = vadd.f32 %v9890_v55, %v10950_v16  ;;  %v8286_v7 = vpop.eup %8285  ;;  %v11058_v4 = vrot.slane %v12642_v0, %v9537_v53  ;;  %v11062_v16 = vld [vmem:[%s9467_s0 + $0x10] sm:$0xff] }
 0x4f3   : > { %v6004_v25 = vsel %vm5679_vm12, %v6003_v35, %v5999_v26  ;;  %v3688_v45 = vadd.f32 %v11062_v16, %v10900_v23  ;;  %8297 = vtanh.f32 %v3699_v38  ;;  %v4211_v28 = vmul.f32 %v10918_v48, %v8286_v7 }
 0x4f4   : > { %v6008_v36 = vrot.slane %v5154_v13, %v10547_v37  ;;  %4745 = vadd.xlane.f32.xlu0 %v4744_v61  ;;  %v11071_v13 = vld [vmem:[%s9467_s0 + $0x78] sm:$0xff]  ;;  %v6269_v24 = vrot.slane %v5207_v5, %v10341_v52 }
 0x4f5   : > { %4784 = vadd.xlane.f32.xlu1 %v4783_v62  ;;  %v4536_v34 = vpop.xlane.xlu0 %4535  ;;  %v3701_v50 = vadd.f32 %v11071_v13, %v10900_v23  ;;  %v8288_v62 = vpop.eup %8287  ;;  %8299 = vtanh.f32 %v3688_v45 }
 0x4f6   : > { %v6009_v42 = vsel %vm5686_vm13, %v6008_v36, %v6004_v25  ;;  %v5156_v17 = vadd.f32 %v9890_v55, %v4536_v34  ;;  %v11041_v49 = vpop.xlane.xlu1 %4718  ;;  %v11076_v25 = vld [vmem:[%s9467_s0 + $0x20] sm:$0xff]  ;;  %v4198_v36 = vmul.f32 %v10918_v48, %v8284_v19  ;;  %v8290_v34 = vpop.eup %8289  ;;  %v4200_v15 = vmul.f32 %v10918_v48, %v8288_v62  ;;  %v11098_v19 = vld [vmem:[%s9467_s0 + $0x8] sm:$0xff] }
 0x4f7   : > { %v6014_v30 = vsel %vm12641_vm14, %v6013_v21, %v6009_v42  ;;  %v3690_v61 = vadd.f32 %v11076_v25, %v10900_v23  ;;  %v4795_v21 = vsel %vm680_vm1, %v4209_v41, 0.0  ;;  %8301 = vtanh.f32 %v3701_v50  ;;  %v8292_v5 = vpop.eup %8291 }
 0x4f8   : > { %v6018_v33 = vrot.slane %v5156_v17, %v10593_v44  ;;  %4751 = vadd.xlane.f32.xlu0 %v4750_v39  ;;  %v4762_v39 = vsel %vm680_vm1, %v4198_v36, 0.0  ;;  %v3719_v43 = vadd.f32 %v11098_v19, %v11058_v4  ;;  %v4213_v41 = vmul.f32 %v10918_v48, %v8290_v34  ;;  %v11118_v36 = vld [vmem:[%s9467_s0 + $0x18] sm:$0xff] }
 0x4f9   : > { %4790 = vadd.xlane.f32.xlu1 %v4789_v8  ;;  %v4686_v35 = vpop.xlane.xlu0 %4685  ;;  %v4801_v8 = vsel %vm680_vm1, %v4211_v28, 0.0  ;;  %8303 = vtanh.f32 %v3690_v61  ;;  %v8294_v7 = vpop.eup %8293  ;;  %v3721_v62 = vadd.f32 %v11118_v36, %v11058_v4 }
 0x4fa   : > { %v6019_v12 = vsel %vm5700_vm15, %v6018_v33, %v6014_v30  ;;  %v5206_v18 = vadd.f32 %v9890_v55, %v4686_v35  ;;  %v11068_v26 = vpop.xlane.xlu1 %4724  ;;  %v5211_v35 = vadd.f32 %v9890_v55, %v10984_v59  ;;  %8305 = vtanh.f32 %v3719_v43 }
 0x4fb   : > { %v11081_v57 = vsel %vm5707_vm0, %v6023_v6, %v6019_v12  ;;  %v6279_v6 = vrot.slane %v5209_v22, %v10386_v63  ;;  %v8296_v59 = vpop.eup %8295  ;;  %v4807_v34 = vsel %vm680_vm1, %v4213_v41, 0.0  ;;  %v4215_v22 = vmul.f32 %v10918_v48, %v8294_v7 }
 0x4fc   : > { %12643 = vst [vmem:[#allocation50_spill] sm:$0xff] %v11081_v57  ;;  %v6265_v14 = vrot.slane %v5206_v18, %v10350_v9  ;;  %4757 = vadd.xlane.f32.xlu0 %v4756_v10  ;;  %v11113_v10 = vld [vmem:[%s9467_s0 + $0x30] sm:$0xff]  ;;  %v4204_v41 = vmul.f32 %v10918_v48, %v8296_v59 }
 0x4fd   : > { %4796 = vadd.xlane.f32.xlu1 %v4795_v21  ;;  %v4692_v42 = vpop.xlane.xlu0 %4691  ;;  %v3692_v61 = vadd.f32 %v11113_v10, %v10900_v23  ;;  %v4202_v21 = vmul.f32 %v10918_v48, %v8292_v5 }
 0x4fe   : > { %v6270_v17 = vsel %vm5609_vm2, %v6269_v24, %v6265_v14  ;;  %v5208_v38 = vadd.f32 %v9890_v55, %v4692_v42  ;;  %v11093_v30 = vpop.xlane.xlu1 %4730  ;;  %v4768_v14 = vsel %vm680_vm1, %v4200_v15, 0.0  ;;  %v11129_v42 = vld [vmem:[%s9467_s0 + $0x40] sm:$0xff]  ;;  %v5213_v15 = vadd.f32 %v9890_v55, %v11001_v46 }
 0x4ff   : > { %8307 = vtanh.f32 %v3692_v61 }
 0x500   : > { %v6274_v33 = vrot.slane %v5208_v38, %v10356_v27  ;;  %4763 = vadd.xlane.f32.xlu0 %v4762_v39  ;;  %v8298_v38 = vpop.eup %8297  ;;  %v6289_v39 = vrot.slane %v5211_v35, %v10442_v54  ;;  %8309 = vtanh.f32 %v3721_v62  ;;  %v11144_v35 = vld [vmem:[%s9467_s0 + $0x28] sm:$0xff]  ;;  %v5215_v62 = vadd.f32 %v9890_v55, %v11018_v1 }
 0x501   : > { %4802 = vadd.xlane.f32.xlu1 %v4801_v8  ;;  %v4698_v45 = vpop.xlane.xlu0 %4697  ;;  %v3723_v46 = vadd.f32 %v11144_v35, %v11058_v4  ;;  %v4217_v59 = vmul.f32 %v10918_v48, %v8298_v38  ;;  %v11160_v38 = vld [vmem:[%s9467_s0 + $0x50] sm:$0xff] }
 0x502   : > { %v6275_v12 = vsel %vm12559_vm3, %v6274_v33, %v6270_v17  ;;  %v5210_v18 = vadd.f32 %v9890_v55, %v4698_v45  ;;  %v11110_v50 = vpop.xlane.xlu1 %4448  ;;  %v3694_v17 = vadd.f32 %v11129_v42, %v10900_v23  ;;  %v8300_v45 = vpop.eup %8299 }
 0x503   : > { %v6280_v24 = vsel %vm12560_vm4, %v6279_v6, %v6275_v12  ;;  %v4774_v6 = vsel %vm680_vm1, %v4202_v21, 0.0  ;;  %v8302_v61 = vpop.eup %8301  ;;  %v4206_v1 = vmul.f32 %v10918_v48, %v8300_v45 }
 0x504   : > { %v6284_v28 = vrot.slane %v5210_v18, %v10394_v32  ;;  %4769 = vadd.xlane.f32.xlu0 %v4768_v14  ;;  %v4813_v18 = vsel %vm680_vm1, %v4215_v22, 0.0  ;;  %8311 = vtanh.f32 %v3694_v17  ;;  %v8304_v21 = vpop.eup %8303  ;;  %v4780_v22 = vsel %vm680_vm1, %v4204_v41, 0.0 }
 0x505   : > { %4808 = vadd.xlane.f32.xlu1 %v4807_v34  ;;  %v4704_v43 = vpop.xlane.xlu0 %4703  ;;  %v3696_v17 = vadd.f32 %v11160_v38, %v10900_v23  ;;  %8313 = vtanh.f32 %v3723_v46  ;;  %v4819_v41 = vsel %vm680_vm1, %v4217_v59, 0.0  ;;  %v5217_v46 = vadd.f32 %v9890_v55, %v11041_v49  ;;  %v11183_v59 = vld [vmem:[%s9467_s0 + $0x60] sm:$0xff] }
 0x506   : > { %v6285_v5 = vsel %vm5630_vm5, %v6284_v28, %v6280_v24  ;;  %v5212_v33 = vadd.f32 %v9890_v55, %v4704_v43  ;;  %v11138_v8 = vpop.xlane.xlu1 %4454  ;;  %v6299_v24 = vrot.slane %v5213_v15, %v10495_v2  ;;  %v11167_v43 = vld [vmem:[%s9467_s0 + $0x38] sm:$0xff]  ;;  %v4786_v49 = vsel %vm680_vm1, %v4206_v1, 0.0 }
 0x507   : > { %v6290_v7 = vsel %vm12561_vm6, %v6289_v39, %v6285_v5  ;;  %v3725_v5 = vadd.f32 %v11167_v43, %v11058_v4  ;;  %8315 = vtanh.f32 %v3696_v17  ;;  %v5219_v1 = vadd.f32 %v9890_v55, %v11068_v26 }
 0x508   : > { %v6294_v12 = vrot.slane %v5212_v33, %v10450_v51  ;;  %4775 = vadd.xlane.f32.xlu0 %v4774_v6  ;;  %v8306_v6 = vpop.eup %8305 }
 0x509   : > { %4814 = vadd.xlane.f32.xlu1 %v4813_v18  ;;  %v4710_v14 = vpop.xlane.xlu0 %4709  ;;  %v4208_v18 = vmul.f32 %v10918_v48, %v8304_v21  ;;  %8317 = vtanh.f32 %v3725_v5 }
 0x50a   : > { %v6295_v28 = vsel %vm5644_vm7, %v6294_v12, %v6290_v7  ;;  %v5214_v34 = vadd.f32 %v9890_v55, %v4710_v14  ;;  %v11156_v39 = vpop.xlane.xlu1 %4460  ;;  %v4219_v7 = vmul.f32 %v10918_v48, %v8302_v61  ;;  %v6309_v12 = vrot.slane %v5215_v62, %v10390_v3 }
 0x50b   : > { %v6300_v15 = vsel %vm5651_vm8, %v6299_v24, %v6295_v28  ;;  %v3698_v61 = vadd.f32 %v11183_v59, %v10900_v23 }
 0x50c   : > { %v6304_v33 = vrot.slane %v5214_v34, %v10499_v20  ;;  %4781 = vadd.xlane.f32.xlu0 %v4780_v22  ;;  %v11190_v34 = vld [vmem:[%s9467_s0 + $0x48] sm:$0xff]  ;;  %v8308_v22 = vpop.eup %8307  ;;  %v4825_v17 = vsel %vm680_vm1, %v4219_v7, 0.0  ;;  %v11206_v7 = vld [vmem:[%s9467_s0 + $0x70] sm:$0xff] }
 0x50d   : > { %4820 = vadd.xlane.f32.xlu1 %v4819_v41  ;;  %v4716_v45 = vpop.xlane.xlu0 %4715  ;;  %v3727_v21 = vadd.f32 %v11190_v34, %v11058_v4  ;;  %v8310_v41 = vpop.eup %8309  ;;  %8319 = vtanh.f32 %v3698_v61  ;;  %v4210_v26 = vmul.f32 %v10918_v48, %v8308_v22 }
 0x50e   : > { %v6305_v24 = vsel %vm5658_vm9, %v6304_v33, %v6300_v15  ;;  %v5216_v14 = vadd.f32 %v9890_v55, %v4716_v45  ;;  %v11180_v28 = vpop.xlane.xlu1 %4466  ;;  %v4237_v33 = vmul.f32 %v10918_v48, %v8306_v6  ;;  %v4792_v45 = vsel %vm680_vm1, %v4208_v18, 0.0 }
 0x50f   : > { %v6310_v62 = vsel %vm5665_vm10, %v6309_v12, %v6305_v24  ;;  %v6319_v12 = vrot.slane %v5217_v46, %v10419_v29  ;;  %v8312_v24 = vpop.eup %8311  ;;  %v3700_v6 = vadd.f32 %v11206_v7, %v10900_v23  ;;  %8321 = vtanh.f32 %v3727_v21 }
 0x510   : > { %v6314_v15 = vrot.slane %v5216_v14, %v10525_v60  ;;  %4787 = vadd.xlane.f32.xlu0 %v4786_v49  ;;  %v3729_v18 = vadd.f32 %v11021_v40, %v11058_v4  ;;  %v4239_v61 = vmul.f32 %v10918_v48, %v8310_v41  ;;  %v6329_v23 = vrot.slane %v5219_v1, %v10446_v47 }
 0x511   : > { %4826 = vadd.xlane.f32.xlu1 %v4825_v17  ;;  %v4722_v5 = vpop.xlane.xlu0 %4721  ;;  %v8314_v17 = vpop.eup %8313  ;;  %v4212_v22 = vmul.f32 %v10918_v48, %v8312_v24  ;;  %8323 = vtanh.f32 %v3700_v6  ;;  %v3718_v41 = vadd.f32 %v11035_v11, %v11058_v4  ;;  %v4798_v1 = vsel %vm680_vm1, %v4210_v26, 0.0 }
 0x512   : > { %v6315_v57 = vsel %vm5672_vm11, %v6314_v15, %v6310_v62  ;;  %v5218_v14 = vadd.f32 %v9890_v55, %v4722_v5  ;;  %v11203_v49 = vpop.xlane.xlu1 %4472  ;;  %v4879_v15 = vsel %vm680_vm1, %v4237_v33, 0.0  ;;  %v12644_v5 = vld [vmem:[#allocation39_spill] sm:$0xff]  ;;  %8325 = vtanh.f32 %v3729_v18 }
 0x513   : > { %v6320_v46 = vsel %vm5679_vm12, %v6319_v12, %v6315_v57  ;;  %v3396_v31 = vcombine.high %v12644_v5, %v12644_v5  ;;  %v5221_v57 = vadd.f32 %v9890_v55, %v11093_v30  ;;  %v3731_v30 = vadd.f32 %v11044_v58, %v11058_v4 }
 0x514   : > { %v6324_v62 = vrot.slane %v5218_v14, %v10547_v37  ;;  %4793 = vadd.xlane.f32.xlu0 %v4792_v45  ;;  %v5127_v24 = vadd.f32 %v9890_v55, %v11110_v50  ;;  %v4885_v6 = vsel %vm680_vm1, %v4239_v61, 0.0  ;;  %8327 = vtanh.f32 %v3718_v41 }
 0x515   : > { %4880 = vadd.xlane.f32.xlu1 %v4879_v15  ;;  %v4728_v21 = vpop.xlane.xlu0 %4727  ;;  %v8316_v15 = vpop.eup %8315  ;;  %v6339_v26 = vrot.slane %v5221_v57, %v10473_v56  ;;  %v3720_v61 = vadd.f32 %v11062_v16, %v11058_v4  ;;  %8329 = vtanh.f32 %v3731_v30  ;;  %v3733_v57 = vadd.f32 %v11071_v13, %v11058_v4 }
 0x516   : > { %v6325_v12 = vsel %vm5686_vm13, %v6324_v62, %v6320_v46  ;;  %v5220_v45 = vadd.f32 %v9890_v55, %v4728_v21  ;;  %v11225_v33 = vpop.xlane.xlu1 %4478  ;;  %v4241_v62 = vmul.f32 %v10918_v48, %v8314_v17  ;;  %v8318_v5 = vpop.eup %8317  ;;  %v4804_v21 = vsel %vm680_vm1, %v4212_v22, 0.0 }
 0x517   : > { %v6330_v14 = vsel %vm12641_vm14, %v6329_v23, %v6325_v12  ;;  %v11239_v23 = vrot.slane %v3396_v31, %v9537_v53  ;;  %v4214_v31 = vmul.f32 %v10918_v48, %v8316_v15  ;;  %v8320_v22 = vpop.eup %8319  ;;  %v3722_v30 = vadd.f32 %v11076_v25, %v11058_v4 }
 0x518   : > { %v6334_v46 = vrot.slane %v5220_v45, %v10593_v44  ;;  %4799 = vadd.xlane.f32.xlu0 %v4798_v1  ;;  %v4891_v41 = vsel %vm680_vm1, %v4241_v62, 0.0  ;;  %8331 = vtanh.f32 %v3720_v61  ;;  %v5131_v61 = vadd.f32 %v9890_v55, %v11156_v39 }
 0x519   : > { %4886 = vadd.xlane.f32.xlu1 %v4885_v6  ;;  %v4446_v18 = vpop.xlane.xlu0 %4445  ;;  %v8322_v6 = vpop.eup %8321  ;;  %v4810_v62 = vsel %vm680_vm1, %v4214_v31, 0.0  ;;  %8333 = vtanh.f32 %v3733_v57 }
 0x51a   : > { %v6335_v12 = vsel %vm5700_vm15, %v6334_v46, %v6330_v14  ;;  %v5126_v50 = vadd.f32 %v9890_v55, %v4446_v18  ;;  %v11245_v45 = vpop.xlane.xlu1 %4484  ;;  %v5874_v14 = vrot.slane %v5127_v24, %v10341_v52  ;;  %v4243_v46 = vmul.f32 %v10918_v48, %v8318_v5 }
 0x51b   : > { %v11250_v17 = vsel %vm5707_vm0, %v6339_v26, %v6335_v12  ;;  %v5129_v26 = vadd.f32 %v9890_v55, %v11138_v8  ;;  %v4216_v5 = vmul.f32 %v10918_v48, %v8320_v22  ;;  %v3639_v8 = vadd.f32 %v11098_v19, %v11239_v23 }
 0x51c   : > { %12645 = vst [vmem:[#allocation39_spill] sm:$0xff] %v11250_v17  ;;  %v5870_v1 = vrot.slane %v5126_v50, %v10350_v9  ;;  %4805 = vadd.xlane.f32.xlu0 %v4804_v21  ;;  %v8324_v21 = vpop.eup %8323  ;;  %8335 = vtanh.f32 %v3722_v30  ;;  %v5894_v0 = vrot.slane %v5131_v61, %v10442_v54 }
 0x51d   : > { %4892 = vadd.xlane.f32.xlu1 %v4891_v41  ;;  %v4452_v15 = vpop.xlane.xlu0 %4451  ;;  %v4897_v41 = vsel %vm680_vm1, %v4243_v46, 0.0  ;;  %v3724_v46 = vadd.f32 %v11113_v10, %v11058_v4  ;;  %v4218_v39 = vmul.f32 %v10918_v48, %v8324_v21  ;;  %8337 = vtanh.f32 %v3639_v8 }
 0x51e   : > { %v5875_v18 = vsel %vm5609_vm2, %v5874_v14, %v5870_v1  ;;  %v5128_v24 = vadd.f32 %v9890_v55, %v4452_v15  ;;  %v11265_v12 = vpop.xlane.xlu1 %4490  ;;  %v4245_v14 = vmul.f32 %v10918_v48, %v8322_v6  ;;  %v8326_v1 = vpop.eup %8325  ;;  %v5884_v15 = vrot.slane %v5129_v26, %v10386_v63 }
 0x51f   : > { %v3641_v6 = vadd.f32 %v11118_v36, %v11239_v23  ;;  %v8328_v30 = vpop.eup %8327  ;;  %v3643_v8 = vadd.f32 %v11144_v35, %v11239_v23  ;;  %8339 = vtanh.f32 %v3724_v46 }
 0x520   : > { %v5879_v50 = vrot.slane %v5128_v24, %v10356_v27  ;;  %4811 = vadd.xlane.f32.xlu0 %v4810_v62  ;;  %v4816_v24 = vsel %vm680_vm1, %v4216_v5, 0.0  ;;  %v4903_v62 = vsel %vm680_vm1, %v4245_v14, 0.0  ;;  %v5133_v5 = vadd.f32 %v9890_v55, %v11180_v28 }
 0x521   : > { %4898 = vadd.xlane.f32.xlu1 %v4897_v41  ;;  %v4458_v31 = vpop.xlane.xlu0 %4457  ;;  %v3726_v41 = vadd.f32 %v11129_v42, %v11058_v4  ;;  %v4236_v61 = vmul.f32 %v10918_v48, %v8328_v30  ;;  %8341 = vtanh.f32 %v3641_v6 }
 0x522   : > { %v5880_v57 = vsel %vm12559_vm3, %v5879_v50, %v5875_v18  ;;  %v5130_v22 = vadd.f32 %v9890_v55, %v4458_v31  ;;  %v11279_v17 = vpop.xlane.xlu1 %4544  ;;  %v4247_v50 = vmul.f32 %v10918_v48, %v8326_v1  ;;  %v8330_v31 = vpop.eup %8329 }
 0x523   : > { %v5885_v26 = vsel %vm12560_vm4, %v5884_v15, %v5880_v57  ;;  %v8332_v28 = vpop.eup %8331  ;;  %8343 = vtanh.f32 %v3726_v41 }
 0x524   : > { %v5889_v18 = vrot.slane %v5130_v22, %v10394_v32  ;;  %4817 = vadd.xlane.f32.xlu0 %v4816_v24  ;;  %v4822_v22 = vsel %vm680_vm1, %v4218_v39, 0.0  ;;  %8345 = vtanh.f32 %v3643_v8 }
 0x525   : > { %4904 = vadd.xlane.f32.xlu1 %v4903_v62  ;;  %v4464_v21 = vpop.xlane.xlu0 %4463  ;;  %v4909_v62 = vsel %vm680_vm1, %v4247_v50, 0.0  ;;  %v3728_v50 = vadd.f32 %v11160_v38, %v11058_v4 }
 0x526   : > { %v5890_v15 = vsel %vm5630_vm5, %v5889_v18, %v5885_v26  ;;  %v5132_v14 = vadd.f32 %v9890_v55, %v4464_v21  ;;  %v11300_v57 = vpop.xlane.xlu1 %4550  ;;  %v4249_v26 = vmul.f32 %v10918_v48, %v8330_v31  ;;  %v8334_v18 = vpop.eup %8333  ;;  %v5904_v21 = vrot.slane %v5133_v5, %v10495_v2 }
 0x527   : > { %v5895_v1 = vsel %vm12561_vm6, %v5894_v0, %v5890_v15  ;;  %v5135_v0 = vadd.f32 %v9890_v55, %v11203_v49  ;;  %v8336_v31 = vpop.eup %8335  ;;  %v4876_v5 = vsel %vm680_vm1, %v4236_v61, 0.0  ;;  %v4238_v15 = vmul.f32 %v10918_v48, %v8332_v28 }
 0x528   : > { %v5899_v24 = vrot.slane %v5132_v14, %v10450_v51  ;;  %4823 = vadd.xlane.f32.xlu0 %v4822_v22  ;;  %v3645_v49 = vadd.f32 %v11167_v43, %v11239_v23  ;;  %v4915_v14 = vsel %vm680_vm1, %v4249_v26, 0.0  ;;  %v8338_v22 = vpop.eup %8337  ;;  %v3730_v28 = vadd.f32 %v11183_v59, %v11058_v4 }
 0x529   : > { %4910 = vadd.xlane.f32.xlu1 %v4909_v62  ;;  %v4470_v46 = vpop.xlane.xlu0 %4469  ;;  %v5137_v62 = vadd.f32 %v9890_v55, %v11225_v33  ;;  %v4240_v26 = vmul.f32 %v10918_v48, %v8336_v31  ;;  %8347 = vtanh.f32 %v3728_v50  ;;  %v3647_v33 = vadd.f32 %v11190_v34, %v11239_v23 }
 0x52a   : > { %v5900_v6 = vsel %vm5644_vm7, %v5899_v24, %v5895_v1  ;;  %v5134_v39 = vadd.f32 %v9890_v55, %v4470_v46  ;;  %v11313_v30 = vpop.xlane.xlu1 %4556  ;;  %v4251_v1 = vmul.f32 %v10918_v48, %v8334_v18  ;;  %v5914_v24 = vrot.slane %v5135_v0, %v10390_v3 }
 0x52b   : > { %v5905_v41 = vsel %vm5651_vm8, %v5904_v21, %v5900_v6  ;;  %v4882_v0 = vsel %vm680_vm1, %v4238_v15, 0.0  ;;  %8349 = vtanh.f32 %v3645_v49  ;;  %v5924_v31 = vrot.slane %v5137_v62, %v10419_v29 }
 0x52c   : > { %v5909_v8 = vrot.slane %v5134_v39, %v10499_v20  ;;  %4877 = vadd.xlane.f32.xlu0 %v4876_v5  ;;  %v8340_v39 = vpop.eup %8339  ;;  %v5139_v50 = vadd.f32 %v9890_v55, %v11245_v45  ;;  %v3732_v49 = vadd.f32 %v11206_v7, %v11058_v4  ;;  %8351 = vtanh.f32 %v3730_v28  ;;  %v12646_v4 = vld [vmem:[#allocation42_spill] sm:$0xff] }
 0x52d   : > { %4916 = vadd.xlane.f32.xlu1 %v4915_v14  ;;  %v4476_v61 = vpop.xlane.xlu0 %4475  ;;  %v8342_v14 = vpop.eup %8341  ;;  %v4242_v45 = vmul.f32 %v10918_v48, %v8340_v39  ;;  %8353 = vtanh.f32 %v3647_v33 }
 0x52e   : > { %v5910_v21 = vsel %vm5658_vm9, %v5909_v8, %v5905_v41  ;;  %v5136_v46 = vadd.f32 %v9890_v55, %v4476_v61  ;;  %v11332_v6 = vpop.xlane.xlu1 %4562  ;;  %v4921_v41 = vsel %vm680_vm1, %v4251_v1, 0.0  ;;  %v4157_v8 = vmul.f32 %v10918_v48, %v8338_v22 }
 0x52f   : > { %v5915_v18 = vsel %vm5665_vm10, %v5914_v24, %v5910_v21  ;;  %v8344_v24 = vpop.eup %8343  ;;  %v4888_v1 = vsel %vm680_vm1, %v4240_v26, 0.0  ;;  %v4159_v26 = vmul.f32 %v10918_v48, %v8342_v14  ;;  %v5934_v28 = vrot.slane %v5139_v50, %v10446_v47 }
 0x530   : > { %v5919_v5 = vrot.slane %v5136_v46, %v10525_v60  ;;  %4883 = vadd.xlane.f32.xlu0 %v4882_v0  ;;  %v8346_v22 = vpop.eup %8345  ;;  %v3649_v0 = vadd.f32 %v11021_v40, %v11239_v23  ;;  %v4244_v39 = vmul.f32 %v10918_v48, %v8344_v24  ;;  %8355 = vtanh.f32 %v3732_v49 }
 0x531   : > { %4922 = vadd.xlane.f32.xlu1 %v4921_v41  ;;  %v4482_v15 = vpop.xlane.xlu0 %4481  ;;  %v3444_v41 = vcombine.high %v12646_v4, %v12646_v4  ;;  %v3638_v14 = vadd.f32 %v11035_v11, %v11239_v23  ;;  %v3651_v24 = vadd.f32 %v11044_v58, %v11239_v23  ;;  %v3640_v4 = vadd.f32 %v11062_v16, %v11239_v23 }
 0x532   : > { %v5920_v61 = vsel %vm5672_vm11, %v5919_v5, %v5915_v18  ;;  %v5138_v21 = vadd.f32 %v9890_v55, %v4482_v15  ;;  %v11349_v46 = vpop.xlane.xlu1 %4568  ;;  %v4639_v5 = vsel %vm680_vm1, %v4157_v8, 0.0  ;;  %v4161_v8 = vmul.f32 %v10918_v48, %v8346_v22 }
 0x533   : > { %v5925_v62 = vsel %vm5679_vm12, %v5924_v31, %v5920_v61  ;;  %v5141_v31 = vadd.f32 %v9890_v55, %v11265_v12  ;;  %v4894_v12 = vsel %vm680_vm1, %v4242_v45, 0.0  ;;  %8357 = vtanh.f32 %v3649_v0  ;;  %v8348_v49 = vpop.eup %8347 }
 0x534   : > { %v5929_v18 = vrot.slane %v5138_v21, %v10547_v37  ;;  %4889 = vadd.xlane.f32.xlu0 %v4888_v1  ;;  %v5159_v1 = vadd.f32 %v9890_v55, %v11279_v17  ;;  %v4645_v22 = vsel %vm680_vm1, %v4159_v26, 0.0  ;;  %v4651_v26 = vsel %vm680_vm1, %v4161_v8, 0.0 }
 0x535   : > { %4640 = vadd.xlane.f32.xlu1 %v4639_v5  ;;  %v4488_v33 = vpop.xlane.xlu0 %4487  ;;  %v11383_v5 = vrot.slane %v3444_v41, %v9537_v53  ;;  %v5944_v45 = vrot.slane %v5141_v31, %v10473_v56  ;;  %8359 = vtanh.f32 %v3638_v14  ;;  %v4246_v41 = vmul.f32 %v10918_v48, %v8348_v49 }
 0x536   : > { %v5930_v15 = vsel %vm5686_vm13, %v5929_v18, %v5925_v62  ;;  %v5140_v61 = vadd.f32 %v9890_v55, %v4488_v33  ;;  %v11367_v21 = vpop.xlane.xlu1 %4574  ;;  %v8350_v18 = vpop.eup %8349  ;;  %8361 = vtanh.f32 %v3651_v24  ;;  %v3653_v31 = vadd.f32 %v11071_v13, %v11239_v23 }
 0x537   : > { %v5935_v50 = vsel %vm12641_vm14, %v5934_v28, %v5930_v15  ;;  %v4900_v28 = vsel %vm680_vm1, %v4244_v39, 0.0  ;;  %v6032_v39 = vrot.slane %v5159_v1, %v10341_v52  ;;  %8363 = vtanh.f32 %v3640_v4 }
 0x538   : > { %v5939_v62 = vrot.slane %v5140_v61, %v10593_v44  ;;  %4895 = vadd.xlane.f32.xlu0 %v4894_v12  ;;  %v8352_v12 = vpop.eup %8351  ;;  %v5161_v14 = vadd.f32 %v9890_v55, %v11300_v57  ;;  %v3642_v1 = vadd.f32 %v11076_v25, %v11239_v23  ;;  %8365 = vtanh.f32 %v3653_v31 }
 0x539   : > { %4646 = vadd.xlane.f32.xlu1 %v4645_v22  ;;  %v4542_v0 = vpop.xlane.xlu0 %4541  ;;  %v8354_v8 = vpop.eup %8353  ;;  %v4248_v4 = vmul.f32 %v10918_v48, %v8352_v12  ;;  %v3703_v57 = vadd.f32 %v11098_v19, %v11383_v5  ;;  %v3644_v31 = vadd.f32 %v11113_v10, %v11239_v23 }
 0x53a   : > { %v5940_v17 = vsel %vm5700_vm15, %v5939_v62, %v5935_v50  ;;  %v5158_v33 = vadd.f32 %v9890_v55, %v4542_v0  ;;  %v11389_v15 = vpop.xlane.xlu1 %4580  ;;  %v4163_v62 = vmul.f32 %v10918_v48, %v8350_v18  ;;  %v8356_v0 = vpop.eup %8355  ;;  %8367 = vtanh.f32 %v3642_v1 }
 0x53b   : > { %v11393_v61 = vsel %vm5707_vm0, %v5944_v45, %v5940_v17  ;;  %8369 = vtanh.f32 %v3703_v57  ;;  %v5165_v1 = vadd.f32 %v9890_v55, %v11332_v6  ;;  %v3707_v6 = vadd.f32 %v11144_v35, %v11383_v5 }
 0x53c   : > { %12647 = vst [vmem:[#allocation42_spill] sm:$0xff] %v11393_v61  ;;  %v6028_v50 = vrot.slane %v5158_v33, %v10350_v9  ;;  %4901 = vadd.xlane.f32.xlu0 %v4900_v28  ;;  %v4906_v28 = vsel %vm680_vm1, %v4246_v41, 0.0  ;;  %v4657_v17 = vsel %vm680_vm1, %v4163_v62, 0.0  ;;  %v4165_v33 = vmul.f32 %v10918_v48, %v8354_v8  ;;  %v11425_v62 = vld [vmem:[#allocation11] ss:$0 sm:$0xff] }
 0x53d   : > { %4652 = vadd.xlane.f32.xlu1 %v4651_v26  ;;  %v4548_v22 = vpop.xlane.xlu0 %4547  ;;  %v8358_v26 = vpop.eup %8357  ;;  %v4250_v48 = vmul.f32 %v11425_v62, %v8356_v0  ;;  %8371 = vtanh.f32 %v3644_v31 }
 0x53e   : > { %v6033_v24 = vsel %vm5609_vm2, %v6032_v39, %v6028_v50  ;;  %v5160_v49 = vadd.f32 %v9890_v55, %v4548_v22  ;;  %v11405_v45 = vpop.xlane.xlu1 %4586  ;;  %v6042_v39 = vrot.slane %v5161_v14, %v10386_v63  ;;  %v5163_v50 = vadd.f32 %v9890_v55, %v11313_v30 }
 0x53f   : > { %v4912_v30 = vsel %vm680_vm1, %v4248_v4, 0.0  ;;  %v3705_v14 = vadd.f32 %v11118_v36, %v11383_v5 }
 0x540   : > { %v6037_v18 = vrot.slane %v5160_v49, %v10356_v27  ;;  %4907 = vadd.xlane.f32.xlu0 %v4906_v28  ;;  %v8360_v28 = vpop.eup %8359  ;;  %v6052_v0 = vrot.slane %v5163_v50, %v10442_v54 }
 0x541   : > { %4658 = vadd.xlane.f32.xlu1 %v4657_v17  ;;  %v4554_v41 = vpop.xlane.xlu0 %4553  ;;  %v4167_v17 = vmul.f32 %v11425_v62, %v8358_v26  ;;  %v3646_v26 = vadd.f32 %v11129_v42, %v11239_v23  ;;  %8373 = vtanh.f32 %v3705_v14 }
 0x542   : > { %v6038_v12 = vsel %vm12559_vm3, %v6037_v18, %v6033_v24  ;;  %v5162_v22 = vadd.f32 %v9890_v55, %v4554_v41  ;;  %v11423_v49 = vpop.xlane.xlu1 %4592  ;;  %v4663_v18 = vsel %vm680_vm1, %v4165_v33, 0.0  ;;  %v8362_v41 = vpop.eup %8361  ;;  %v4918_v33 = vsel %vm680_vm1, %v4250_v48, 0.0 }
 0x543   : > { %v6043_v8 = vsel %vm12560_vm4, %v6042_v39, %v6038_v12  ;;  %v8364_v57 = vpop.eup %8363  ;;  %v6062_v48 = vrot.slane %v5165_v1, %v10495_v2  ;;  %8375 = vtanh.f32 %v3646_v26 }
 0x544   : > { %v6047_v24 = vrot.slane %v5162_v22, %v10394_v32  ;;  %4913 = vadd.xlane.f32.xlu0 %v4912_v30  ;;  %v4156_v30 = vmul.f32 %v11425_v62, %v8360_v28  ;;  %v4158_v14 = vmul.f32 %v11425_v62, %v8364_v57  ;;  %8377 = vtanh.f32 %v3707_v6 }
 0x545   : > { %4664 = vadd.xlane.f32.xlu1 %v4663_v18  ;;  %v4560_v4 = vpop.xlane.xlu0 %4559  ;;  %v8366_v18 = vpop.eup %8365 }
 0x546   : > { %v6048_v39 = vsel %vm5630_vm5, %v6047_v24, %v6043_v8  ;;  %v5164_v12 = vadd.f32 %v9890_v55, %v4560_v4  ;;  %v11440_v22 = vpop.xlane.xlu1 %4598  ;;  %v4669_v8 = vsel %vm680_vm1, %v4167_v17, 0.0  ;;  %v4169_v24 = vmul.f32 %v11425_v62, %v8362_v41 }
 0x547   : > { %v6053_v50 = vsel %vm12561_vm6, %v6052_v0, %v6048_v39  ;;  %v5167_v4 = vadd.f32 %v9890_v55, %v11349_v46  ;;  %v3648_v17 = vadd.f32 %v11160_v38, %v11239_v23  ;;  %v4636_v1 = vsel %vm680_vm1, %v4156_v30, 0.0 }
 0x548   : > { %v6057_v31 = vrot.slane %v5164_v12, %v10450_v51  ;;  %4919 = vadd.xlane.f32.xlu0 %v4918_v33  ;;  %v3709_v46 = vadd.f32 %v11167_v43, %v11383_v5  ;;  %v8368_v33 = vpop.eup %8367  ;;  %v4642_v6 = vsel %vm680_vm1, %v4158_v14, 0.0 }
 0x549   : > { %4670 = vadd.xlane.f32.xlu1 %v4669_v8  ;;  %v4566_v0 = vpop.xlane.xlu0 %4565  ;;  %v8370_v26 = vpop.eup %8369  ;;  %v6072_v8 = vrot.slane %v5167_v4, %v10390_v3  ;;  %8379 = vtanh.f32 %v3648_v17 }
 0x54a   : > { %v6058_v28 = vsel %vm5644_vm7, %v6057_v31, %v6053_v50  ;;  %v5166_v39 = vadd.f32 %v9890_v55, %v4566_v0  ;;  %v11458_v12 = vpop.xlane.xlu1 %4604  ;;  %v4675_v50 = vsel %vm680_vm1, %v4169_v24, 0.0  ;;  %v4171_v31 = vmul.f32 %v11425_v62, %v8366_v18  ;;  %v8372_v18 = vpop.eup %8371 }
 0x54b   : > { %v6063_v41 = vsel %vm5651_vm8, %v6062_v48, %v6058_v28  ;;  %v5169_v48 = vadd.f32 %v9890_v55, %v11367_v21  ;;  %v3650_v24 = vadd.f32 %v11183_v59, %v11239_v23  ;;  %8381 = vtanh.f32 %v3709_v46  ;;  %v8374_v17 = vpop.eup %8373 }
 0x54c   : > { %v6067_v57 = vrot.slane %v5166_v39, %v10499_v20  ;;  %4637 = vadd.xlane.f32.xlu0 %v4636_v1  ;;  %v4160_v1 = vmul.f32 %v11425_v62, %v8368_v33  ;;  %v3711_v21 = vadd.f32 %v11190_v34, %v11383_v5  ;;  %v3652_v46 = vadd.f32 %v11206_v7, %v11239_v23 }
 0x54d   : > { %4676 = vadd.xlane.f32.xlu1 %v4675_v50  ;;  %v4572_v30 = vpop.xlane.xlu0 %4571  ;;  %v6082_v50 = vrot.slane %v5169_v48, %v10419_v29  ;;  %8383 = vtanh.f32 %v3650_v24 }
 0x54e   : > { %v6068_v0 = vsel %vm5658_vm9, %v6067_v57, %v6063_v41  ;;  %v5168_v28 = vadd.f32 %v9890_v55, %v4572_v30  ;;  %v11475_v39 = vpop.xlane.xlu1 %4610  ;;  %v4681_v41 = vsel %vm680_vm1, %v4171_v31, 0.0  ;;  %v4221_v57 = vmul.f32 %v11425_v62, %v8370_v26 }
 0x54f   : > { %v6073_v4 = vsel %vm5665_vm10, %v6072_v8, %v6068_v0  ;;  %v5171_v30 = vadd.f32 %v9890_v55, %v11389_v15  ;;  %v4162_v31 = vmul.f32 %v11425_v62, %v8372_v18  ;;  %v4648_v48 = vsel %vm680_vm1, %v4160_v1, 0.0 }
 0x550   : > { %v6077_v14 = vrot.slane %v5168_v28, %v10525_v60  ;;  %4643 = vadd.xlane.f32.xlu0 %v4642_v6  ;;  %8385 = vtanh.f32 %v3711_v21  ;;  %v3713_v15 = vadd.f32 %v11021_v40, %v11383_v5  ;;  %v8376_v28 = vpop.eup %8375 }
 0x551   : > { %4682 = vadd.xlane.f32.xlu1 %v4681_v41  ;;  %v4578_v8 = vpop.xlane.xlu0 %4577  ;;  %v8378_v41 = vpop.eup %8377  ;;  %v6092_v18 = vrot.slane %v5171_v30, %v10446_v47  ;;  %8387 = vtanh.f32 %v3652_v46  ;;  %v4654_v40 = vsel %vm680_vm1, %v4162_v31, 0.0  ;;  %v3715_v30 = vadd.f32 %v11044_v58, %v11383_v5 }
 0x552   : > { %v6078_v33 = vsel %vm5672_vm11, %v6077_v14, %v6073_v4  ;;  %v5170_v0 = vadd.f32 %v9890_v55, %v4578_v8  ;;  %v11493_v6 = vpop.xlane.xlu1 %4616  ;;  %v4831_v4 = vsel %vm680_vm1, %v4221_v57, 0.0  ;;  %v4223_v14 = vmul.f32 %v11425_v62, %v8374_v17 }
 0x553   : > { %v6083_v26 = vsel %vm5679_vm12, %v6082_v50, %v6078_v33  ;;  %v3702_v8 = vadd.f32 %v11035_v11, %v11383_v5  ;;  %v4164_v17 = vmul.f32 %v11425_v62, %v8376_v28  ;;  %8389 = vtanh.f32 %v3713_v15  ;;  %v8380_v46 = vpop.eup %8379  ;;  %v12648_v28 = vld [vmem:[#allocation43_spill] sm:$0xff] }
 0x554   : > { %v6087_v23 = vrot.slane %v5170_v0, %v10547_v37  ;;  %4649 = vadd.xlane.f32.xlu0 %v4648_v48  ;;  %v5175_v33 = vadd.f32 %v9890_v55, %v11423_v49  ;;  %v4837_v31 = vsel %vm680_vm1, %v4223_v14, 0.0  ;;  %v3704_v15 = vadd.f32 %v11062_v16, %v11383_v5 }
 0x555   : > { %4832 = vadd.xlane.f32.xlu1 %v4831_v4  ;;  %v4584_v24 = vpop.xlane.xlu0 %4583  ;;  %v8382_v11 = vpop.eup %8381  ;;  %v11524_v58 = vrot.slane %v12648_v28, %v9537_v53  ;;  %8391 = vtanh.f32 %v3702_v8  ;;  %v4660_v14 = vsel %vm680_vm1, %v4164_v17, 0.0  ;;  %v3717_v16 = vadd.f32 %v11071_v13, %v11383_v5 }
 0x556   : > { %v6088_v1 = vsel %vm5686_vm13, %v6087_v23, %v6083_v26  ;;  %v5172_v21 = vadd.f32 %v9890_v55, %v4584_v24  ;;  %v11506_v50 = vpop.xlane.xlu1 %4622  ;;  %v4225_v26 = vmul.f32 %v11425_v62, %v8378_v41  ;;  %v4166_v41 = vmul.f32 %v11425_v62, %v8380_v46 }
 0x557   : > { %v6093_v57 = vsel %vm12641_vm14, %v6092_v18, %v6088_v1  ;;  %8393 = vtanh.f32 %v3715_v30  ;;  %v8384_v18 = vpop.eup %8383  ;;  %v6111_v24 = vrot.slane %v5175_v33, %v10341_v52  ;;  %v5177_v8 = vadd.f32 %v9890_v55, %v11440_v22 }
 0x558   : > { %v6097_v0 = vrot.slane %v5172_v21, %v10593_v44  ;;  %4655 = vadd.xlane.f32.xlu0 %v4654_v40  ;;  %v4843_v21 = vsel %vm680_vm1, %v4225_v26, 0.0  ;;  %v4227_v40 = vmul.f32 %v11425_v62, %v8382_v11  ;;  %8395 = vtanh.f32 %v3704_v15 }
 0x559   : > { %4838 = vadd.xlane.f32.xlu1 %v4837_v31  ;;  %v4590_v48 = vpop.xlane.xlu0 %4589  ;;  %v3706_v33 = vadd.f32 %v11076_v25, %v11383_v5  ;;  %v4666_v31 = vsel %vm680_vm1, %v4166_v41, 0.0  ;;  %v4168_v26 = vmul.f32 %v11425_v62, %v8384_v18  ;;  %8397 = vtanh.f32 %v3717_v16 }
 0x55a   : > { %v11527_v23 = vsel %vm5700_vm15, %v6097_v0, %v6093_v57  ;;  %v5174_v49 = vadd.f32 %v9890_v55, %v4590_v48  ;;  %v11530_v4 = vpop.xlane.xlu1 %4628  ;;  %v8386_v57 = vpop.eup %8385  ;;  %v3735_v22 = vadd.f32 %v11098_v19, %v11524_v58  ;;  %v4849_v48 = vsel %vm680_vm1, %v4227_v40, 0.0 }
 0x55b   : > { %12649 = vst [vmem:[#allocation43_spill] sm:$0xff] %v11527_v23  ;;  %v8388_v0 = vpop.eup %8387  ;;  %v4229_v15 = vmul.f32 %v11425_v62, %v8386_v57  ;;  %v5179_v25 = vadd.f32 %v9890_v55, %v11458_v12  ;;  %v3708_v16 = vadd.f32 %v11113_v10, %v11383_v5  ;;  %8399 = vtanh.f32 %v3706_v33 }
 0x55c   : > { %v6107_v1 = vrot.slane %v5174_v49, %v10350_v9  ;;  %4661 = vadd.xlane.f32.xlu0 %v4660_v14  ;;  %v6121_v14 = vrot.slane %v5177_v8, %v10386_v63  ;;  %v4672_v40 = vsel %vm680_vm1, %v4168_v26, 0.0  ;;  %8401 = vtanh.f32 %v3735_v22 }
 0x55d   : > { %4844 = vadd.xlane.f32.xlu1 %v4843_v21  ;;  %v4596_v17 = vpop.xlane.xlu0 %4595  ;;  %v8390_v49 = vpop.eup %8389  ;;  %v3737_v12 = vadd.f32 %v11118_v36, %v11524_v58  ;;  %v4855_v8 = vsel %vm680_vm1, %v4229_v15, 0.0  ;;  %v5181_v33 = vadd.f32 %v9890_v55, %v11475_v39  ;;  %8403 = vtanh.f32 %v3708_v16 }
 0x55e   : > { %v6112_v30 = vsel %vm5609_vm2, %v6111_v24, %v6107_v1  ;;  %v5176_v13 = vadd.f32 %v9890_v55, %v4596_v17  ;;  %v11544_v46 = vpop.xlane.xlu1 %4634  ;;  %v4170_v1 = vmul.f32 %v11425_v62, %v8388_v0  ;;  %v4231_v17 = vmul.f32 %v11425_v62, %v8390_v49 }
 0x55f   : > { %12650 = vst [vmem:[#allocation51_spill] sm:$0xff] %v11544_v46  ;;  %v8392_v57 = vpop.eup %8391  ;;  %8405 = vtanh.f32 %v3737_v12  ;;  %v3739_v39 = vadd.f32 %v11144_v35, %v11524_v58 }
 0x560   : > { %v6116_v11 = vrot.slane %v5176_v13, %v10356_v27  ;;  %4667 = vadd.xlane.f32.xlu0 %v4666_v31  ;;  %v6131_v13 = vrot.slane %v5179_v25, %v10442_v54  ;;  %v4678_v22 = vsel %vm680_vm1, %v4170_v1, 0.0  ;;  %v4220_v49 = vmul.f32 %v11425_v62, %v8392_v57 }
 0x561   : > { %4850 = vadd.xlane.f32.xlu1 %v4849_v48  ;;  %v4602_v41 = vpop.xlane.xlu0 %4601  ;;  %v4861_v25 = vsel %vm680_vm1, %v4231_v17, 0.0  ;;  %v3712_v1 = vadd.f32 %v11160_v38, %v11383_v5 }
 0x562   : > { %v6117_v19 = vsel %vm12559_vm3, %v6116_v11, %v6112_v30  ;;  %v5178_v18 = vadd.f32 %v9890_v55, %v4602_v41  ;;  %v11562_v24 = vpop.xlane.xlu1 %4736  ;;  %v8394_v30 = vpop.eup %8393  ;;  %v3710_v11 = vadd.f32 %v11129_v42, %v11383_v5  ;;  %v5183_v42 = vadd.f32 %v9890_v55, %v11493_v6 }
 0x563   : > { %v6122_v21 = vsel %vm12560_vm4, %v6121_v14, %v6117_v19  ;;  %v8396_v48 = vpop.eup %8395  ;;  %v4233_v41 = vmul.f32 %v11425_v62, %v8394_v30  ;;  %v6141_v19 = vrot.slane %v5181_v33, %v10495_v2  ;;  %v3741_v6 = vadd.f32 %v11167_v43, %v11524_v58 }
 0x564   : > { %v6126_v10 = vrot.slane %v5178_v18, %v10394_v32  ;;  %4673 = vadd.xlane.f32.xlu0 %v4672_v40  ;;  %v8398_v16 = vpop.eup %8397  ;;  %v4222_v12 = vmul.f32 %v11425_v62, %v8396_v48  ;;  %8407 = vtanh.f32 %v3710_v11  ;;  %v6151_v33 = vrot.slane %v5183_v42, %v10390_v3 }
 0x565   : > { %4856 = vadd.xlane.f32.xlu1 %v4855_v8  ;;  %v4608_v0 = vpop.xlane.xlu0 %4607  ;;  %8409 = vtanh.f32 %v3739_v39  ;;  %v8400_v8 = vpop.eup %8399  ;;  %v4867_v17 = vsel %vm680_vm1, %v4233_v41, 0.0  ;;  %v4235_v30 = vmul.f32 %v11425_v62, %v8398_v16 }
 0x566   : > { %v6127_v31 = vsel %vm5630_vm5, %v6126_v10, %v6122_v21  ;;  %v5180_v36 = vadd.f32 %v9890_v55, %v4608_v0  ;;  %v11577_v26 = vpop.xlane.xlu1 %4742  ;;  %v4828_v10 = vsel %vm680_vm1, %v4220_v49, 0.0  ;;  %v5185_v0 = vadd.f32 %v9890_v55, %v11506_v50 }
 0x567   : > { %v6132_v15 = vsel %vm12561_vm6, %v6131_v13, %v6127_v31  ;;  %v8402_v13 = vpop.eup %8401  ;;  %v4834_v48 = vsel %vm680_vm1, %v4222_v12, 0.0  ;;  %8411 = vtanh.f32 %v3712_v1  ;;  %v4224_v39 = vmul.f32 %v11425_v62, %v8400_v8 }
 0x568   : > { %v6136_v14 = vrot.slane %v5180_v36, %v10450_v51  ;;  %4679 = vadd.xlane.f32.xlu0 %v4678_v22  ;;  %v3714_v36 = vadd.f32 %v11183_v59, %v11383_v5  ;;  %8413 = vtanh.f32 %v3741_v6  ;;  %v3743_v50 = vadd.f32 %v11190_v34, %v11524_v58 }
 0x569   : > { %4862 = vadd.xlane.f32.xlu1 %v4861_v25  ;;  %v4614_v18 = vpop.xlane.xlu0 %4613  ;;  %v4873_v41 = vsel %vm680_vm1, %v4235_v30, 0.0  ;;  %v4253_v16 = vmul.f32 %v11425_v62, %v8402_v13  ;;  %v6161_v42 = vrot.slane %v5185_v0, %v10419_v29  ;;  %v3716_v34 = vadd.f32 %v11206_v7, %v11383_v5 }
 0x56a   : > { %v6137_v35 = vsel %vm5644_vm7, %v6136_v14, %v6132_v15  ;;  %v5182_v21 = vadd.f32 %v9890_v55, %v4614_v18  ;;  %v11596_v40 = vpop.xlane.xlu1 %4748  ;;  %v8404_v15 = vpop.eup %8403  ;;  %v12651_v14 = vld [vmem:[#allocation41_spill] sm:$0xff]  ;;  %v5187_v18 = vadd.f32 %v9890_v55, %v11530_v4  ;;  %8415 = vtanh.f32 %v3714_v36 }
 0x56b   : > { %v6142_v57 = vsel %vm5651_vm8, %v6141_v19, %v6137_v35  ;;  %v3443_v59 = vcombine.high %v12651_v14, %v12651_v14  ;;  %v8406_v19 = vpop.eup %8405  ;;  %v4840_v4 = vsel %vm680_vm1, %v4224_v39, 0.0  ;;  %v4226_v8 = vmul.f32 %v11425_v62, %v8404_v15 }
 0x56c   : > { %v6146_v38 = vrot.slane %v5182_v21, %v10499_v20  ;;  %4829 = vadd.xlane.f32.xlu0 %v4828_v10  ;;  %8417 = vtanh.f32 %v3743_v50  ;;  %v11662_v50 = vld [vmem:[%s9467_s0 + $0x68] sm:$0xff] }
 0x56d   : > { %4868 = vadd.xlane.f32.xlu1 %v4867_v17  ;;  %v4620_v31 = vpop.xlane.xlu0 %4619  ;;  %v4255_v17 = vmul.f32 %v11425_v62, %v8406_v19  ;;  %v11646_v13 = vrot.slane %v3443_v59, %v9537_v53  ;;  %8419 = vtanh.f32 %v3716_v34  ;;  %v3747_v14 = vadd.f32 %v11662_v50, %v11524_v58 }
 0x56e   : > { %v6147_v43 = vsel %vm5658_vm9, %v6146_v38, %v6142_v57  ;;  %v5184_v22 = vadd.f32 %v9890_v55, %v4620_v31  ;;  %v11613_v11 = vpop.xlane.xlu1 %4754  ;;  %v11635_v57 = vld [vmem:[%s9467_s0 + $0x58] sm:$0xff]  ;;  %v8408_v7 = vpop.eup %8407  ;;  %v4927_v38 = vsel %vm680_vm1, %v4253_v16, 0.0 }
 0x56f   : > { %v6152_v49 = vsel %vm5665_vm10, %v6151_v33, %v6147_v43  ;;  %v3745_v10 = vadd.f32 %v11635_v57, %v11524_v58  ;;  %v8410_v30 = vpop.eup %8409  ;;  %v6171_v33 = vrot.slane %v5187_v18, %v10446_v47  ;;  %v4228_v39 = vmul.f32 %v11425_v62, %v8408_v7 }
 0x570   : > { %v6156_v25 = vrot.slane %v5184_v22, %v10525_v60  ;;  %4835 = vadd.xlane.f32.xlu0 %v4834_v48  ;;  %v11654_v22 = vld [vmem:[%s9467_s0] sm:$0xff]  ;;  %v4933_v16 = vsel %vm680_vm1, %v4255_v17, 0.0  ;;  %v4257_v19 = vmul.f32 %v11425_v62, %v8410_v30 }
 0x571   : > { %4874 = vadd.xlane.f32.xlu1 %v4873_v41  ;;  %v4626_v1 = vpop.xlane.xlu0 %4625  ;;  %8421 = vtanh.f32 %v3745_v10  ;;  %v3734_v48 = vadd.f32 %v11654_v22, %v11524_v58  ;;  %v8412_v59 = vpop.eup %8411 }
 0x572   : > { %v6157_v35 = vsel %vm5672_vm11, %v6156_v25, %v6152_v49  ;;  %v5186_v21 = vadd.f32 %v9890_v55, %v4626_v1  ;;  %v11632_v12 = vpop.xlane.xlu1 %4760  ;;  %v4846_v49 = vsel %vm680_vm1, %v4226_v8, 0.0  ;;  %v5223_v25 = vadd.f32 %v9890_v55, %v11562_v24  ;;  %v11672_v1 = vld [vmem:[%s9467_s0 + $0x10] sm:$0xff] }
 0x573   : > { %v6162_v6 = vsel %vm5679_vm12, %v6161_v42, %v6157_v35  ;;  %v8414_v42 = vpop.eup %8413  ;;  %v3736_v34 = vadd.f32 %v11672_v1, %v11524_v58  ;;  %8423 = vtanh.f32 %v3734_v48  ;;  %v3750_v8 = vadd.f32 %v11654_v22, %v11646_v13 }
 0x574   : > { %v6166_v5 = vrot.slane %v5186_v21, %v10547_v37  ;;  %4841 = vadd.xlane.f32.xlu0 %v4840_v4  ;;  %v8416_v10 = vpop.eup %8415  ;;  %v4230_v4 = vmul.f32 %v11425_v62, %v8412_v59  ;;  %8425 = vtanh.f32 %v3747_v14  ;;  %v6348_v7 = vrot.slane %v5223_v25, %v10341_v52 }
 0x575   : > { %4928 = vadd.xlane.f32.xlu1 %v4927_v38  ;;  %v4632_v0 = vpop.xlane.xlu0 %4631  ;;  %v4939_v38 = vsel %vm680_vm1, %v4257_v19, 0.0  ;;  %v4259_v17 = vmul.f32 %v11425_v62, %v8414_v42  ;;  %8427 = vtanh.f32 %v3736_v34  ;;  %v3752_v59 = vadd.f32 %v11672_v1, %v11646_v13 }
 0x576   : > { %v6167_v31 = vsel %vm5686_vm13, %v6166_v5, %v6162_v6  ;;  %v5188_v36 = vadd.f32 %v9890_v55, %v4632_v0  ;;  %v11651_v43 = vpop.xlane.xlu1 %4766  ;;  %v4852_v6 = vsel %vm680_vm1, %v4228_v39, 0.0  ;;  %v8418_v30 = vpop.eup %8417  ;;  %v4232_v39 = vmul.f32 %v11425_v62, %v8416_v10 }
 0x577   : > { %v6172_v15 = vsel %vm12641_vm14, %v6171_v33, %v6167_v31  ;;  %v5225_v33 = vadd.f32 %v9890_v55, %v11577_v26  ;;  %v11693_v31 = vld [vmem:[%s9467_s0 + $0x20] sm:$0xff]  ;;  %v8420_v14 = vpop.eup %8419  ;;  %v4858_v26 = vsel %vm680_vm1, %v4230_v4, 0.0  ;;  %8429 = vtanh.f32 %v3750_v8 }
 0x578   : > { %v6176_v41 = vrot.slane %v5188_v36, %v10593_v44  ;;  %4847 = vadd.xlane.f32.xlu0 %v4846_v49  ;;  %v3738_v36 = vadd.f32 %v11693_v31, %v11524_v58  ;;  %v4261_v19 = vmul.f32 %v11425_v62, %v8418_v30 }
 0x579   : > { %4934 = vadd.xlane.f32.xlu1 %v4933_v16  ;;  %v4734_v18 = vpop.xlane.xlu0 %4733  ;;  %v4945_v16 = vsel %vm680_vm1, %v4259_v17, 0.0  ;;  %v6358_v42 = vrot.slane %v5225_v33, %v10386_v63  ;;  %v3754_v17 = vadd.f32 %v11693_v31, %v11646_v13 }
 0x57a   : > { %v11677_v35 = vsel %vm5700_vm15, %v6176_v41, %v6172_v15  ;;  %v5222_v24 = vadd.f32 %v9890_v55, %v4734_v18  ;;  %v11680_v21 = vpop.xlane.xlu1 %4772  ;;  %v5227_v18 = vadd.f32 %v9890_v55, %v11596_v40  ;;  %8431 = vtanh.f32 %v3738_v36  ;;  %v11729_v36 = vld [vmem:[%s9467_s0 + $0x40] sm:$0xff] }
 0x57b   : > { %12652 = vst [vmem:[#allocation41_spill] sm:$0xff] %v11677_v35  ;;  %v8422_v25 = vpop.eup %8421  ;;  %8433 = vtanh.f32 %v3752_v59 }
 0x57c   : > { %v6344_v5 = vrot.slane %v5222_v24, %v10350_v9  ;;  %4853 = vadd.xlane.f32.xlu0 %v4852_v6  ;;  %v11712_v24 = vld [vmem:[%s9467_s0 + $0x30] sm:$0xff] }
 0x57d   : > { %4940 = vadd.xlane.f32.xlu1 %v4939_v38  ;;  %v4740_v0 = vpop.xlane.xlu0 %4739  ;;  %v3740_v10 = vadd.f32 %v11712_v24, %v11524_v58  ;;  %v4263_v38 = vmul.f32 %v11425_v62, %v8422_v25  ;;  %v8424_v30 = vpop.eup %8423 }
 0x57e   : > { %v6349_v48 = vsel %vm5609_vm2, %v6348_v7, %v6344_v5  ;;  %v5224_v15 = vadd.f32 %v9890_v55, %v4740_v0  ;;  %v11699_v49 = vpop.xlane.xlu1 %4778  ;;  %v4864_v7 = vsel %vm680_vm1, %v4232_v39, 0.0  ;;  %v4234_v5 = vmul.f32 %v11425_v62, %v8420_v14 }
 0x57f   : > { %v4951_v0 = vsel %vm680_vm1, %v4261_v19, 0.0  ;;  %v6368_v39 = vrot.slane %v5227_v18, %v10442_v54  ;;  %v5229_v14 = vadd.f32 %v9890_v55, %v11613_v11  ;;  %8435 = vtanh.f32 %v3740_v10  ;;  %v11742_v19 = vld [vmem:[%s9467_s0 + $0x28] sm:$0xff] }
 0x580   : > { %v6353_v41 = vrot.slane %v5224_v15, %v10356_v27  ;;  %4859 = vadd.xlane.f32.xlu0 %v4858_v26  ;;  %v8426_v15 = vpop.eup %8425  ;;  %v4252_v10 = vmul.f32 %v11425_v62, %v8424_v30  ;;  %8437 = vtanh.f32 %v3754_v17 }
 0x581   : > { %4946 = vadd.xlane.f32.xlu1 %v4945_v16  ;;  %v4746_v34 = vpop.xlane.xlu0 %4745  ;;  %v4870_v16 = vsel %vm680_vm1, %v4234_v5, 0.0  ;;  %v8428_v18 = vpop.eup %8427 }
 0x582   : > { %v6354_v6 = vsel %vm12559_vm3, %v6353_v41, %v6349_v48  ;;  %v5226_v4 = vadd.f32 %v9890_v55, %v4746_v34  ;;  %v11718_v8 = vpop.xlane.xlu1 %4784  ;;  %v3742_v48 = vadd.f32 %v11729_v36, %v11524_v58  ;;  %v4957_v34 = vsel %vm680_vm1, %v4263_v38, 0.0 }
 0x583   : > { %v6359_v40 = vsel %vm12560_vm4, %v6358_v42, %v6354_v6  ;;  %v3755_v42 = vadd.f32 %v11742_v19, %v11646_v13  ;;  %v5231_v38 = vadd.f32 %v9890_v55, %v11632_v12  ;;  %v3756_v12 = vadd.f32 %v11712_v24, %v11646_v13 }
 0x584   : > { %v6363_v33 = vrot.slane %v5226_v4, %v10394_v32  ;;  %4865 = vadd.xlane.f32.xlu0 %v4864_v7  ;;  %v4265_v4 = vmul.f32 %v11425_v62, %v8426_v15  ;;  %8439 = vtanh.f32 %v3742_v48  ;;  %v11752_v7 = vld [vmem:[%s9467_s0 + $0x50] sm:$0xff]  ;;  %v4254_v48 = vmul.f32 %v11425_v62, %v8428_v18 }
 0x585   : > { %4952 = vadd.xlane.f32.xlu1 %v4951_v0  ;;  %v4752_v26 = vpop.xlane.xlu0 %4751  ;;  %v3744_v5 = vadd.f32 %v11752_v7, %v11524_v58  ;;  %8441 = vtanh.f32 %v3755_v42  ;;  %v6388_v42 = vrot.slane %v5231_v38, %v10390_v3 }
 0x586   : > { %v6364_v59 = vsel %vm5630_vm5, %v6363_v33, %v6359_v40  ;;  %v5228_v25 = vadd.f32 %v9890_v55, %v4752_v26  ;;  %v11738_v41 = vpop.xlane.xlu1 %4790  ;;  %v8430_v40 = vpop.eup %8429  ;;  %v6378_v33 = vrot.slane %v5229_v14, %v10495_v2  ;;  %v4924_v14 = vsel %vm680_vm1, %v4252_v10, 0.0  ;;  %v11775_v10 = vld [vmem:[%s9467_s0 + $0x60] sm:$0xff] }
 0x587   : > { %v6369_v11 = vsel %vm12561_vm6, %v6368_v39, %v6364_v59  ;;  %v8432_v15 = vpop.eup %8431  ;;  %8443 = vtanh.f32 %v3744_v5  ;;  %v4930_v5 = vsel %vm680_vm1, %v4254_v48, 0.0 }
 0x588   : > { %v6373_v6 = vrot.slane %v5228_v25, %v10450_v51  ;;  %4871 = vadd.xlane.f32.xlu0 %v4870_v16  ;;  %v4963_v25 = vsel %vm680_vm1, %v4265_v4, 0.0  ;;  %v4268_v16 = vmul.f32 %v11425_v62, %v8430_v40  ;;  %v8434_v18 = vpop.eup %8433  ;;  %8445 = vtanh.f32 %v3756_v12  ;;  %v11798_v12 = vld [vmem:[%s9467_s0 + $0x70] sm:$0xff] }
 0x589   : > { %4958 = vadd.xlane.f32.xlu1 %v4957_v34  ;;  %v4758_v30 = vpop.xlane.xlu0 %4757 }
 0x58a   : > { %v6374_v17 = vsel %vm5644_vm7, %v6373_v6, %v6369_v11  ;;  %v5230_v0 = vadd.f32 %v9890_v55, %v4758_v30  ;;  %v11761_v39 = vpop.xlane.xlu1 %4796  ;;  %v5233_v11 = vadd.f32 %v9890_v55, %v11651_v43  ;;  %v3746_v6 = vadd.f32 %v11775_v10, %v11524_v58  ;;  %v8436_v30 = vpop.eup %8435 }
 0x58b   : > { %v6379_v26 = vsel %vm5651_vm8, %v6378_v33, %v6374_v17  ;;  %v4256_v43 = vmul.f32 %v11425_v62, %v8432_v15  ;;  %v11787_v17 = vld [vmem:[%s9467_s0 + $0x38] sm:$0xff]  ;;  %v8438_v48 = vpop.eup %8437 }
 0x58c   : > { %v6383_v59 = vrot.slane %v5230_v0, %v10499_v20  ;;  %4925 = vadd.xlane.f32.xlu0 %v4924_v14  ;;  %v3757_v0 = vadd.f32 %v11787_v17, %v11646_v13  ;;  %v4972_v14 = vsel %vm680_vm1, %v4268_v16, 0.0  ;;  %8447 = vtanh.f32 %v3746_v6 }
 0x58d   : > { %4964 = vadd.xlane.f32.xlu1 %v4963_v25  ;;  %v4764_v34 = vpop.xlane.xlu0 %4763  ;;  %v6398_v25 = vrot.slane %v5233_v11, %v10419_v29  ;;  %v4258_v11 = vmul.f32 %v11425_v62, %v8436_v30  ;;  %v3758_v6 = vadd.f32 %v11729_v36, %v11646_v13  ;;  %v5237_v30 = vadd.f32 %v9890_v55, %v11699_v49 }
 0x58e   : > { %v6384_v33 = vsel %vm5658_vm9, %v6383_v59, %v6379_v26  ;;  %v5232_v4 = vadd.f32 %v9890_v55, %v4764_v34  ;;  %v11781_v40 = vpop.xlane.xlu1 %4802  ;;  %v4270_v59 = vmul.f32 %v11425_v62, %v8434_v18  ;;  %v3748_v34 = vadd.f32 %v11798_v12, %v11524_v58 }
 0x58f   : > { %v6389_v38 = vsel %vm5665_vm10, %v6388_v42, %v6384_v33  ;;  %v5235_v42 = vadd.f32 %v9890_v55, %v11680_v21  ;;  %v8440_v33 = vpop.eup %8439  ;;  %v4936_v21 = vsel %vm680_vm1, %v4256_v43, 0.0  ;;  %8449 = vtanh.f32 %v3757_v0 }
 0x590   : > { %v6393_v26 = vrot.slane %v5232_v4, %v10525_v60  ;;  %4931 = vadd.xlane.f32.xlu0 %v4930_v5  ;;  %v4260_v0 = vmul.f32 %v11425_v62, %v8440_v33  ;;  %8451 = vtanh.f32 %v3748_v34  ;;  %v11831_v34 = vld [vmem:[%s9467_s0 + $0x48] sm:$0xff]  ;;  %v5239_v33 = vadd.f32 %v9890_v55, %v11718_v8 }
 0x591   : > { %4973 = vadd.xlane.f32.xlu1 %v4972_v14  ;;  %v4770_v15 = vpop.xlane.xlu0 %4769  ;;  %v8442_v14 = vpop.eup %8441  ;;  %8453 = vtanh.f32 %v3758_v6  ;;  %v6418_v6 = vrot.slane %v5237_v30, %v10473_v56 }
 0x592   : > { %v6394_v4 = vsel %vm5672_vm11, %v6393_v26, %v6389_v38  ;;  %v5234_v16 = vadd.f32 %v9890_v55, %v4770_v15  ;;  %v11804_v18 = vpop.xlane.xlu1 %4808  ;;  %v4978_v38 = vsel %vm680_vm1, %v4270_v59, 0.0  ;;  %v4272_v26 = vmul.f32 %v11425_v62, %v8438_v48  ;;  %v11824_v48 = vld [vmem:[%s9467_s0 + $0x8] sm:$0xff] }
 0x593   : > { %v6399_v5 = vsel %vm5679_vm12, %v6398_v25, %v6394_v4  ;;  %v6408_v15 = vrot.slane %v5235_v42, %v10446_v47  ;;  %v8444_v25 = vpop.eup %8443  ;;  %v4942_v59 = vsel %vm680_vm1, %v4258_v11, 0.0  ;;  %v3751_v42 = vadd.f32 %v11824_v48, %v11646_v13 }
 0x594   : > { %v6403_v61 = vrot.slane %v5234_v16, %v10547_v37  ;;  %4937 = vadd.xlane.f32.xlu0 %v4936_v21  ;;  %v4262_v35 = vmul.f32 %v11425_v62, %v8444_v25  ;;  %v3760_v25 = vadd.f32 %v11752_v7, %v11646_v13 }
 0x595   : > { %4979 = vadd.xlane.f32.xlu1 %v4978_v38  ;;  %v4776_v43 = vpop.xlane.xlu0 %4775  ;;  %v4273_v38 = vmul.f32 %v11425_v62, %v8442_v14  ;;  %8455 = vtanh.f32 %v3751_v42 }
 0x596   : > { %v6404_v4 = vsel %vm5686_vm13, %v6403_v61, %v6399_v5  ;;  %v5236_v16 = vadd.f32 %v9890_v55, %v4776_v43  ;;  %v11820_v21 = vpop.xlane.xlu1 %4814  ;;  %v3759_v61 = vadd.f32 %v11831_v34, %v11646_v13  ;;  %v4984_v5 = vsel %vm680_vm1, %v4272_v26, 0.0  ;;  %v8446_v43 = vpop.eup %8445  ;;  %v11849_v26 = vld [vmem:[%s9467_s0 + $0x18] sm:$0xff] }
 0x597   : > { %v6409_v49 = vsel %vm12641_vm14, %v6408_v15, %v6404_v4  ;;  %v3445_v15 = vcombine.high %v12648_v28, %v12648_v28  ;;  %v4948_v4 = vsel %vm680_vm1, %v4260_v0, 0.0  ;;  %v3753_v28 = vadd.f32 %v11849_v26, %v11646_v13  ;;  %v8448_v30 = vpop.eup %8447 }
 0x598   : > { %v6413_v11 = vrot.slane %v5236_v16, %v10593_v44  ;;  %4943 = vadd.xlane.f32.xlu0 %v4942_v59  ;;  %v4987_v0 = vsel %vm680_vm1, %v4273_v38, 0.0  ;;  %8457 = vtanh.f32 %v3759_v61  ;;  %vm12654_vm14 = vcmask 1041409  }
 0x599   : > { %4985 = vadd.xlane.f32.xlu1 %v4984_v5  ;;  %v4782_v14 = vpop.xlane.xlu0 %4781  ;;  %v8450_v46 = vpop.eup %8449  ;;  %v5241_v38 = vadd.f32 %v9890_v55, %v11738_v41  ;;  %8459 = vtanh.f32 %v3753_v28  ;;  %v3761_v41 = vadd.f32 %v11635_v57, %v11646_v13  ;;  %v5243_v28 = vadd.f32 %v9890_v55, %v11761_v39 }
 0x59a   : > { %v6414_v23 = vsel %vm5700_vm15, %v6413_v11, %v6409_v49  ;;  %v5238_v8 = vadd.f32 %v9890_v55, %v4782_v14  ;;  %v11846_v16 = vpop.xlane.xlu1 %4820  ;;  %v6427_v49 = vrot.slane %v5239_v33, %v10341_v52  ;;  %v12653_v11 = vld [vmem:[#allocation39_spill] sm:$0xff]  ;;  %v4274_v14 = vmul.f32 %v11425_v62, %v8446_v43 }
 0x59b   : > { %v6419_v59 = vsel %vm5707_vm0, %v6418_v6, %v6414_v23  ;;  %v11865_v23 = vrot.slane %v3445_v15, %v9537_v53  ;;  %v11870_v6 = vld [vmem:[%s9467_s0 + $0x78] sm:$0xff]  ;;  %v4264_v43 = vmul.f32 %v11425_v62, %v8448_v30  ;;  %v8452_v15 = vpop.eup %8451  ;;  %8461 = vtanh.f32 %v3760_v25 }
 0x59c   : > { %v11860_v42 = vsel %vm12654_vm14, %v6419_v59, %v12653_v11  ;;  %v6423_v5 = vrot.slane %v5238_v8, %v10350_v9  ;;  %4949 = vadd.xlane.f32.xlu0 %v4948_v4  ;;  %v3749_v33 = vadd.f32 %v11870_v6, %v11524_v58  ;;  %v4954_v11 = vsel %vm680_vm1, %v4262_v35, 0.0 }
 0x59d   : > { %4988 = vadd.xlane.f32.xlu1 %v4987_v0  ;;  %v4788_v61 = vpop.xlane.xlu0 %4787  ;;  %v4990_v58 = vsel %vm680_vm1, %v4274_v14, 0.0  ;;  %v3762_v39 = vadd.f32 %v11775_v10, %v11646_v13  ;;  %vm12657_vm14 = vcmask 917312  }
 0x59e   : > { %v6428_v59 = vsel %vm5609_vm2, %v6427_v49, %v6423_v5  ;;  %v5240_v4 = vadd.f32 %v9890_v55, %v4788_v61  ;;  %v11876_v8 = vpop.xlane.xlu1 %4826  ;;  %v4275_v49 = vmul.f32 %v11425_v62, %v8450_v46  ;;  %v8454_v5 = vpop.eup %8453  ;;  %v6437_v61 = vrot.slane %v5241_v38, %v10386_v63 }
 0x59f   : > { %8463 = vtanh.f32 %v3749_v33  ;;  %v3766_v46 = vadd.f32 %v11654_v22, %v11865_v23  ;;  %v4266_v38 = vmul.f32 %v11425_v62, %v8452_v15  ;;  %v8456_v33 = vpop.eup %8455  ;;  %v5245_v22 = vadd.f32 %v9890_v55, %v11781_v40 }
 0x5a0   : > { %v6432_v0 = vrot.slane %v5240_v4, %v10356_v27  ;;  %4955 = vadd.xlane.f32.xlu0 %v4954_v11  ;;  %v4960_v4 = vsel %vm680_vm1, %v4264_v43, 0.0  ;;  %8465 = vtanh.f32 %v3761_v41  ;;  %v4993_v11 = vsel %vm680_vm1, %v4275_v49, 0.0 }
 0x5a1   : > { %4991 = vadd.xlane.f32.xlu1 %v4990_v58  ;;  %v4794_v30 = vpop.xlane.xlu0 %4793  ;;  %v6447_v58 = vrot.slane %v5243_v28, %v10442_v54  ;;  %v3774_v41 = vadd.f32 %v11729_v36, %v11865_v23  ;;  %8467 = vtanh.f32 %v3766_v46  ;;  %v3763_v49 = vadd.f32 %v11662_v50, %v11646_v13 }
 0x5a2   : > { %v6433_v35 = vsel %vm12559_vm3, %v6432_v0, %v6428_v59  ;;  %v5242_v25 = vadd.f32 %v9890_v55, %v4794_v30  ;;  %v11890_v53 = vpop.xlane.xlu1 %4880  ;;  %v4276_v0 = vmul.f32 %v11425_v62, %v8454_v5  ;;  %v8458_v43 = vpop.eup %8457  ;;  %v4966_v28 = vsel %vm680_vm1, %v4266_v38, 0.0 }
 0x5a3   : > { %v6438_v14 = vsel %vm12560_vm4, %v6437_v61, %v6433_v35  ;;  %v4269_v40 = vmul.f32 %v11425_v62, %v8456_v33  ;;  %8469 = vtanh.f32 %v3762_v39  ;;  %v6457_v46 = vrot.slane %v5245_v22, %v10495_v2 }
 0x5a4   : > { %v6442_v59 = vrot.slane %v5242_v25, %v10394_v32  ;;  %4961 = vadd.xlane.f32.xlu0 %v4960_v4  ;;  %v8460_v25 = vpop.eup %8459  ;;  %v4996_v4 = vsel %vm680_vm1, %v4276_v0, 0.0  ;;  %8471 = vtanh.f32 %v3774_v41  ;;  %v3779_v0 = vadd.f32 %v11662_v50, %v11865_v23 }
 0x5a5   : > { %4994 = vadd.xlane.f32.xlu1 %v4993_v11  ;;  %v4800_v15 = vpop.xlane.xlu0 %4799  ;;  %v5247_v11 = vadd.f32 %v9890_v55, %v11804_v18  ;;  %8473 = vtanh.f32 %v3763_v49  ;;  %v4975_v22 = vsel %vm680_vm1, %v4269_v40, 0.0  ;;  %v3764_v41 = vadd.f32 %v11798_v12, %v11646_v13 }
 0x5a6   : > { %v6443_v61 = vsel %vm5630_vm5, %v6442_v59, %v6438_v14  ;;  %v5244_v30 = vadd.f32 %v9890_v55, %v4800_v15  ;;  %v11909_v35 = vpop.xlane.xlu1 %4886  ;;  %v4277_v14 = vmul.f32 %v11425_v62, %v8458_v43  ;;  %v8462_v59 = vpop.eup %8461  ;;  %v11930_v15 = vld [vmem:[#allocation11] ss:$0 sm:$0xff]  ;;  %8475 = vtanh.f32 %v3779_v0 }
 0x5a7   : > { %v6448_v5 = vsel %vm12561_vm6, %v6447_v58, %v6443_v61  ;;  %v4271_v18 = vmul.f32 %v11930_v15, %v8460_v25  ;;  %v4278_v49 = vmul.f32 %v11930_v15, %v8462_v59  ;;  %v3780_v25 = vadd.f32 %v11798_v12, %v11865_v23 }
 0x5a8   : > { %v6452_v36 = vrot.slane %v5244_v30, %v10450_v51  ;;  %4967 = vadd.xlane.f32.xlu0 %v4966_v28  ;;  %v4999_v30 = vsel %vm680_vm1, %v4277_v14, 0.0  ;;  %v5249_v28 = vadd.f32 %v9890_v55, %v11820_v21  ;;  %v3765_v14 = vadd.f32 %v11870_v6, %v11646_v13 }
 0x5a9   : > { %4997 = vadd.xlane.f32.xlu1 %v4996_v4  ;;  %v4806_v58 = vpop.xlane.xlu0 %4805  ;;  %v8464_v62 = vpop.eup %8463  ;;  %8477 = vtanh.f32 %v3764_v41  ;;  %v5251_v13 = vadd.f32 %v9890_v55, %v11846_v16 }
 0x5aa   : > { %v6453_v38 = vsel %vm5644_vm7, %v6452_v36, %v6448_v5  ;;  %v5246_v39 = vadd.f32 %v9890_v55, %v4806_v58  ;;  %v11924_v33 = vpop.xlane.xlu1 %4892  ;;  %v8466_v50 = vpop.eup %8465  ;;  %v6467_v5 = vrot.slane %v5247_v11, %v10390_v3  ;;  %v4981_v11 = vsel %vm680_vm1, %v4271_v18, 0.0 }
 0x5ab   : > { %v6458_v43 = vsel %vm5651_vm8, %v6457_v46, %v6453_v38  ;;  %v4267_v21 = vmul.f32 %v11930_v15, %v8464_v62  ;;  %v8468_v58 = vpop.eup %8467  ;;  %v5002_v38 = vsel %vm680_vm1, %v4278_v49, 0.0  ;;  %v6477_v0 = vrot.slane %v5249_v28, %v10419_v29 }
 0x5ac   : > { %v6462_v61 = vrot.slane %v5246_v39, %v10499_v20  ;;  %4976 = vadd.xlane.f32.xlu0 %v4975_v22  ;;  %v4279_v39 = vmul.f32 %v11930_v15, %v8466_v50  ;;  %8479 = vtanh.f32 %v3780_v25  ;;  %v12655_v25 = vld [vmem:[#allocation48_spill] sm:$0xff] }
 0x5ad   : > { %5000 = vadd.xlane.f32.xlu1 %v4999_v30  ;;  %v4812_v40 = vpop.xlane.xlu0 %4811  ;;  %v4969_v50 = vsel %vm680_vm1, %v4267_v21, 0.0  ;;  %8481 = vtanh.f32 %v3765_v14 }
 0x5ae   : > { %v6463_v36 = vsel %vm5658_vm9, %v6462_v61, %v6458_v43  ;;  %v5248_v4 = vadd.f32 %v9890_v55, %v4812_v40  ;;  %v11945_v46 = vpop.xlane.xlu1 %4898  ;;  %v8470_v43 = vpop.eup %8469  ;;  %v3767_v61 = vadd.f32 %v11824_v48, %v11865_v23  ;;  %v5005_v40 = vsel %vm680_vm1, %v4279_v39, 0.0 }
 0x5af   : > { %v6468_v59 = vsel %vm5665_vm10, %v6467_v5, %v6463_v36  ;;  %v8472_v30 = vpop.eup %8471  ;;  %v4284_v5 = vmul.f32 %v11930_v15, %v8468_v58  ;;  %v4280_v36 = vmul.f32 %v11930_v15, %v8470_v43  ;;  %v6487_v48 = vrot.slane %v5251_v13, %v10446_v47 }
 0x5b0   : > { %v6472_v12 = vrot.slane %v5248_v4, %v10525_v60  ;;  %4982 = vadd.xlane.f32.xlu0 %v4981_v11  ;;  %v8474_v16 = vpop.eup %8473  ;;  %v12656_v4 = vld [vmem:[#allocation44_spill] sm:$0xff]  ;;  %v5253_v11 = vadd.f32 %v9890_v55, %v11876_v8  ;;  %8483 = vtanh.f32 %v3767_v61 }
 0x5b1   : > { %5003 = vadd.xlane.f32.xlu1 %v5002_v38  ;;  %v4818_v22 = vpop.xlane.xlu0 %4817  ;;  %v3768_v38 = vadd.f32 %v11672_v1, %v11865_v23  ;;  %v5020_v43 = vsel %vm680_vm1, %v4284_v5, 0.0  ;;  %v4281_v8 = vmul.f32 %v11930_v15, %v8474_v16  ;;  %v8476_v13 = vpop.eup %8475 }
 0x5b2   : > { %v6473_v18 = vsel %vm5672_vm11, %v6472_v12, %v6468_v59  ;;  %v5250_v62 = vadd.f32 %v9890_v55, %v4818_v22  ;;  %v11960_v41 = vpop.xlane.xlu1 %4904  ;;  %v3228_v59 = vsub.f32 %v12656_v4, %v12655_v25  ;;  %v5271_v22 = vadd.f32 %v9890_v55, %v11890_v53 }
 0x5b3   : > { %v6478_v49 = vsel %vm5679_vm12, %v6477_v0, %v6473_v18  ;;  %v4292_v0 = vmul.f32 %v11930_v15, %v8472_v30  ;;  %v8478_v61 = vpop.eup %8477  ;;  %v6497_v1 = vrot.slane %v5253_v11, %v10473_v56  ;;  %8485 = vtanh.f32 %v3768_v38 }
 0x5b4   : > { %v6482_v28 = vrot.slane %v5250_v62, %v10547_v37  ;;  %4970 = vadd.xlane.f32.xlu0 %v4969_v50  ;;  %v5008_v62 = vsel %vm680_vm1, %v4280_v36, 0.0  ;;  %v3769_v53 = vadd.f32 %v11849_v26, %v11865_v23  ;;  %v5011_v36 = vsel %vm680_vm1, %v4281_v8, 0.0 }
 0x5b5   : > { %5006 = vadd.xlane.f32.xlu1 %v5005_v40  ;;  %v4824_v21 = vpop.xlane.xlu0 %4823  ;;  %v5044_v40 = vsel %vm680_vm1, %v4292_v0, 0.0  ;;  %v4297_v25 = vmul.f32 %v11930_v15, %v8476_v13  ;;  %v4282_v26 = vmul.f32 %v11930_v15, %v8478_v61  ;;  %v3770_v8 = vadd.f32 %v11693_v31, %v11865_v23 }
 0x5b6   : > { %v6483_v14 = vsel %vm5686_vm13, %v6482_v28, %v6478_v49  ;;  %v5252_v58 = vadd.f32 %v9890_v55, %v4824_v21  ;;  %v11977_v12 = vpop.xlane.xlu1 %4910  ;;  %v3230_v49 = vmul.f32 1.442695, %v3228_v59  ;;  %v8480_v4 = vpop.eup %8479  ;;  %v6585_v59 = vrot.slane %v5271_v22, %v10341_v52 }
 0x5b7   : > { %v6488_v39 = vsel %vm12657_vm14, %v6487_v48, %v6483_v14  ;;  %vm12658_vm14 = vcmask 1042434   ;;  %v8482_v21 = vpop.eup %8481  ;;  %v5273_v14 = vadd.f32 %v9890_v55, %v11909_v35  ;;  %v4298_v0 = vmul.f32 %v11930_v15, %v8480_v4 }
 0x5b8   : > { %v6492_v18 = vrot.slane %v5252_v58, %v10593_v44  ;;  %5021 = vadd.xlane.f32.xlu0 %v5020_v43  ;;  %8487 = vpow2.f32 %v3230_v49  ;;  %v5014_v35 = vsel %vm680_vm1, %v4282_v26, 0.0  ;;  %v5275_v61 = vadd.f32 %v9890_v55, %v11924_v33 }
 0x5b9   : > { %5009 = vadd.xlane.f32.xlu1 %v5008_v62  ;;  %v4878_v50 = vpop.xlane.xlu0 %4877  ;;  %8489 = vtanh.f32 %v3769_v53  ;;  %v6595_v62 = vrot.slane %v5273_v14, %v10386_v63  ;;  %v3771_v53 = vadd.f32 %v11742_v19, %v11865_v23  ;;  %v5277_v4 = vadd.f32 %v9890_v55, %v11945_v46 }
 0x5ba   : > { %v6493_v5 = vsel %vm5700_vm15, %v6492_v18, %v6488_v39  ;;  %v5270_v30 = vadd.f32 %v9890_v55, %v4878_v50  ;;  %v11992_v16 = vpop.xlane.xlu1 %4916  ;;  %v8484_v13 = vpop.eup %8483  ;;  %v4283_v18 = vmul.f32 %v11930_v15, %v8482_v21  ;;  %8491 = vtanh.f32 %v3770_v8 }
 0x5bb   : > { %v6498_v28 = vsel %vm5707_vm0, %v6497_v1, %v6493_v5  ;;  %8493 = vtanh.f32 %v3771_v53  ;;  %v5279_v8 = vadd.f32 %v9890_v55, %v11960_v41 }
 0x5bc   : > { %v12003_v48 = vsel %vm12658_vm14, %v6498_v28, %v11860_v42  ;;  %v6581_v11 = vrot.slane %v5270_v30, %v10350_v9  ;;  %5045 = vadd.xlane.f32.xlu0 %v5044_v40  ;;  %v5059_v42 = vsel %vm680_vm1, %v4297_v25, 0.0  ;;  %v5062_v30 = vsel %vm680_vm1, %v4298_v0, 0.0 }
 0x5bd   : > { %5012 = vadd.xlane.f32.xlu1 %v5011_v36  ;;  %v4884_v58 = vpop.xlane.xlu0 %4883  ;;  %v8486_v28 = vpop.eup %8485  ;;  %v5017_v33 = vsel %vm680_vm1, %v4283_v18, 0.0  ;;  %v4285_v36 = vmul.f32 %v11930_v15, %v8484_v13  ;;  %v6605_v25 = vrot.slane %v5275_v61, %v10442_v54  ;;  %v6615_v0 = vrot.slane %v5277_v4, %v10495_v2 }
 0x5be   : > { %v6586_v38 = vsel %vm5609_vm2, %v6585_v59, %v6581_v11  ;;  %v5272_v39 = vadd.f32 %v9890_v55, %v4884_v58  ;;  %v12011_v43 = vpop.xlane.xlu1 %4922  ;;  %v3772_v58 = vadd.f32 %v11712_v24, %v11865_v23  ;;  %vm12659_vm14 = vcmask 917312  }
 0x5bf   : > { %v5023_v46 = vsel %vm680_vm1, %v4285_v36, 0.0 }
 0x5c0   : > { %v6590_v22 = vrot.slane %v5272_v39, %v10356_v27  ;;  %5060 = vadd.xlane.f32.xlu0 %v5059_v42  ;;  %v4286_v39 = vmul.f32 %v11930_v15, %v8486_v28  ;;  %8495 = vtanh.f32 %v3772_v58 }
 0x5c1   : > { %5015 = vadd.xlane.f32.xlu1 %v5014_v35  ;;  %v4890_v49 = vpop.xlane.xlu0 %4889 }
 0x5c2   : > { %v6591_v1 = vsel %vm12559_vm3, %v6590_v22, %v6586_v38  ;;  %v5274_v50 = vadd.f32 %v9890_v55, %v4890_v49  ;;  %v12025_v31 = vpop.xlane.xlu1 %4640  ;;  %v12041_v21 = vpop.eup %8487  ;;  %v5026_v49 = vsel %vm680_vm1, %v4286_v39, 0.0 }
 0x5c3   : > { %v6596_v5 = vsel %vm12560_vm4, %v6595_v62, %v6591_v1  ;;  %v8490_v42 = vpop.eup %8489  ;;  %v3773_v62 = vadd.f32 %v11787_v17, %v11865_v23 }
 0x5c4   : > { %v6600_v40 = vrot.slane %v5274_v50, %v10394_v32  ;;  %5063 = vadd.xlane.f32.xlu0 %v5062_v30  ;;  %v4287_v41 = vmul.f32 %v11930_v15, %v8490_v42  ;;  %v8492_v1 = vpop.eup %8491  ;;  %v6625_v50 = vrot.slane %v5279_v8, %v10390_v3 }
 0x5c5   : > { %5018 = vadd.xlane.f32.xlu1 %v5017_v33  ;;  %v4896_v59 = vpop.xlane.xlu0 %4895  ;;  %8497 = vtanh.f32 %v3773_v62  ;;  %v3775_v33 = vadd.f32 %v11831_v34, %v11865_v23  ;;  %v8494_v4 = vpop.eup %8493  ;;  %v3776_v34 = vadd.f32 %v11752_v7, %v11865_v23  ;;  %v3777_v62 = vadd.f32 %v11635_v57, %v11865_v23 }
 0x5c6   : > { %v6601_v11 = vsel %vm5630_vm5, %v6600_v40, %v6596_v5  ;;  %v5276_v26 = vadd.f32 %v9890_v55, %v4896_v59  ;;  %v12039_v19 = vpop.xlane.xlu1 %4646  ;;  %v5281_v5 = vadd.f32 %v9890_v55, %v11977_v12  ;;  %v4288_v12 = vmul.f32 %v11930_v15, %v8492_v1 }
 0x5c7   : > { %v6606_v14 = vsel %vm12561_vm6, %v6605_v25, %v6601_v11  ;;  %v5029_v25 = vsel %vm680_vm1, %v4287_v41, 0.0  ;;  %v5283_v11 = vadd.f32 %v9890_v55, %v11992_v16  ;;  %8499 = vtanh.f32 %v3775_v33 }
 0x5c8   : > { %v6610_v38 = vrot.slane %v5276_v26, %v10450_v51  ;;  %3234 = vadd.xlane.f32.xlu0 %v12041_v21  ;;  %v6635_v59 = vrot.slane %v5281_v5, %v10419_v29  ;;  %v5032_v42 = vsel %vm680_vm1, %v4288_v12, 0.0  ;;  %v4289_v16 = vmul.f32 %v11930_v15, %v8494_v4 }
 0x5c9   : > { %5024 = vadd.xlane.f32.xlu1 %v5023_v46  ;;  %v4902_v13 = vpop.xlane.xlu0 %4901  ;;  %v6645_v8 = vrot.slane %v5283_v11, %v10446_v47  ;;  %8501 = vtanh.f32 %v3776_v34 }
 0x5ca   : > { %v6611_v22 = vsel %vm5644_vm7, %v6610_v38, %v6606_v14  ;;  %v5278_v24 = vadd.f32 %v9890_v55, %v4902_v13  ;;  %v12055_v35 = vpop.xlane.xlu1 %4652  ;;  %v5285_v13 = vadd.f32 %v9890_v55, %v12011_v43  ;;  %v5035_v43 = vsel %vm680_vm1, %v4289_v16, 0.0 }
 0x5cb   : > { %v6616_v18 = vsel %vm5651_vm8, %v6615_v0, %v6611_v22  ;;  %v8496_v0 = vpop.eup %8495  ;;  %8503 = vtanh.f32 %v3777_v62 }
 0x5cc   : > { %v6620_v61 = vrot.slane %v5278_v24, %v10499_v20  ;;  %v4290_v1 = vmul.f32 %v11930_v15, %v8496_v0  ;;  %v6655_v5 = vrot.slane %v5285_v13, %v10473_v56  ;;  %v5195_v13 = vadd.f32 %v9890_v55, %v12055_v35 }
 0x5cd   : > { %5027 = vadd.xlane.f32.xlu1 %v5026_v49  ;;  %v4908_v30 = vpop.xlane.xlu0 %4907  ;;  %v5191_v49 = vadd.f32 %v9890_v55, %v12025_v31 }
 0x5ce   : > { %v6621_v53 = vsel %vm5658_vm9, %v6620_v61, %v6616_v18  ;;  %v5280_v28 = vadd.f32 %v9890_v55, %v4908_v30  ;;  %v12068_v40 = vpop.xlane.xlu1 %4658  ;;  %v5038_v4 = vsel %vm680_vm1, %v4290_v1, 0.0 }
 0x5cf   : > { %v6626_v17 = vsel %vm5665_vm10, %v6625_v50, %v6621_v53  ;;  %v8498_v50 = vpop.eup %8497 }
 0x5d0   : > { %v6630_v36 = vrot.slane %v5280_v28, %v10525_v60 }
 0x5d1   : > { %5030 = vadd.xlane.f32.xlu1 %v5029_v25  ;;  %v4914_v26 = vpop.xlane.xlu0 %4913  ;;  %v6190_v25 = vrot.slane %v5191_v49, %v10341_v52  ;;  %v8500_v11 = vpop.eup %8499  ;;  %v12662_v49 = vld [vmem:[#allocation49_spill] sm:$0xff] }
 0x5d2   : > { %v6631_v14 = vsel %vm5672_vm11, %v6630_v36, %v6626_v17  ;;  %v5282_v58 = vadd.f32 %v9890_v55, %v4914_v26  ;;  %v12081_v38 = vpop.xlane.xlu1 %4664  ;;  %v12660_v17 = vld [vmem:[#allocation37_spill] sm:$0xff]  ;;  %v3778_v36 = vadd.f32 %v11775_v10, %v11865_v23  ;;  %v5193_v10 = vadd.f32 %v9890_v55, %v12039_v19  ;;  %v12661_v19 = vld [vmem:[#allocation51_spill] sm:$0xff] }
 0x5d3   : > { %v6636_v46 = vsel %vm5679_vm12, %v6635_v59, %v6631_v14  ;;  %v747_v33 = vsub.f32 1.0, %v12660_v17  ;;  %v4291_v59 = vmul.f32 %v11930_v15, %v8498_v50  ;;  %v4293_v0 = vmul.f32 %v11930_v15, %v8500_v11  ;;  %v12664_v11 = vld [vmem:[#allocation43_spill] sm:$0xff] }
 0x5d4   : > { %v6640_v39 = vrot.slane %v5282_v58, %v10547_v37  ;;  %8505 = vtanh.f32 %v3778_v36  ;;  %v6200_v62 = vrot.slane %v5193_v10, %v10386_v63 }
 0x5d5   : > { %5033 = vadd.xlane.f32.xlu1 %v5032_v42  ;;  %v4920_v22 = vpop.xlane.xlu0 %4919  ;;  %v5041_v16 = vsel %vm680_vm1, %v4291_v59, 0.0  ;;  %v5047_v1 = vsel %vm680_vm1, %v4293_v0, 0.0  ;;  %v12667_v0 = vld [vmem:[#allocation42_spill] sm:$0xff] }
 0x5d6   : > { %v6641_v24 = vsel %vm5686_vm13, %v6640_v39, %v6636_v46  ;;  %v5284_v7 = vadd.f32 %v9890_v55, %v4920_v22  ;;  %v12094_v18 = vpop.xlane.xlu1 %4670  ;;  %v3781_v46 = vadd.f32 %v11870_v6, %v11865_v23  ;;  %v8502_v39 = vpop.eup %8501 }
 0x5d7   : > { %v6646_v61 = vsel %vm12659_vm14, %v6645_v8, %v6641_v24  ;;  %v5173_v8 = vadd.f32 %v9890_v55, %v11405_v45  ;;  %v5189_v24 = vadd.f32 %v9890_v55, %v12661_v19  ;;  %v8504_v45 = vpop.eup %8503  ;;  %vm6898_vm14 = vcmask 1043459  }
 0x5d8   : > { %v6650_v41 = vrot.slane %v5284_v7, %v10593_v44  ;;  %8507 = vtanh.f32 %v3781_v46  ;;  %v4295_v59 = vmul.f32 %v11930_v15, %v8504_v45 }
 0x5d9   : > { %5036 = vadd.xlane.f32.xlu1 %v5035_v43  ;;  %v4638_v30 = vpop.xlane.xlu0 %4637  ;;  %v6102_v50 = vrot.slane %v5173_v8, %v10473_v56  ;;  %v6181_v17 = vrot.slane %v5189_v24, %v10473_v56 }
 0x5da   : > { %v6651_v53 = vsel %vm5700_vm15, %v6650_v41, %v6646_v61  ;;  %v5190_v57 = vadd.f32 %v9890_v55, %v4638_v30  ;;  %v12107_v28 = vpop.xlane.xlu1 %4676  ;;  %v4294_v61 = vmul.f32 %v11930_v15, %v8502_v39  ;;  %v12663_v41 = vld [vmem:[#allocation45_spill] sm:$0xff]  ;;  %v5197_v30 = vadd.f32 %v9890_v55, %v12068_v40 }
 0x5db   : > { %v12110_v31 = vsel %vm5707_vm0, %v6655_v5, %v6651_v53  ;;  %v3229_v35 = vsub.f32 %v12663_v41, %v12662_v49  ;;  %v6210_v5 = vrot.slane %v5195_v13, %v10442_v54  ;;  %v5199_v39 = vadd.f32 %v9890_v55, %v12081_v38 }
 0x5dc   : > { %v6186_v12 = vrot.slane %v5190_v57, %v10350_v9  ;;  %v6220_v46 = vrot.slane %v5197_v30, %v10495_v2  ;;  %v5053_v45 = vsel %vm680_vm1, %v4295_v59, 0.0 }
 0x5dd   : > { %5039 = vadd.xlane.f32.xlu1 %v5038_v4  ;;  %v4644_v26 = vpop.xlane.xlu0 %4643  ;;  %v5050_v4 = vsel %vm680_vm1, %v4294_v61, 0.0  ;;  %v3232_v13 = vmul.f32 1.442695, %v3229_v35 }
 0x5de   : > { %v6191_v14 = vsel %vm5609_vm2, %v6190_v25, %v6186_v12  ;;  %v5192_v58 = vadd.f32 %v9890_v55, %v4644_v26  ;;  %v12121_v34 = vpop.xlane.xlu1 %4682  ;;  %6921 = vperm.xlu0 %7784, %v747_v33   ;;  %v6103_v26 = vsel %vm5707_vm0, %v6102_v50, %v12664_v11  ;;  %v8506_v10 = vpop.eup %8505 }
 0x5df   : > { %v4296_v49 = vmul.f32 %v11930_v15, %v8506_v10  ;;  %8509 = vpow2.f32 %v3232_v13  ;;  %v5205_v10 = vadd.f32 %v9890_v55, %v12121_v34 }
 0x5e0   : > { %v6195_v42 = vrot.slane %v5192_v58, %v10356_v27 }
 0x5e1   : > { %5042 = vadd.xlane.f32.xlu1 %v5041_v16  ;;  %v4650_v22 = vpop.xlane.xlu0 %4649  ;;  %v12666_v16 = vld [vmem:[#allocation40_spill] sm:$0xff] }
 0x5e2   : > { %v6196_v23 = vsel %vm12559_vm3, %v6195_v42, %v6191_v14  ;;  %v5194_v6 = vadd.f32 %v9890_v55, %v4650_v22  ;;  %v12138_v7 = vpop.xlane.xlu1 %4832  ;;  %vm6900_vm3 = vcmask 1044484   ;;  %v12665_v14 = vld [vmem:[#allocation41_spill] sm:$0xff]  ;;  %v6899_v8 = vsel %vm6898_vm14, %v12667_v0, %v12666_v16  ;;  %v8508_v35 = vpop.eup %8507 }
 0x5e3   : > { %v6201_v53 = vsel %vm12560_vm4, %v6200_v62, %v6196_v23  ;;  %vm12564_vm4 = vcmask 1045509   ;;  %v6182_v58 = vsel %vm5707_vm0, %v6181_v17, %v12665_v14  ;;  %v12668_v23 = vld [vmem:[#allocation50_spill] sm:$0xff] }
 0x5e4   : > { %v6205_v43 = vrot.slane %v5194_v6, %v10394_v32  ;;  %v6901_v6 = vsel %vm6900_vm3, %v12668_v23, %v6899_v8  ;;  %v5255_v8 = vadd.f32 %v9890_v55, %v12138_v7 }
 0x5e5   : > { %5048 = vadd.xlane.f32.xlu1 %v5047_v1  ;;  %v4656_v57 = vpop.xlane.xlu0 %4655  ;;  %v6903_v38 = vsel %vm12564_vm4, %v6103_v26, %v6901_v6  ;;  %v5201_v1 = vadd.f32 %v9890_v55, %v12094_v18  ;;  %v5203_v18 = vadd.f32 %v9890_v55, %v12107_v28  ;;  %vm12672_vm4 = vcmask 392512  }
 0x5e6   : > { %v6206_v33 = vsel %vm5630_vm5, %v6205_v43, %v6201_v53  ;;  %v5196_v36 = vadd.f32 %v9890_v55, %v4656_v57  ;;  %v12154_v25 = vpop.xlane.xlu1 %4838  ;;  %v6230_v43 = vrot.slane %v5199_v39, %v10390_v3 }
 0x5e7   : > { %v6211_v12 = vsel %vm12561_vm6, %v6210_v5, %v6206_v33  ;;  %vm12562_vm6 = vcmask 1046534   ;;  %v5056_v33 = vsel %vm680_vm1, %v4296_v49, 0.0 }
 0x5e8   : > { %v6215_v40 = vrot.slane %v5196_v36, %v10450_v51  ;;  %v6905_v41 = vsel %vm12562_vm6, %v6182_v58, %v6903_v38  ;;  %v4299_v36 = vmul.f32 %v11930_v15, %v8508_v35  ;;  %v6250_v15 = vrot.slane %v5203_v18, %v10446_v47 }
 0x5e9   : > { %5051 = vadd.xlane.f32.xlu1 %v5050_v4  ;;  %v4662_v42 = vpop.xlane.xlu0 %4661  ;;  %vm12669_vm6 = vcmask 917312   ;;  %v12203_v0 = vpop.eup %8509  ;;  %v6506_v38 = vrot.slane %v5255_v8, %v10341_v52 }
 0x5ea   : > { %v6216_v22 = vsel %vm5644_vm7, %v6215_v40, %v6211_v12  ;;  %v5198_v19 = vadd.f32 %v9890_v55, %v4662_v42  ;;  %v4845_v24 = vpop.xlane.xlu1 %4844  ;;  %v6240_v12 = vrot.slane %v5201_v1, %v10419_v29  ;;  %v5065_v58 = vsel %vm680_vm1, %v4299_v36, 0.0 }
 0x5eb   : > { %v6221_v62 = vsel %vm5651_vm8, %v6220_v46, %v6216_v22  ;;  %v6260_v22 = vrot.slane %v5205_v10, %v10473_v56  ;;  %vm12563_vm1 = vcmask 1047559  }
 0x5ec   : > { %v6225_v61 = vrot.slane %v5198_v19, %v10499_v20 }
 0x5ed   : > { %5054 = vadd.xlane.f32.xlu1 %v5053_v45  ;;  %v4668_v50 = vpop.xlane.xlu0 %4667  ;;  %v5257_v45 = vadd.f32 %v9890_v55, %v12154_v25 }
 0x5ee   : > { %v6226_v5 = vsel %vm5658_vm9, %v6225_v61, %v6221_v62  ;;  %v5200_v30 = vadd.f32 %v9890_v55, %v4668_v50  ;;  %v4851_v53 = vpop.xlane.xlu1 %4850 }
 0x5ef   : > { %v6231_v57 = vsel %vm5665_vm10, %v6230_v43, %v6226_v5  ;;  %v6516_v5 = vrot.slane %v5257_v45, %v10386_v63  ;;  %v5261_v18 = vadd.f32 %v9890_v55, %v4851_v53 }
 0x5f0   : > { %v6235_v17 = vrot.slane %v5200_v30, %v10525_v60  ;;  %v5259_v30 = vadd.f32 %v9890_v55, %v4845_v24 }
 0x5f1   : > { %5057 = vadd.xlane.f32.xlu1 %v5056_v33  ;;  %v4674_v4 = vpop.xlane.xlu0 %4673  ;;  %v6536_v10 = vrot.slane %v5261_v18, %v10495_v2 }
 0x5f2   : > { %v6236_v59 = vsel %vm5672_vm11, %v6235_v17, %v6231_v57  ;;  %v5202_v40 = vadd.f32 %v9890_v55, %v4674_v4  ;;  %v4857_v11 = vpop.xlane.xlu1 %4856 }
 0x5f3   : > { %v6241_v26 = vsel %vm5679_vm12, %v6240_v12, %v6236_v59  ;;  %v6526_v12 = vrot.slane %v5259_v30, %v10442_v54 }
 0x5f4   : > { %v6245_v14 = vrot.slane %v5202_v40, %v10547_v37 }
 0x5f5   : > { %5066 = vadd.xlane.f32.xlu1 %v5065_v58  ;;  %v4680_v28 = vpop.xlane.xlu0 %4679  ;;  %v12673_v58 = vld [vmem:[#allocation38_spill] sm:$0xff] }
 0x5f6   : > { %v6246_v46 = vsel %vm5686_vm13, %v6245_v14, %v6241_v26  ;;  %v5204_v39 = vadd.f32 %v9890_v55, %v4680_v28  ;;  %v4863_v42 = vpop.xlane.xlu1 %4862  ;;  %v5263_v28 = vadd.f32 %v9890_v55, %v4857_v11 }
 0x5f7   : > { %v6251_v16 = vsel %vm12669_vm6, %v6250_v15, %v6246_v46  ;;  %vm12670_vm6 = vcmask 195712   ;;  %v748_v15 = vsub.f32 1.0, %v12673_v58 }
 0x5f8   : > { %v6255_v13 = vrot.slane %v5204_v39, %v10593_v44 }
 0x5f9   : > { %3236 = vadd.xlane.f32.xlu1 %v12203_v0  ;;  %v4830_v34 = vpop.xlane.xlu0 %4829 }
 0x5fa   : > { %v5254_v19 = vadd.f32 %v9890_v55, %v4830_v34  ;;  %v4869_v23 = vpop.xlane.xlu1 %4868  ;;  %v6256_v6 = vsel %vm5700_vm15, %v6255_v13, %v6251_v16  ;;  %v5265_v34 = vadd.f32 %v9890_v55, %v4863_v42 }
 0x5fb   : > { %v6261_v62 = vsel %vm5707_vm0, %v6260_v22, %v6256_v6  ;;  %v6546_v22 = vrot.slane %v5263_v28, %v10390_v3 }
 0x5fc   : > { %v6502_v61 = vrot.slane %v5254_v19, %v10350_v9  ;;  %v12216_v7 = vsel %vm12563_vm1, %v6261_v62, %v6905_v41  ;;  %vm12671_vm1 = vcmask 261312   ;;  %v6556_v45 = vrot.slane %v5265_v34, %v10419_v29 }
 0x5fd   : > { %v4836_v49 = vpop.xlane.xlu0 %4835 }
 0x5fe   : > { %v6507_v35 = vsel %vm5609_vm2, %v6506_v38, %v6502_v61  ;;  %v5256_v43 = vadd.f32 %v9890_v55, %v4836_v49  ;;  %v4875_v1 = vpop.xlane.xlu1 %4874  ;;  %v5267_v49 = vadd.f32 %v9890_v55, %v4869_v23 }
 0x600   : > { %v6511_v50 = vrot.slane %v5256_v43, %v10356_v27 }
 0x601   : > { %v4842_v57 = vpop.xlane.xlu0 %4841 }
 0x602   : > { %v6512_v17 = vsel %vm12670_vm6, %v6511_v50, %v6507_v35  ;;  %v5258_v41 = vadd.f32 %v9890_v55, %v4842_v57  ;;  %v4929_v33 = vpop.xlane.xlu1 %4928  ;;  %v6566_v57 = vrot.slane %v5267_v49, %v10446_v47 }
 0x603   : > { %v6517_v25 = vsel %vm12671_vm1, %v6516_v5, %v6512_v17  ;;  %v5269_v17 = vadd.f32 %v9890_v55, %v4875_v1  ;;  %v5287_v18 = vadd.f32 %v9890_v55, %v4929_v33 }
 0x604   : > { %v6521_v36 = vrot.slane %v5258_v41, %v10394_v32 }
 0x605   : > { %v4848_v4 = vpop.xlane.xlu0 %4847 }
 0x606   : > { %v6522_v59 = vsel %vm5630_vm5, %v6521_v36, %v6517_v25  ;;  %v5260_v40 = vadd.f32 %v9890_v55, %v4848_v4  ;;  %v4935_v24 = vpop.xlane.xlu1 %4934 }
 0x607   : > { %v6527_v26 = vsel %vm12672_vm4, %v6526_v12, %v6522_v59  ;;  %vm12674_vm4 = vcmask 917312   ;;  %v6576_v59 = vrot.slane %v5269_v17, %v10473_v56  ;;  %v5289_v33 = vadd.f32 %v9890_v55, %v4935_v24 }
 0x608   : > { %v6531_v14 = vrot.slane %v5260_v40, %v10450_v51 }
 0x609   : > { %v4854_v46 = vpop.xlane.xlu0 %4853  ;;  %v6674_v34 = vrot.slane %v5289_v33, %v10386_v63 }
 0x60a   : > { %v6532_v39 = vsel %vm5644_vm7, %v6531_v14, %v6527_v26  ;;  %v5262_v53 = vadd.f32 %v9890_v55, %v4854_v46  ;;  %6926 = vperm.xlu1 %7785, %v748_v15   ;;  %v4941_v16 = vpop.xlane.xlu1 %4940  ;;  %v6664_v15 = vrot.slane %v5287_v18, %v10341_v52 }
 0x60b   : > { %v6537_v8 = vsel %vm5651_vm8, %v6536_v10, %v6532_v39 }
 0x60c   : > { %v6541_v13 = vrot.slane %v5262_v53, %v10499_v20 }
 0x60d   : > { %v4860_v19 = vpop.xlane.xlu0 %4859 }
 0x60e   : > { %v6542_v6 = vsel %vm5658_vm9, %v6541_v13, %v6537_v8  ;;  %v5264_v11 = vadd.f32 %v9890_v55, %v4860_v19  ;;  %v4947_v62 = vpop.xlane.xlu1 %4946  ;;  %v5291_v19 = vadd.f32 %v9890_v55, %v4941_v16 }
 0x60f   : > { %v6547_v38 = vsel %vm5665_vm10, %v6546_v22, %v6542_v6 }
 0x610   : > { %v6551_v61 = vrot.slane %v5264_v11, %v10525_v60 }
 0x611   : > { %v4866_v35 = vpop.xlane.xlu0 %4865 }
 0x612   : > { %v6552_v43 = vsel %vm5672_vm11, %v6551_v61, %v6547_v38  ;;  %v5266_v50 = vadd.f32 %v9890_v55, %v4866_v35  ;;  %v4953_v42 = vpop.xlane.xlu1 %4952  ;;  %v6684_v61 = vrot.slane %v5291_v19, %v10442_v54 }
 0x613   : > { %v6557_v5 = vsel %vm5679_vm12, %v6556_v45, %v6552_v43  ;;  %v5293_v45 = vadd.f32 %v9890_v55, %v4947_v62 }
 0x614   : > { %v6561_v30 = vrot.slane %v5266_v50, %v10547_v37 }
 0x615   : > { %v4872_v41 = vpop.xlane.xlu0 %4871 }
 0x616   : > { %v6562_v25 = vsel %vm5686_vm13, %v6561_v30, %v6557_v5  ;;  %v5268_v36 = vadd.f32 %v9890_v55, %v4872_v41  ;;  %v4959_v23 = vpop.xlane.xlu1 %4958  ;;  %v6694_v30 = vrot.slane %v5293_v45, %v10495_v2 }
 0x617   : > { %v6567_v12 = vsel %vm12674_vm4, %v6566_v57, %v6562_v25  ;;  %v5295_v57 = vadd.f32 %v9890_v55, %v4953_v42 }
 0x618   : > { %v6571_v4 = vrot.slane %v5268_v36, %v10593_v44 }
 0x619   : > { %v4926_v40 = vpop.xlane.xlu0 %4925  ;;  %v6704_v18 = vrot.slane %v5295_v57, %v10390_v3 }
 0x61a   : > { %v6572_v26 = vsel %vm5700_vm15, %v6571_v4, %v6567_v12  ;;  %v5286_v14 = vadd.f32 %v9890_v55, %v4926_v40  ;;  %v4965_v1 = vpop.xlane.xlu1 %4964  ;;  %v5297_v4 = vadd.f32 %v9890_v55, %v4959_v23 }
 0x61b   : > { %v6577_v58 = vsel %vm5707_vm0, %v6576_v59, %v6572_v26 }
 0x61c   : > { %v6660_v10 = vrot.slane %v5286_v14, %v10350_v9  ;;  %v6910_v28 = vsel %vm6898_vm14, %v6577_v58, %v12003_v48  ;;  %vm12675_vm14 = vmmov %vm12670_vm6 }
 0x61d   : > { %v4932_v46 = vpop.xlane.xlu0 %4931  ;;  %v12272_v39 = vsel %vm6900_vm3, %v12110_v31, %v6910_v28  ;;  %vm12676_vm3 = vcmask 392512   ;;  %vm12677_vm6 = vmmov %vm12674_vm4 }
 0x61e   : > { %v6665_v53 = vsel %vm5609_vm2, %v6664_v15, %v6660_v10  ;;  %v5288_v8 = vadd.f32 %v9890_v55, %v4932_v46  ;;  %v4974_v13 = vpop.xlane.xlu1 %4973  ;;  %v6714_v15 = vrot.slane %v5297_v4, %v10419_v29  ;;  %v5299_v10 = vadd.f32 %v9890_v55, %v4965_v1  ;;  %vm12678_vm4 = vmmov %vm12675_vm14 }
 0x620   : > { %v6669_v22 = vrot.slane %v5288_v8, %v10356_v27 }
 0x621   : > { %v4938_v6 = vpop.xlane.xlu0 %4937 }
 0x622   : > { %v6670_v48 = vsel %vm12675_vm14, %v6669_v22, %v6665_v53  ;;  %v5290_v24 = vadd.f32 %v9890_v55, %v4938_v6  ;;  %v4980_v11 = vpop.xlane.xlu1 %4979  ;;  %v6724_v22 = vrot.slane %v5299_v10, %v10446_v47  ;;  %vm12679_vm14 = vmmov %vm12671_vm1 }
 0x623   : > { %v6675_v31 = vsel %vm12671_vm1, %v6674_v34, %v6670_v48  ;;  %vm12680_vm1 = vmmov %vm12676_vm3 }
 0x624   : > { %v6679_v38 = vrot.slane %v5290_v24, %v10394_v32  ;;  %v5302_v24 = vadd.f32 %v9890_v55, %v4974_v13 }
 0x625   : > { %v4944_v49 = vpop.xlane.xlu0 %4943 }
 0x626   : > { %v6680_v35 = vsel %vm5630_vm5, %v6679_v38, %v6675_v31  ;;  %v5292_v43 = vadd.f32 %v9890_v55, %v4944_v49  ;;  %v4986_v16 = vpop.xlane.xlu1 %4985  ;;  %v5304_v38 = vadd.f32 %v9890_v55, %v4980_v11 }
 0x627   : > { %v6685_v50 = vsel %vm12676_vm3, %v6684_v61, %v6680_v35  ;;  %vm12681_vm3 = vcmask 1045509  }
 0x628   : > { %v6689_v5 = vrot.slane %v5292_v43, %v10450_v51  ;;  %v6739_v43 = vrot.slane %v5302_v24, %v10350_v9 }
 0x629   : > { %v4950_v17 = vpop.xlane.xlu0 %4949 }
 0x62a   : > { %v6690_v41 = vsel %vm5644_vm7, %v6689_v5, %v6685_v50  ;;  %v5294_v25 = vadd.f32 %v9890_v55, %v4950_v17  ;;  %v4989_v62 = vpop.xlane.xlu1 %4988  ;;  %v6748_v5 = vrot.slane %v5304_v38, %v10356_v27 }
 0x62b   : > { %v6695_v36 = vsel %vm5651_vm8, %v6694_v30, %v6690_v41  ;;  %v5306_v30 = vadd.f32 %v9890_v55, %v4986_v16  ;;  %v5307_v13 = vadd.f32 %v9890_v55, %v4989_v62 }
 0x62c   : > { %v6699_v12 = vrot.slane %v5294_v25, %v10499_v20 }
 0x62d   : > { %v4956_v59 = vpop.xlane.xlu0 %4955  ;;  %v6758_v4 = vrot.slane %v5306_v30, %v10394_v32  ;;  %v6763_v62 = vrot.slane %v5307_v13, %v10442_v54 }
 0x62e   : > { %v6700_v40 = vsel %vm5658_vm9, %v6699_v12, %v6695_v36  ;;  %v5296_v26 = vadd.f32 %v9890_v55, %v4956_v59  ;;  %v4992_v42 = vpop.xlane.xlu1 %4991 }
 0x62f   : > { %v6705_v14 = vsel %vm5665_vm10, %v6704_v18, %v6700_v40  ;;  %v5308_v25 = vadd.f32 %v9890_v55, %v4992_v42 }
 0x630   : > { %v6709_v58 = vrot.slane %v5296_v26, %v10525_v60 }
 0x631   : > { %v4962_v28 = vpop.xlane.xlu0 %4961 }
 0x632   : > { %v6710_v33 = vsel %vm5672_vm11, %v6709_v58, %v6705_v14  ;;  %v5298_v46 = vadd.f32 %v9890_v55, %v4962_v28  ;;  %v4995_v23 = vpop.xlane.xlu1 %4994  ;;  %v6768_v58 = vrot.slane %v5308_v25, %v10450_v51 }
 0x633   : > { %v6715_v53 = vsel %vm5679_vm12, %v6714_v15, %v6710_v33  ;;  %v5309_v12 = vadd.f32 %v9890_v55, %v4995_v23 }
 0x634   : > { %v6719_v8 = vrot.slane %v5298_v46, %v10547_v37 }
 0x635   : > { %v4968_v34 = vpop.xlane.xlu0 %4967  ;;  %v6773_v10 = vrot.slane %v5309_v12, %v10495_v2 }
 0x636   : > { %v6720_v19 = vsel %vm5686_vm13, %v6719_v8, %v6715_v53  ;;  %v5300_v6 = vadd.f32 %v9890_v55, %v4968_v34  ;;  %v4998_v48 = vpop.xlane.xlu1 %4997 }
 0x637   : > { %v6725_v1 = vsel %vm12677_vm6, %v6724_v22, %v6720_v19  ;;  %v5310_v16 = vadd.f32 %v9890_v55, %v4998_v48 }
 0x638   : > { %v6729_v31 = vrot.slane %v5300_v6, %v10593_v44 }
 0x639   : > { %v4977_v61 = vpop.xlane.xlu0 %4976  ;;  %v6778_v46 = vrot.slane %v5310_v16, %v10499_v20 }
 0x63a   : > { %v6730_v45 = vsel %vm5700_vm15, %v6729_v31, %v6725_v1  ;;  %v5303_v49 = vadd.f32 %v9890_v55, %v4977_v61  ;;  %v5001_v35 = vpop.xlane.xlu1 %5000 }
 0x63b   : > { %v5311_v40 = vadd.f32 %v9890_v55, %v5001_v35 }
 0x63c   : > { %v6743_v50 = vrot.slane %v5303_v49, %v10341_v52 }
 0x63d   : > { %v4983_v57 = vpop.xlane.xlu0 %4982  ;;  %v6783_v8 = vrot.slane %v5311_v40, %v10390_v3 }
 0x63e   : > { %v6744_v17 = vsel %vm5609_vm2, %v6743_v50, %v6739_v43  ;;  %v5305_v11 = vadd.f32 %v9890_v55, %v4983_v57  ;;  %v5004_v41 = vpop.xlane.xlu1 %5003  ;;  %v5334_v50 = vld [vmem:[%s549_s10] sm:$0x1] }
 0x63f   : > { %v6749_v36 = vsel %vm12678_vm4, %v6748_v5, %v6744_v17  ;;  %v5312_v24 = vadd.f32 %v9890_v55, %v5004_v41  ;;  %vm5335_vm6 = vcmp.gt.f32.partialorder %v5334_v50, 0.0  ;;  %vm12683_vm4 = vcmask 917312  }
 0x640   : > { %v6753_v18 = vrot.slane %v5305_v11, %v10386_v63 }
 0x641   : > { %v4971_v59 = vpop.xlane.xlu0 %4970  ;;  %v6788_v49 = vrot.slane %v5312_v24, %v10525_v60 }
 0x642   : > { %v6754_v26 = vsel %vm12679_vm14, %v6753_v18, %v6749_v36  ;;  %v5301_v14 = vadd.f32 %v9890_v55, %v4971_v59  ;;  %v5007_v42 = vpop.xlane.xlu1 %5006  ;;  %v12682_v18 = vmov 0   ;;  %vm12685_vm14 = vcmask 1046534  }
 0x643   : > { %v6759_v15 = vsel %vm5630_vm5, %v6758_v4, %v6754_v26  ;;  %v5313_v61 = vadd.f32 %v9890_v55, %v5007_v42  ;;  %v5336_v4 = vsel %vm5335_vm6, 1, %v12682_v18  ;;  %v12684_v42 = vld [vmem:[#allocation36_spill] sm:$0xff]  ;;  %vm12690_vm6 = vcmask 261312  }
 0x644   : > { %v6764_v28 = vsel %vm12680_vm1, %v6763_v62, %v6759_v15  ;;  %v6734_v33 = vrot.slane %v5301_v14, %v10473_v56 }
 0x645   : > { %v6769_v23 = vsel %vm5644_vm7, %v6768_v58, %v6764_v28  ;;  %v5022_v53 = vpop.xlane.xlu0 %5021  ;;  %v6793_v30 = vrot.slane %v5313_v61, %v10419_v29  ;;  %v5340_v58 = vrot.slane %v5336_v4, %v12684_v42 }
 0x646   : > { %v6774_v22 = vsel %vm5651_vm8, %v6773_v10, %v6769_v23  ;;  %v6735_v34 = vsel %vm5707_vm0, %v6734_v33, %v6730_v45  ;;  %v5010_v19 = vpop.xlane.xlu1 %5009 }
 0x647   : > { %v6779_v6 = vsel %vm5658_vm9, %v6778_v46, %v6774_v22  ;;  %v6912_v48 = vsel %vm12681_vm3, %v6735_v34, %v12272_v39  ;;  %v5314_v35 = vadd.f32 %v9890_v55, %v5010_v19  ;;  %vm12379_vm1 = vcmp.eq.s32.totalorder %v5340_v58, 1 }
 0x648   : > { %v6784_v1 = vsel %vm5665_vm10, %v6783_v8, %v6779_v6  ;;  %v6917_v23 = vsel %vm12379_vm1, %v12216_v7, -1e+09  ;;  %vm12689_vm3 = vcmask 195712  }
 0x649   : > { %v12348_v31 = vpop.xlane.xlu0 %5045  ;;  %v6789_v39 = vsel %vm5672_vm11, %v6788_v49, %v6784_v1  ;;  %v6798_v13 = vrot.slane %v5314_v35, %v10547_v37  ;;  %v5318_v35 = vadd.f32 %v9890_v55, %v5022_v53 }
 0x64a   : > { %v5013_v38 = vpop.xlane.xlu1 %5012  ;;  %v6794_v17 = vsel %vm5679_vm12, %v6793_v30, %v6789_v39 }
 0x64b   : > { %v5315_v45 = vadd.f32 %v9890_v55, %v5013_v38  ;;  %v6799_v16 = vsel %vm5686_vm13, %v6798_v13, %v6794_v17  ;;  %v6818_v13 = vrot.slane %v5318_v35, %v10350_v9 }
 0x64d   : > { %v12354_v43 = vpop.xlane.xlu0 %5060  ;;  %v6803_v11 = vrot.slane %v5315_v45, %v10446_v47 }
 0x64e   : > { %v5016_v5 = vpop.xlane.xlu1 %5015 }
 0x64f   : > { %v5316_v57 = vadd.f32 %v9890_v55, %v5016_v5  ;;  %v6804_v59 = vsel %vm12683_vm4, %v6803_v11, %v6799_v16 }
 0x651   : > { %v12364_v41 = vpop.xlane.xlu0 %5063  ;;  %v6808_v25 = vrot.slane %v5316_v57, %v10593_v44 }
 0x652   : > { %v5019_v36 = vpop.xlane.xlu1 %5018 }
 0x653   : > { %v5317_v12 = vadd.f32 %v9890_v55, %v5019_v36  ;;  %v6809_v26 = vsel %vm5700_vm15, %v6808_v25, %v6804_v59 }
 0x655   : > { %v6813_v62 = vrot.slane %v5317_v12, %v10473_v56  ;;  %v3235_v40 = vpop.xlane.xlu0 %3234 }
 0x656   : > { %8511 = vrcp.f32 %v3235_v40  ;;  %v5025_v14 = vpop.xlane.xlu1 %5024 }
 0x657   : > { %v6814_v15 = vsel %vm5707_vm0, %v6813_v62, %v6809_v26  ;;  %v5319_v61 = vadd.f32 %v9890_v55, %v5025_v14 }
 0x658   : > { %v12376_v10 = vsel %vm12685_vm14, %v6814_v15, %v6912_v48  ;;  %v12688_v48 = vld [vmem:[#allocation46_spill] sm:$0xff]  ;;  %v5332_v15 = vadd.f32 %v9890_v55, %v12364_v41 }
 0x659   : > { %v6822_v39 = vrot.slane %v5319_v61, %v10341_v52 }
 0x65a   : > { %v5028_v28 = vpop.xlane.xlu1 %5027  ;;  %v6887_v41 = vrot.slane %v5332_v15, %v10593_v44 }
 0x65b   : > { %v5320_v7 = vadd.f32 %v9890_v55, %v5028_v28  ;;  %v6823_v25 = vsel %vm5609_vm2, %v6822_v39, %v6818_v13  ;;  %vm12691_vm2 = vcmask 392512  }
 0x65d   : > { %v6922_v46 = vpop.permute.xlu0 %6921  ;;  %v6827_v30 = vrot.slane %v5320_v7, %v10356_v27 }
 0x65e   : > { %v6929_v8 = vmul.f32 %v6922_v46, %v6917_v23  ;;  %v5031_v22 = vpop.xlane.xlu1 %5030 }
 0x65f   : > { %v5321_v45 = vadd.f32 %v9890_v55, %v5031_v22  ;;  %v6828_v12 = vsel %vm12689_vm3, %v6827_v30, %v6823_v25 }
 0x660   : > { %v8512_v34 = vpop.eup %8511  ;;  %6931 = vst [vmem:[%s12386_s29 + $0x8] sm:$0xff] %v6929_v8 }
 0x661   : > { %v3239_v19 = vmul.f32 %v8512_v34, %v12041_v21  ;;  %v6832_v17 = vrot.slane %v5321_v45, %v10386_v63  ;;  %v5326_v63 = vadd.f32 %v9890_v55, %v12348_v31  ;;  %v5331_v31 = vadd.f32 %v9890_v55, %v12354_v43 }
 0x662   : > { %v5034_v6 = vpop.xlane.xlu1 %5033 }
 0x663   : > { %v3252_v1 = vmul.f32 %v12688_v48, %v3239_v19  ;;  %v5322_v50 = vadd.f32 %v9890_v55, %v5034_v6  ;;  %v6833_v27 = vsel %vm12690_vm6, %v6832_v17, %v6828_v12  ;;  %v6857_v26 = vrot.slane %v5326_v63, %v10499_v20 }
 0x665   : > { %3254 = vst [vmem:[%s12386_s29] sm:$0xff] %v3252_v1  ;;  %v6837_v53 = vrot.slane %v5322_v50, %v10394_v32 }
 0x666   : > { %v5037_v24 = vpop.xlane.xlu1 %5036 }
 0x667   : > { %v5323_v21 = vadd.f32 %v9890_v55, %v5037_v24  ;;  %v6838_v32 = vsel %vm5630_vm5, %v6837_v53, %v6833_v27  ;;  %vm12693_vm5 = vmmov %vm12683_vm4 }
 0x669   : > { %v6842_v36 = vrot.slane %v5323_v21, %v10442_v54 }
 0x66a   : > { %v5040_v38 = vpop.xlane.xlu1 %5039 }
 0x66b   : > { %v5324_v57 = vadd.f32 %v9890_v55, %v5040_v38  ;;  %v6843_v54 = vsel %vm12691_vm2, %v6842_v36, %v6838_v32 }
 0x66d   : > { %v6847_v18 = vrot.slane %v5324_v57, %v10450_v51 }
 0x66e   : > { %v5043_v49 = vpop.xlane.xlu1 %5042 }
 0x66f   : > { %v5325_v11 = vadd.f32 %v9890_v55, %v5043_v49  ;;  %v6848_v62 = vsel %vm5644_vm7, %v6847_v18, %v6843_v54  ;;  %vm12694_vm7 = vcmask 1047559  }
 0x671   : > { %v6852_v4 = vrot.slane %v5325_v11, %v10495_v2 }
 0x672   : > { %v5049_v5 = vpop.xlane.xlu1 %5048 }
 0x673   : > { %v5327_v9 = vadd.f32 %v9890_v55, %v5049_v5  ;;  %v6853_v40 = vsel %vm5651_vm8, %v6852_v4, %v6848_v62 }
 0x674   : > { %v6858_v28 = vsel %vm5658_vm9, %v6857_v26, %v6853_v40 }
 0x675   : > { %v6862_v2 = vrot.slane %v5327_v9, %v10390_v3 }
 0x676   : > { %v5052_v52 = vpop.xlane.xlu1 %5051 }
 0x677   : > { %v5328_v16 = vadd.f32 %v9890_v55, %v5052_v52  ;;  %v6863_v23 = vsel %vm5665_vm10, %v6862_v2, %v6858_v28 }
 0x679   : > { %v6867_v14 = vrot.slane %v5328_v16, %v10525_v60  ;;  %v6882_v60 = vrot.slane %v5331_v31, %v10446_v47 }
 0x67a   : > { %v5055_v59 = vpop.xlane.xlu1 %5054 }
 0x67b   : > { %v5329_v51 = vadd.f32 %v9890_v55, %v5055_v59  ;;  %v6868_v3 = vsel %vm5672_vm11, %v6867_v14, %v6863_v23 }
 0x67d   : > { %v6872_v42 = vrot.slane %v5329_v51, %v10419_v29 }
 0x67e   : > { %v5058_v58 = vpop.xlane.xlu1 %5057 }
 0x67f   : > { %v5330_v46 = vadd.f32 %v9890_v55, %v5058_v58  ;;  %v6873_v43 = vsel %vm5679_vm12, %v6872_v42, %v6868_v3 }
 0x681   : > { %v6877_v20 = vrot.slane %v5330_v46, %v10547_v37 }
 0x682   : > { %v5067_v29 = vpop.xlane.xlu1 %5066 }
 0x683   : > { %v6878_v8 = vsel %vm5686_vm13, %v6877_v20, %v6873_v43  ;;  %v5333_v22 = vadd.f32 %v9890_v55, %v5067_v29 }
 0x684   : > { %v6883_v34 = vsel %vm12693_vm5, %v6882_v60, %v6878_v8 }
 0x685   : > { %v6892_v19 = vrot.slane %v5333_v22, %v10473_v56  ;;  %v6888_v37 = vsel %vm5700_vm15, %v6887_v41, %v6883_v34 }
 0x686   : > { %v3237_v47 = vpop.xlane.xlu1 %3236 }
 0x687   : > { %8513 = vrcp.f32 %v3237_v47  ;;  %v6893_v6 = vsel %vm5707_vm0, %v6892_v19, %v6888_v37 }
 0x688   : > { %v6914_v48 = vsel %vm12694_vm7, %v6893_v6, %v12376_v10  ;;  %v12696_v10 = vld [vmem:[#allocation47_spill] sm:$0xff] }
 0x689   : > { %v6918_v44 = vsel %vm12379_vm1, %v6914_v48, -1e+09 }
 0x68a   : > { %v6927_v55 = vpop.permute.xlu1 %6926 }
 0x68b   : > { %v6930_v1 = vmul.f32 %v6927_v55, %v6918_v44 }
 0x68d   : > { %6932 = vst [vmem:[%s12386_s29 + $0x18] sm:$0xff] %v6930_v1 }
 0x691   : > { %v8514_v56 = vpop.eup %8513 }
 0x692   : > { %v3241_v24 = vmul.f32 %v8514_v56, %v12203_v0 }
 0x694   : > { %v3253_v33 = vmul.f32 %v12696_v10, %v3241_v24 }
 0x696   : > { %3255 = vst [vmem:[%s12386_s29 + $0x10] sm:$0xff] %v3253_v33 }
 0x697   : > { %8895 = shalt.err (!%p8892_p13)
}
 0x698   : > { %s8896_s21 = scalar_lea.hbm %s12455_s16, 512  ;;  %s8900_s18 = scalar_lea.hbm %s12695_s17, 1024 }
 0x699   : > { %p8897_p4 = scmp.ne.s32.totalorder %s12455_s16, %s8896_s21  ;;  %p8901_p8 = scmp.lt.u32.totalorder %s12455_s16, %s12695_s17 }
 0x69a   : > { %p8902_p6 = scmp.lt.u32.totalorder %s8900_s18, %s8896_s21  ;;  %p8904_p12 = scmp.lt.u32.totalorder %s8896_s21, %s12455_s16 }
 0x69b   : > { %p8898_p7 = pnand %p8897_p4, %p12697_p0 }
 0x69c   : > { %p8903_p11 = por %p8902_p6, %p8901_p8 }
 0x69d   : > { %p8899_p2 = pneg %p8898_p7 }
 0x69e   : > { %p8905_p3 = por %p8904_p12, %p8903_p11 }
 0x6a0   : > { %p8906_p10 = pnand %p8905_p3, %p8899_p2 }
 0x6a2   : > { %8909 = shalt.err (!%p8906_p10)
}
 0x6a3   : > { %s9008_s10 = smov 256   ;;  %s9009_s28 = smov 16  }
 0x6a4   : > { %7657 = dma.vmem_to_hbm [thread:$0]  (%p12697_p0), %s12449_s3, 512, %s12455_s16, %s6934_s13, %s9008_s10, %s9008_s10, %s9009_s28  }
 0x6a5 PF: > { %s12698_s30 = sld [smem:[#allocation35_spill]]  ;;  %s12699_s29 = sld [smem:[#allocation31_spill]] }
 0x6a6   : > { %s6965_s27 = sand.u32 1, %s8964_s23  }
 0x6a7   : > { %s6966_s6 = scalar_lea.sflag [#allocation5], %s6965_s27 }
 0x6ab   : > { %p12700_p9 = scmp.ne.s32.totalorder %s12698_s30, 0  ;;  %p12701_p5 = scmp.ge.s32.totalorder %s12699_s29, 2 }
 0x6ad   : > { %p7695_p1 = pnand %p12701_p5, %p12700_p9 }
 0x6af   : > { %8959 = dma.done.wait (!%p7695_p1), %s6966_s6, 512  }
 0x6b0   : > { %8961 = vsyncadd (!%p7695_p1), %s6966_s6, 4294966784  ;;  %s37_s27 = sadd.s32 1, %s12699_s29   ;;  %s12702_s12 = sld [smem:[#allocation29_spill]] }
 0x6b1   : > { %p34_p13 = scmp.ge.s32.totalorder %s37_s27, 4   ;;  %s12703_s25 = sld [smem:[#allocation34_spill]] }
 0x6b2   : > { %s12704_s15 = sld [smem:[#allocation33_spill]]  ;;  %s12705_s23 = smov %s8968_s24 }
 0x6b3   : > { %s12707_s26 = smov %s8980_s5  ;;  %36 = sbr.rel (!%p34_p13) target bundleno = 23 (0x17), region = 169 }
 0x6b6   : > { %s12706_s24 = smov %s12702_s12 }
 0x6b8   : > { %s12708_s5 = smov %s12704_s15 }
 0x6ba   :  { %6971 = vsyncpa [#allocation4], 1 }
 0x6bb   :  { %6973 = vsyncpa [#allocation4 + $0x1], 1 }
 0x6bc   :  { %6974 = vsyncpa [#allocation7], 1 }
 0x6bd   :  { %6976 = vsyncpa [#allocation7 + $0x1], 1 }
 0x6be   :  { %6977 = vsyncpa [#allocation10], 1 }
 0x6bf   :  { %6978 = vsyncpa [#allocation13], 1 }
 0x6c0   :  { %6979 = vsyncpa [#allocation16], 1 }
 0x6c1   :  { %6980 = vsyncpa [#allocation19], 1 }
 0x6c2   :  { %6981 = vsyncpa [#allocation5], 1 }
 0x6c3   :  { %6983 = vsyncpa [#allocation5 + $0x1], 1 }

</bundles_post_ra>
